<compile_context>
chip_gen: v6e
topology: v6e:2x2x1
jax: 0.10.0
libtpu: 0.0.40
codegen_flags: <defaults>
</compile_context>

<pallas_src>
import numpy as np
import jax
import jax.numpy as jnp
from jax import lax
from jax.experimental import pallas as pl
from jax.experimental.pallas import tpu as pltpu

_BN_EPS = 1e-5


# --------------------------- host-side helpers ---------------------------

def _conv_out(size, k, stride, pad):
    return (size + 2 * pad - k) // stride + 1


def _sel_matrices(hi, wi, ho, wo, kh, kw, stride, pad):
    """Per-tap 0/1 gather matrices: S[t] @ x_flat gathers tap t (0 rows = padding)."""
    S = np.zeros((kh * kw, ho * wo, hi * wi), np.float32)
    taps = [(a, b) for a in range(kh) for b in range(kw)]
    for t, (di, dj) in enumerate(taps):
        for r in range(ho):
            for c in range(wo):
                ri = r * stride + di - pad
                ci = c * stride + dj - pad
                if 0 <= ri < hi and 0 <= ci < wi:
                    S[t, r * wo + c, ri * wi + ci] = 1.0
    return S


def _fold_bn(gamma, beta, mean, var, eps=_BN_EPS):
    s = gamma / jnp.sqrt(var + eps)
    return s, beta - mean * s


def _fold_conv3x3(w_oihw, bnp):
    # (Cout,Cin,3,3) -> per-tap (9, Cin, Cout) with BN scale folded in, plus bias.
    s, b = _fold_bn(*bnp)
    co, ci = w_oihw.shape[0], w_oihw.shape[1]
    w = jnp.transpose(w_oihw, (2, 3, 1, 0)).reshape(9, ci, co)
    return (w * s[None, None, :]).astype(jnp.bfloat16), b.reshape(1, co)


def _fold_conv1x1(w_oihw, bnp):
    s, b = _fold_bn(*bnp)
    co, ci = w_oihw.shape[0], w_oihw.shape[1]
    w = jnp.transpose(w_oihw, (2, 3, 1, 0)).reshape(ci, co)
    return (w * s[None, :]).astype(jnp.bfloat16), b.reshape(1, co)


def _fold_stem(w_oihw, bnp, k_pad):
    s, b = _fold_bn(*bnp)
    co, ci, kh, kw = w_oihw.shape
    w = jnp.transpose(w_oihw, (2, 3, 1, 0)).reshape(kh * kw * ci, co) * s[None, :]
    w = jnp.pad(w, ((0, k_pad - kh * kw * ci), (0, 0)))
    return w.astype(jnp.bfloat16), b.reshape(1, co)


def _im2col(x, kh, kw, stride, pad):
    # TODO(synk): only used for the raw 1-channel network input (stem patches);
    # all other convs gather their taps inside the kernel, so no inter-layer
    # activations ever round-trip through HBM.
    B, H, W, C = x.shape
    Ho = _conv_out(H, kh, stride, pad)
    Wo = _conv_out(W, kw, stride, pad)
    xp = jnp.pad(x, ((0, 0), (pad, pad), (pad, pad), (0, 0)))
    cols = []
    for di in range(kh):
        for dj in range(kw):
            cols.append(xp[:, di:di + stride * (Ho - 1) + 1:stride,
                           dj:dj + stride * (Wo - 1) + 1:stride, :])
    patches = jnp.concatenate(cols, axis=-1)
    return patches.reshape(B, Ho * Wo, kh * kw * C), Ho, Wo


# --------------------------- the fused Pallas kernel ---------------------------

def _resnet_kernel(patches_ref,
                   stem_w_ref, stem_b_ref,
                   s_mp_ref,
                   s_l1_ref, l1_w1_ref, l1_b1_ref, l1_w2_ref, l1_b2_ref,
                   s_l2a_ref, s_l2b_ref, l2_w1_ref, l2_b1_ref, l2_w2_ref,
                   l2_b2_ref, l2_wsc_ref, l2_bsc_ref,
                   s_l3a_ref, s_l3b_ref, l3_w1_ref, l3_b1_ref, l3_w2_ref,
                   l3_b2_ref, l3_wsc_ref, l3_bsc_ref,
                   fc1_w_ref, fc1_b_ref, fc2_w_ref, fc2_b_ref,
                   out_ref):
    f32, bf16 = jnp.float32, jnp.bfloat16

    def gather(s_ref, t, x_bf):
        # tap gather: 0/1 selection matrix @ activations (exact, f32 accumulate)
        return jnp.dot(s_ref[t], x_bf, preferred_element_type=f32)

    def conv3x3(s_ref, w_ref, b_ref, x_bf):
        acc = None
        for t in range(s_ref.shape[0]):
            g = gather(s_ref, t, x_bf).astype(bf16)
            o = jnp.dot(g, w_ref[t], preferred_element_type=f32)
            acc = o if acc is None else acc + o
        return acc + b_ref[...]

    def proj_shortcut(s_ref, w_ref, b_ref, x_bf):
        # 1x1 / stride-2 conv == centre tap (index 4) of the 3x3/stride-2 gather
        g = gather(s_ref, 4, x_bf).astype(bf16)
        return jnp.dot(g, w_ref[...], preferred_element_type=f32) + b_ref[...]

    # ---- stem: 5x5/s2/p2 conv (pre-gathered patches) + folded BN + ReLU ----
    x = patches_ref[0]                                                 # (256, 32) bf16
    h = jnp.dot(x, stem_w_ref[...], preferred_element_type=f32) + stem_b_ref[...]
    h = jnp.maximum(h, 0.0).astype(bf16)                               # (256, 32)

    # ---- maxpool 3x3/s2/p1: 9 tap gathers + elementwise max ----
    m = None
    for t in range(s_mp_ref.shape[0]):
        g = gather(s_mp_ref, t, h)
        m = g if m is None else jnp.maximum(m, g)
    x1_f32 = m                                                         # (64, 32) f32, >= 0
    x1 = x1_f32.astype(bf16)

    # ---- layer1: 32->32, stride 1, identity shortcut ----
    o = jnp.maximum(conv3x3(s_l1_ref, l1_w1_ref, l1_b1_ref, x1), 0.0).astype(bf16)
    o = conv3x3(s_l1_ref, l1_w2_ref, l1_b2_ref, o)
    x2_f32 = jnp.maximum(o + x1_f32, 0.0)
    x2 = x2_f32.astype(bf16)                                           # (64, 32)

    # ---- layer2: 32->64, stride 2, fused 1x1 projection shortcut ----
    o = jnp.maximum(conv3x3(s_l2a_ref, l2_w1_ref, l2_b1_ref, x2), 0.0).astype(bf16)
    sc = proj_shortcut(s_l2a_ref, l2_wsc_ref, l2_bsc_ref, x2)
    o = conv3x3(s_l2b_ref, l2_w2_ref, l2_b2_ref, o)
    x3 = jnp.maximum(o + sc, 0.0).astype(bf16)                         # (16, 64)

    # ---- layer3: 64->128, stride 2, fused 1x1 projection shortcut ----
    o = jnp.maximum(conv3x3(s_l3a_ref, l3_w1_ref, l3_b1_ref, x3), 0.0).astype(bf16)
    sc = proj_shortcut(s_l3a_ref, l3_wsc_ref, l3_bsc_ref, x3)
    o = conv3x3(s_l3b_ref, l3_w2_ref, l3_b2_ref, o)
    x4 = jnp.maximum(o + sc, 0.0)                                      # (4, 128) f32

    # ---- head: global average pool + fc1 + ReLU + fc2 (lane-padded to 128) ----
    pooled = jnp.mean(x4, axis=0, keepdims=True).astype(bf16)          # (1, 128)
    hh = jnp.dot(pooled, fc1_w_ref[...], preferred_element_type=f32) + fc1_b_ref[...]
    hh = jnp.maximum(hh, 0.0).astype(bf16)
    out_ref[0] = jnp.dot(hh, fc2_w_ref[...], preferred_element_type=f32) + fc2_b_ref[...]


# --------------------------- forward pass (Pallas) ---------------------------

def forward_pallas(x, p):
    # x: (B, num_images, H, W); each image runs through the shared LightResNet.
    B, N, H, W = x.shape
    BN = B * N
    xi = x.reshape(BN, H, W, 1)                                        # NHWC, 1 channel

    # spatial sizes along the trunk
    h1, w1 = _conv_out(H, 5, 2, 2), _conv_out(W, 5, 2, 2)              # stem
    hp, wp = _conv_out(h1, 3, 2, 1), _conv_out(w1, 3, 2, 1)            # maxpool / layer1
    h2, w2 = _conv_out(hp, 3, 2, 1), _conv_out(wp, 3, 2, 1)            # layer2
    h3, w3 = _conv_out(h2, 3, 2, 1), _conv_out(w2, 3, 2, 1)            # layer3

    # stem patches (raw input only), K padded 25 -> 32 for aligned MXU feed
    k_stem = 32
    patches, _, _ = _im2col(xi, 5, 5, 2, 2)                            # (BN, h1*w1, 25)
    patches = jnp.pad(patches, ((0, 0), (0, 0), (0, k_stem - patches.shape[-1])))
    patches = patches.astype(jnp.bfloat16)

    # fold BN (running stats) into conv weights, biases kept f32 for the epilogue
    stem_w, stem_b = _fold_stem(p['stem_conv'], p['stem_bn'], k_stem)
    l1_w1, l1_b1 = _fold_conv3x3(p['l1']['conv1_w'], p['l1']['bn1'])
    l1_w2, l1_b2 = _fold_conv3x3(p['l1']['conv2_w'], p['l1']['bn2'])
    l2_w1, l2_b1 = _fold_conv3x3(p['l2']['conv1_w'], p['l2']['bn1'])
    l2_w2, l2_b2 = _fold_conv3x3(p['l2']['conv2_w'], p['l2']['bn2'])
    l2_wsc, l2_bsc = _fold_conv1x1(p['l2']['sc_w'], p['l2']['sc_bn'])
    l3_w1, l3_b1 = _fold_conv3x3(p['l3']['conv1_w'], p['l3']['bn1'])
    l3_w2, l3_b2 = _fold_conv3x3(p['l3']['conv2_w'], p['l3']['bn2'])
    l3_wsc, l3_bsc = _fold_conv1x1(p['l3']['sc_w'], p['l3']['sc_bn'])

    # fc head; fc2 lane-padded to 128 so the only HBM store is lane-dense
    fc1_w = p['fc1_w'].T.astype(jnp.bfloat16)                          # (128, 64)
    fc1_b = p['fc1_b'].reshape(1, -1)
    fc2_w = jnp.pad(p['fc2_w'].T, ((0, 0), (0, 127))).astype(jnp.bfloat16)   # (64, 128)
    fc2_b = jnp.pad(p['fc2_b'].reshape(1, 1), ((0, 0), (0, 127)))            # (1, 128)

    # per-tap 0/1 gather matrices (compile-time constants, resident in VMEM)
    bf = jnp.bfloat16
    s_mp = jnp.asarray(_sel_matrices(h1, w1, hp, wp, 3, 3, 2, 1), bf)  # (9, 64, 256)
    s_l1 = jnp.asarray(_sel_matrices(hp, wp, hp, wp, 3, 3, 1, 1), bf)  # (9, 64, 64)
    s_l2a = jnp.asarray(_sel_matrices(hp, wp, h2, w2, 3, 3, 2, 1), bf)  # (9, 16, 64)
    s_l2b = jnp.asarray(_sel_matrices(h2, w2, h2, w2, 3, 3, 1, 1), bf)  # (9, 16, 16)
    s_l3a = jnp.asarray(_sel_matrices(h2, w2, h3, w3, 3, 3, 2, 1), bf)  # (9, 4, 16)
    s_l3b = jnp.asarray(_sel_matrices(h3, w3, h3, w3, 3, 3, 1, 1), bf)  # (9, 4, 4)

    inputs = [patches,
              stem_w, stem_b, s_mp,
              s_l1, l1_w1, l1_b1, l1_w2, l1_b2,
              s_l2a, s_l2b, l2_w1, l2_b1, l2_w2, l2_b2, l2_wsc, l2_bsc,
              s_l3a, s_l3b, l3_w1, l3_b1, l3_w2, l3_b2, l3_wsc, l3_bsc,
              fc1_w, fc1_b, fc2_w, fc2_b]

    def resident(a):
        nd = a.ndim
        return pl.BlockSpec(a.shape, lambda i, _nd=nd: (0,) * _nd)

    in_specs = [pl.BlockSpec((1,) + patches.shape[1:], lambda i: (i, 0, 0))]
    in_specs += [resident(a) for a in inputs[1:]]

    # advisory cost estimate (2 * MACs; gathers + tap matmuls + fc)
    def _cc(t, mo, mi, ci, co):
        return t * (mo * mi * ci + mo * ci * co)
    m1, mp_, m2, m3 = h1 * w1, hp * wp, h2 * w2, h3 * w3
    macs = (m1 * k_stem * 32 + 9 * mp_ * m1 * 32
            + 2 * _cc(9, mp_, mp_, 32, 32)
            + _cc(9, m2, mp_, 32, 64) + _cc(1, m2, mp_, 32, 64)
            + _cc(9, m2, m2, 64, 64)
            + _cc(9, m3, m2, 64, 128) + _cc(1, m3, m2, 64, 128)
            + _cc(9, m3, m3, 128, 128)
            + 128 * 64 + 64 * 128)
    bytes_accessed = sum(int(a.size) * a.dtype.itemsize for a in inputs) + BN * 128 * 4
    cost = pl.CostEstimate(flops=int(2 * BN * macs), transcendentals=0,
                           bytes_accessed=int(bytes_accessed))

    scores = pl.pallas_call(
        _resnet_kernel,
        grid=(BN,),
        in_specs=in_specs,
        out_specs=pl.BlockSpec((1, 1, 128), lambda i: (i, 0, 0)),
        out_shape=jax.ShapeDtypeStruct((BN, 1, 128), jnp.float32),
        compiler_params=pltpu.CompilerParams(dimension_semantics=("parallel",)),
        cost_estimate=cost,
    )(*inputs)

    # TODO(synk): final per-sample mean over the N per-image scalars is plain
    # JAX (a dedicated pallas_call would be pure launch overhead).
    return scores[:, 0, 0].reshape(B, N).mean(axis=1, keepdims=True)


# --------------------------- parameters ---------------------------

def conv_w(key, cout, cin, kh, kw):
    return jax.random.normal(key, (cout, cin, kh, kw), jnp.float32) * 0.1


def bn_p(key, c):
    k1, k2, k3, k4 = jax.random.split(key, 4)
    gamma = 1.0 + 0.1 * jax.random.normal(k1, (c,), jnp.float32)
    beta = 0.1 * jax.random.normal(k2, (c,), jnp.float32)
    mean = 0.1 * jax.random.normal(k3, (c,), jnp.float32)
    var = 1.0 + 0.1 * jax.random.uniform(k4, (c,), jnp.float32)
    return (gamma, beta, mean, var)


def init_params(key):
    keys = iter(jax.random.split(key, 32))
    nk = lambda: next(keys)
    p = {}
    p['stem_conv'] = conv_w(nk(), 32, 1, 5, 5)
    p['stem_bn'] = bn_p(nk(), 32)
    p['l1'] = dict(conv1_w=conv_w(nk(), 32, 32, 3, 3), bn1=bn_p(nk(), 32),
                   conv2_w=conv_w(nk(), 32, 32, 3, 3), bn2=bn_p(nk(), 32),
                   sc_w=None, sc_bn=None)
    p['l2'] = dict(conv1_w=conv_w(nk(), 64, 32, 3, 3), bn1=bn_p(nk(), 64),
                   conv2_w=conv_w(nk(), 64, 64, 3, 3), bn2=bn_p(nk(), 64),
                   sc_w=conv_w(nk(), 64, 32, 1, 1), sc_bn=bn_p(nk(), 64))
    p['l3'] = dict(conv1_w=conv_w(nk(), 128, 64, 3, 3), bn1=bn_p(nk(), 128),
                   conv2_w=conv_w(nk(), 128, 128, 3, 3), bn2=bn_p(nk(), 128),
                   sc_w=conv_w(nk(), 128, 64, 1, 1), sc_bn=bn_p(nk(), 128))
    p['fc1_w'] = jax.random.normal(nk(), (64, 128), jnp.float32) * 0.1   # (out, in)
    p['fc1_b'] = jax.random.normal(nk(), (64,), jnp.float32) * 0.1
    p['fc2_w'] = jax.random.normal(nk(), (1, 64), jnp.float32) * 0.1
    p['fc2_b'] = jax.random.normal(nk(), (1,), jnp.float32) * 0.1
    return p


# --------------------------- pure-JAX reference for checking ---------------------------

def forward_reference(x, p):
    B, N, H, W = x.shape
    xi = x.reshape(B * N, H, W, 1)

    def conv(x, w, stride, pad):
        return lax.conv_general_dilated(
            x, jnp.transpose(w, (2, 3, 1, 0)),
            window_strides=(stride, stride),
            padding=[(pad, pad), (pad, pad)],
            dimension_numbers=('NHWC', 'HWIO', 'NHWC'))

    def bn(x, bnp):
        s, b = _fold_bn(*bnp)
        return x * s + b

    out = jax.nn.relu(bn(conv(xi, p['stem_conv'], 2, 2), p['stem_bn']))
    out = lax.reduce_window(out, -jnp.inf, lax.max, (1, 3, 3, 1), (1, 2, 2, 1),
                            padding=((0, 0), (1, 1), (1, 1), (0, 0)))

    def block(x, bp, stride):
        o = jax.nn.relu(bn(conv(x, bp['conv1_w'], stride, 1), bp['bn1']))
        o = bn(conv(o, bp['conv2_w'], 1, 1), bp['bn2'])
        sc = bn(conv(x, bp['sc_w'], stride, 0), bp['sc_bn']) if bp['sc_w'] is not None else x
        return jax.nn.relu(o + sc)

    out = block(out, p['l1'], 1)
    out = block(out, p['l2'], 2)
    out = block(out, p['l3'], 2)
    pooled = jnp.mean(out, axis=(1, 2))
    h = jax.nn.relu(pooled @ p['fc1_w'].T + p['fc1_b'])
    scores = (h @ p['fc2_w'].T + p['fc2_b']).reshape(B, N)
    return jnp.mean(scores, axis=1, keepdims=True)


if __name__ == "__main__":
    key = jax.random.PRNGKey(0)
    kp, kx = jax.random.split(key)
    params = init_params(kp)

    B, N, H, W = 2, 3, 32, 32
    x = jax.random.normal(kx, (B, N, H, W), jnp.float32)

    out = jax.block_until_ready(jax.jit(forward_pallas)(x, params))
    ref = jax.block_until_ready(forward_reference(x, params))

    assert out.shape == (B, 1)
    # bf16 MXU operands (f32 accumulation) across ~10 stacked matmul layers
    # drift at the ~1e-3..1e-2 level vs. the pure-f32 reference.
    np.testing.assert_allclose(np.asarray(out), np.asarray(ref), rtol=5e-2, atol=5e-2)
    print("KERNEL_OK")
</pallas_src>

<mosaic_0001>
module attributes {stable_mosaic.version = 11 : i64} {
  func.func @_resnet_kernel(%arg0: i32, %arg1: memref<1x256x32xbf16, #tpu.memory_space<vmem>>, %arg2: memref<32x32xbf16, #tpu.memory_space<vmem>>, %arg3: memref<1x32xf32, #tpu.memory_space<vmem>>, %arg4: memref<9x64x256xbf16, #tpu.memory_space<vmem>>, %arg5: memref<9x64x64xbf16, #tpu.memory_space<vmem>>, %arg6: memref<9x32x32xbf16, #tpu.memory_space<vmem>>, %arg7: memref<1x32xf32, #tpu.memory_space<vmem>>, %arg8: memref<9x32x32xbf16, #tpu.memory_space<vmem>>, %arg9: memref<1x32xf32, #tpu.memory_space<vmem>>, %arg10: memref<9x16x64xbf16, #tpu.memory_space<vmem>>, %arg11: memref<9x16x16xbf16, #tpu.memory_space<vmem>>, %arg12: memref<9x32x64xbf16, #tpu.memory_space<vmem>>, %arg13: memref<1x64xf32, #tpu.memory_space<vmem>>, %arg14: memref<9x64x64xbf16, #tpu.memory_space<vmem>>, %arg15: memref<1x64xf32, #tpu.memory_space<vmem>>, %arg16: memref<32x64xbf16, #tpu.memory_space<vmem>>, %arg17: memref<1x64xf32, #tpu.memory_space<vmem>>, %arg18: memref<9x4x16xbf16, #tpu.memory_space<vmem>>, %arg19: memref<9x4x4xbf16, #tpu.memory_space<vmem>>, %arg20: memref<9x64x128xbf16, #tpu.memory_space<vmem>>, %arg21: memref<1x128xf32, #tpu.memory_space<vmem>>, %arg22: memref<9x128x128xbf16, #tpu.memory_space<vmem>>, %arg23: memref<1x128xf32, #tpu.memory_space<vmem>>, %arg24: memref<64x128xbf16, #tpu.memory_space<vmem>>, %arg25: memref<1x128xf32, #tpu.memory_space<vmem>>, %arg26: memref<128x64xbf16, #tpu.memory_space<vmem>>, %arg27: memref<1x64xf32, #tpu.memory_space<vmem>>, %arg28: memref<64x128xbf16, #tpu.memory_space<vmem>>, %arg29: memref<1x128xf32, #tpu.memory_space<vmem>>, %arg30: memref<1x1x128xf32, #tpu.memory_space<vmem>>) attributes {dimension_semantics = [#tpu.dimension_semantics<parallel>], iteration_bounds = array<i64: 6>, scalar_prefetch = 0 : i64, scratch_operands = 0 : i64, tpu.core_type = #tpu.core_type<tc>, window_params = [{transform_indices = @transform_0, window_bounds = array<i64: 1, 256, 32>}, {pipeline_mode = #tpu.pipeline_mode<synchronous>, transform_indices = @transform_1, window_bounds = array<i64: 32, 32>}, {pipeline_mode = #tpu.pipeline_mode<synchronous>, transform_indices = @transform_2, window_bounds = array<i64: 1, 32>}, {pipeline_mode = #tpu.pipeline_mode<synchronous>, transform_indices = @transform_3, window_bounds = array<i64: 9, 64, 256>}, {pipeline_mode = #tpu.pipeline_mode<synchronous>, transform_indices = @transform_4, window_bounds = array<i64: 9, 64, 64>}, {pipeline_mode = #tpu.pipeline_mode<synchronous>, transform_indices = @transform_5, window_bounds = array<i64: 9, 32, 32>}, {pipeline_mode = #tpu.pipeline_mode<synchronous>, transform_indices = @transform_6, window_bounds = array<i64: 1, 32>}, {pipeline_mode = #tpu.pipeline_mode<synchronous>, transform_indices = @transform_7, window_bounds = array<i64: 9, 32, 32>}, {pipeline_mode = #tpu.pipeline_mode<synchronous>, transform_indices = @transform_8, window_bounds = array<i64: 1, 32>}, {pipeline_mode = #tpu.pipeline_mode<synchronous>, transform_indices = @transform_9, window_bounds = array<i64: 9, 16, 64>}, {pipeline_mode = #tpu.pipeline_mode<synchronous>, transform_indices = @transform_10, window_bounds = array<i64: 9, 16, 16>}, {pipeline_mode = #tpu.pipeline_mode<synchronous>, transform_indices = @transform_11, window_bounds = array<i64: 9, 32, 64>}, {pipeline_mode = #tpu.pipeline_mode<synchronous>, transform_indices = @transform_12, window_bounds = array<i64: 1, 64>}, {pipeline_mode = #tpu.pipeline_mode<synchronous>, transform_indices = @transform_13, window_bounds = array<i64: 9, 64, 64>}, {pipeline_mode = #tpu.pipeline_mode<synchronous>, transform_indices = @transform_14, window_bounds = array<i64: 1, 64>}, {pipeline_mode = #tpu.pipeline_mode<synchronous>, transform_indices = @transform_15, window_bounds = array<i64: 32, 64>}, {pipeline_mode = #tpu.pipeline_mode<synchronous>, transform_indices = @transform_16, window_bounds = array<i64: 1, 64>}, {pipeline_mode = #tpu.pipeline_mode<synchronous>, transform_indices = @transform_17, window_bounds = array<i64: 9, 4, 16>}, {pipeline_mode = #tpu.pipeline_mode<synchronous>, transform_indices = @transform_18, window_bounds = array<i64: 9, 4, 4>}, {pipeline_mode = #tpu.pipeline_mode<synchronous>, transform_indices = @transform_19, window_bounds = array<i64: 9, 64, 128>}, {pipeline_mode = #tpu.pipeline_mode<synchronous>, transform_indices = @transform_20, window_bounds = array<i64: 1, 128>}, {pipeline_mode = #tpu.pipeline_mode<synchronous>, transform_indices = @transform_21, window_bounds = array<i64: 9, 128, 128>}, {pipeline_mode = #tpu.pipeline_mode<synchronous>, transform_indices = @transform_22, window_bounds = array<i64: 1, 128>}, {pipeline_mode = #tpu.pipeline_mode<synchronous>, transform_indices = @transform_23, window_bounds = array<i64: 64, 128>}, {pipeline_mode = #tpu.pipeline_mode<synchronous>, transform_indices = @transform_24, window_bounds = array<i64: 1, 128>}, {pipeline_mode = #tpu.pipeline_mode<synchronous>, transform_indices = @transform_25, window_bounds = array<i64: 128, 64>}, {pipeline_mode = #tpu.pipeline_mode<synchronous>, transform_indices = @transform_26, window_bounds = array<i64: 1, 64>}, {pipeline_mode = #tpu.pipeline_mode<synchronous>, transform_indices = @transform_27, window_bounds = array<i64: 64, 128>}, {pipeline_mode = #tpu.pipeline_mode<synchronous>, transform_indices = @transform_28, window_bounds = array<i64: 1, 128>}, {transform_indices = @transform_29, window_bounds = array<i64: 1, 1, 128>}]} {
    %c0 = arith.constant 0 : index
    %c0_0 = arith.constant 0 : index
    %c0_1 = arith.constant 0 : index
    %0 = vector.load %arg1[%c0, %c0_0, %c0_1] : memref<1x256x32xbf16, #tpu.memory_space<vmem>>, vector<1x256x32xbf16>
    %1 = vector.shape_cast %0 : vector<1x256x32xbf16> to vector<256x32xbf16>
    %c0_2 = arith.constant 0 : index
    %c0_3 = arith.constant 0 : index
    %2 = vector.load %arg2[%c0_2, %c0_3] : memref<32x32xbf16, #tpu.memory_space<vmem>>, vector<32x32xbf16>
    %cst = arith.constant dense<0.000000e+00> : vector<256x32xf32>
    %3 = tpu.matmul %1, %2, %cst {dimension_numbers = #tpu.dot_dimension_numbers<[1], [0], [0], [1], [0, 0, 1, 1], [], []>} : vector<256x32xbf16>, vector<32x32xbf16>, vector<256x32xf32> -> vector<256x32xf32>
    %c0_4 = arith.constant 0 : index
    %c0_5 = arith.constant 0 : index
    %4 = vector.load %arg3[%c0_4, %c0_5] : memref<1x32xf32, #tpu.memory_space<vmem>>, vector<1x32xf32>
    %5 = vector.broadcast %4 : vector<1x32xf32> to vector<256x32xf32>
    %6 = arith.addf %3, %5 : vector<256x32xf32>
    %cst_6 = arith.constant 0.000000e+00 : f32
    %7 = vector.broadcast %cst_6 : f32 to vector<256x32xf32>
    %8 = arith.maximumf %6, %7 : vector<256x32xf32>
    %9 = arith.truncf %8 : vector<256x32xf32> to vector<256x32xbf16>
    %c0_7 = arith.constant 0 : index
    %c0_8 = arith.constant 0 : index
    %c0_9 = arith.constant 0 : index
    %10 = vector.load %arg4[%c0_7, %c0_8, %c0_9] : memref<9x64x256xbf16, #tpu.memory_space<vmem>>, vector<1x64x256xbf16>
    %11 = vector.shape_cast %10 : vector<1x64x256xbf16> to vector<64x256xbf16>
    %cst_10 = arith.constant dense<0.000000e+00> : vector<64x32xf32>
    %12 = tpu.matmul %11, %9, %cst_10 {dimension_numbers = #tpu.dot_dimension_numbers<[1], [0], [0], [1], [0, 0, 1, 1], [], []>} : vector<64x256xbf16>, vector<256x32xbf16>, vector<64x32xf32> -> vector<64x32xf32>
    %c1 = arith.constant 1 : index
    %c0_11 = arith.constant 0 : index
    %c0_12 = arith.constant 0 : index
    %13 = vector.load %arg4[%c1, %c0_11, %c0_12] : memref<9x64x256xbf16, #tpu.memory_space<vmem>>, vector<1x64x256xbf16>
    %14 = vector.shape_cast %13 : vector<1x64x256xbf16> to vector<64x256xbf16>
    %cst_13 = arith.constant dense<0.000000e+00> : vector<64x32xf32>
    %15 = tpu.matmul %14, %9, %cst_13 {dimension_numbers = #tpu.dot_dimension_numbers<[1], [0], [0], [1], [0, 0, 1, 1], [], []>} : vector<64x256xbf16>, vector<256x32xbf16>, vector<64x32xf32> -> vector<64x32xf32>
    %16 = arith.maximumf %12, %15 : vector<64x32xf32>
    %c2 = arith.constant 2 : index
    %c0_14 = arith.constant 0 : index
    %c0_15 = arith.constant 0 : index
    %17 = vector.load %arg4[%c2, %c0_14, %c0_15] : memref<9x64x256xbf16, #tpu.memory_space<vmem>>, vector<1x64x256xbf16>
    %18 = vector.shape_cast %17 : vector<1x64x256xbf16> to vector<64x256xbf16>
    %cst_16 = arith.constant dense<0.000000e+00> : vector<64x32xf32>
    %19 = tpu.matmul %18, %9, %cst_16 {dimension_numbers = #tpu.dot_dimension_numbers<[1], [0], [0], [1], [0, 0, 1, 1], [], []>} : vector<64x256xbf16>, vector<256x32xbf16>, vector<64x32xf32> -> vector<64x32xf32>
    %20 = arith.maximumf %16, %19 : vector<64x32xf32>
    %c3 = arith.constant 3 : index
    %c0_17 = arith.constant 0 : index
    %c0_18 = arith.constant 0 : index
    %21 = vector.load %arg4[%c3, %c0_17, %c0_18] : memref<9x64x256xbf16, #tpu.memory_space<vmem>>, vector<1x64x256xbf16>
    %22 = vector.shape_cast %21 : vector<1x64x256xbf16> to vector<64x256xbf16>
    %cst_19 = arith.constant dense<0.000000e+00> : vector<64x32xf32>
    %23 = tpu.matmul %22, %9, %cst_19 {dimension_numbers = #tpu.dot_dimension_numbers<[1], [0], [0], [1], [0, 0, 1, 1], [], []>} : vector<64x256xbf16>, vector<256x32xbf16>, vector<64x32xf32> -> vector<64x32xf32>
    %24 = arith.maximumf %20, %23 : vector<64x32xf32>
    %c4 = arith.constant 4 : index
    %c0_20 = arith.constant 0 : index
    %c0_21 = arith.constant 0 : index
    %25 = vector.load %arg4[%c4, %c0_20, %c0_21] : memref<9x64x256xbf16, #tpu.memory_space<vmem>>, vector<1x64x256xbf16>
    %26 = vector.shape_cast %25 : vector<1x64x256xbf16> to vector<64x256xbf16>
    %cst_22 = arith.constant dense<0.000000e+00> : vector<64x32xf32>
    %27 = tpu.matmul %26, %9, %cst_22 {dimension_numbers = #tpu.dot_dimension_numbers<[1], [0], [0], [1], [0, 0, 1, 1], [], []>} : vector<64x256xbf16>, vector<256x32xbf16>, vector<64x32xf32> -> vector<64x32xf32>
    %28 = arith.maximumf %24, %27 : vector<64x32xf32>
    %c5 = arith.constant 5 : index
    %c0_23 = arith.constant 0 : index
    %c0_24 = arith.constant 0 : index
    %29 = vector.load %arg4[%c5, %c0_23, %c0_24] : memref<9x64x256xbf16, #tpu.memory_space<vmem>>, vector<1x64x256xbf16>
    %30 = vector.shape_cast %29 : vector<1x64x256xbf16> to vector<64x256xbf16>
    %cst_25 = arith.constant dense<0.000000e+00> : vector<64x32xf32>
    %31 = tpu.matmul %30, %9, %cst_25 {dimension_numbers = #tpu.dot_dimension_numbers<[1], [0], [0], [1], [0, 0, 1, 1], [], []>} : vector<64x256xbf16>, vector<256x32xbf16>, vector<64x32xf32> -> vector<64x32xf32>
    %32 = arith.maximumf %28, %31 : vector<64x32xf32>
    %c6 = arith.constant 6 : index
    %c0_26 = arith.constant 0 : index
    %c0_27 = arith.constant 0 : index
    %33 = vector.load %arg4[%c6, %c0_26, %c0_27] : memref<9x64x256xbf16, #tpu.memory_space<vmem>>, vector<1x64x256xbf16>
    %34 = vector.shape_cast %33 : vector<1x64x256xbf16> to vector<64x256xbf16>
    %cst_28 = arith.constant dense<0.000000e+00> : vector<64x32xf32>
    %35 = tpu.matmul %34, %9, %cst_28 {dimension_numbers = #tpu.dot_dimension_numbers<[1], [0], [0], [1], [0, 0, 1, 1], [], []>} : vector<64x256xbf16>, vector<256x32xbf16>, vector<64x32xf32> -> vector<64x32xf32>
    %36 = arith.maximumf %32, %35 : vector<64x32xf32>
    %c7 = arith.constant 7 : index
    %c0_29 = arith.constant 0 : index
    %c0_30 = arith.constant 0 : index
    %37 = vector.load %arg4[%c7, %c0_29, %c0_30] : memref<9x64x256xbf16, #tpu.memory_space<vmem>>, vector<1x64x256xbf16>
    %38 = vector.shape_cast %37 : vector<1x64x256xbf16> to vector<64x256xbf16>
    %cst_31 = arith.constant dense<0.000000e+00> : vector<64x32xf32>
    %39 = tpu.matmul %38, %9, %cst_31 {dimension_numbers = #tpu.dot_dimension_numbers<[1], [0], [0], [1], [0, 0, 1, 1], [], []>} : vector<64x256xbf16>, vector<256x32xbf16>, vector<64x32xf32> -> vector<64x32xf32>
    %40 = arith.maximumf %36, %39 : vector<64x32xf32>
    %c8 = arith.constant 8 : index
    %c0_32 = arith.constant 0 : index
    %c0_33 = arith.constant 0 : index
    %41 = vector.load %arg4[%c8, %c0_32, %c0_33] : memref<9x64x256xbf16, #tpu.memory_space<vmem>>, vector<1x64x256xbf16>
    %42 = vector.shape_cast %41 : vector<1x64x256xbf16> to vector<64x256xbf16>
    %cst_34 = arith.constant dense<0.000000e+00> : vector<64x32xf32>
    %43 = tpu.matmul %42, %9, %cst_34 {dimension_numbers = #tpu.dot_dimension_numbers<[1], [0], [0], [1], [0, 0, 1, 1], [], []>} : vector<64x256xbf16>, vector<256x32xbf16>, vector<64x32xf32> -> vector<64x32xf32>
    %44 = arith.maximumf %40, %43 : vector<64x32xf32>
    %45 = arith.truncf %44 : vector<64x32xf32> to vector<64x32xbf16>
    %c0_35 = arith.constant 0 : index
    %c0_36 = arith.constant 0 : index
    %c0_37 = arith.constant 0 : index
    %46 = vector.load %arg5[%c0_35, %c0_36, %c0_37] : memref<9x64x64xbf16, #tpu.memory_space<vmem>>, vector<1x64x64xbf16>
    %47 = vector.shape_cast %46 : vector<1x64x64xbf16> to vector<64x64xbf16>
    %cst_38 = arith.constant dense<0.000000e+00> : vector<64x32xf32>
    %48 = tpu.matmul %47, %45, %cst_38 {dimension_numbers = #tpu.dot_dimension_numbers<[1], [0], [0], [1], [0, 0, 1, 1], [], []>} : vector<64x64xbf16>, vector<64x32xbf16>, vector<64x32xf32> -> vector<64x32xf32>
    %49 = arith.truncf %48 : vector<64x32xf32> to vector<64x32xbf16>
    %c0_39 = arith.constant 0 : index
    %c0_40 = arith.constant 0 : index
    %c0_41 = arith.constant 0 : index
    %50 = vector.load %arg6[%c0_39, %c0_40, %c0_41] : memref<9x32x32xbf16, #tpu.memory_space<vmem>>, vector<1x32x32xbf16>
    %51 = vector.shape_cast %50 : vector<1x32x32xbf16> to vector<32x32xbf16>
    %cst_42 = arith.constant dense<0.000000e+00> : vector<64x32xf32>
    %52 = tpu.matmul %49, %51, %cst_42 {dimension_numbers = #tpu.dot_dimension_numbers<[1], [0], [0], [1], [0, 0, 1, 1], [], []>} : vector<64x32xbf16>, vector<32x32xbf16>, vector<64x32xf32> -> vector<64x32xf32>
    %c1_43 = arith.constant 1 : index
    %c0_44 = arith.constant 0 : index
    %c0_45 = arith.constant 0 : index
    %53 = vector.load %arg5[%c1_43, %c0_44, %c0_45] : memref<9x64x64xbf16, #tpu.memory_space<vmem>>, vector<1x64x64xbf16>
    %54 = vector.shape_cast %53 : vector<1x64x64xbf16> to vector<64x64xbf16>
    %cst_46 = arith.constant dense<0.000000e+00> : vector<64x32xf32>
    %55 = tpu.matmul %54, %45, %cst_46 {dimension_numbers = #tpu.dot_dimension_numbers<[1], [0], [0], [1], [0, 0, 1, 1], [], []>} : vector<64x64xbf16>, vector<64x32xbf16>, vector<64x32xf32> -> vector<64x32xf32>
    %56 = arith.truncf %55 : vector<64x32xf32> to vector<64x32xbf16>
    %c1_47 = arith.constant 1 : index
    %c0_48 = arith.constant 0 : index
    %c0_49 = arith.constant 0 : index
    %57 = vector.load %arg6[%c1_47, %c0_48, %c0_49] : memref<9x32x32xbf16, #tpu.memory_space<vmem>>, vector<1x32x32xbf16>
    %58 = vector.shape_cast %57 : vector<1x32x32xbf16> to vector<32x32xbf16>
    %cst_50 = arith.constant dense<0.000000e+00> : vector<64x32xf32>
    %59 = tpu.matmul %56, %58, %cst_50 {dimension_numbers = #tpu.dot_dimension_numbers<[1], [0], [0], [1], [0, 0, 1, 1], [], []>} : vector<64x32xbf16>, vector<32x32xbf16>, vector<64x32xf32> -> vector<64x32xf32>
    %60 = arith.addf %52, %59 : vector<64x32xf32>
    %c2_51 = arith.constant 2 : index
    %c0_52 = arith.constant 0 : index
    %c0_53 = arith.constant 0 : index
    %61 = vector.load %arg5[%c2_51, %c0_52, %c0_53] : memref<9x64x64xbf16, #tpu.memory_space<vmem>>, vector<1x64x64xbf16>
    %62 = vector.shape_cast %61 : vector<1x64x64xbf16> to vector<64x64xbf16>
    %cst_54 = arith.constant dense<0.000000e+00> : vector<64x32xf32>
    %63 = tpu.matmul %62, %45, %cst_54 {dimension_numbers = #tpu.dot_dimension_numbers<[1], [0], [0], [1], [0, 0, 1, 1], [], []>} : vector<64x64xbf16>, vector<64x32xbf16>, vector<64x32xf32> -> vector<64x32xf32>
    %64 = arith.truncf %63 : vector<64x32xf32> to vector<64x32xbf16>
    %c2_55 = arith.constant 2 : index
    %c0_56 = arith.constant 0 : index
    %c0_57 = arith.constant 0 : index
    %65 = vector.load %arg6[%c2_55, %c0_56, %c0_57] : memref<9x32x32xbf16, #tpu.memory_space<vmem>>, vector<1x32x32xbf16>
    %66 = vector.shape_cast %65 : vector<1x32x32xbf16> to vector<32x32xbf16>
    %cst_58 = arith.constant dense<0.000000e+00> : vector<64x32xf32>
    %67 = tpu.matmul %64, %66, %cst_58 {dimension_numbers = #tpu.dot_dimension_numbers<[1], [0], [0], [1], [0, 0, 1, 1], [], []>} : vector<64x32xbf16>, vector<32x32xbf16>, vector<64x32xf32> -> vector<64x32xf32>
    %68 = arith.addf %60, %67 : vector<64x32xf32>
    %c3_59 = arith.constant 3 : index
    %c0_60 = arith.constant 0 : index
    %c0_61 = arith.constant 0 : index
    %69 = vector.load %arg5[%c3_59, %c0_60, %c0_61] : memref<9x64x64xbf16, #tpu.memory_space<vmem>>, vector<1x64x64xbf16>
    %70 = vector.shape_cast %69 : vector<1x64x64xbf16> to vector<64x64xbf16>
    %cst_62 = arith.constant dense<0.000000e+00> : vector<64x32xf32>
    %71 = tpu.matmul %70, %45, %cst_62 {dimension_numbers = #tpu.dot_dimension_numbers<[1], [0], [0], [1], [0, 0, 1, 1], [], []>} : vector<64x64xbf16>, vector<64x32xbf16>, vector<64x32xf32> -> vector<64x32xf32>
    %72 = arith.truncf %71 : vector<64x32xf32> to vector<64x32xbf16>
    %c3_63 = arith.constant 3 : index
    %c0_64 = arith.constant 0 : index
    %c0_65 = arith.constant 0 : index
    %73 = vector.load %arg6[%c3_63, %c0_64, %c0_65] : memref<9x32x32xbf16, #tpu.memory_space<vmem>>, vector<1x32x32xbf16>
    %74 = vector.shape_cast %73 : vector<1x32x32xbf16> to vector<32x32xbf16>
    %cst_66 = arith.constant dense<0.000000e+00> : vector<64x32xf32>
    %75 = tpu.matmul %72, %74, %cst_66 {dimension_numbers = #tpu.dot_dimension_numbers<[1], [0], [0], [1], [0, 0, 1, 1], [], []>} : vector<64x32xbf16>, vector<32x32xbf16>, vector<64x32xf32> -> vector<64x32xf32>
    %76 = arith.addf %68, %75 : vector<64x32xf32>
    %c4_67 = arith.constant 4 : index
    %c0_68 = arith.constant 0 : index
    %c0_69 = arith.constant 0 : index
    %77 = vector.load %arg5[%c4_67, %c0_68, %c0_69] : memref<9x64x64xbf16, #tpu.memory_space<vmem>>, vector<1x64x64xbf16>
    %78 = vector.shape_cast %77 : vector<1x64x64xbf16> to vector<64x64xbf16>
    %cst_70 = arith.constant dense<0.000000e+00> : vector<64x32xf32>
    %79 = tpu.matmul %78, %45, %cst_70 {dimension_numbers = #tpu.dot_dimension_numbers<[1], [0], [0], [1], [0, 0, 1, 1], [], []>} : vector<64x64xbf16>, vector<64x32xbf16>, vector<64x32xf32> -> vector<64x32xf32>
    %80 = arith.truncf %79 : vector<64x32xf32> to vector<64x32xbf16>
    %c4_71 = arith.constant 4 : index
    %c0_72 = arith.constant 0 : index
    %c0_73 = arith.constant 0 : index
    %81 = vector.load %arg6[%c4_71, %c0_72, %c0_73] : memref<9x32x32xbf16, #tpu.memory_space<vmem>>, vector<1x32x32xbf16>
    %82 = vector.shape_cast %81 : vector<1x32x32xbf16> to vector<32x32xbf16>
    %cst_74 = arith.constant dense<0.000000e+00> : vector<64x32xf32>
    %83 = tpu.matmul %80, %82, %cst_74 {dimension_numbers = #tpu.dot_dimension_numbers<[1], [0], [0], [1], [0, 0, 1, 1], [], []>} : vector<64x32xbf16>, vector<32x32xbf16>, vector<64x32xf32> -> vector<64x32xf32>
    %84 = arith.addf %76, %83 : vector<64x32xf32>
    %c5_75 = arith.constant 5 : index
    %c0_76 = arith.constant 0 : index
    %c0_77 = arith.constant 0 : index
    %85 = vector.load %arg5[%c5_75, %c0_76, %c0_77] : memref<9x64x64xbf16, #tpu.memory_space<vmem>>, vector<1x64x64xbf16>
    %86 = vector.shape_cast %85 : vector<1x64x64xbf16> to vector<64x64xbf16>
    %cst_78 = arith.constant dense<0.000000e+00> : vector<64x32xf32>
    %87 = tpu.matmul %86, %45, %cst_78 {dimension_numbers = #tpu.dot_dimension_numbers<[1], [0], [0], [1], [0, 0, 1, 1], [], []>} : vector<64x64xbf16>, vector<64x32xbf16>, vector<64x32xf32> -> vector<64x32xf32>
    %88 = arith.truncf %87 : vector<64x32xf32> to vector<64x32xbf16>
    %c5_79 = arith.constant 5 : index
    %c0_80 = arith.constant 0 : index
    %c0_81 = arith.constant 0 : index
    %89 = vector.load %arg6[%c5_79, %c0_80, %c0_81] : memref<9x32x32xbf16, #tpu.memory_space<vmem>>, vector<1x32x32xbf16>
    %90 = vector.shape_cast %89 : vector<1x32x32xbf16> to vector<32x32xbf16>
    %cst_82 = arith.constant dense<0.000000e+00> : vector<64x32xf32>
    %91 = tpu.matmul %88, %90, %cst_82 {dimension_numbers = #tpu.dot_dimension_numbers<[1], [0], [0], [1], [0, 0, 1, 1], [], []>} : vector<64x32xbf16>, vector<32x32xbf16>, vector<64x32xf32> -> vector<64x32xf32>
    %92 = arith.addf %84, %91 : vector<64x32xf32>
    %c6_83 = arith.constant 6 : index
    %c0_84 = arith.constant 0 : index
    %c0_85 = arith.constant 0 : index
    %93 = vector.load %arg5[%c6_83, %c0_84, %c0_85] : memref<9x64x64xbf16, #tpu.memory_space<vmem>>, vector<1x64x64xbf16>
    %94 = vector.shape_cast %93 : vector<1x64x64xbf16> to vector<64x64xbf16>
    %cst_86 = arith.constant dense<0.000000e+00> : vector<64x32xf32>
    %95 = tpu.matmul %94, %45, %cst_86 {dimension_numbers = #tpu.dot_dimension_numbers<[1], [0], [0], [1], [0, 0, 1, 1], [], []>} : vector<64x64xbf16>, vector<64x32xbf16>, vector<64x32xf32> -> vector<64x32xf32>
    %96 = arith.truncf %95 : vector<64x32xf32> to vector<64x32xbf16>
    %c6_87 = arith.constant 6 : index
    %c0_88 = arith.constant 0 : index
    %c0_89 = arith.constant 0 : index
    %97 = vector.load %arg6[%c6_87, %c0_88, %c0_89] : memref<9x32x32xbf16, #tpu.memory_space<vmem>>, vector<1x32x32xbf16>
    %98 = vector.shape_cast %97 : vector<1x32x32xbf16> to vector<32x32xbf16>
    %cst_90 = arith.constant dense<0.000000e+00> : vector<64x32xf32>
    %99 = tpu.matmul %96, %98, %cst_90 {dimension_numbers = #tpu.dot_dimension_numbers<[1], [0], [0], [1], [0, 0, 1, 1], [], []>} : vector<64x32xbf16>, vector<32x32xbf16>, vector<64x32xf32> -> vector<64x32xf32>
    %100 = arith.addf %92, %99 : vector<64x32xf32>
    %c7_91 = arith.constant 7 : index
    %c0_92 = arith.constant 0 : index
    %c0_93 = arith.constant 0 : index
    %101 = vector.load %arg5[%c7_91, %c0_92, %c0_93] : memref<9x64x64xbf16, #tpu.memory_space<vmem>>, vector<1x64x64xbf16>
    %102 = vector.shape_cast %101 : vector<1x64x64xbf16> to vector<64x64xbf16>
    %cst_94 = arith.constant dense<0.000000e+00> : vector<64x32xf32>
    %103 = tpu.matmul %102, %45, %cst_94 {dimension_numbers = #tpu.dot_dimension_numbers<[1], [0], [0], [1], [0, 0, 1, 1], [], []>} : vector<64x64xbf16>, vector<64x32xbf16>, vector<64x32xf32> -> vector<64x32xf32>
    %104 = arith.truncf %103 : vector<64x32xf32> to vector<64x32xbf16>
    %c7_95 = arith.constant 7 : index
    %c0_96 = arith.constant 0 : index
    %c0_97 = arith.constant 0 : index
    %105 = vector.load %arg6[%c7_95, %c0_96, %c0_97] : memref<9x32x32xbf16, #tpu.memory_space<vmem>>, vector<1x32x32xbf16>
    %106 = vector.shape_cast %105 : vector<1x32x32xbf16> to vector<32x32xbf16>
    %cst_98 = arith.constant dense<0.000000e+00> : vector<64x32xf32>
    %107 = tpu.matmul %104, %106, %cst_98 {dimension_numbers = #tpu.dot_dimension_numbers<[1], [0], [0], [1], [0, 0, 1, 1], [], []>} : vector<64x32xbf16>, vector<32x32xbf16>, vector<64x32xf32> -> vector<64x32xf32>
    %108 = arith.addf %100, %107 : vector<64x32xf32>
    %c8_99 = arith.constant 8 : index
    %c0_100 = arith.constant 0 : index
    %c0_101 = arith.constant 0 : index
    %109 = vector.load %arg5[%c8_99, %c0_100, %c0_101] : memref<9x64x64xbf16, #tpu.memory_space<vmem>>, vector<1x64x64xbf16>
    %110 = vector.shape_cast %109 : vector<1x64x64xbf16> to vector<64x64xbf16>
    %cst_102 = arith.constant dense<0.000000e+00> : vector<64x32xf32>
    %111 = tpu.matmul %110, %45, %cst_102 {dimension_numbers = #tpu.dot_dimension_numbers<[1], [0], [0], [1], [0, 0, 1, 1], [], []>} : vector<64x64xbf16>, vector<64x32xbf16>, vector<64x32xf32> -> vector<64x32xf32>
    %112 = arith.truncf %111 : vector<64x32xf32> to vector<64x32xbf16>
    %c8_103 = arith.constant 8 : index
    %c0_104 = arith.constant 0 : index
    %c0_105 = arith.constant 0 : index
    %113 = vector.load %arg6[%c8_103, %c0_104, %c0_105] : memref<9x32x32xbf16, #tpu.memory_space<vmem>>, vector<1x32x32xbf16>
    %114 = vector.shape_cast %113 : vector<1x32x32xbf16> to vector<32x32xbf16>
    %cst_106 = arith.constant dense<0.000000e+00> : vector<64x32xf32>
    %115 = tpu.matmul %112, %114, %cst_106 {dimension_numbers = #tpu.dot_dimension_numbers<[1], [0], [0], [1], [0, 0, 1, 1], [], []>} : vector<64x32xbf16>, vector<32x32xbf16>, vector<64x32xf32> -> vector<64x32xf32>
    %116 = arith.addf %108, %115 : vector<64x32xf32>
    %c0_107 = arith.constant 0 : index
    %c0_108 = arith.constant 0 : index
    %117 = vector.load %arg7[%c0_107, %c0_108] : memref<1x32xf32, #tpu.memory_space<vmem>>, vector<1x32xf32>
    %118 = vector.broadcast %117 : vector<1x32xf32> to vector<64x32xf32>
    %119 = arith.addf %116, %118 : vector<64x32xf32>
    %cst_109 = arith.constant 0.000000e+00 : f32
    %120 = vector.broadcast %cst_109 : f32 to vector<64x32xf32>
    %121 = arith.maximumf %119, %120 : vector<64x32xf32>
    %122 = arith.truncf %121 : vector<64x32xf32> to vector<64x32xbf16>
    %c0_110 = arith.constant 0 : index
    %c0_111 = arith.constant 0 : index
    %c0_112 = arith.constant 0 : index
    %123 = vector.load %arg5[%c0_110, %c0_111, %c0_112] : memref<9x64x64xbf16, #tpu.memory_space<vmem>>, vector<1x64x64xbf16>
    %124 = vector.shape_cast %123 : vector<1x64x64xbf16> to vector<64x64xbf16>
    %cst_113 = arith.constant dense<0.000000e+00> : vector<64x32xf32>
    %125 = tpu.matmul %124, %122, %cst_113 {dimension_numbers = #tpu.dot_dimension_numbers<[1], [0], [0], [1], [0, 0, 1, 1], [], []>} : vector<64x64xbf16>, vector<64x32xbf16>, vector<64x32xf32> -> vector<64x32xf32>
    %126 = arith.truncf %125 : vector<64x32xf32> to vector<64x32xbf16>
    %c0_114 = arith.constant 0 : index
    %c0_115 = arith.constant 0 : index
    %c0_116 = arith.constant 0 : index
    %127 = vector.load %arg8[%c0_114, %c0_115, %c0_116] : memref<9x32x32xbf16, #tpu.memory_space<vmem>>, vector<1x32x32xbf16>
    %128 = vector.shape_cast %127 : vector<1x32x32xbf16> to vector<32x32xbf16>
    %cst_117 = arith.constant dense<0.000000e+00> : vector<64x32xf32>
    %129 = tpu.matmul %126, %128, %cst_117 {dimension_numbers = #tpu.dot_dimension_numbers<[1], [0], [0], [1], [0, 0, 1, 1], [], []>} : vector<64x32xbf16>, vector<32x32xbf16>, vector<64x32xf32> -> vector<64x32xf32>
    %c1_118 = arith.constant 1 : index
    %c0_119 = arith.constant 0 : index
    %c0_120 = arith.constant 0 : index
    %130 = vector.load %arg5[%c1_118, %c0_119, %c0_120] : memref<9x64x64xbf16, #tpu.memory_space<vmem>>, vector<1x64x64xbf16>
    %131 = vector.shape_cast %130 : vector<1x64x64xbf16> to vector<64x64xbf16>
    %cst_121 = arith.constant dense<0.000000e+00> : vector<64x32xf32>
    %132 = tpu.matmul %131, %122, %cst_121 {dimension_numbers = #tpu.dot_dimension_numbers<[1], [0], [0], [1], [0, 0, 1, 1], [], []>} : vector<64x64xbf16>, vector<64x32xbf16>, vector<64x32xf32> -> vector<64x32xf32>
    %133 = arith.truncf %132 : vector<64x32xf32> to vector<64x32xbf16>
    %c1_122 = arith.constant 1 : index
    %c0_123 = arith.constant 0 : index
    %c0_124 = arith.constant 0 : index
    %134 = vector.load %arg8[%c1_122, %c0_123, %c0_124] : memref<9x32x32xbf16, #tpu.memory_space<vmem>>, vector<1x32x32xbf16>
    %135 = vector.shape_cast %134 : vector<1x32x32xbf16> to vector<32x32xbf16>
    %cst_125 = arith.constant dense<0.000000e+00> : vector<64x32xf32>
    %136 = tpu.matmul %133, %135, %cst_125 {dimension_numbers = #tpu.dot_dimension_numbers<[1], [0], [0], [1], [0, 0, 1, 1], [], []>} : vector<64x32xbf16>, vector<32x32xbf16>, vector<64x32xf32> -> vector<64x32xf32>
    %137 = arith.addf %129, %136 : vector<64x32xf32>
    %c2_126 = arith.constant 2 : index
    %c0_127 = arith.constant 0 : index
    %c0_128 = arith.constant 0 : index
    %138 = vector.load %arg5[%c2_126, %c0_127, %c0_128] : memref<9x64x64xbf16, #tpu.memory_space<vmem>>, vector<1x64x64xbf16>
    %139 = vector.shape_cast %138 : vector<1x64x64xbf16> to vector<64x64xbf16>
    %cst_129 = arith.constant dense<0.000000e+00> : vector<64x32xf32>
    %140 = tpu.matmul %139, %122, %cst_129 {dimension_numbers = #tpu.dot_dimension_numbers<[1], [0], [0], [1], [0, 0, 1, 1], [], []>} : vector<64x64xbf16>, vector<64x32xbf16>, vector<64x32xf32> -> vector<64x32xf32>
    %141 = arith.truncf %140 : vector<64x32xf32> to vector<64x32xbf16>
    %c2_130 = arith.constant 2 : index
    %c0_131 = arith.constant 0 : index
    %c0_132 = arith.constant 0 : index
    %142 = vector.load %arg8[%c2_130, %c0_131, %c0_132] : memref<9x32x32xbf16, #tpu.memory_space<vmem>>, vector<1x32x32xbf16>
    %143 = vector.shape_cast %142 : vector<1x32x32xbf16> to vector<32x32xbf16>
    %cst_133 = arith.constant dense<0.000000e+00> : vector<64x32xf32>
    %144 = tpu.matmul %141, %143, %cst_133 {dimension_numbers = #tpu.dot_dimension_numbers<[1], [0], [0], [1], [0, 0, 1, 1], [], []>} : vector<64x32xbf16>, vector<32x32xbf16>, vector<64x32xf32> -> vector<64x32xf32>
    %145 = arith.addf %137, %144 : vector<64x32xf32>
    %c3_134 = arith.constant 3 : index
    %c0_135 = arith.constant 0 : index
    %c0_136 = arith.constant 0 : index
    %146 = vector.load %arg5[%c3_134, %c0_135, %c0_136] : memref<9x64x64xbf16, #tpu.memory_space<vmem>>, vector<1x64x64xbf16>
    %147 = vector.shape_cast %146 : vector<1x64x64xbf16> to vector<64x64xbf16>
    %cst_137 = arith.constant dense<0.000000e+00> : vector<64x32xf32>
    %148 = tpu.matmul %147, %122, %cst_137 {dimension_numbers = #tpu.dot_dimension_numbers<[1], [0], [0], [1], [0, 0, 1, 1], [], []>} : vector<64x64xbf16>, vector<64x32xbf16>, vector<64x32xf32> -> vector<64x32xf32>
    %149 = arith.truncf %148 : vector<64x32xf32> to vector<64x32xbf16>
    %c3_138 = arith.constant 3 : index
    %c0_139 = arith.constant 0 : index
    %c0_140 = arith.constant 0 : index
    %150 = vector.load %arg8[%c3_138, %c0_139, %c0_140] : memref<9x32x32xbf16, #tpu.memory_space<vmem>>, vector<1x32x32xbf16>
    %151 = vector.shape_cast %150 : vector<1x32x32xbf16> to vector<32x32xbf16>
    %cst_141 = arith.constant dense<0.000000e+00> : vector<64x32xf32>
    %152 = tpu.matmul %149, %151, %cst_141 {dimension_numbers = #tpu.dot_dimension_numbers<[1], [0], [0], [1], [0, 0, 1, 1], [], []>} : vector<64x32xbf16>, vector<32x32xbf16>, vector<64x32xf32> -> vector<64x32xf32>
    %153 = arith.addf %145, %152 : vector<64x32xf32>
    %c4_142 = arith.constant 4 : index
    %c0_143 = arith.constant 0 : index
    %c0_144 = arith.constant 0 : index
    %154 = vector.load %arg5[%c4_142, %c0_143, %c0_144] : memref<9x64x64xbf16, #tpu.memory_space<vmem>>, vector<1x64x64xbf16>
    %155 = vector.shape_cast %154 : vector<1x64x64xbf16> to vector<64x64xbf16>
    %cst_145 = arith.constant dense<0.000000e+00> : vector<64x32xf32>
    %156 = tpu.matmul %155, %122, %cst_145 {dimension_numbers = #tpu.dot_dimension_numbers<[1], [0], [0], [1], [0, 0, 1, 1], [], []>} : vector<64x64xbf16>, vector<64x32xbf16>, vector<64x32xf32> -> vector<64x32xf32>
    %157 = arith.truncf %156 : vector<64x32xf32> to vector<64x32xbf16>
    %c4_146 = arith.constant 4 : index
    %c0_147 = arith.constant 0 : index
    %c0_148 = arith.constant 0 : index
    %158 = vector.load %arg8[%c4_146, %c0_147, %c0_148] : memref<9x32x32xbf16, #tpu.memory_space<vmem>>, vector<1x32x32xbf16>
    %159 = vector.shape_cast %158 : vector<1x32x32xbf16> to vector<32x32xbf16>
    %cst_149 = arith.constant dense<0.000000e+00> : vector<64x32xf32>
    %160 = tpu.matmul %157, %159, %cst_149 {dimension_numbers = #tpu.dot_dimension_numbers<[1], [0], [0], [1], [0, 0, 1, 1], [], []>} : vector<64x32xbf16>, vector<32x32xbf16>, vector<64x32xf32> -> vector<64x32xf32>
    %161 = arith.addf %153, %160 : vector<64x32xf32>
    %c5_150 = arith.constant 5 : index
    %c0_151 = arith.constant 0 : index
    %c0_152 = arith.constant 0 : index
    %162 = vector.load %arg5[%c5_150, %c0_151, %c0_152] : memref<9x64x64xbf16, #tpu.memory_space<vmem>>, vector<1x64x64xbf16>
    %163 = vector.shape_cast %162 : vector<1x64x64xbf16> to vector<64x64xbf16>
    %cst_153 = arith.constant dense<0.000000e+00> : vector<64x32xf32>
    %164 = tpu.matmul %163, %122, %cst_153 {dimension_numbers = #tpu.dot_dimension_numbers<[1], [0], [0], [1], [0, 0, 1, 1], [], []>} : vector<64x64xbf16>, vector<64x32xbf16>, vector<64x32xf32> -> vector<64x32xf32>
    %165 = arith.truncf %164 : vector<64x32xf32> to vector<64x32xbf16>
    %c5_154 = arith.constant 5 : index
    %c0_155 = arith.constant 0 : index
    %c0_156 = arith.constant 0 : index
    %166 = vector.load %arg8[%c5_154, %c0_155, %c0_156] : memref<9x32x32xbf16, #tpu.memory_space<vmem>>, vector<1x32x32xbf16>
    %167 = vector.shape_cast %166 : vector<1x32x32xbf16> to vector<32x32xbf16>
    %cst_157 = arith.constant dense<0.000000e+00> : vector<64x32xf32>
    %168 = tpu.matmul %165, %167, %cst_157 {dimension_numbers = #tpu.dot_dimension_numbers<[1], [0], [0], [1], [0, 0, 1, 1], [], []>} : vector<64x32xbf16>, vector<32x32xbf16>, vector<64x32xf32> -> vector<64x32xf32>
    %169 = arith.addf %161, %168 : vector<64x32xf32>
    %c6_158 = arith.constant 6 : index
    %c0_159 = arith.constant 0 : index
    %c0_160 = arith.constant 0 : index
    %170 = vector.load %arg5[%c6_158, %c0_159, %c0_160] : memref<9x64x64xbf16, #tpu.memory_space<vmem>>, vector<1x64x64xbf16>
    %171 = vector.shape_cast %170 : vector<1x64x64xbf16> to vector<64x64xbf16>
    %cst_161 = arith.constant dense<0.000000e+00> : vector<64x32xf32>
    %172 = tpu.matmul %171, %122, %cst_161 {dimension_numbers = #tpu.dot_dimension_numbers<[1], [0], [0], [1], [0, 0, 1, 1], [], []>} : vector<64x64xbf16>, vector<64x32xbf16>, vector<64x32xf32> -> vector<64x32xf32>
    %173 = arith.truncf %172 : vector<64x32xf32> to vector<64x32xbf16>
    %c6_162 = arith.constant 6 : index
    %c0_163 = arith.constant 0 : index
    %c0_164 = arith.constant 0 : index
    %174 = vector.load %arg8[%c6_162, %c0_163, %c0_164] : memref<9x32x32xbf16, #tpu.memory_space<vmem>>, vector<1x32x32xbf16>
    %175 = vector.shape_cast %174 : vector<1x32x32xbf16> to vector<32x32xbf16>
    %cst_165 = arith.constant dense<0.000000e+00> : vector<64x32xf32>
    %176 = tpu.matmul %173, %175, %cst_165 {dimension_numbers = #tpu.dot_dimension_numbers<[1], [0], [0], [1], [0, 0, 1, 1], [], []>} : vector<64x32xbf16>, vector<32x32xbf16>, vector<64x32xf32> -> vector<64x32xf32>
    %177 = arith.addf %169, %176 : vector<64x32xf32>
    %c7_166 = arith.constant 7 : index
    %c0_167 = arith.constant 0 : index
    %c0_168 = arith.constant 0 : index
    %178 = vector.load %arg5[%c7_166, %c0_167, %c0_168] : memref<9x64x64xbf16, #tpu.memory_space<vmem>>, vector<1x64x64xbf16>
    %179 = vector.shape_cast %178 : vector<1x64x64xbf16> to vector<64x64xbf16>
    %cst_169 = arith.constant dense<0.000000e+00> : vector<64x32xf32>
    %180 = tpu.matmul %179, %122, %cst_169 {dimension_numbers = #tpu.dot_dimension_numbers<[1], [0], [0], [1], [0, 0, 1, 1], [], []>} : vector<64x64xbf16>, vector<64x32xbf16>, vector<64x32xf32> -> vector<64x32xf32>
    %181 = arith.truncf %180 : vector<64x32xf32> to vector<64x32xbf16>
    %c7_170 = arith.constant 7 : index
    %c0_171 = arith.constant 0 : index
    %c0_172 = arith.constant 0 : index
    %182 = vector.load %arg8[%c7_170, %c0_171, %c0_172] : memref<9x32x32xbf16, #tpu.memory_space<vmem>>, vector<1x32x32xbf16>
    %183 = vector.shape_cast %182 : vector<1x32x32xbf16> to vector<32x32xbf16>
    %cst_173 = arith.constant dense<0.000000e+00> : vector<64x32xf32>
    %184 = tpu.matmul %181, %183, %cst_173 {dimension_numbers = #tpu.dot_dimension_numbers<[1], [0], [0], [1], [0, 0, 1, 1], [], []>} : vector<64x32xbf16>, vector<32x32xbf16>, vector<64x32xf32> -> vector<64x32xf32>
    %185 = arith.addf %177, %184 : vector<64x32xf32>
    %c8_174 = arith.constant 8 : index
    %c0_175 = arith.constant 0 : index
    %c0_176 = arith.constant 0 : index
    %186 = vector.load %arg5[%c8_174, %c0_175, %c0_176] : memref<9x64x64xbf16, #tpu.memory_space<vmem>>, vector<1x64x64xbf16>
    %187 = vector.shape_cast %186 : vector<1x64x64xbf16> to vector<64x64xbf16>
    %cst_177 = arith.constant dense<0.000000e+00> : vector<64x32xf32>
    %188 = tpu.matmul %187, %122, %cst_177 {dimension_numbers = #tpu.dot_dimension_numbers<[1], [0], [0], [1], [0, 0, 1, 1], [], []>} : vector<64x64xbf16>, vector<64x32xbf16>, vector<64x32xf32> -> vector<64x32xf32>
    %189 = arith.truncf %188 : vector<64x32xf32> to vector<64x32xbf16>
    %c8_178 = arith.constant 8 : index
    %c0_179 = arith.constant 0 : index
    %c0_180 = arith.constant 0 : index
    %190 = vector.load %arg8[%c8_178, %c0_179, %c0_180] : memref<9x32x32xbf16, #tpu.memory_space<vmem>>, vector<1x32x32xbf16>
    %191 = vector.shape_cast %190 : vector<1x32x32xbf16> to vector<32x32xbf16>
    %cst_181 = arith.constant dense<0.000000e+00> : vector<64x32xf32>
    %192 = tpu.matmul %189, %191, %cst_181 {dimension_numbers = #tpu.dot_dimension_numbers<[1], [0], [0], [1], [0, 0, 1, 1], [], []>} : vector<64x32xbf16>, vector<32x32xbf16>, vector<64x32xf32> -> vector<64x32xf32>
    %193 = arith.addf %185, %192 : vector<64x32xf32>
    %c0_182 = arith.constant 0 : index
    %c0_183 = arith.constant 0 : index
    %194 = vector.load %arg9[%c0_182, %c0_183] : memref<1x32xf32, #tpu.memory_space<vmem>>, vector<1x32xf32>
    %195 = vector.broadcast %194 : vector<1x32xf32> to vector<64x32xf32>
    %196 = arith.addf %193, %195 : vector<64x32xf32>
    %197 = arith.addf %196, %44 : vector<64x32xf32>
    %cst_184 = arith.constant 0.000000e+00 : f32
    %198 = vector.broadcast %cst_184 : f32 to vector<64x32xf32>
    %199 = arith.maximumf %197, %198 : vector<64x32xf32>
    %200 = arith.truncf %199 : vector<64x32xf32> to vector<64x32xbf16>
    %c0_185 = arith.constant 0 : index
    %c0_186 = arith.constant 0 : index
    %c0_187 = arith.constant 0 : index
    %201 = vector.load %arg10[%c0_185, %c0_186, %c0_187] : memref<9x16x64xbf16, #tpu.memory_space<vmem>>, vector<1x16x64xbf16>
    %202 = vector.shape_cast %201 : vector<1x16x64xbf16> to vector<16x64xbf16>
    %cst_188 = arith.constant dense<0.000000e+00> : vector<16x32xf32>
    %203 = tpu.matmul %202, %200, %cst_188 {dimension_numbers = #tpu.dot_dimension_numbers<[1], [0], [0], [1], [0, 0, 1, 1], [], []>} : vector<16x64xbf16>, vector<64x32xbf16>, vector<16x32xf32> -> vector<16x32xf32>
    %204 = arith.truncf %203 : vector<16x32xf32> to vector<16x32xbf16>
    %c0_189 = arith.constant 0 : index
    %c0_190 = arith.constant 0 : index
    %c0_191 = arith.constant 0 : index
    %205 = vector.load %arg12[%c0_189, %c0_190, %c0_191] : memref<9x32x64xbf16, #tpu.memory_space<vmem>>, vector<1x32x64xbf16>
    %206 = vector.shape_cast %205 : vector<1x32x64xbf16> to vector<32x64xbf16>
    %cst_192 = arith.constant dense<0.000000e+00> : vector<16x64xf32>
    %207 = tpu.matmul %204, %206, %cst_192 {dimension_numbers = #tpu.dot_dimension_numbers<[1], [0], [0], [1], [0, 0, 1, 1], [], []>} : vector<16x32xbf16>, vector<32x64xbf16>, vector<16x64xf32> -> vector<16x64xf32>
    %c1_193 = arith.constant 1 : index
    %c0_194 = arith.constant 0 : index
    %c0_195 = arith.constant 0 : index
    %208 = vector.load %arg10[%c1_193, %c0_194, %c0_195] : memref<9x16x64xbf16, #tpu.memory_space<vmem>>, vector<1x16x64xbf16>
    %209 = vector.shape_cast %208 : vector<1x16x64xbf16> to vector<16x64xbf16>
    %cst_196 = arith.constant dense<0.000000e+00> : vector<16x32xf32>
    %210 = tpu.matmul %209, %200, %cst_196 {dimension_numbers = #tpu.dot_dimension_numbers<[1], [0], [0], [1], [0, 0, 1, 1], [], []>} : vector<16x64xbf16>, vector<64x32xbf16>, vector<16x32xf32> -> vector<16x32xf32>
    %211 = arith.truncf %210 : vector<16x32xf32> to vector<16x32xbf16>
    %c1_197 = arith.constant 1 : index
    %c0_198 = arith.constant 0 : index
    %c0_199 = arith.constant 0 : index
    %212 = vector.load %arg12[%c1_197, %c0_198, %c0_199] : memref<9x32x64xbf16, #tpu.memory_space<vmem>>, vector<1x32x64xbf16>
    %213 = vector.shape_cast %212 : vector<1x32x64xbf16> to vector<32x64xbf16>
    %cst_200 = arith.constant dense<0.000000e+00> : vector<16x64xf32>
    %214 = tpu.matmul %211, %213, %cst_200 {dimension_numbers = #tpu.dot_dimension_numbers<[1], [0], [0], [1], [0, 0, 1, 1], [], []>} : vector<16x32xbf16>, vector<32x64xbf16>, vector<16x64xf32> -> vector<16x64xf32>
    %215 = arith.addf %207, %214 : vector<16x64xf32>
    %c2_201 = arith.constant 2 : index
    %c0_202 = arith.constant 0 : index
    %c0_203 = arith.constant 0 : index
    %216 = vector.load %arg10[%c2_201, %c0_202, %c0_203] : memref<9x16x64xbf16, #tpu.memory_space<vmem>>, vector<1x16x64xbf16>
    %217 = vector.shape_cast %216 : vector<1x16x64xbf16> to vector<16x64xbf16>
    %cst_204 = arith.constant dense<0.000000e+00> : vector<16x32xf32>
    %218 = tpu.matmul %217, %200, %cst_204 {dimension_numbers = #tpu.dot_dimension_numbers<[1], [0], [0], [1], [0, 0, 1, 1], [], []>} : vector<16x64xbf16>, vector<64x32xbf16>, vector<16x32xf32> -> vector<16x32xf32>
    %219 = arith.truncf %218 : vector<16x32xf32> to vector<16x32xbf16>
    %c2_205 = arith.constant 2 : index
    %c0_206 = arith.constant 0 : index
    %c0_207 = arith.constant 0 : index
    %220 = vector.load %arg12[%c2_205, %c0_206, %c0_207] : memref<9x32x64xbf16, #tpu.memory_space<vmem>>, vector<1x32x64xbf16>
    %221 = vector.shape_cast %220 : vector<1x32x64xbf16> to vector<32x64xbf16>
    %cst_208 = arith.constant dense<0.000000e+00> : vector<16x64xf32>
    %222 = tpu.matmul %219, %221, %cst_208 {dimension_numbers = #tpu.dot_dimension_numbers<[1], [0], [0], [1], [0, 0, 1, 1], [], []>} : vector<16x32xbf16>, vector<32x64xbf16>, vector<16x64xf32> -> vector<16x64xf32>
    %223 = arith.addf %215, %222 : vector<16x64xf32>
    %c3_209 = arith.constant 3 : index
    %c0_210 = arith.constant 0 : index
    %c0_211 = arith.constant 0 : index
    %224 = vector.load %arg10[%c3_209, %c0_210, %c0_211] : memref<9x16x64xbf16, #tpu.memory_space<vmem>>, vector<1x16x64xbf16>
    %225 = vector.shape_cast %224 : vector<1x16x64xbf16> to vector<16x64xbf16>
    %cst_212 = arith.constant dense<0.000000e+00> : vector<16x32xf32>
    %226 = tpu.matmul %225, %200, %cst_212 {dimension_numbers = #tpu.dot_dimension_numbers<[1], [0], [0], [1], [0, 0, 1, 1], [], []>} : vector<16x64xbf16>, vector<64x32xbf16>, vector<16x32xf32> -> vector<16x32xf32>
    %227 = arith.truncf %226 : vector<16x32xf32> to vector<16x32xbf16>
    %c3_213 = arith.constant 3 : index
    %c0_214 = arith.constant 0 : index
    %c0_215 = arith.constant 0 : index
    %228 = vector.load %arg12[%c3_213, %c0_214, %c0_215] : memref<9x32x64xbf16, #tpu.memory_space<vmem>>, vector<1x32x64xbf16>
    %229 = vector.shape_cast %228 : vector<1x32x64xbf16> to vector<32x64xbf16>
    %cst_216 = arith.constant dense<0.000000e+00> : vector<16x64xf32>
    %230 = tpu.matmul %227, %229, %cst_216 {dimension_numbers = #tpu.dot_dimension_numbers<[1], [0], [0], [1], [0, 0, 1, 1], [], []>} : vector<16x32xbf16>, vector<32x64xbf16>, vector<16x64xf32> -> vector<16x64xf32>
    %231 = arith.addf %223, %230 : vector<16x64xf32>
    %c4_217 = arith.constant 4 : index
    %c0_218 = arith.constant 0 : index
    %c0_219 = arith.constant 0 : index
    %232 = vector.load %arg10[%c4_217, %c0_218, %c0_219] : memref<9x16x64xbf16, #tpu.memory_space<vmem>>, vector<1x16x64xbf16>
    %233 = vector.shape_cast %232 : vector<1x16x64xbf16> to vector<16x64xbf16>
    %cst_220 = arith.constant dense<0.000000e+00> : vector<16x32xf32>
    %234 = tpu.matmul %233, %200, %cst_220 {dimension_numbers = #tpu.dot_dimension_numbers<[1], [0], [0], [1], [0, 0, 1, 1], [], []>} : vector<16x64xbf16>, vector<64x32xbf16>, vector<16x32xf32> -> vector<16x32xf32>
    %235 = arith.truncf %234 : vector<16x32xf32> to vector<16x32xbf16>
    %c4_221 = arith.constant 4 : index
    %c0_222 = arith.constant 0 : index
    %c0_223 = arith.constant 0 : index
    %236 = vector.load %arg12[%c4_221, %c0_222, %c0_223] : memref<9x32x64xbf16, #tpu.memory_space<vmem>>, vector<1x32x64xbf16>
    %237 = vector.shape_cast %236 : vector<1x32x64xbf16> to vector<32x64xbf16>
    %cst_224 = arith.constant dense<0.000000e+00> : vector<16x64xf32>
    %238 = tpu.matmul %235, %237, %cst_224 {dimension_numbers = #tpu.dot_dimension_numbers<[1], [0], [0], [1], [0, 0, 1, 1], [], []>} : vector<16x32xbf16>, vector<32x64xbf16>, vector<16x64xf32> -> vector<16x64xf32>
    %239 = arith.addf %231, %238 : vector<16x64xf32>
    %c5_225 = arith.constant 5 : index
    %c0_226 = arith.constant 0 : index
    %c0_227 = arith.constant 0 : index
    %240 = vector.load %arg10[%c5_225, %c0_226, %c0_227] : memref<9x16x64xbf16, #tpu.memory_space<vmem>>, vector<1x16x64xbf16>
    %241 = vector.shape_cast %240 : vector<1x16x64xbf16> to vector<16x64xbf16>
    %cst_228 = arith.constant dense<0.000000e+00> : vector<16x32xf32>
    %242 = tpu.matmul %241, %200, %cst_228 {dimension_numbers = #tpu.dot_dimension_numbers<[1], [0], [0], [1], [0, 0, 1, 1], [], []>} : vector<16x64xbf16>, vector<64x32xbf16>, vector<16x32xf32> -> vector<16x32xf32>
    %243 = arith.truncf %242 : vector<16x32xf32> to vector<16x32xbf16>
    %c5_229 = arith.constant 5 : index
    %c0_230 = arith.constant 0 : index
    %c0_231 = arith.constant 0 : index
    %244 = vector.load %arg12[%c5_229, %c0_230, %c0_231] : memref<9x32x64xbf16, #tpu.memory_space<vmem>>, vector<1x32x64xbf16>
    %245 = vector.shape_cast %244 : vector<1x32x64xbf16> to vector<32x64xbf16>
    %cst_232 = arith.constant dense<0.000000e+00> : vector<16x64xf32>
    %246 = tpu.matmul %243, %245, %cst_232 {dimension_numbers = #tpu.dot_dimension_numbers<[1], [0], [0], [1], [0, 0, 1, 1], [], []>} : vector<16x32xbf16>, vector<32x64xbf16>, vector<16x64xf32> -> vector<16x64xf32>
    %247 = arith.addf %239, %246 : vector<16x64xf32>
    %c6_233 = arith.constant 6 : index
    %c0_234 = arith.constant 0 : index
    %c0_235 = arith.constant 0 : index
    %248 = vector.load %arg10[%c6_233, %c0_234, %c0_235] : memref<9x16x64xbf16, #tpu.memory_space<vmem>>, vector<1x16x64xbf16>
    %249 = vector.shape_cast %248 : vector<1x16x64xbf16> to vector<16x64xbf16>
    %cst_236 = arith.constant dense<0.000000e+00> : vector<16x32xf32>
    %250 = tpu.matmul %249, %200, %cst_236 {dimension_numbers = #tpu.dot_dimension_numbers<[1], [0], [0], [1], [0, 0, 1, 1], [], []>} : vector<16x64xbf16>, vector<64x32xbf16>, vector<16x32xf32> -> vector<16x32xf32>
    %251 = arith.truncf %250 : vector<16x32xf32> to vector<16x32xbf16>
    %c6_237 = arith.constant 6 : index
    %c0_238 = arith.constant 0 : index
    %c0_239 = arith.constant 0 : index
    %252 = vector.load %arg12[%c6_237, %c0_238, %c0_239] : memref<9x32x64xbf16, #tpu.memory_space<vmem>>, vector<1x32x64xbf16>
    %253 = vector.shape_cast %252 : vector<1x32x64xbf16> to vector<32x64xbf16>
    %cst_240 = arith.constant dense<0.000000e+00> : vector<16x64xf32>
    %254 = tpu.matmul %251, %253, %cst_240 {dimension_numbers = #tpu.dot_dimension_numbers<[1], [0], [0], [1], [0, 0, 1, 1], [], []>} : vector<16x32xbf16>, vector<32x64xbf16>, vector<16x64xf32> -> vector<16x64xf32>
    %255 = arith.addf %247, %254 : vector<16x64xf32>
    %c7_241 = arith.constant 7 : index
    %c0_242 = arith.constant 0 : index
    %c0_243 = arith.constant 0 : index
    %256 = vector.load %arg10[%c7_241, %c0_242, %c0_243] : memref<9x16x64xbf16, #tpu.memory_space<vmem>>, vector<1x16x64xbf16>
    %257 = vector.shape_cast %256 : vector<1x16x64xbf16> to vector<16x64xbf16>
    %cst_244 = arith.constant dense<0.000000e+00> : vector<16x32xf32>
    %258 = tpu.matmul %257, %200, %cst_244 {dimension_numbers = #tpu.dot_dimension_numbers<[1], [0], [0], [1], [0, 0, 1, 1], [], []>} : vector<16x64xbf16>, vector<64x32xbf16>, vector<16x32xf32> -> vector<16x32xf32>
    %259 = arith.truncf %258 : vector<16x32xf32> to vector<16x32xbf16>
    %c7_245 = arith.constant 7 : index
    %c0_246 = arith.constant 0 : index
    %c0_247 = arith.constant 0 : index
    %260 = vector.load %arg12[%c7_245, %c0_246, %c0_247] : memref<9x32x64xbf16, #tpu.memory_space<vmem>>, vector<1x32x64xbf16>
    %261 = vector.shape_cast %260 : vector<1x32x64xbf16> to vector<32x64xbf16>
    %cst_248 = arith.constant dense<0.000000e+00> : vector<16x64xf32>
    %262 = tpu.matmul %259, %261, %cst_248 {dimension_numbers = #tpu.dot_dimension_numbers<[1], [0], [0], [1], [0, 0, 1, 1], [], []>} : vector<16x32xbf16>, vector<32x64xbf16>, vector<16x64xf32> -> vector<16x64xf32>
    %263 = arith.addf %255, %262 : vector<16x64xf32>
    %c8_249 = arith.constant 8 : index
    %c0_250 = arith.constant 0 : index
    %c0_251 = arith.constant 0 : index
    %264 = vector.load %arg10[%c8_249, %c0_250, %c0_251] : memref<9x16x64xbf16, #tpu.memory_space<vmem>>, vector<1x16x64xbf16>
    %265 = vector.shape_cast %264 : vector<1x16x64xbf16> to vector<16x64xbf16>
    %cst_252 = arith.constant dense<0.000000e+00> : vector<16x32xf32>
    %266 = tpu.matmul %265, %200, %cst_252 {dimension_numbers = #tpu.dot_dimension_numbers<[1], [0], [0], [1], [0, 0, 1, 1], [], []>} : vector<16x64xbf16>, vector<64x32xbf16>, vector<16x32xf32> -> vector<16x32xf32>
    %267 = arith.truncf %266 : vector<16x32xf32> to vector<16x32xbf16>
    %c8_253 = arith.constant 8 : index
    %c0_254 = arith.constant 0 : index
    %c0_255 = arith.constant 0 : index
    %268 = vector.load %arg12[%c8_253, %c0_254, %c0_255] : memref<9x32x64xbf16, #tpu.memory_space<vmem>>, vector<1x32x64xbf16>
    %269 = vector.shape_cast %268 : vector<1x32x64xbf16> to vector<32x64xbf16>
    %cst_256 = arith.constant dense<0.000000e+00> : vector<16x64xf32>
    %270 = tpu.matmul %267, %269, %cst_256 {dimension_numbers = #tpu.dot_dimension_numbers<[1], [0], [0], [1], [0, 0, 1, 1], [], []>} : vector<16x32xbf16>, vector<32x64xbf16>, vector<16x64xf32> -> vector<16x64xf32>
    %271 = arith.addf %263, %270 : vector<16x64xf32>
    %c0_257 = arith.constant 0 : index
    %c0_258 = arith.constant 0 : index
    %272 = vector.load %arg13[%c0_257, %c0_258] : memref<1x64xf32, #tpu.memory_space<vmem>>, vector<1x64xf32>
    %273 = vector.broadcast %272 : vector<1x64xf32> to vector<16x64xf32>
    %274 = arith.addf %271, %273 : vector<16x64xf32>
    %cst_259 = arith.constant 0.000000e+00 : f32
    %275 = vector.broadcast %cst_259 : f32 to vector<16x64xf32>
    %276 = arith.maximumf %274, %275 : vector<16x64xf32>
    %277 = arith.truncf %276 : vector<16x64xf32> to vector<16x64xbf16>
    %c4_260 = arith.constant 4 : index
    %c0_261 = arith.constant 0 : index
    %c0_262 = arith.constant 0 : index
    %278 = vector.load %arg10[%c4_260, %c0_261, %c0_262] : memref<9x16x64xbf16, #tpu.memory_space<vmem>>, vector<1x16x64xbf16>
    %279 = vector.shape_cast %278 : vector<1x16x64xbf16> to vector<16x64xbf16>
    %cst_263 = arith.constant dense<0.000000e+00> : vector<16x32xf32>
    %280 = tpu.matmul %279, %200, %cst_263 {dimension_numbers = #tpu.dot_dimension_numbers<[1], [0], [0], [1], [0, 0, 1, 1], [], []>} : vector<16x64xbf16>, vector<64x32xbf16>, vector<16x32xf32> -> vector<16x32xf32>
    %281 = arith.truncf %280 : vector<16x32xf32> to vector<16x32xbf16>
    %c0_264 = arith.constant 0 : index
    %c0_265 = arith.constant 0 : index
    %282 = vector.load %arg16[%c0_264, %c0_265] : memref<32x64xbf16, #tpu.memory_space<vmem>>, vector<32x64xbf16>
    %cst_266 = arith.constant dense<0.000000e+00> : vector<16x64xf32>
    %283 = tpu.matmul %281, %282, %cst_266 {dimension_numbers = #tpu.dot_dimension_numbers<[1], [0], [0], [1], [0, 0, 1, 1], [], []>} : vector<16x32xbf16>, vector<32x64xbf16>, vector<16x64xf32> -> vector<16x64xf32>
    %c0_267 = arith.constant 0 : index
    %c0_268 = arith.constant 0 : index
    %284 = vector.load %arg17[%c0_267, %c0_268] : memref<1x64xf32, #tpu.memory_space<vmem>>, vector<1x64xf32>
    %285 = vector.broadcast %284 : vector<1x64xf32> to vector<16x64xf32>
    %286 = arith.addf %283, %285 : vector<16x64xf32>
    %c0_269 = arith.constant 0 : index
    %c0_270 = arith.constant 0 : index
    %c0_271 = arith.constant 0 : index
    %287 = vector.load %arg11[%c0_269, %c0_270, %c0_271] : memref<9x16x16xbf16, #tpu.memory_space<vmem>>, vector<1x16x16xbf16>
    %288 = vector.shape_cast %287 : vector<1x16x16xbf16> to vector<16x16xbf16>
    %cst_272 = arith.constant dense<0.000000e+00> : vector<16x64xf32>
    %289 = tpu.matmul %288, %277, %cst_272 {dimension_numbers = #tpu.dot_dimension_numbers<[1], [0], [0], [1], [0, 0, 1, 1], [], []>} : vector<16x16xbf16>, vector<16x64xbf16>, vector<16x64xf32> -> vector<16x64xf32>
    %290 = arith.truncf %289 : vector<16x64xf32> to vector<16x64xbf16>
    %c0_273 = arith.constant 0 : index
    %c0_274 = arith.constant 0 : index
    %c0_275 = arith.constant 0 : index
    %291 = vector.load %arg14[%c0_273, %c0_274, %c0_275] : memref<9x64x64xbf16, #tpu.memory_space<vmem>>, vector<1x64x64xbf16>
    %292 = vector.shape_cast %291 : vector<1x64x64xbf16> to vector<64x64xbf16>
    %cst_276 = arith.constant dense<0.000000e+00> : vector<16x64xf32>
    %293 = tpu.matmul %290, %292, %cst_276 {dimension_numbers = #tpu.dot_dimension_numbers<[1], [0], [0], [1], [0, 0, 1, 1], [], []>} : vector<16x64xbf16>, vector<64x64xbf16>, vector<16x64xf32> -> vector<16x64xf32>
    %c1_277 = arith.constant 1 : index
    %c0_278 = arith.constant 0 : index
    %c0_279 = arith.constant 0 : index
    %294 = vector.load %arg11[%c1_277, %c0_278, %c0_279] : memref<9x16x16xbf16, #tpu.memory_space<vmem>>, vector<1x16x16xbf16>
    %295 = vector.shape_cast %294 : vector<1x16x16xbf16> to vector<16x16xbf16>
    %cst_280 = arith.constant dense<0.000000e+00> : vector<16x64xf32>
    %296 = tpu.matmul %295, %277, %cst_280 {dimension_numbers = #tpu.dot_dimension_numbers<[1], [0], [0], [1], [0, 0, 1, 1], [], []>} : vector<16x16xbf16>, vector<16x64xbf16>, vector<16x64xf32> -> vector<16x64xf32>
    %297 = arith.truncf %296 : vector<16x64xf32> to vector<16x64xbf16>
    %c1_281 = arith.constant 1 : index
    %c0_282 = arith.constant 0 : index
    %c0_283 = arith.constant 0 : index
    %298 = vector.load %arg14[%c1_281, %c0_282, %c0_283] : memref<9x64x64xbf16, #tpu.memory_space<vmem>>, vector<1x64x64xbf16>
    %299 = vector.shape_cast %298 : vector<1x64x64xbf16> to vector<64x64xbf16>
    %cst_284 = arith.constant dense<0.000000e+00> : vector<16x64xf32>
    %300 = tpu.matmul %297, %299, %cst_284 {dimension_numbers = #tpu.dot_dimension_numbers<[1], [0], [0], [1], [0, 0, 1, 1], [], []>} : vector<16x64xbf16>, vector<64x64xbf16>, vector<16x64xf32> -> vector<16x64xf32>
    %301 = arith.addf %293, %300 : vector<16x64xf32>
    %c2_285 = arith.constant 2 : index
    %c0_286 = arith.constant 0 : index
    %c0_287 = arith.constant 0 : index
    %302 = vector.load %arg11[%c2_285, %c0_286, %c0_287] : memref<9x16x16xbf16, #tpu.memory_space<vmem>>, vector<1x16x16xbf16>
    %303 = vector.shape_cast %302 : vector<1x16x16xbf16> to vector<16x16xbf16>
    %cst_288 = arith.constant dense<0.000000e+00> : vector<16x64xf32>
    %304 = tpu.matmul %303, %277, %cst_288 {dimension_numbers = #tpu.dot_dimension_numbers<[1], [0], [0], [1], [0, 0, 1, 1], [], []>} : vector<16x16xbf16>, vector<16x64xbf16>, vector<16x64xf32> -> vector<16x64xf32>
    %305 = arith.truncf %304 : vector<16x64xf32> to vector<16x64xbf16>
    %c2_289 = arith.constant 2 : index
    %c0_290 = arith.constant 0 : index
    %c0_291 = arith.constant 0 : index
    %306 = vector.load %arg14[%c2_289, %c0_290, %c0_291] : memref<9x64x64xbf16, #tpu.memory_space<vmem>>, vector<1x64x64xbf16>
    %307 = vector.shape_cast %306 : vector<1x64x64xbf16> to vector<64x64xbf16>
    %cst_292 = arith.constant dense<0.000000e+00> : vector<16x64xf32>
    %308 = tpu.matmul %305, %307, %cst_292 {dimension_numbers = #tpu.dot_dimension_numbers<[1], [0], [0], [1], [0, 0, 1, 1], [], []>} : vector<16x64xbf16>, vector<64x64xbf16>, vector<16x64xf32> -> vector<16x64xf32>
    %309 = arith.addf %301, %308 : vector<16x64xf32>
    %c3_293 = arith.constant 3 : index
    %c0_294 = arith.constant 0 : index
    %c0_295 = arith.constant 0 : index
    %310 = vector.load %arg11[%c3_293, %c0_294, %c0_295] : memref<9x16x16xbf16, #tpu.memory_space<vmem>>, vector<1x16x16xbf16>
    %311 = vector.shape_cast %310 : vector<1x16x16xbf16> to vector<16x16xbf16>
    %cst_296 = arith.constant dense<0.000000e+00> : vector<16x64xf32>
    %312 = tpu.matmul %311, %277, %cst_296 {dimension_numbers = #tpu.dot_dimension_numbers<[1], [0], [0], [1], [0, 0, 1, 1], [], []>} : vector<16x16xbf16>, vector<16x64xbf16>, vector<16x64xf32> -> vector<16x64xf32>
    %313 = arith.truncf %312 : vector<16x64xf32> to vector<16x64xbf16>
    %c3_297 = arith.constant 3 : index
    %c0_298 = arith.constant 0 : index
    %c0_299 = arith.constant 0 : index
    %314 = vector.load %arg14[%c3_297, %c0_298, %c0_299] : memref<9x64x64xbf16, #tpu.memory_space<vmem>>, vector<1x64x64xbf16>
    %315 = vector.shape_cast %314 : vector<1x64x64xbf16> to vector<64x64xbf16>
    %cst_300 = arith.constant dense<0.000000e+00> : vector<16x64xf32>
    %316 = tpu.matmul %313, %315, %cst_300 {dimension_numbers = #tpu.dot_dimension_numbers<[1], [0], [0], [1], [0, 0, 1, 1], [], []>} : vector<16x64xbf16>, vector<64x64xbf16>, vector<16x64xf32> -> vector<16x64xf32>
    %317 = arith.addf %309, %316 : vector<16x64xf32>
    %c4_301 = arith.constant 4 : index
    %c0_302 = arith.constant 0 : index
    %c0_303 = arith.constant 0 : index
    %318 = vector.load %arg11[%c4_301, %c0_302, %c0_303] : memref<9x16x16xbf16, #tpu.memory_space<vmem>>, vector<1x16x16xbf16>
    %319 = vector.shape_cast %318 : vector<1x16x16xbf16> to vector<16x16xbf16>
    %cst_304 = arith.constant dense<0.000000e+00> : vector<16x64xf32>
    %320 = tpu.matmul %319, %277, %cst_304 {dimension_numbers = #tpu.dot_dimension_numbers<[1], [0], [0], [1], [0, 0, 1, 1], [], []>} : vector<16x16xbf16>, vector<16x64xbf16>, vector<16x64xf32> -> vector<16x64xf32>
    %321 = arith.truncf %320 : vector<16x64xf32> to vector<16x64xbf16>
    %c4_305 = arith.constant 4 : index
    %c0_306 = arith.constant 0 : index
    %c0_307 = arith.constant 0 : index
    %322 = vector.load %arg14[%c4_305, %c0_306, %c0_307] : memref<9x64x64xbf16, #tpu.memory_space<vmem>>, vector<1x64x64xbf16>
    %323 = vector.shape_cast %322 : vector<1x64x64xbf16> to vector<64x64xbf16>
    %cst_308 = arith.constant dense<0.000000e+00> : vector<16x64xf32>
    %324 = tpu.matmul %321, %323, %cst_308 {dimension_numbers = #tpu.dot_dimension_numbers<[1], [0], [0], [1], [0, 0, 1, 1], [], []>} : vector<16x64xbf16>, vector<64x64xbf16>, vector<16x64xf32> -> vector<16x64xf32>
    %325 = arith.addf %317, %324 : vector<16x64xf32>
    %c5_309 = arith.constant 5 : index
    %c0_310 = arith.constant 0 : index
    %c0_311 = arith.constant 0 : index
    %326 = vector.load %arg11[%c5_309, %c0_310, %c0_311] : memref<9x16x16xbf16, #tpu.memory_space<vmem>>, vector<1x16x16xbf16>
    %327 = vector.shape_cast %326 : vector<1x16x16xbf16> to vector<16x16xbf16>
    %cst_312 = arith.constant dense<0.000000e+00> : vector<16x64xf32>
    %328 = tpu.matmul %327, %277, %cst_312 {dimension_numbers = #tpu.dot_dimension_numbers<[1], [0], [0], [1], [0, 0, 1, 1], [], []>} : vector<16x16xbf16>, vector<16x64xbf16>, vector<16x64xf32> -> vector<16x64xf32>
    %329 = arith.truncf %328 : vector<16x64xf32> to vector<16x64xbf16>
    %c5_313 = arith.constant 5 : index
    %c0_314 = arith.constant 0 : index
    %c0_315 = arith.constant 0 : index
    %330 = vector.load %arg14[%c5_313, %c0_314, %c0_315] : memref<9x64x64xbf16, #tpu.memory_space<vmem>>, vector<1x64x64xbf16>
    %331 = vector.shape_cast %330 : vector<1x64x64xbf16> to vector<64x64xbf16>
    %cst_316 = arith.constant dense<0.000000e+00> : vector<16x64xf32>
    %332 = tpu.matmul %329, %331, %cst_316 {dimension_numbers = #tpu.dot_dimension_numbers<[1], [0], [0], [1], [0, 0, 1, 1], [], []>} : vector<16x64xbf16>, vector<64x64xbf16>, vector<16x64xf32> -> vector<16x64xf32>
    %333 = arith.addf %325, %332 : vector<16x64xf32>
    %c6_317 = arith.constant 6 : index
    %c0_318 = arith.constant 0 : index
    %c0_319 = arith.constant 0 : index
    %334 = vector.load %arg11[%c6_317, %c0_318, %c0_319] : memref<9x16x16xbf16, #tpu.memory_space<vmem>>, vector<1x16x16xbf16>
    %335 = vector.shape_cast %334 : vector<1x16x16xbf16> to vector<16x16xbf16>
    %cst_320 = arith.constant dense<0.000000e+00> : vector<16x64xf32>
    %336 = tpu.matmul %335, %277, %cst_320 {dimension_numbers = #tpu.dot_dimension_numbers<[1], [0], [0], [1], [0, 0, 1, 1], [], []>} : vector<16x16xbf16>, vector<16x64xbf16>, vector<16x64xf32> -> vector<16x64xf32>
    %337 = arith.truncf %336 : vector<16x64xf32> to vector<16x64xbf16>
    %c6_321 = arith.constant 6 : index
    %c0_322 = arith.constant 0 : index
    %c0_323 = arith.constant 0 : index
    %338 = vector.load %arg14[%c6_321, %c0_322, %c0_323] : memref<9x64x64xbf16, #tpu.memory_space<vmem>>, vector<1x64x64xbf16>
    %339 = vector.shape_cast %338 : vector<1x64x64xbf16> to vector<64x64xbf16>
    %cst_324 = arith.constant dense<0.000000e+00> : vector<16x64xf32>
    %340 = tpu.matmul %337, %339, %cst_324 {dimension_numbers = #tpu.dot_dimension_numbers<[1], [0], [0], [1], [0, 0, 1, 1], [], []>} : vector<16x64xbf16>, vector<64x64xbf16>, vector<16x64xf32> -> vector<16x64xf32>
    %341 = arith.addf %333, %340 : vector<16x64xf32>
    %c7_325 = arith.constant 7 : index
    %c0_326 = arith.constant 0 : index
    %c0_327 = arith.constant 0 : index
    %342 = vector.load %arg11[%c7_325, %c0_326, %c0_327] : memref<9x16x16xbf16, #tpu.memory_space<vmem>>, vector<1x16x16xbf16>
    %343 = vector.shape_cast %342 : vector<1x16x16xbf16> to vector<16x16xbf16>
    %cst_328 = arith.constant dense<0.000000e+00> : vector<16x64xf32>
    %344 = tpu.matmul %343, %277, %cst_328 {dimension_numbers = #tpu.dot_dimension_numbers<[1], [0], [0], [1], [0, 0, 1, 1], [], []>} : vector<16x16xbf16>, vector<16x64xbf16>, vector<16x64xf32> -> vector<16x64xf32>
    %345 = arith.truncf %344 : vector<16x64xf32> to vector<16x64xbf16>
    %c7_329 = arith.constant 7 : index
    %c0_330 = arith.constant 0 : index
    %c0_331 = arith.constant 0 : index
    %346 = vector.load %arg14[%c7_329, %c0_330, %c0_331] : memref<9x64x64xbf16, #tpu.memory_space<vmem>>, vector<1x64x64xbf16>
    %347 = vector.shape_cast %346 : vector<1x64x64xbf16> to vector<64x64xbf16>
    %cst_332 = arith.constant dense<0.000000e+00> : vector<16x64xf32>
    %348 = tpu.matmul %345, %347, %cst_332 {dimension_numbers = #tpu.dot_dimension_numbers<[1], [0], [0], [1], [0, 0, 1, 1], [], []>} : vector<16x64xbf16>, vector<64x64xbf16>, vector<16x64xf32> -> vector<16x64xf32>
    %349 = arith.addf %341, %348 : vector<16x64xf32>
    %c8_333 = arith.constant 8 : index
    %c0_334 = arith.constant 0 : index
    %c0_335 = arith.constant 0 : index
    %350 = vector.load %arg11[%c8_333, %c0_334, %c0_335] : memref<9x16x16xbf16, #tpu.memory_space<vmem>>, vector<1x16x16xbf16>
    %351 = vector.shape_cast %350 : vector<1x16x16xbf16> to vector<16x16xbf16>
    %cst_336 = arith.constant dense<0.000000e+00> : vector<16x64xf32>
    %352 = tpu.matmul %351, %277, %cst_336 {dimension_numbers = #tpu.dot_dimension_numbers<[1], [0], [0], [1], [0, 0, 1, 1], [], []>} : vector<16x16xbf16>, vector<16x64xbf16>, vector<16x64xf32> -> vector<16x64xf32>
    %353 = arith.truncf %352 : vector<16x64xf32> to vector<16x64xbf16>
    %c8_337 = arith.constant 8 : index
    %c0_338 = arith.constant 0 : index
    %c0_339 = arith.constant 0 : index
    %354 = vector.load %arg14[%c8_337, %c0_338, %c0_339] : memref<9x64x64xbf16, #tpu.memory_space<vmem>>, vector<1x64x64xbf16>
    %355 = vector.shape_cast %354 : vector<1x64x64xbf16> to vector<64x64xbf16>
    %cst_340 = arith.constant dense<0.000000e+00> : vector<16x64xf32>
    %356 = tpu.matmul %353, %355, %cst_340 {dimension_numbers = #tpu.dot_dimension_numbers<[1], [0], [0], [1], [0, 0, 1, 1], [], []>} : vector<16x64xbf16>, vector<64x64xbf16>, vector<16x64xf32> -> vector<16x64xf32>
    %357 = arith.addf %349, %356 : vector<16x64xf32>
    %c0_341 = arith.constant 0 : index
    %c0_342 = arith.constant 0 : index
    %358 = vector.load %arg15[%c0_341, %c0_342] : memref<1x64xf32, #tpu.memory_space<vmem>>, vector<1x64xf32>
    %359 = vector.broadcast %358 : vector<1x64xf32> to vector<16x64xf32>
    %360 = arith.addf %357, %359 : vector<16x64xf32>
    %361 = arith.addf %360, %286 : vector<16x64xf32>
    %cst_343 = arith.constant 0.000000e+00 : f32
    %362 = vector.broadcast %cst_343 : f32 to vector<16x64xf32>
    %363 = arith.maximumf %361, %362 : vector<16x64xf32>
    %364 = arith.truncf %363 : vector<16x64xf32> to vector<16x64xbf16>
    %c0_344 = arith.constant 0 : index
    %c0_345 = arith.constant 0 : index
    %c0_346 = arith.constant 0 : index
    %365 = vector.load %arg18[%c0_344, %c0_345, %c0_346] : memref<9x4x16xbf16, #tpu.memory_space<vmem>>, vector<1x4x16xbf16>
    %366 = vector.shape_cast %365 : vector<1x4x16xbf16> to vector<4x16xbf16>
    %cst_347 = arith.constant dense<0.000000e+00> : vector<4x64xf32>
    %367 = tpu.matmul %366, %364, %cst_347 {dimension_numbers = #tpu.dot_dimension_numbers<[1], [0], [0], [1], [0, 0, 1, 1], [], []>} : vector<4x16xbf16>, vector<16x64xbf16>, vector<4x64xf32> -> vector<4x64xf32>
    %368 = arith.truncf %367 : vector<4x64xf32> to vector<4x64xbf16>
    %c0_348 = arith.constant 0 : index
    %c0_349 = arith.constant 0 : index
    %c0_350 = arith.constant 0 : index
    %369 = vector.load %arg20[%c0_348, %c0_349, %c0_350] : memref<9x64x128xbf16, #tpu.memory_space<vmem>>, vector<1x64x128xbf16>
    %370 = vector.shape_cast %369 : vector<1x64x128xbf16> to vector<64x128xbf16>
    %cst_351 = arith.constant dense<0.000000e+00> : vector<4x128xf32>
    %371 = tpu.matmul %368, %370, %cst_351 {dimension_numbers = #tpu.dot_dimension_numbers<[1], [0], [0], [1], [0, 0, 1, 1], [], []>} : vector<4x64xbf16>, vector<64x128xbf16>, vector<4x128xf32> -> vector<4x128xf32>
    %c1_352 = arith.constant 1 : index
    %c0_353 = arith.constant 0 : index
    %c0_354 = arith.constant 0 : index
    %372 = vector.load %arg18[%c1_352, %c0_353, %c0_354] : memref<9x4x16xbf16, #tpu.memory_space<vmem>>, vector<1x4x16xbf16>
    %373 = vector.shape_cast %372 : vector<1x4x16xbf16> to vector<4x16xbf16>
    %cst_355 = arith.constant dense<0.000000e+00> : vector<4x64xf32>
    %374 = tpu.matmul %373, %364, %cst_355 {dimension_numbers = #tpu.dot_dimension_numbers<[1], [0], [0], [1], [0, 0, 1, 1], [], []>} : vector<4x16xbf16>, vector<16x64xbf16>, vector<4x64xf32> -> vector<4x64xf32>
    %375 = arith.truncf %374 : vector<4x64xf32> to vector<4x64xbf16>
    %c1_356 = arith.constant 1 : index
    %c0_357 = arith.constant 0 : index
    %c0_358 = arith.constant 0 : index
    %376 = vector.load %arg20[%c1_356, %c0_357, %c0_358] : memref<9x64x128xbf16, #tpu.memory_space<vmem>>, vector<1x64x128xbf16>
    %377 = vector.shape_cast %376 : vector<1x64x128xbf16> to vector<64x128xbf16>
    %cst_359 = arith.constant dense<0.000000e+00> : vector<4x128xf32>
    %378 = tpu.matmul %375, %377, %cst_359 {dimension_numbers = #tpu.dot_dimension_numbers<[1], [0], [0], [1], [0, 0, 1, 1], [], []>} : vector<4x64xbf16>, vector<64x128xbf16>, vector<4x128xf32> -> vector<4x128xf32>
    %379 = arith.addf %371, %378 : vector<4x128xf32>
    %c2_360 = arith.constant 2 : index
    %c0_361 = arith.constant 0 : index
    %c0_362 = arith.constant 0 : index
    %380 = vector.load %arg18[%c2_360, %c0_361, %c0_362] : memref<9x4x16xbf16, #tpu.memory_space<vmem>>, vector<1x4x16xbf16>
    %381 = vector.shape_cast %380 : vector<1x4x16xbf16> to vector<4x16xbf16>
    %cst_363 = arith.constant dense<0.000000e+00> : vector<4x64xf32>
    %382 = tpu.matmul %381, %364, %cst_363 {dimension_numbers = #tpu.dot_dimension_numbers<[1], [0], [0], [1], [0, 0, 1, 1], [], []>} : vector<4x16xbf16>, vector<16x64xbf16>, vector<4x64xf32> -> vector<4x64xf32>
    %383 = arith.truncf %382 : vector<4x64xf32> to vector<4x64xbf16>
    %c2_364 = arith.constant 2 : index
    %c0_365 = arith.constant 0 : index
    %c0_366 = arith.constant 0 : index
    %384 = vector.load %arg20[%c2_364, %c0_365, %c0_366] : memref<9x64x128xbf16, #tpu.memory_space<vmem>>, vector<1x64x128xbf16>
    %385 = vector.shape_cast %384 : vector<1x64x128xbf16> to vector<64x128xbf16>
    %cst_367 = arith.constant dense<0.000000e+00> : vector<4x128xf32>
    %386 = tpu.matmul %383, %385, %cst_367 {dimension_numbers = #tpu.dot_dimension_numbers<[1], [0], [0], [1], [0, 0, 1, 1], [], []>} : vector<4x64xbf16>, vector<64x128xbf16>, vector<4x128xf32> -> vector<4x128xf32>
    %387 = arith.addf %379, %386 : vector<4x128xf32>
    %c3_368 = arith.constant 3 : index
    %c0_369 = arith.constant 0 : index
    %c0_370 = arith.constant 0 : index
    %388 = vector.load %arg18[%c3_368, %c0_369, %c0_370] : memref<9x4x16xbf16, #tpu.memory_space<vmem>>, vector<1x4x16xbf16>
    %389 = vector.shape_cast %388 : vector<1x4x16xbf16> to vector<4x16xbf16>
    %cst_371 = arith.constant dense<0.000000e+00> : vector<4x64xf32>
    %390 = tpu.matmul %389, %364, %cst_371 {dimension_numbers = #tpu.dot_dimension_numbers<[1], [0], [0], [1], [0, 0, 1, 1], [], []>} : vector<4x16xbf16>, vector<16x64xbf16>, vector<4x64xf32> -> vector<4x64xf32>
    %391 = arith.truncf %390 : vector<4x64xf32> to vector<4x64xbf16>
    %c3_372 = arith.constant 3 : index
    %c0_373 = arith.constant 0 : index
    %c0_374 = arith.constant 0 : index
    %392 = vector.load %arg20[%c3_372, %c0_373, %c0_374] : memref<9x64x128xbf16, #tpu.memory_space<vmem>>, vector<1x64x128xbf16>
    %393 = vector.shape_cast %392 : vector<1x64x128xbf16> to vector<64x128xbf16>
    %cst_375 = arith.constant dense<0.000000e+00> : vector<4x128xf32>
    %394 = tpu.matmul %391, %393, %cst_375 {dimension_numbers = #tpu.dot_dimension_numbers<[1], [0], [0], [1], [0, 0, 1, 1], [], []>} : vector<4x64xbf16>, vector<64x128xbf16>, vector<4x128xf32> -> vector<4x128xf32>
    %395 = arith.addf %387, %394 : vector<4x128xf32>
    %c4_376 = arith.constant 4 : index
    %c0_377 = arith.constant 0 : index
    %c0_378 = arith.constant 0 : index
    %396 = vector.load %arg18[%c4_376, %c0_377, %c0_378] : memref<9x4x16xbf16, #tpu.memory_space<vmem>>, vector<1x4x16xbf16>
    %397 = vector.shape_cast %396 : vector<1x4x16xbf16> to vector<4x16xbf16>
    %cst_379 = arith.constant dense<0.000000e+00> : vector<4x64xf32>
    %398 = tpu.matmul %397, %364, %cst_379 {dimension_numbers = #tpu.dot_dimension_numbers<[1], [0], [0], [1], [0, 0, 1, 1], [], []>} : vector<4x16xbf16>, vector<16x64xbf16>, vector<4x64xf32> -> vector<4x64xf32>
    %399 = arith.truncf %398 : vector<4x64xf32> to vector<4x64xbf16>
    %c4_380 = arith.constant 4 : index
    %c0_381 = arith.constant 0 : index
    %c0_382 = arith.constant 0 : index
    %400 = vector.load %arg20[%c4_380, %c0_381, %c0_382] : memref<9x64x128xbf16, #tpu.memory_space<vmem>>, vector<1x64x128xbf16>
    %401 = vector.shape_cast %400 : vector<1x64x128xbf16> to vector<64x128xbf16>
    %cst_383 = arith.constant dense<0.000000e+00> : vector<4x128xf32>
    %402 = tpu.matmul %399, %401, %cst_383 {dimension_numbers = #tpu.dot_dimension_numbers<[1], [0], [0], [1], [0, 0, 1, 1], [], []>} : vector<4x64xbf16>, vector<64x128xbf16>, vector<4x128xf32> -> vector<4x128xf32>
    %403 = arith.addf %395, %402 : vector<4x128xf32>
    %c5_384 = arith.constant 5 : index
    %c0_385 = arith.constant 0 : index
    %c0_386 = arith.constant 0 : index
    %404 = vector.load %arg18[%c5_384, %c0_385, %c0_386] : memref<9x4x16xbf16, #tpu.memory_space<vmem>>, vector<1x4x16xbf16>
    %405 = vector.shape_cast %404 : vector<1x4x16xbf16> to vector<4x16xbf16>
    %cst_387 = arith.constant dense<0.000000e+00> : vector<4x64xf32>
    %406 = tpu.matmul %405, %364, %cst_387 {dimension_numbers = #tpu.dot_dimension_numbers<[1], [0], [0], [1], [0, 0, 1, 1], [], []>} : vector<4x16xbf16>, vector<16x64xbf16>, vector<4x64xf32> -> vector<4x64xf32>
    %407 = arith.truncf %406 : vector<4x64xf32> to vector<4x64xbf16>
    %c5_388 = arith.constant 5 : index
    %c0_389 = arith.constant 0 : index
    %c0_390 = arith.constant 0 : index
    %408 = vector.load %arg20[%c5_388, %c0_389, %c0_390] : memref<9x64x128xbf16, #tpu.memory_space<vmem>>, vector<1x64x128xbf16>
    %409 = vector.shape_cast %408 : vector<1x64x128xbf16> to vector<64x128xbf16>
    %cst_391 = arith.constant dense<0.000000e+00> : vector<4x128xf32>
    %410 = tpu.matmul %407, %409, %cst_391 {dimension_numbers = #tpu.dot_dimension_numbers<[1], [0], [0], [1], [0, 0, 1, 1], [], []>} : vector<4x64xbf16>, vector<64x128xbf16>, vector<4x128xf32> -> vector<4x128xf32>
    %411 = arith.addf %403, %410 : vector<4x128xf32>
    %c6_392 = arith.constant 6 : index
    %c0_393 = arith.constant 0 : index
    %c0_394 = arith.constant 0 : index
    %412 = vector.load %arg18[%c6_392, %c0_393, %c0_394] : memref<9x4x16xbf16, #tpu.memory_space<vmem>>, vector<1x4x16xbf16>
    %413 = vector.shape_cast %412 : vector<1x4x16xbf16> to vector<4x16xbf16>
    %cst_395 = arith.constant dense<0.000000e+00> : vector<4x64xf32>
    %414 = tpu.matmul %413, %364, %cst_395 {dimension_numbers = #tpu.dot_dimension_numbers<[1], [0], [0], [1], [0, 0, 1, 1], [], []>} : vector<4x16xbf16>, vector<16x64xbf16>, vector<4x64xf32> -> vector<4x64xf32>
    %415 = arith.truncf %414 : vector<4x64xf32> to vector<4x64xbf16>
    %c6_396 = arith.constant 6 : index
    %c0_397 = arith.constant 0 : index
    %c0_398 = arith.constant 0 : index
    %416 = vector.load %arg20[%c6_396, %c0_397, %c0_398] : memref<9x64x128xbf16, #tpu.memory_space<vmem>>, vector<1x64x128xbf16>
    %417 = vector.shape_cast %416 : vector<1x64x128xbf16> to vector<64x128xbf16>
    %cst_399 = arith.constant dense<0.000000e+00> : vector<4x128xf32>
    %418 = tpu.matmul %415, %417, %cst_399 {dimension_numbers = #tpu.dot_dimension_numbers<[1], [0], [0], [1], [0, 0, 1, 1], [], []>} : vector<4x64xbf16>, vector<64x128xbf16>, vector<4x128xf32> -> vector<4x128xf32>
    %419 = arith.addf %411, %418 : vector<4x128xf32>
    %c7_400 = arith.constant 7 : index
    %c0_401 = arith.constant 0 : index
    %c0_402 = arith.constant 0 : index
    %420 = vector.load %arg18[%c7_400, %c0_401, %c0_402] : memref<9x4x16xbf16, #tpu.memory_space<vmem>>, vector<1x4x16xbf16>
    %421 = vector.shape_cast %420 : vector<1x4x16xbf16> to vector<4x16xbf16>
    %cst_403 = arith.constant dense<0.000000e+00> : vector<4x64xf32>
    %422 = tpu.matmul %421, %364, %cst_403 {dimension_numbers = #tpu.dot_dimension_numbers<[1], [0], [0], [1], [0, 0, 1, 1], [], []>} : vector<4x16xbf16>, vector<16x64xbf16>, vector<4x64xf32> -> vector<4x64xf32>
    %423 = arith.truncf %422 : vector<4x64xf32> to vector<4x64xbf16>
    %c7_404 = arith.constant 7 : index
    %c0_405 = arith.constant 0 : index
    %c0_406 = arith.constant 0 : index
    %424 = vector.load %arg20[%c7_404, %c0_405, %c0_406] : memref<9x64x128xbf16, #tpu.memory_space<vmem>>, vector<1x64x128xbf16>
    %425 = vector.shape_cast %424 : vector<1x64x128xbf16> to vector<64x128xbf16>
    %cst_407 = arith.constant dense<0.000000e+00> : vector<4x128xf32>
    %426 = tpu.matmul %423, %425, %cst_407 {dimension_numbers = #tpu.dot_dimension_numbers<[1], [0], [0], [1], [0, 0, 1, 1], [], []>} : vector<4x64xbf16>, vector<64x128xbf16>, vector<4x128xf32> -> vector<4x128xf32>
    %427 = arith.addf %419, %426 : vector<4x128xf32>
    %c8_408 = arith.constant 8 : index
    %c0_409 = arith.constant 0 : index
    %c0_410 = arith.constant 0 : index
    %428 = vector.load %arg18[%c8_408, %c0_409, %c0_410] : memref<9x4x16xbf16, #tpu.memory_space<vmem>>, vector<1x4x16xbf16>
    %429 = vector.shape_cast %428 : vector<1x4x16xbf16> to vector<4x16xbf16>
    %cst_411 = arith.constant dense<0.000000e+00> : vector<4x64xf32>
    %430 = tpu.matmul %429, %364, %cst_411 {dimension_numbers = #tpu.dot_dimension_numbers<[1], [0], [0], [1], [0, 0, 1, 1], [], []>} : vector<4x16xbf16>, vector<16x64xbf16>, vector<4x64xf32> -> vector<4x64xf32>
    %431 = arith.truncf %430 : vector<4x64xf32> to vector<4x64xbf16>
    %c8_412 = arith.constant 8 : index
    %c0_413 = arith.constant 0 : index
    %c0_414 = arith.constant 0 : index
    %432 = vector.load %arg20[%c8_412, %c0_413, %c0_414] : memref<9x64x128xbf16, #tpu.memory_space<vmem>>, vector<1x64x128xbf16>
    %433 = vector.shape_cast %432 : vector<1x64x128xbf16> to vector<64x128xbf16>
    %cst_415 = arith.constant dense<0.000000e+00> : vector<4x128xf32>
    %434 = tpu.matmul %431, %433, %cst_415 {dimension_numbers = #tpu.dot_dimension_numbers<[1], [0], [0], [1], [0, 0, 1, 1], [], []>} : vector<4x64xbf16>, vector<64x128xbf16>, vector<4x128xf32> -> vector<4x128xf32>
    %435 = arith.addf %427, %434 : vector<4x128xf32>
    %c0_416 = arith.constant 0 : index
    %c0_417 = arith.constant 0 : index
    %436 = vector.load %arg21[%c0_416, %c0_417] : memref<1x128xf32, #tpu.memory_space<vmem>>, vector<1x128xf32>
    %437 = vector.broadcast %436 : vector<1x128xf32> to vector<4x128xf32>
    %438 = arith.addf %435, %437 : vector<4x128xf32>
    %cst_418 = arith.constant 0.000000e+00 : f32
    %439 = vector.broadcast %cst_418 : f32 to vector<4x128xf32>
    %440 = arith.maximumf %438, %439 : vector<4x128xf32>
    %441 = arith.truncf %440 : vector<4x128xf32> to vector<4x128xbf16>
    %c4_419 = arith.constant 4 : index
    %c0_420 = arith.constant 0 : index
    %c0_421 = arith.constant 0 : index
    %442 = vector.load %arg18[%c4_419, %c0_420, %c0_421] : memref<9x4x16xbf16, #tpu.memory_space<vmem>>, vector<1x4x16xbf16>
    %443 = vector.shape_cast %442 : vector<1x4x16xbf16> to vector<4x16xbf16>
    %cst_422 = arith.constant dense<0.000000e+00> : vector<4x64xf32>
    %444 = tpu.matmul %443, %364, %cst_422 {dimension_numbers = #tpu.dot_dimension_numbers<[1], [0], [0], [1], [0, 0, 1, 1], [], []>} : vector<4x16xbf16>, vector<16x64xbf16>, vector<4x64xf32> -> vector<4x64xf32>
    %445 = arith.truncf %444 : vector<4x64xf32> to vector<4x64xbf16>
    %c0_423 = arith.constant 0 : index
    %c0_424 = arith.constant 0 : index
    %446 = vector.load %arg24[%c0_423, %c0_424] : memref<64x128xbf16, #tpu.memory_space<vmem>>, vector<64x128xbf16>
    %cst_425 = arith.constant dense<0.000000e+00> : vector<4x128xf32>
    %447 = tpu.matmul %445, %446, %cst_425 {dimension_numbers = #tpu.dot_dimension_numbers<[1], [0], [0], [1], [0, 0, 1, 1], [], []>} : vector<4x64xbf16>, vector<64x128xbf16>, vector<4x128xf32> -> vector<4x128xf32>
    %c0_426 = arith.constant 0 : index
    %c0_427 = arith.constant 0 : index
    %448 = vector.load %arg25[%c0_426, %c0_427] : memref<1x128xf32, #tpu.memory_space<vmem>>, vector<1x128xf32>
    %449 = vector.broadcast %448 : vector<1x128xf32> to vector<4x128xf32>
    %450 = arith.addf %447, %449 : vector<4x128xf32>
    %c0_428 = arith.constant 0 : index
    %c0_429 = arith.constant 0 : index
    %c0_430 = arith.constant 0 : index
    %451 = vector.load %arg19[%c0_428, %c0_429, %c0_430] : memref<9x4x4xbf16, #tpu.memory_space<vmem>>, vector<1x4x4xbf16>
    %452 = vector.shape_cast %451 : vector<1x4x4xbf16> to vector<4x4xbf16>
    %cst_431 = arith.constant dense<0.000000e+00> : vector<4x128xf32>
    %453 = tpu.matmul %452, %441, %cst_431 {dimension_numbers = #tpu.dot_dimension_numbers<[1], [0], [0], [1], [0, 0, 1, 1], [], []>} : vector<4x4xbf16>, vector<4x128xbf16>, vector<4x128xf32> -> vector<4x128xf32>
    %454 = arith.truncf %453 : vector<4x128xf32> to vector<4x128xbf16>
    %c0_432 = arith.constant 0 : index
    %c0_433 = arith.constant 0 : index
    %c0_434 = arith.constant 0 : index
    %455 = vector.load %arg22[%c0_432, %c0_433, %c0_434] : memref<9x128x128xbf16, #tpu.memory_space<vmem>>, vector<1x128x128xbf16>
    %456 = vector.shape_cast %455 : vector<1x128x128xbf16> to vector<128x128xbf16>
    %cst_435 = arith.constant dense<0.000000e+00> : vector<4x128xf32>
    %457 = tpu.matmul %454, %456, %cst_435 {dimension_numbers = #tpu.dot_dimension_numbers<[1], [0], [0], [1], [0, 0, 1, 1], [], []>} : vector<4x128xbf16>, vector<128x128xbf16>, vector<4x128xf32> -> vector<4x128xf32>
    %c1_436 = arith.constant 1 : index
    %c0_437 = arith.constant 0 : index
    %c0_438 = arith.constant 0 : index
    %458 = vector.load %arg19[%c1_436, %c0_437, %c0_438] : memref<9x4x4xbf16, #tpu.memory_space<vmem>>, vector<1x4x4xbf16>
    %459 = vector.shape_cast %458 : vector<1x4x4xbf16> to vector<4x4xbf16>
    %cst_439 = arith.constant dense<0.000000e+00> : vector<4x128xf32>
    %460 = tpu.matmul %459, %441, %cst_439 {dimension_numbers = #tpu.dot_dimension_numbers<[1], [0], [0], [1], [0, 0, 1, 1], [], []>} : vector<4x4xbf16>, vector<4x128xbf16>, vector<4x128xf32> -> vector<4x128xf32>
    %461 = arith.truncf %460 : vector<4x128xf32> to vector<4x128xbf16>
    %c1_440 = arith.constant 1 : index
    %c0_441 = arith.constant 0 : index
    %c0_442 = arith.constant 0 : index
    %462 = vector.load %arg22[%c1_440, %c0_441, %c0_442] : memref<9x128x128xbf16, #tpu.memory_space<vmem>>, vector<1x128x128xbf16>
    %463 = vector.shape_cast %462 : vector<1x128x128xbf16> to vector<128x128xbf16>
    %cst_443 = arith.constant dense<0.000000e+00> : vector<4x128xf32>
    %464 = tpu.matmul %461, %463, %cst_443 {dimension_numbers = #tpu.dot_dimension_numbers<[1], [0], [0], [1], [0, 0, 1, 1], [], []>} : vector<4x128xbf16>, vector<128x128xbf16>, vector<4x128xf32> -> vector<4x128xf32>
    %465 = arith.addf %457, %464 : vector<4x128xf32>
    %c2_444 = arith.constant 2 : index
    %c0_445 = arith.constant 0 : index
    %c0_446 = arith.constant 0 : index
    %466 = vector.load %arg19[%c2_444, %c0_445, %c0_446] : memref<9x4x4xbf16, #tpu.memory_space<vmem>>, vector<1x4x4xbf16>
    %467 = vector.shape_cast %466 : vector<1x4x4xbf16> to vector<4x4xbf16>
    %cst_447 = arith.constant dense<0.000000e+00> : vector<4x128xf32>
    %468 = tpu.matmul %467, %441, %cst_447 {dimension_numbers = #tpu.dot_dimension_numbers<[1], [0], [0], [1], [0, 0, 1, 1], [], []>} : vector<4x4xbf16>, vector<4x128xbf16>, vector<4x128xf32> -> vector<4x128xf32>
    %469 = arith.truncf %468 : vector<4x128xf32> to vector<4x128xbf16>
    %c2_448 = arith.constant 2 : index
    %c0_449 = arith.constant 0 : index
    %c0_450 = arith.constant 0 : index
    %470 = vector.load %arg22[%c2_448, %c0_449, %c0_450] : memref<9x128x128xbf16, #tpu.memory_space<vmem>>, vector<1x128x128xbf16>
    %471 = vector.shape_cast %470 : vector<1x128x128xbf16> to vector<128x128xbf16>
    %cst_451 = arith.constant dense<0.000000e+00> : vector<4x128xf32>
    %472 = tpu.matmul %469, %471, %cst_451 {dimension_numbers = #tpu.dot_dimension_numbers<[1], [0], [0], [1], [0, 0, 1, 1], [], []>} : vector<4x128xbf16>, vector<128x128xbf16>, vector<4x128xf32> -> vector<4x128xf32>
    %473 = arith.addf %465, %472 : vector<4x128xf32>
    %c3_452 = arith.constant 3 : index
    %c0_453 = arith.constant 0 : index
    %c0_454 = arith.constant 0 : index
    %474 = vector.load %arg19[%c3_452, %c0_453, %c0_454] : memref<9x4x4xbf16, #tpu.memory_space<vmem>>, vector<1x4x4xbf16>
    %475 = vector.shape_cast %474 : vector<1x4x4xbf16> to vector<4x4xbf16>
    %cst_455 = arith.constant dense<0.000000e+00> : vector<4x128xf32>
    %476 = tpu.matmul %475, %441, %cst_455 {dimension_numbers = #tpu.dot_dimension_numbers<[1], [0], [0], [1], [0, 0, 1, 1], [], []>} : vector<4x4xbf16>, vector<4x128xbf16>, vector<4x128xf32> -> vector<4x128xf32>
    %477 = arith.truncf %476 : vector<4x128xf32> to vector<4x128xbf16>
    %c3_456 = arith.constant 3 : index
    %c0_457 = arith.constant 0 : index
    %c0_458 = arith.constant 0 : index
    %478 = vector.load %arg22[%c3_456, %c0_457, %c0_458] : memref<9x128x128xbf16, #tpu.memory_space<vmem>>, vector<1x128x128xbf16>
    %479 = vector.shape_cast %478 : vector<1x128x128xbf16> to vector<128x128xbf16>
    %cst_459 = arith.constant dense<0.000000e+00> : vector<4x128xf32>
    %480 = tpu.matmul %477, %479, %cst_459 {dimension_numbers = #tpu.dot_dimension_numbers<[1], [0], [0], [1], [0, 0, 1, 1], [], []>} : vector<4x128xbf16>, vector<128x128xbf16>, vector<4x128xf32> -> vector<4x128xf32>
    %481 = arith.addf %473, %480 : vector<4x128xf32>
    %c4_460 = arith.constant 4 : index
    %c0_461 = arith.constant 0 : index
    %c0_462 = arith.constant 0 : index
    %482 = vector.load %arg19[%c4_460, %c0_461, %c0_462] : memref<9x4x4xbf16, #tpu.memory_space<vmem>>, vector<1x4x4xbf16>
    %483 = vector.shape_cast %482 : vector<1x4x4xbf16> to vector<4x4xbf16>
    %cst_463 = arith.constant dense<0.000000e+00> : vector<4x128xf32>
    %484 = tpu.matmul %483, %441, %cst_463 {dimension_numbers = #tpu.dot_dimension_numbers<[1], [0], [0], [1], [0, 0, 1, 1], [], []>} : vector<4x4xbf16>, vector<4x128xbf16>, vector<4x128xf32> -> vector<4x128xf32>
    %485 = arith.truncf %484 : vector<4x128xf32> to vector<4x128xbf16>
    %c4_464 = arith.constant 4 : index
    %c0_465 = arith.constant 0 : index
    %c0_466 = arith.constant 0 : index
    %486 = vector.load %arg22[%c4_464, %c0_465, %c0_466] : memref<9x128x128xbf16, #tpu.memory_space<vmem>>, vector<1x128x128xbf16>
    %487 = vector.shape_cast %486 : vector<1x128x128xbf16> to vector<128x128xbf16>
    %cst_467 = arith.constant dense<0.000000e+00> : vector<4x128xf32>
    %488 = tpu.matmul %485, %487, %cst_467 {dimension_numbers = #tpu.dot_dimension_numbers<[1], [0], [0], [1], [0, 0, 1, 1], [], []>} : vector<4x128xbf16>, vector<128x128xbf16>, vector<4x128xf32> -> vector<4x128xf32>
    %489 = arith.addf %481, %488 : vector<4x128xf32>
    %c5_468 = arith.constant 5 : index
    %c0_469 = arith.constant 0 : index
    %c0_470 = arith.constant 0 : index
    %490 = vector.load %arg19[%c5_468, %c0_469, %c0_470] : memref<9x4x4xbf16, #tpu.memory_space<vmem>>, vector<1x4x4xbf16>
    %491 = vector.shape_cast %490 : vector<1x4x4xbf16> to vector<4x4xbf16>
    %cst_471 = arith.constant dense<0.000000e+00> : vector<4x128xf32>
    %492 = tpu.matmul %491, %441, %cst_471 {dimension_numbers = #tpu.dot_dimension_numbers<[1], [0], [0], [1], [0, 0, 1, 1], [], []>} : vector<4x4xbf16>, vector<4x128xbf16>, vector<4x128xf32> -> vector<4x128xf32>
    %493 = arith.truncf %492 : vector<4x128xf32> to vector<4x128xbf16>
    %c5_472 = arith.constant 5 : index
    %c0_473 = arith.constant 0 : index
    %c0_474 = arith.constant 0 : index
    %494 = vector.load %arg22[%c5_472, %c0_473, %c0_474] : memref<9x128x128xbf16, #tpu.memory_space<vmem>>, vector<1x128x128xbf16>
    %495 = vector.shape_cast %494 : vector<1x128x128xbf16> to vector<128x128xbf16>
    %cst_475 = arith.constant dense<0.000000e+00> : vector<4x128xf32>
    %496 = tpu.matmul %493, %495, %cst_475 {dimension_numbers = #tpu.dot_dimension_numbers<[1], [0], [0], [1], [0, 0, 1, 1], [], []>} : vector<4x128xbf16>, vector<128x128xbf16>, vector<4x128xf32> -> vector<4x128xf32>
    %497 = arith.addf %489, %496 : vector<4x128xf32>
    %c6_476 = arith.constant 6 : index
    %c0_477 = arith.constant 0 : index
    %c0_478 = arith.constant 0 : index
    %498 = vector.load %arg19[%c6_476, %c0_477, %c0_478] : memref<9x4x4xbf16, #tpu.memory_space<vmem>>, vector<1x4x4xbf16>
    %499 = vector.shape_cast %498 : vector<1x4x4xbf16> to vector<4x4xbf16>
    %cst_479 = arith.constant dense<0.000000e+00> : vector<4x128xf32>
    %500 = tpu.matmul %499, %441, %cst_479 {dimension_numbers = #tpu.dot_dimension_numbers<[1], [0], [0], [1], [0, 0, 1, 1], [], []>} : vector<4x4xbf16>, vector<4x128xbf16>, vector<4x128xf32> -> vector<4x128xf32>
    %501 = arith.truncf %500 : vector<4x128xf32> to vector<4x128xbf16>
    %c6_480 = arith.constant 6 : index
    %c0_481 = arith.constant 0 : index
    %c0_482 = arith.constant 0 : index
    %502 = vector.load %arg22[%c6_480, %c0_481, %c0_482] : memref<9x128x128xbf16, #tpu.memory_space<vmem>>, vector<1x128x128xbf16>
    %503 = vector.shape_cast %502 : vector<1x128x128xbf16> to vector<128x128xbf16>
    %cst_483 = arith.constant dense<0.000000e+00> : vector<4x128xf32>
    %504 = tpu.matmul %501, %503, %cst_483 {dimension_numbers = #tpu.dot_dimension_numbers<[1], [0], [0], [1], [0, 0, 1, 1], [], []>} : vector<4x128xbf16>, vector<128x128xbf16>, vector<4x128xf32> -> vector<4x128xf32>
    %505 = arith.addf %497, %504 : vector<4x128xf32>
    %c7_484 = arith.constant 7 : index
    %c0_485 = arith.constant 0 : index
    %c0_486 = arith.constant 0 : index
    %506 = vector.load %arg19[%c7_484, %c0_485, %c0_486] : memref<9x4x4xbf16, #tpu.memory_space<vmem>>, vector<1x4x4xbf16>
    %507 = vector.shape_cast %506 : vector<1x4x4xbf16> to vector<4x4xbf16>
    %cst_487 = arith.constant dense<0.000000e+00> : vector<4x128xf32>
    %508 = tpu.matmul %507, %441, %cst_487 {dimension_numbers = #tpu.dot_dimension_numbers<[1], [0], [0], [1], [0, 0, 1, 1], [], []>} : vector<4x4xbf16>, vector<4x128xbf16>, vector<4x128xf32> -> vector<4x128xf32>
    %509 = arith.truncf %508 : vector<4x128xf32> to vector<4x128xbf16>
    %c7_488 = arith.constant 7 : index
    %c0_489 = arith.constant 0 : index
    %c0_490 = arith.constant 0 : index
    %510 = vector.load %arg22[%c7_488, %c0_489, %c0_490] : memref<9x128x128xbf16, #tpu.memory_space<vmem>>, vector<1x128x128xbf16>
    %511 = vector.shape_cast %510 : vector<1x128x128xbf16> to vector<128x128xbf16>
    %cst_491 = arith.constant dense<0.000000e+00> : vector<4x128xf32>
    %512 = tpu.matmul %509, %511, %cst_491 {dimension_numbers = #tpu.dot_dimension_numbers<[1], [0], [0], [1], [0, 0, 1, 1], [], []>} : vector<4x128xbf16>, vector<128x128xbf16>, vector<4x128xf32> -> vector<4x128xf32>
    %513 = arith.addf %505, %512 : vector<4x128xf32>
    %c8_492 = arith.constant 8 : index
    %c0_493 = arith.constant 0 : index
    %c0_494 = arith.constant 0 : index
    %514 = vector.load %arg19[%c8_492, %c0_493, %c0_494] : memref<9x4x4xbf16, #tpu.memory_space<vmem>>, vector<1x4x4xbf16>
    %515 = vector.shape_cast %514 : vector<1x4x4xbf16> to vector<4x4xbf16>
    %cst_495 = arith.constant dense<0.000000e+00> : vector<4x128xf32>
    %516 = tpu.matmul %515, %441, %cst_495 {dimension_numbers = #tpu.dot_dimension_numbers<[1], [0], [0], [1], [0, 0, 1, 1], [], []>} : vector<4x4xbf16>, vector<4x128xbf16>, vector<4x128xf32> -> vector<4x128xf32>
    %517 = arith.truncf %516 : vector<4x128xf32> to vector<4x128xbf16>
    %c8_496 = arith.constant 8 : index
    %c0_497 = arith.constant 0 : index
    %c0_498 = arith.constant 0 : index
    %518 = vector.load %arg22[%c8_496, %c0_497, %c0_498] : memref<9x128x128xbf16, #tpu.memory_space<vmem>>, vector<1x128x128xbf16>
    %519 = vector.shape_cast %518 : vector<1x128x128xbf16> to vector<128x128xbf16>
    %cst_499 = arith.constant dense<0.000000e+00> : vector<4x128xf32>
    %520 = tpu.matmul %517, %519, %cst_499 {dimension_numbers = #tpu.dot_dimension_numbers<[1], [0], [0], [1], [0, 0, 1, 1], [], []>} : vector<4x128xbf16>, vector<128x128xbf16>, vector<4x128xf32> -> vector<4x128xf32>
    %521 = arith.addf %513, %520 : vector<4x128xf32>
    %c0_500 = arith.constant 0 : index
    %c0_501 = arith.constant 0 : index
    %522 = vector.load %arg23[%c0_500, %c0_501] : memref<1x128xf32, #tpu.memory_space<vmem>>, vector<1x128xf32>
    %523 = vector.broadcast %522 : vector<1x128xf32> to vector<4x128xf32>
    %524 = arith.addf %521, %523 : vector<4x128xf32>
    %525 = arith.addf %524, %450 : vector<4x128xf32>
    %cst_502 = arith.constant 0.000000e+00 : f32
    %526 = vector.broadcast %cst_502 : f32 to vector<4x128xf32>
    %527 = arith.maximumf %525, %526 : vector<4x128xf32>
    %cst_503 = arith.constant dense<0.000000e+00> : vector<128xf32>
    %528 = vector.multi_reduction <add>, %527, %cst_503 [0] : vector<4x128xf32> to vector<128xf32>
    %529 = vector.shape_cast %528 : vector<128xf32> to vector<1x128xf32>
    %cst_504 = arith.constant 4.000000e+00 : f32
    %530 = vector.broadcast %cst_504 : f32 to vector<1x128xf32>
    %531 = arith.divf %529, %530 : vector<1x128xf32>
    %532 = arith.truncf %531 : vector<1x128xf32> to vector<1x128xbf16>
    %c0_505 = arith.constant 0 : index
    %c0_506 = arith.constant 0 : index
    %533 = vector.load %arg26[%c0_505, %c0_506] : memref<128x64xbf16, #tpu.memory_space<vmem>>, vector<128x64xbf16>
    %cst_507 = arith.constant dense<0.000000e+00> : vector<1x64xf32>
    %534 = tpu.matmul %532, %533, %cst_507 {dimension_numbers = #tpu.dot_dimension_numbers<[1], [0], [0], [1], [0, 0, 1, 1], [], []>} : vector<1x128xbf16>, vector<128x64xbf16>, vector<1x64xf32> -> vector<1x64xf32>
    %c0_508 = arith.constant 0 : index
    %c0_509 = arith.constant 0 : index
    %535 = vector.load %arg27[%c0_508, %c0_509] : memref<1x64xf32, #tpu.memory_space<vmem>>, vector<1x64xf32>
    %536 = arith.addf %534, %535 : vector<1x64xf32>
    %cst_510 = arith.constant 0.000000e+00 : f32
    %537 = vector.broadcast %cst_510 : f32 to vector<1x64xf32>
    %538 = arith.maximumf %536, %537 : vector<1x64xf32>
    %539 = arith.truncf %538 : vector<1x64xf32> to vector<1x64xbf16>
    %c0_511 = arith.constant 0 : index
    %c0_512 = arith.constant 0 : index
    %540 = vector.load %arg28[%c0_511, %c0_512] : memref<64x128xbf16, #tpu.memory_space<vmem>>, vector<64x128xbf16>
    %cst_513 = arith.constant dense<0.000000e+00> : vector<1x128xf32>
    %541 = tpu.matmul %539, %540, %cst_513 {dimension_numbers = #tpu.dot_dimension_numbers<[1], [0], [0], [1], [0, 0, 1, 1], [], []>} : vector<1x64xbf16>, vector<64x128xbf16>, vector<1x128xf32> -> vector<1x128xf32>
    %c0_514 = arith.constant 0 : index
    %c0_515 = arith.constant 0 : index
    %542 = vector.load %arg29[%c0_514, %c0_515] : memref<1x128xf32, #tpu.memory_space<vmem>>, vector<1x128xf32>
    %543 = arith.addf %541, %542 : vector<1x128xf32>
    %c0_516 = arith.constant 0 : index
    %c0_517 = arith.constant 0 : index
    %c0_518 = arith.constant 0 : index
    %544 = vector.load %arg30[%c0_516, %c0_517, %c0_518] : memref<1x1x128xf32, #tpu.memory_space<vmem>>, vector<1x1x128xf32>
    %545 = vector.shape_cast %544 : vector<1x1x128xf32> to vector<1x128xf32>
    %546 = vector.shape_cast %543 : vector<1x128xf32> to vector<1x1x128xf32>
    tpu.vector_store %arg30[%c0_516, %c0_517, %c0_518], %546 {strides = array<i32>} : memref<1x1x128xf32, #tpu.memory_space<vmem>>, vector<1x1x128xf32>,
    return
  }
  func.func @transform_0(%arg0: i32) -> (i32, i32, i32) {
    %c0_i32 = arith.constant 0 : i32
    %c0_i32_0 = arith.constant 0 : i32
    %c0_i32_1 = arith.constant 0 : i32
    return %arg0, %c0_i32, %c0_i32_0 : i32, i32, i32
  }
  func.func @transform_1(%arg0: i32) -> (i32, i32) {
    %c0_i32 = arith.constant 0 : i32
    %c0_i32_0 = arith.constant 0 : i32
    %c0_i32_1 = arith.constant 0 : i32
    return %c0_i32, %c0_i32_0 : i32, i32
  }
  func.func @transform_2(%arg0: i32) -> (i32, i32) {
    %c0_i32 = arith.constant 0 : i32
    %c0_i32_0 = arith.constant 0 : i32
    %c0_i32_1 = arith.constant 0 : i32
    return %c0_i32, %c0_i32_0 : i32, i32
  }
  func.func @transform_3(%arg0: i32) -> (i32, i32, i32) {
    %c0_i32 = arith.constant 0 : i32
    %c0_i32_0 = arith.constant 0 : i32
    %c0_i32_1 = arith.constant 0 : i32
    %c0_i32_2 = arith.constant 0 : i32
    return %c0_i32, %c0_i32_0, %c0_i32_1 : i32, i32, i32
  }
  func.func @transform_4(%arg0: i32) -> (i32, i32, i32) {
    %c0_i32 = arith.constant 0 : i32
    %c0_i32_0 = arith.constant 0 : i32
    %c0_i32_1 = arith.constant 0 : i32
    %c0_i32_2 = arith.constant 0 : i32
    return %c0_i32, %c0_i32_0, %c0_i32_1 : i32, i32, i32
  }
  func.func @transform_5(%arg0: i32) -> (i32, i32, i32) {
    %c0_i32 = arith.constant 0 : i32
    %c0_i32_0 = arith.constant 0 : i32
    %c0_i32_1 = arith.constant 0 : i32
    %c0_i32_2 = arith.constant 0 : i32
    return %c0_i32, %c0_i32_0, %c0_i32_1 : i32, i32, i32
  }
  func.func @transform_6(%arg0: i32) -> (i32, i32) {
    %c0_i32 = arith.constant 0 : i32
    %c0_i32_0 = arith.constant 0 : i32
    %c0_i32_1 = arith.constant 0 : i32
    return %c0_i32, %c0_i32_0 : i32, i32
  }
  func.func @transform_7(%arg0: i32) -> (i32, i32, i32) {
    %c0_i32 = arith.constant 0 : i32
    %c0_i32_0 = arith.constant 0 : i32
    %c0_i32_1 = arith.constant 0 : i32
    %c0_i32_2 = arith.constant 0 : i32
    return %c0_i32, %c0_i32_0, %c0_i32_1 : i32, i32, i32
  }
  func.func @transform_8(%arg0: i32) -> (i32, i32) {
    %c0_i32 = arith.constant 0 : i32
    %c0_i32_0 = arith.constant 0 : i32
    %c0_i32_1 = arith.constant 0 : i32
    return %c0_i32, %c0_i32_0 : i32, i32
  }
  func.func @transform_9(%arg0: i32) -> (i32, i32, i32) {
    %c0_i32 = arith.constant 0 : i32
    %c0_i32_0 = arith.constant 0 : i32
    %c0_i32_1 = arith.constant 0 : i32
    %c0_i32_2 = arith.constant 0 : i32
    return %c0_i32, %c0_i32_0, %c0_i32_1 : i32, i32, i32
  }
  func.func @transform_10(%arg0: i32) -> (i32, i32, i32) {
    %c0_i32 = arith.constant 0 : i32
    %c0_i32_0 = arith.constant 0 : i32
    %c0_i32_1 = arith.constant 0 : i32
    %c0_i32_2 = arith.constant 0 : i32
    return %c0_i32, %c0_i32_0, %c0_i32_1 : i32, i32, i32
  }
  func.func @transform_11(%arg0: i32) -> (i32, i32, i32) {
    %c0_i32 = arith.constant 0 : i32
    %c0_i32_0 = arith.constant 0 : i32
    %c0_i32_1 = arith.constant 0 : i32
    %c0_i32_2 = arith.constant 0 : i32
    return %c0_i32, %c0_i32_0, %c0_i32_1 : i32, i32, i32
  }
  func.func @transform_12(%arg0: i32) -> (i32, i32) {
    %c0_i32 = arith.constant 0 : i32
    %c0_i32_0 = arith.constant 0 : i32
    %c0_i32_1 = arith.constant 0 : i32
    return %c0_i32, %c0_i32_0 : i32, i32
  }
  func.func @transform_13(%arg0: i32) -> (i32, i32, i32) {
    %c0_i32 = arith.constant 0 : i32
    %c0_i32_0 = arith.constant 0 : i32
    %c0_i32_1 = arith.constant 0 : i32
    %c0_i32_2 = arith.constant 0 : i32
    return %c0_i32, %c0_i32_0, %c0_i32_1 : i32, i32, i32
  }
  func.func @transform_14(%arg0: i32) -> (i32, i32) {
    %c0_i32 = arith.constant 0 : i32
    %c0_i32_0 = arith.constant 0 : i32
    %c0_i32_1 = arith.constant 0 : i32
    return %c0_i32, %c0_i32_0 : i32, i32
  }
  func.func @transform_15(%arg0: i32) -> (i32, i32) {
    %c0_i32 = arith.constant 0 : i32
    %c0_i32_0 = arith.constant 0 : i32
    %c0_i32_1 = arith.constant 0 : i32
    return %c0_i32, %c0_i32_0 : i32, i32
  }
  func.func @transform_16(%arg0: i32) -> (i32, i32) {
    %c0_i32 = arith.constant 0 : i32
    %c0_i32_0 = arith.constant 0 : i32
    %c0_i32_1 = arith.constant 0 : i32
    return %c0_i32, %c0_i32_0 : i32, i32
  }
  func.func @transform_17(%arg0: i32) -> (i32, i32, i32) {
    %c0_i32 = arith.constant 0 : i32
    %c0_i32_0 = arith.constant 0 : i32
    %c0_i32_1 = arith.constant 0 : i32
    %c0_i32_2 = arith.constant 0 : i32
    return %c0_i32, %c0_i32_0, %c0_i32_1 : i32, i32, i32
  }
  func.func @transform_18(%arg0: i32) -> (i32, i32, i32) {
    %c0_i32 = arith.constant 0 : i32
    %c0_i32_0 = arith.constant 0 : i32
    %c0_i32_1 = arith.constant 0 : i32
    %c0_i32_2 = arith.constant 0 : i32
    return %c0_i32, %c0_i32_0, %c0_i32_1 : i32, i32, i32
  }
  func.func @transform_19(%arg0: i32) -> (i32, i32, i32) {
    %c0_i32 = arith.constant 0 : i32
    %c0_i32_0 = arith.constant 0 : i32
    %c0_i32_1 = arith.constant 0 : i32
    %c0_i32_2 = arith.constant 0 : i32
    return %c0_i32, %c0_i32_0, %c0_i32_1 : i32, i32, i32
  }
  func.func @transform_20(%arg0: i32) -> (i32, i32) {
    %c0_i32 = arith.constant 0 : i32
    %c0_i32_0 = arith.constant 0 : i32
    %c0_i32_1 = arith.constant 0 : i32
    return %c0_i32, %c0_i32_0 : i32, i32
  }
  func.func @transform_21(%arg0: i32) -> (i32, i32, i32) {
    %c0_i32 = arith.constant 0 : i32
    %c0_i32_0 = arith.constant 0 : i32
    %c0_i32_1 = arith.constant 0 : i32
    %c0_i32_2 = arith.constant 0 : i32
    return %c0_i32, %c0_i32_0, %c0_i32_1 : i32, i32, i32
  }
  func.func @transform_22(%arg0: i32) -> (i32, i32) {
    %c0_i32 = arith.constant 0 : i32
    %c0_i32_0 = arith.constant 0 : i32
    %c0_i32_1 = arith.constant 0 : i32
    return %c0_i32, %c0_i32_0 : i32, i32
  }
  func.func @transform_23(%arg0: i32) -> (i32, i32) {
    %c0_i32 = arith.constant 0 : i32
    %c0_i32_0 = arith.constant 0 : i32
    %c0_i32_1 = arith.constant 0 : i32
    return %c0_i32, %c0_i32_0 : i32, i32
  }
  func.func @transform_24(%arg0: i32) -> (i32, i32) {
    %c0_i32 = arith.constant 0 : i32
    %c0_i32_0 = arith.constant 0 : i32
    %c0_i32_1 = arith.constant 0 : i32
    return %c0_i32, %c0_i32_0 : i32, i32
  }
  func.func @transform_25(%arg0: i32) -> (i32, i32) {
    %c0_i32 = arith.constant 0 : i32
    %c0_i32_0 = arith.constant 0 : i32
    %c0_i32_1 = arith.constant 0 : i32
    return %c0_i32, %c0_i32_0 : i32, i32
  }
  func.func @transform_26(%arg0: i32) -> (i32, i32) {
    %c0_i32 = arith.constant 0 : i32
    %c0_i32_0 = arith.constant 0 : i32
    %c0_i32_1 = arith.constant 0 : i32
    return %c0_i32, %c0_i32_0 : i32, i32
  }
  func.func @transform_27(%arg0: i32) -> (i32, i32) {
    %c0_i32 = arith.constant 0 : i32
    %c0_i32_0 = arith.constant 0 : i32
    %c0_i32_1 = arith.constant 0 : i32
    return %c0_i32, %c0_i32_0 : i32, i32
  }
  func.func @transform_28(%arg0: i32) -> (i32, i32) {
    %c0_i32 = arith.constant 0 : i32
    %c0_i32_0 = arith.constant 0 : i32
    %c0_i32_1 = arith.constant 0 : i32
    return %c0_i32, %c0_i32_0 : i32, i32
  }
  func.func @transform_29(%arg0: i32) -> (i32, i32, i32) {
    %c0_i32 = arith.constant 0 : i32
    %c0_i32_0 = arith.constant 0 : i32
    %c0_i32_1 = arith.constant 0 : i32
    return %arg0, %c0_i32, %c0_i32_0 : i32, i32, i32
  }
}

</mosaic_0001>

<bundles_post_ra>
// kernel: squeeze.1
= control target key start
LH: loop header
LB: loop body
LE: loop exit
PB: predicated region body
PF: predicated region fallthrough
CT: control target
= control target key end

     0   :  { %vm8_vm0 = vcmask 23552   ;;  %s42_s0 = inlined_call_operand.vmem [shape: f32[6], index: 0, kind: input, shape index: {}]   ;;  %s43_s1 = inlined_call_operand.vmem [shape: f32[2,3], index: 1, kind: output, shape index: {}]  }
   0x1   :  { %v5_v0 = vld [vmem:[%s42_s0] sm:$0x1]  ;;  %s25_s0 = smov 125  }
   0x2   :  { %6 = vst [vmem:[#allocation1] sm:$0x1] %v5_v0 }
   0x9   :  { %v10_v1 = vld [vmem:[#allocation1] sm:$0x1]  }
   0xa   :  { %v7_v2 = vld [vmem:[#allocation1] sm:$0x1]   ;;  %11 = vrot.lane.b32.xlu0 %v10_v1, %s25_s0 }
   0xb   :  { %9 = vst.msk [vmem:[#allocation0] sm:$0x1] %vm8_vm0, %v7_v2  }
  0x7c   :  { %v12_v3 = vpop.permute.xlu0 %11  }
  0x7d   :  { %15 = vst.msk [vmem:[#allocation0 + $0x1] sm:$0x1] %vm8_vm0, %v12_v3  }
  0x84   :  { %v20_v4 = vld [vmem:[#allocation0] sm:$0x3] }
  0x85   :  { %23 = vst [vmem:[%s43_s1] sm:$0x3] %v20_v4 }

// kernel: forward_pallas.1
= control target key start
LH: loop header
LB: loop body
LE: loop exit
PB: predicated region body
PF: predicated region fallthrough
CT: control target
= control target key end

     0   :  { %s14873_s6 = smov 1   ;;  %s14874_s10 = smov 2   ;;  %s17086_s0 = inlined_call_operand.smem [shape: u32[30], index: -1, kind: input, shape index: {}] }
   0x1   :  { %s14912_s5 = sld [smem:[%s17086_s0]]   ;;  %s14875_s14 = smov 3  }
   0x2   :  { %s14917_s9 = sld [smem:[%s17086_s0 + %s14873_s6]]   ;;  %s14876_s18 = smov 4  }
   0x3   :  { %s14922_s13 = sld [smem:[%s17086_s0 + %s14874_s10]]   ;;  %s14877_s22 = smov 5  }
   0x4   :  { %s14927_s17 = sld [smem:[%s17086_s0 + %s14875_s14]]   ;;  %s14878_s26 = smov 6  }
   0x5   :  { %s14932_s21 = sld [smem:[%s17086_s0 + %s14876_s18]]   ;;  %s14879_s30 = smov 7  }
   0x6   :  { %s14937_s25 = sld [smem:[%s17086_s0 + %s14877_s22]]   ;;  %s14880_s4 = smov 8  }
   0x7   :  { %s14942_s29 = sld [smem:[%s17086_s0 + %s14878_s26]]   ;;  %s14881_s10 = smov 9  }
   0x8   :  { %s14947_s3 = sld [smem:[%s17086_s0 + %s14879_s30]]   ;;  %s14882_s15 = smov 10  }
   0x9   :  { %s14952_s8 = sld [smem:[%s17086_s0 + %s14880_s4]]   ;;  %s14883_s20 = smov 11  }
   0xa   :  { %s14957_s14 = sld [smem:[%s17086_s0 + %s14881_s10]]   ;;  %s14884_s26 = smov 12  }
   0xb   :  { %s14962_s19 = sld [smem:[%s17086_s0 + %s14882_s15]]   ;;  %s14885_s1 = smov 13  }
   0xc   :  { %s14967_s24 = sld [smem:[%s17086_s0 + %s14883_s20]]   ;;  %s14886_s7 = smov 14  }
   0xd   :  { %s14972_s30 = sld [smem:[%s17086_s0 + %s14884_s26]]   ;;  %s14887_s15 = smov 15  }
   0xe   :  { %s14977_s6 = sld [smem:[%s17086_s0 + %s14885_s1]]   ;;  %s14888_s22 = smov 16  }
   0xf   :  { %s14982_s12 = sld [smem:[%s17086_s0 + %s14886_s7]]   ;;  %s14889_s28 = smov 17  }
  0x10   :  { %s14987_s20 = sld [smem:[%s17086_s0 + %s14887_s15]]   ;;  %s14890_s7 = smov 18  }
  0x11   :  { %s14992_s27 = sld [smem:[%s17086_s0 + %s14888_s22]]   ;;  %s14891_s15 = smov 19  }
  0x12   :  { %s14997_s4 = sld [smem:[%s17086_s0 + %s14889_s28]]   ;;  %s14892_s22 = smov 20  }
  0x13   :  { %s14893_s28 = smov 21  }
  0x14   :  { %17130 = sst [smem:[#allocation2_spill]] %s14977_s6 }
  0x15   :  { %17131 = sst [smem:[#allocation3_spill]] %s14982_s12 }
  0x16   :  { %s15002_s12 = sld [smem:[%s17086_s0 + %s14890_s7]]   ;;  %s14894_s7 = smov 22  }
  0x17   :  { %17132 = sst [smem:[#allocation4_spill]] %s14992_s27 }
  0x18   :  { %17133 = sst [smem:[#allocation5_spill]] %s14997_s4 }
  0x19   :  { %s15007_s6 = sld [smem:[%s17086_s0 + %s14891_s15]]   ;;  %s14895_s15 = smov 23  }
  0x1a   :  { %s15012_s27 = sld [smem:[%s17086_s0 + %s14892_s22]]   ;;  %s14896_s22 = smov 24  }
  0x1b   :  { %s15017_s4 = sld [smem:[%s17086_s0 + %s14893_s28]]   ;;  %s14897_s28 = smov 25  }
  0x1c   :  { %17134 = sst [smem:[#allocation6_spill]] %s15002_s12 }
  0x1d   :  { %s15022_s12 = sld [smem:[%s17086_s0 + %s14894_s7]]   ;;  %s14898_s7 = smov 26  }
  0x1f   :  { %17135 = sst [smem:[#allocation7_spill]] %s15007_s6 }
  0x20   :  { %17136 = sst [smem:[#allocation8_spill]] %s15012_s27 }
  0x21   :  { %17137 = sst [smem:[#allocation9_spill]] %s15017_s4 }
  0x22   :  { %s15027_s6 = sld [smem:[%s17086_s0 + %s14895_s15]]   ;;  %s14899_s15 = smov 27  }
  0x23   :  { %17138 = sst [smem:[#allocation10_spill]] %s15022_s12 }
  0x24   :  { %s15032_s27 = sld [smem:[%s17086_s0 + %s14896_s22]]   ;;  %s14900_s22 = smov 28  }
  0x25   :  { %s15037_s4 = sld [smem:[%s17086_s0 + %s14897_s28]]   ;;  %s14901_s28 = smov 29  }
  0x26   :  { %s15042_s12 = sld [smem:[%s17086_s0 + %s14898_s7]]   ;;  %s15059_s7 = smov 0  }
  0x28   :  { %17139 = sst [smem:[#allocation11_spill]] %s15027_s6 }
  0x29   :  { %s15047_s6 = sld [smem:[%s17086_s0 + %s14899_s15]]  }
  0x2a   :  { %17140 = sst [smem:[#allocation12_spill]] %s15032_s27 }
  0x2b   :  { %17141 = sst [smem:[#allocation13_spill]] %s15037_s4 }
  0x2c   :  { %s15052_s27 = sld [smem:[%s17086_s0 + %s14900_s22]]  }
  0x2d   :  { %s15057_s4 = sld [smem:[%s17086_s0 + %s14901_s28]]  }
  0x2e LB: > { %s11014_s10 = sadd.s32 4294967295, %s14871_s7   ;;  %p11018_p0 = scmp.ge.s32.totalorder %s14871_s7, 1  ;;  %s14871_s7 = sphi %s15059_s7, %s69_s7  }
  0x2f   : > { %p817_p1 = scmp.lt.s32.totalorder %s14871_s7, 7 }
  0x31   : > { %p818_p2 = pnand %p11018_p0, %p817_p1 }
  0x33   : > { %821 = sbr.rel (%p818_p2) target bundleno = 8198 (0x2006), region = 136 }
  0x38   : > { %v14469_v0 = vld [vmem:[%s14917_s9 + $0x8] sm:$0xff]   ;;  %p891_p3 = scmp.lt.s32.totalorder %s11014_s10, 5  ;;  %v14470_v1 = vld [vmem:[%s14917_s9] sm:$0xff]   ;;  %vm1035_vm0 = vcmask 261120   ;;  %vm2414_vm1 = vcmask 523264   ;;  %vm14903_vm2 = vmmov 0  }
  0x39   : > { %13096 = vmatprep.subr.bf16.mxu0 %v14469_v0  ;;  %14426 = vmatprep.subr.bf16.mxu1 %v14469_v0  ;;  %v14489_v18 = vld [vmem:[%s14927_s17 + $0x4] ss:$8 sps:$4 sm:$0xff]   ;;  %v15140_v46 = vld [vmem:[%s14922_s13] ss:$0 sm:$0xff]  ;;  %s17238_s15 = sld [smem:[#allocation2_spill]]  ;;  %vm6982_vm3 = vcmask 130048  }
  0x3a   : > { %s17251_s10 = smov (!%p891_p3, %s11014_s10), 5  ;;  %13097 = vmatpush3.bf16.msra.mxu0 %v14469_v0  ;;  %14428 = vmatpush3.bf16.msra.mxu1 %v14469_v0  ;;  %v14492_v19 = vld [vmem:[%s14927_s17 + $0x84] ss:$8 sps:$4 sm:$0xff]   ;;  %s17239_s16 = sld [smem:[#allocation7_spill]]  ;;  %vm9369_vm4 = vcmask 1041408   ;;  %vm9365_vm5 = vcmask 31744  }
  0x3b   : > { %13098 = vmatprep.subr.bf16.mxu0 %v14470_v1  ;;  %14427 = vmatprep.subr.bf16.mxu1 %v14470_v1  ;;  %s12146_s0 = sshll.u32 %s17251_s10, 7  ;;  %s17240_s18 = sld [smem:[#allocation4_spill]]  ;;  %vm10743_vm6 = vcmask 1043456  }
  0x3c   : > { %s15073_s11 = scalar_lea.vmem %s14912_s5, %s12146_s0  ;;  %s17241_s22 = sld [smem:[#allocation3_spill]] }
  0x3d   : > { %v14471_v2 = vld [vmem:[%s15073_s11] sm:$0xff]   ;;  %v14473_v4 = vld [vmem:[%s15073_s11 + $0x8] sm:$0xff]   ;;  %v14475_v6 = vld [vmem:[%s15073_s11 + $0x10] sm:$0xff]   ;;  %s17242_s23 = sld [smem:[#allocation5_spill]] }
  0x3e   : > { %13099 = vmatpush3.bf16.msra.mxu0 %v14470_v1  ;;  %14429 = vmatpush3.bf16.msra.mxu1 %v14470_v1  ;;  %v14472_v3 = vld [vmem:[%s15073_s11 + $0x40] sm:$0xff]   ;;  %v14474_v5 = vld [vmem:[%s15073_s11 + $0x48] sm:$0xff]   ;;  %v14476_v7 = vld [vmem:[%s15073_s11 + $0x50] sm:$0xff]   ;;  %s17243_s26 = sld [smem:[#allocation11_spill]] }
  0x3f   : > { %13100 = vmatprep.mubr.msk.bf16.mxu0 %vm1035_vm0, %v14471_v2  ;;  %13116 = vmatprep.mubr.msk.bf16.mxu1 %vm1035_vm0, %v14472_v3  ;;  %v14477_v8 = vld [vmem:[%s15073_s11 + $0x18] sm:$0xff]   ;;  %v14479_v10 = vld [vmem:[%s15073_s11 + $0x20] sm:$0xff]   ;;  %v14481_v12 = vld [vmem:[%s15073_s11 + $0x28] sm:$0xff]   ;;  %s17244_s28 = sld [smem:[#allocation8_spill]] }
  0x40   : > { %v14478_v9 = vld [vmem:[%s15073_s11 + $0x58] sm:$0xff]   ;;  %v14480_v11 = vld [vmem:[%s15073_s11 + $0x60] sm:$0xff]   ;;  %v14482_v13 = vld [vmem:[%s15073_s11 + $0x68] sm:$0xff]   ;;  %s17245_s1 = sld [smem:[#allocation6_spill]] }
  0x41   : > { %13101 = vmatmul.mubr.msk.bf16.vlgmr.msra.gmra.mxu0 %vm1035_vm0, %v14473_v4  ;;  %13117 = vmatmul.mubr.msk.bf16.vlgmr.msra.gmra.mxu1 %vm1035_vm0, %v14474_v5  ;;  %v14483_v14 = vld [vmem:[%s15073_s11 + $0x30] sm:$0xff]   ;;  %v14485_v16 = vld [vmem:[%s15073_s11 + $0x38] sm:$0xff]   ;;  %s17246_s2 = sld [smem:[#allocation9_spill]] }
  0x42   : > { %13104 = vmatprep.mubr.msk.bf16.mxu0 %vm1035_vm0, %v14475_v6  ;;  %13120 = vmatprep.mubr.msk.bf16.mxu1 %vm1035_vm0, %v14476_v7  ;;  %v14484_v15 = vld [vmem:[%s15073_s11 + $0x70] sm:$0xff]   ;;  %v14486_v17 = vld [vmem:[%s15073_s11 + $0x78] sm:$0xff]   ;;  %s17247_s0 = sld [smem:[#allocation13_spill]] }
  0x43   : > { %s17248_s11 = sld [smem:[#allocation12_spill]] }
  0x49   : > { %13105 = vmatmul.mubr.msk.bf16.gmra.mxu0 %vm1035_vm0, %v14477_v8  ;;  %13121 = vmatmul.mubr.msk.bf16.gmra.mxu1 %vm1035_vm0, %v14478_v9 }
  0x4a   : > { %13108 = vmatprep.mubr.msk.bf16.mxu0 %vm1035_vm0, %v14479_v10  ;;  %13124 = vmatprep.mubr.msk.bf16.mxu1 %vm1035_vm0, %v14480_v11 }
  0x51   : > { %13109 = vmatmul.mubr.msk.bf16.gmra.mxu0 %vm1035_vm0, %v14481_v12  ;;  %13125 = vmatmul.mubr.msk.bf16.gmra.mxu1 %vm1035_vm0, %v14482_v13 }
  0x52   : > { %13112 = vmatprep.mubr.msk.bf16.mxu0 %vm1035_vm0, %v14483_v14  ;;  %13128 = vmatprep.mubr.msk.bf16.mxu1 %vm1035_vm0, %v14484_v15 }
  0x59   : > { %13113 = vmatmul.mubr.msk.bf16.gmra.mxu0 %vm1035_vm0, %v14485_v16  ;;  %13129 = vmatmul.mubr.msk.bf16.gmra.mxu1 %vm1035_vm0, %v14486_v17 }
  0x5a   : > { %1373 = vmatprep.mubr.bf16.mxu1 %v14489_v18  ;;  %1609 = vmatprep.mubr.bf16.mxu0 %v14492_v19 }
 0x101   : > { %v15109_v20 = vpop.f32.mrf.mxu0  ;;  %v15111_v21 = vpop.f32.mrf.mxu1 }
 0x103   : > { %v15113_v22 = vpop.f32.mrf.mxu0  ;;  %v15115_v23 = vpop.f32.mrf.mxu1 }
 0x105   : > { %v15117_v24 = vpop.f32.mrf.mxu0  ;;  %v15119_v25 = vpop.f32.mrf.mxu1 }
 0x107   : > { %v15121_v26 = vpop.f32.mrf.mxu0  ;;  %v15123_v27 = vpop.f32.mrf.mxu1 }
 0x109   : > { %v15125_v28 = vpop.f32.mrf.mxu0  ;;  %v15127_v29 = vpop.f32.mrf.mxu1 }
 0x10b   : > { %v15129_v30 = vpop.f32.mrf.mxu0  ;;  %v15131_v31 = vpop.f32.mrf.mxu1 }
 0x10d   : > { %v15133_v32 = vpop.f32.mrf.mxu0  ;;  %v13123_v33 = vpop.f32.mrf.mxu1 }
 0x10e   : > { %v1210_v12 = vadd.f32 %v13123_v33, %v15140_v46 }
 0x10f   : > { %v15135_v34 = vpop.f32.mrf.mxu0  ;;  %v15137_v35 = vpop.f32.mrf.mxu1 }
 0x111   : > { %v13110_v36 = vpop.f32.mrf.mxu0  ;;  %v13126_v37 = vpop.f32.mrf.mxu1 }
 0x112   : > { %v1223_v58 = vadd.f32 %v13126_v37, %v15140_v46  ;;  %v1159_v13 = vadd.f32 %v13110_v36, %v15140_v46  ;;  %v1268_v36 = vmax.f32 %v1210_v12, 0.0  ;;  %v14495_v12 = vld [vmem:[%s14927_s17 + $0x10] ss:$8 sps:$4 sm:$0xff]  }
 0x113   : > { %v1150_v38 = vpop.f32.mrf.mxu0  ;;  %v1214_v39 = vpop.f32.mrf.mxu1 }
 0x114   : > { %v1271_v14 = vmax.f32 %v1223_v58, 0.0  ;;  %v1215_v16 = vadd.f32 %v15140_v46, %v1214_v39  ;;  %v1207_v39 = vadd.f32 %v15127_v29, %v15140_v46 }
 0x115   : > { %v13111_v40 = vpop.f32.mrf.mxu0  ;;  %v13127_v41 = vpop.f32.mrf.mxu1 }
 0x116   : > { %v1226_v52 = vadd.f32 %v13127_v41, %v15140_v46  ;;  %v1162_v63 = vadd.f32 %v13111_v40, %v15140_v46  ;;  %v1255_v40 = vmax.f32 %v1159_v13, 0.0  ;;  %v1151_v41 = vadd.f32 %v15140_v46, %v1150_v38  ;;  %v14498_v13 = vld [vmem:[%s14927_s17 + $0x90] ss:$8 sps:$4 sm:$0xff]  }
 0x117   : > { %v1153_v42 = vpop.f32.mrf.mxu0  ;;  %v1217_v43 = vpop.f32.mrf.mxu1  ;;  %v1202_v38 = vadd.f32 %v15140_v46, %v15137_v35  ;;  %v1138_v35 = vadd.f32 %v15140_v46, %v15135_v34 }
 0x118   : > { %v1272_v3 = vmax.f32 %v1226_v52, 0.0  ;;  %v1218_v4 = vadd.f32 %v15140_v46, %v1217_v43  ;;  %v1256_v17 = vmax.f32 %v1162_v63, 0.0  ;;  %v1154_v18 = vadd.f32 %v15140_v46, %v1153_v42 }
 0x119   : > { %v13114_v44 = vpop.f32.mrf.mxu0  ;;  %v13130_v45 = vpop.f32.mrf.mxu1  ;;  %v1269_v42 = vmax.f32 %v1215_v16, 0.0  ;;  %v1253_v29 = vmax.f32 %v1151_v41, 0.0  ;;  %v14501_v16 = vld [vmem:[%s14927_s17 + $0x20] ss:$8 sps:$4 sm:$0xff]   ;;  %v14513_v41 = vld [vmem:[%s14927_s17 + $0x44] ss:$8 sps:$4 sm:$0xff]  }
 0x11a   : > { %v1175_v48 = vadd.f32 %v13114_v44, %v15140_v46  ;;  %v1239_v50 = vadd.f32 %v13130_v45, %v15140_v46  ;;  %v1270_v19 = vmax.f32 %v1218_v4, 0.0  ;;  %v15172_v33 = vpack.c.bf16 %v1272_v3, %v1271_v14  ;;  %v14499_v14 = vld [vmem:[%s14927_s17 + $0x24] ss:$8 sps:$4 sm:$0xff]  }
 0x11b   : > { %v1166_v47 = vpop.f32.mrf.mxu0  ;;  %v1230_v49 = vpop.f32.mrf.mxu1  ;;  %v1254_v43 = vmax.f32 %v1154_v18, 0.0  ;;  %v1146_v44 = vadd.f32 %v15133_v32, %v15140_v46  ;;  %v15183_v45 = vpack.c.bf16 %v1256_v17, %v1255_v40  ;;  %v14504_v17 = vld [vmem:[%s14927_s17 + $0xa0] ss:$8 sps:$4 sm:$0xff]   ;;  %v14505_v18 = vld [vmem:[%s14927_s17 + $0x34] ss:$8 sps:$4 sm:$0xff]  }
 0x11c   : > { %v1231_v55 = vadd.f32 %v15140_v46, %v1230_v49  ;;  %v1259_v59 = vmax.f32 %v1175_v48, 0.0  ;;  %v1275_v0 = vmax.f32 %v1239_v50, 0.0  ;;  %v1167_v5 = vadd.f32 %v15140_v46, %v1166_v47  ;;  %v14510_v40 = vld [vmem:[%s14927_s17 + $0xb0] ss:$8 sps:$4 sm:$0xff]  }
 0x11d   : > { %v13115_v51 = vpop.f32.mrf.mxu0  ;;  %v13131_v54 = vpop.f32.mrf.mxu1  ;;  %v15187_v47 = vpack.c.bf16 %v1270_v19, %v1269_v42  ;;  %v1143_v48 = vadd.f32 %v15125_v28, %v15140_v46  ;;  %v1267_v49 = vmax.f32 %v1207_v39, 0.0  ;;  %v1199_v50 = vadd.f32 %v15140_v46, %v15131_v31  ;;  %v14508_v19 = vld [vmem:[%s14927_s17 + $0xb4] ss:$8 sps:$4 sm:$0xff]   ;;  %v14516_v39 = vld [vmem:[%s14927_s17 + $0x104] ss:$8 sps:$4 sm:$0xff]  }
 0x11e   : > { %v1178_v53 = vadd.f32 %v13115_v51, %v15140_v46  ;;  %v1242_v56 = vadd.f32 %v13131_v54, %v15140_v46  ;;  %v1273_v7 = vmax.f32 %v1231_v55, 0.0  ;;  %v1257_v15 = vmax.f32 %v1167_v5, 0.0  ;;  %v14511_v42 = vld [vmem:[%s14927_s17 + $0x40] ss:$8 sps:$4 sm:$0xff]  }
 0x11f   : > { %v1169_v57 = vpop.f32.mrf.mxu0  ;;  %v1233_v62 = vpop.f32.mrf.mxu1  ;;  %v1252_v32 = vmax.f32 %v1146_v44, 0.0  ;;  %v15199_v51 = vpack.c.bf16 %v1254_v43, %v1253_v29  ;;  %v1194_v28 = vadd.f32 %v15119_v25, %v15140_v46  ;;  %v15203_v52 = vpack.c.bf16 %v1268_v36, %v1267_v49  ;;  %v14507_v36 = vld [vmem:[%s14927_s17 + $0x30] ss:$8 sps:$4 sm:$0xff]   ;;  %v14514_v43 = vld [vmem:[%s14927_s17 + $0x100] ss:$8 sps:$4 sm:$0xff]  }
 0x120   : > { %v1260_v60 = vmax.f32 %v1178_v53, 0.0  ;;  %v1170_v61 = vadd.f32 %v15140_v46, %v1169_v57  ;;  %v1276_v1 = vmax.f32 %v1242_v56, 0.0  ;;  %v1234_v2 = vadd.f32 %v15140_v46, %v1233_v62  ;;  %v14517_v44 = vld [vmem:[%s14927_s17 + $0x54] ss:$8 sps:$4 sm:$0xff]   ;;  %v14522_v29 = vld [vmem:[%s14927_s17 + $0x110] ss:$8 sps:$4 sm:$0xff]  }
 0x121   : > { %v1266_v53 = vmax.f32 %v1202_v38, 0.0  ;;  %v1251_v54 = vmax.f32 %v1143_v48, 0.0  ;;  %v1135_v31 = vadd.f32 %v15140_v46, %v15129_v30  ;;  %v1191_v55 = vadd.f32 %v15111_v21, %v15140_v46  ;;  %v14520_v38 = vld [vmem:[%s14927_s17 + $0x114] ss:$8 sps:$4 sm:$0xff]   ;;  %v14519_v48 = vld [vmem:[%s14927_s17 + $0x50] ss:$8 sps:$4 sm:$0xff]  }
 0x122   : > { %v15154_v6 = vpack.c.bf16 %v1260_v60, %v1259_v59  ;;  %v15156_v8 = vpack.c.bf16 %v1276_v1, %v1275_v0  ;;  %v1258_v9 = vmax.f32 %v1170_v61, 0.0  ;;  %v1274_v10 = vmax.f32 %v1234_v2, 0.0  ;;  %v14523_v49 = vld [vmem:[%s14927_s17 + $0x64] ss:$8 sps:$4 sm:$0xff]  }
 0x123   : > { %v1265_v34 = vmax.f32 %v1199_v50, 0.0  ;;  %v1130_v25 = vadd.f32 %v15117_v24, %v15140_v46  ;;  %v15215_v56 = vpack.c.bf16 %v1252_v32, %v1251_v54  ;;  %v1250_v57 = vmax.f32 %v1138_v35, 0.0  ;;  %v14526_v50 = vld [vmem:[%s14927_s17 + $0x124] ss:$8 sps:$4 sm:$0xff]   ;;  %v14525_v32 = vld [vmem:[%s14927_s17 + $0x60] ss:$8 sps:$4 sm:$0xff]  }
 0x124   : > { %v15158_v11 = vpack.c.bf16 %v1274_v10, %v1273_v7  ;;  %12165 = vmatprep.subr.bf16.mxu1 %v15156_v8  ;;  %12245 = vmatprep.subr.bf16.mxu0 %v15156_v8  ;;  %v15170_v37 = vpack.c.bf16 %v1258_v9, %v1257_v15  ;;  %v1264_v58 = vmax.f32 %v1194_v28, 0.0  ;;  %v1186_v30 = vadd.f32 %v15140_v46, %v15123_v27  ;;  %v14490_v7 = vld [vmem:[%s14927_s17 + $0x80] ss:$8 sps:$4 sm:$0xff]   ;;  %v14493_v9 = vld [vmem:[%s14927_s17 + $0x14] ss:$8 sps:$4 sm:$0xff]  }
 0x125   : > { %12166 = vmatpush3.bf16.msra.mxu1 %v15154_v6  ;;  %12246 = vmatpush3.bf16.msra.mxu0 %v15154_v6  ;;  %v15219_v59 = vpack.c.bf16 %v1266_v53, %v1265_v34  ;;  %v1127_v21 = vadd.f32 %v15109_v20, %v15140_v46  ;;  %v1249_v60 = vmax.f32 %v1135_v31, 0.0  ;;  %v1263_v61 = vmax.f32 %v1191_v55, 0.0  ;;  %v14496_v10 = vld [vmem:[%s14927_s17 + $0x94] ss:$8 sps:$4 sm:$0xff]   ;;  %v14502_v15 = vld [vmem:[%s14927_s17 + $0xa4] ss:$8 sps:$4 sm:$0xff]  }
 0x126   : > { %12167 = vmatprep.subr.bf16.mxu1 %v15158_v11  ;;  %12247 = vmatprep.subr.bf16.mxu0 %v15158_v11  ;;  %v1183_v24 = vadd.f32 %v15140_v46, %v15115_v23  ;;  %v1248_v62 = vmax.f32 %v1130_v25, 0.0  ;;  %v1122_v27 = vadd.f32 %v15140_v46, %v15121_v26  ;;  %v1262_v0 = vmax.f32 %v1186_v30, 0.0  ;;  %v14528_v35 = vld [vmem:[%s14927_s17 + $0x120] ss:$8 sps:$4 sm:$0xff]   ;;  %v14529_v28 = vld [vmem:[%s14927_s17 + $0x74] ss:$8 sps:$4 sm:$0xff]  }
 0x127   : > { %v15231_v63 = vpack.c.bf16 %v1250_v57, %v1249_v60  ;;  %v15233_v20 = vpack.c.bf16 %v1264_v58, %v1263_v61  ;;  %v1247_v1 = vmax.f32 %v1127_v21, 0.0  ;;  %v1119_v2 = vadd.f32 %v15140_v46, %v15113_v22  ;;  %v14487_v46 = vld [vmem:[%s14927_s17] ss:$8 sps:$4 sm:$0xff]   ;;  %v14532_v53 = vld [vmem:[%s14927_s17 + $0x134] ss:$8 sps:$4 sm:$0xff]  }
 0x128   : > { %v1261_v23 = vmax.f32 %v1183_v24, 0.0  ;;  %v1246_v3 = vmax.f32 %v1122_v27, 0.0  ;;  %v14531_v54 = vld [vmem:[%s14927_s17 + $0x70] ss:$8 sps:$4 sm:$0xff]   ;;  %v14537_v55 = vld [vmem:[%s14927_s17 + $0xc4] ss:$8 sps:$4 sm:$0xff]  }
 0x129   : > { %12168 = vmatpush3.bf16.msra.mxu1 %v15170_v37  ;;  %12248 = vmatpush3.bf16.msra.mxu0 %v15170_v37  ;;  %v15241_v26 = vpack.c.bf16 %v1248_v62, %v1247_v1  ;;  %v1245_v5 = vmax.f32 %v1119_v2, 0.0  ;;  %v14534_v31 = vld [vmem:[%s14927_s17 + $0x130] ss:$8 sps:$4 sm:$0xff]   ;;  %v14540_v34 = vld [vmem:[%s14927_s17 + $0x184] ss:$8 sps:$4 sm:$0xff]  }
 0x12a   : > { %12169 = vmatprep.subr.bf16.mxu1 %v15172_v33  ;;  %12249 = vmatprep.subr.bf16.mxu0 %v15172_v33  ;;  %v15243_v4 = vpack.c.bf16 %v1262_v0, %v1261_v23  ;;  %v14535_v25 = vld [vmem:[%s14927_s17 + $0xc0] ss:$8 sps:$4 sm:$0xff]   ;;  %v14541_v58 = vld [vmem:[%s14927_s17 + $0xd4] ss:$8 sps:$4 sm:$0xff]   ;;  %v14543_v21 = vld [vmem:[%s14927_s17 + $0xd0] ss:$8 sps:$4 sm:$0xff]  }
 0x12b   : > { %v15249_v22 = vpack.c.bf16 %v1246_v3, %v1245_v5  ;;  %v14538_v57 = vld [vmem:[%s14927_s17 + $0x180] ss:$8 sps:$4 sm:$0xff]   ;;  %v14553_v30 = vld [vmem:[%s14927_s17 + $0x194] ss:$8 sps:$4 sm:$0xff]   ;;  %v14555_v60 = vld [vmem:[%s14927_s17 + $0x190] ss:$8 sps:$4 sm:$0xff]  }
 0x12c   : > { %v14544_v61 = vld [vmem:[%s14927_s17 + $0xe4] ss:$8 sps:$4 sm:$0xff]   ;;  %v14546_v62 = vld [vmem:[%s14927_s17 + $0xe0] ss:$8 sps:$4 sm:$0xff]   ;;  %v14547_v0 = vld [vmem:[%s14927_s17 + $0xf4] ss:$8 sps:$4 sm:$0xff]  }
 0x12d   : > { %12170 = vmatpush3.bf16.msra.mxu1 %v15183_v45  ;;  %12250 = vmatpush3.bf16.msra.mxu0 %v15183_v45  ;;  %v14559_v24 = vld [vmem:[%s14927_s17 + $0x1a4] ss:$8 sps:$4 sm:$0xff]   ;;  %v14561_v27 = vld [vmem:[%s14927_s17 + $0x1a0] ss:$8 sps:$4 sm:$0xff]   ;;  %v14565_v1 = vld [vmem:[%s14927_s17 + $0x1b4] ss:$8 sps:$4 sm:$0xff]  }
 0x12e   : > { %12171 = vmatprep.subr.bf16.mxu1 %v15187_v47  ;;  %12251 = vmatprep.subr.bf16.mxu0 %v15187_v47  ;;  %v14549_v2 = vld [vmem:[%s14927_s17 + $0xf0] ss:$8 sps:$4 sm:$0xff]   ;;  %v14552_v3 = vld [vmem:[%s14927_s17 + $0x144] ss:$8 sps:$4 sm:$0xff]  }
 0x12f   : > { %v14567_v23 = vld [vmem:[%s14927_s17 + $0x1b0] ss:$8 sps:$4 sm:$0xff]   ;;  %v14573_v5 = vld [vmem:[%s14927_s17 + $0x204] ss:$8 sps:$4 sm:$0xff]  }
 0x131   : > { %12172 = vmatpush3.bf16.msra.mxu1 %v15199_v51  ;;  %12252 = vmatpush3.bf16.msra.mxu0 %v15199_v51 }
 0x132   : > { %12173 = vmatprep.subr.bf16.mxu1 %v15203_v52  ;;  %12253 = vmatprep.subr.bf16.mxu0 %v15203_v52 }
 0x135   : > { %12174 = vmatpush3.bf16.msra.mxu1 %v15215_v56  ;;  %12254 = vmatpush3.bf16.msra.mxu0 %v15215_v56 }
 0x136   : > { %12175 = vmatprep.subr.bf16.mxu1 %v15219_v59  ;;  %12255 = vmatprep.subr.bf16.mxu0 %v15219_v59 }
 0x139   : > { %12176 = vmatpush3.bf16.msra.mxu1 %v15231_v63  ;;  %12256 = vmatpush3.bf16.msra.mxu0 %v15231_v63 }
 0x13a   : > { %12177 = vmatprep.subr.bf16.mxu1 %v15233_v20  ;;  %12257 = vmatprep.subr.bf16.mxu0 %v15233_v20 }
 0x13d   : > { %12178 = vmatpush3.bf16.msra.mxu1 %v15241_v26  ;;  %12258 = vmatpush3.bf16.msra.mxu0 %v15241_v26 }
 0x13e   : > { %12179 = vmatprep.subr.bf16.mxu1 %v15243_v4  ;;  %12259 = vmatprep.subr.bf16.mxu0 %v15243_v4 }
 0x141   : > { %12180 = vmatpush3.bf16.msra.mxu1 %v15249_v22  ;;  %12260 = vmatpush3.bf16.msra.mxu0 %v15249_v22 }
 0x142   : > { %12205 = vmatprep.subr.bf16.mxu1 %v15156_v8  ;;  %12325 = vmatprep.subr.bf16.mxu0 %v15156_v8 }
 0x144   : > { %1374 = vmatmul.mubr.bf16.vlgmr.msra.gmra.mxu1 %v14487_v46  ;;  %1610 = vmatmul.mubr.bf16.vlgmr.msra.gmra.mxu0 %v14490_v7  ;;  %v14550_v46 = vld [vmem:[%s14927_s17 + $0x140] ss:$8 sps:$4 sm:$0xff]  }
 0x145   : > { %12206 = vmatpush3.bf16.msra.mxu1 %v15154_v6  ;;  %12326 = vmatpush3.bf16.msra.mxu0 %v15154_v6  ;;  %v14571_v7 = vld [vmem:[%s14927_s17 + $0x200] ss:$8 sps:$4 sm:$0xff]  }
 0x146   : > { %12207 = vmatprep.subr.bf16.mxu1 %v15158_v11  ;;  %12327 = vmatprep.subr.bf16.mxu0 %v15158_v11 }
 0x147   : > { %1381 = vmatprep.mubr.bf16.mxu1 %v14493_v9  ;;  %1617 = vmatprep.mubr.bf16.mxu0 %v14496_v10  ;;  %v14556_v9 = vld [vmem:[%s14927_s17 + $0x154] ss:$8 sps:$4 sm:$0xff]  }
 0x148   : > { %v14577_v10 = vld [vmem:[%s14927_s17 + $0x214] ss:$8 sps:$4 sm:$0xff]  }
 0x149   : > { %12208 = vmatpush3.bf16.msra.mxu1 %v15170_v37  ;;  %12328 = vmatpush3.bf16.msra.mxu0 %v15170_v37 }
 0x14a   : > { %12209 = vmatprep.subr.bf16.mxu1 %v15172_v33  ;;  %12329 = vmatprep.subr.bf16.mxu0 %v15172_v33 }
 0x14c   : > { %1382 = vmatmul.mubr.bf16.gmra.mxu1 %v14495_v12  ;;  %1618 = vmatmul.mubr.bf16.gmra.mxu0 %v14498_v13  ;;  %v14558_v12 = vld [vmem:[%s14927_s17 + $0x150] ss:$8 sps:$4 sm:$0xff]  }
 0x14d   : > { %12210 = vmatpush3.bf16.msra.mxu1 %v15183_v45  ;;  %12330 = vmatpush3.bf16.msra.mxu0 %v15183_v45  ;;  %v14579_v13 = vld [vmem:[%s14927_s17 + $0x210] ss:$8 sps:$4 sm:$0xff]  }
 0x14e   : > { %12211 = vmatprep.subr.bf16.mxu1 %v15187_v47  ;;  %12331 = vmatprep.subr.bf16.mxu0 %v15187_v47 }
 0x14f   : > { %1389 = vmatprep.mubr.bf16.mxu1 %v14499_v14  ;;  %1625 = vmatprep.mubr.bf16.mxu0 %v14502_v15  ;;  %v14562_v14 = vld [vmem:[%s14927_s17 + $0x164] ss:$8 sps:$4 sm:$0xff]   ;;  %v14592_v15 = vld [vmem:[%s14927_s17 + $0x1f4] ss:$8 sps:$4 sm:$0xff]  }
 0x151   : > { %12212 = vmatpush3.bf16.msra.mxu1 %v15199_v51  ;;  %12332 = vmatpush3.bf16.msra.mxu0 %v15199_v51 }
 0x152   : > { %12213 = vmatprep.subr.bf16.mxu1 %v15203_v52  ;;  %12333 = vmatprep.subr.bf16.mxu0 %v15203_v52 }
 0x154   : > { %1390 = vmatmul.mubr.bf16.gmra.mxu1 %v14501_v16  ;;  %1626 = vmatmul.mubr.bf16.gmra.mxu0 %v14504_v17  ;;  %v14594_v16 = vld [vmem:[%s14927_s17 + $0x1f0] ss:$8 sps:$4 sm:$0xff]  }
 0x155   : > { %12214 = vmatpush3.bf16.msra.mxu1 %v15215_v56  ;;  %12334 = vmatpush3.bf16.msra.mxu0 %v15215_v56 }
 0x156   : > { %12215 = vmatprep.subr.bf16.mxu1 %v15219_v59  ;;  %12335 = vmatprep.subr.bf16.mxu0 %v15219_v59 }
 0x157   : > { %1397 = vmatprep.mubr.bf16.mxu1 %v14505_v18  ;;  %1633 = vmatprep.mubr.bf16.mxu0 %v14508_v19 }
 0x159   : > { %12216 = vmatpush3.bf16.msra.mxu1 %v15231_v63  ;;  %12336 = vmatpush3.bf16.msra.mxu0 %v15231_v63 }
 0x15a   : > { %12217 = vmatprep.subr.bf16.mxu1 %v15233_v20  ;;  %12337 = vmatprep.subr.bf16.mxu0 %v15233_v20 }
 0x15c   : > { %1398 = vmatmul.mubr.bf16.gmra.mxu1 %v14507_v36  ;;  %1634 = vmatmul.mubr.bf16.gmra.mxu0 %v14510_v40 }
 0x15d   : > { %12218 = vmatpush3.bf16.msra.mxu1 %v15241_v26  ;;  %12338 = vmatpush3.bf16.msra.mxu0 %v15241_v26 }
 0x15e   : > { %12219 = vmatprep.subr.bf16.mxu1 %v15243_v4  ;;  %12339 = vmatprep.subr.bf16.mxu0 %v15243_v4 }
 0x15f   : > { %1487 = vmatprep.mubr.bf16.mxu1 %v14513_v41  ;;  %1853 = vmatprep.mubr.bf16.mxu0 %v14516_v39 }
 0x161   : > { %12220 = vmatpush3.bf16.msra.mxu1 %v15249_v22  ;;  %12340 = vmatpush3.bf16.msra.mxu0 %v15249_v22 }
 0x162   : > { %12285 = vmatprep.subr.bf16.mxu1 %v15156_v8  ;;  %12405 = vmatprep.subr.bf16.mxu0 %v15156_v8 }
 0x164   : > { %1488 = vmatmul.mubr.bf16.vlgmr.msra.gmra.mxu1 %v14511_v42  ;;  %1854 = vmatmul.mubr.bf16.vlgmr.msra.gmra.mxu0 %v14514_v43 }
 0x165   : > { %12286 = vmatpush3.bf16.msra.mxu1 %v15154_v6  ;;  %12406 = vmatpush3.bf16.msra.mxu0 %v15154_v6 }
 0x166   : > { %12287 = vmatprep.subr.bf16.mxu1 %v15158_v11  ;;  %12407 = vmatprep.subr.bf16.mxu0 %v15158_v11 }
 0x167   : > { %1495 = vmatprep.mubr.bf16.mxu1 %v14517_v44  ;;  %1861 = vmatprep.mubr.bf16.mxu0 %v14520_v38 }
 0x169   : > { %12288 = vmatpush3.bf16.msra.mxu1 %v15170_v37  ;;  %12408 = vmatpush3.bf16.msra.mxu0 %v15170_v37 }
 0x16a   : > { %12289 = vmatprep.subr.bf16.mxu1 %v15172_v33  ;;  %12409 = vmatprep.subr.bf16.mxu0 %v15172_v33 }
 0x16c   : > { %1496 = vmatmul.mubr.bf16.gmra.mxu1 %v14519_v48  ;;  %1862 = vmatmul.mubr.bf16.gmra.mxu0 %v14522_v29 }
 0x16d   : > { %12290 = vmatpush3.bf16.msra.mxu1 %v15183_v45  ;;  %12410 = vmatpush3.bf16.msra.mxu0 %v15183_v45 }
 0x16e   : > { %12291 = vmatprep.subr.bf16.mxu1 %v15187_v47  ;;  %12411 = vmatprep.subr.bf16.mxu0 %v15187_v47 }
 0x16f   : > { %1503 = vmatprep.mubr.bf16.mxu1 %v14523_v49  ;;  %1869 = vmatprep.mubr.bf16.mxu0 %v14526_v50 }
 0x171   : > { %12292 = vmatpush3.bf16.msra.mxu1 %v15199_v51  ;;  %12412 = vmatpush3.bf16.msra.mxu0 %v15199_v51 }
 0x172   : > { %12293 = vmatprep.subr.bf16.mxu1 %v15203_v52  ;;  %12413 = vmatprep.subr.bf16.mxu0 %v15203_v52 }
 0x174   : > { %1504 = vmatmul.mubr.bf16.gmra.mxu1 %v14525_v32  ;;  %1870 = vmatmul.mubr.bf16.gmra.mxu0 %v14528_v35 }
 0x175   : > { %12294 = vmatpush3.bf16.msra.mxu1 %v15215_v56  ;;  %12414 = vmatpush3.bf16.msra.mxu0 %v15215_v56 }
 0x176   : > { %12295 = vmatprep.subr.bf16.mxu1 %v15219_v59  ;;  %12415 = vmatprep.subr.bf16.mxu0 %v15219_v59 }
 0x177   : > { %1511 = vmatprep.mubr.bf16.mxu1 %v14529_v28  ;;  %1877 = vmatprep.mubr.bf16.mxu0 %v14532_v53 }
 0x179   : > { %12296 = vmatpush3.bf16.msra.mxu1 %v15231_v63  ;;  %12416 = vmatpush3.bf16.msra.mxu0 %v15231_v63 }
 0x17a   : > { %12297 = vmatprep.subr.bf16.mxu1 %v15233_v20  ;;  %12417 = vmatprep.subr.bf16.mxu0 %v15233_v20 }
 0x17c   : > { %1512 = vmatmul.mubr.bf16.gmra.mxu1 %v14531_v54  ;;  %1878 = vmatmul.mubr.bf16.gmra.mxu0 %v14534_v31 }
 0x17d   : > { %12298 = vmatpush3.bf16.msra.mxu1 %v15241_v26  ;;  %12418 = vmatpush3.bf16.msra.mxu0 %v15241_v26 }
 0x17e   : > { %12299 = vmatprep.subr.bf16.mxu1 %v15243_v4  ;;  %12419 = vmatprep.subr.bf16.mxu0 %v15243_v4 }
 0x17f   : > { %1731 = vmatprep.mubr.bf16.mxu1 %v14537_v55  ;;  %2097 = vmatprep.mubr.bf16.mxu0 %v14540_v34 }
 0x181   : > { %12300 = vmatpush3.bf16.msra.mxu1 %v15249_v22  ;;  %12420 = vmatpush3.bf16.msra.mxu0 %v15249_v22 }
 0x182   : > { %12365 = vmatprep.subr.bf16.mxu1 %v15156_v8  ;;  %12485 = vmatprep.subr.bf16.mxu0 %v15156_v8 }
 0x184   : > { %1732 = vmatmul.mubr.bf16.vlgmr.msra.gmra.mxu1 %v14535_v25  ;;  %2098 = vmatmul.mubr.bf16.vlgmr.msra.gmra.mxu0 %v14538_v57 }
 0x185   : > { %12366 = vmatpush3.bf16.msra.mxu1 %v15154_v6  ;;  %12486 = vmatpush3.bf16.msra.mxu0 %v15154_v6 }
 0x186   : > { %12367 = vmatprep.subr.bf16.mxu1 %v15158_v11  ;;  %12487 = vmatprep.subr.bf16.mxu0 %v15158_v11 }
 0x187   : > { %1739 = vmatprep.mubr.bf16.mxu1 %v14541_v58  ;;  %2105 = vmatprep.mubr.bf16.mxu0 %v14553_v30 }
 0x189   : > { %12368 = vmatpush3.bf16.msra.mxu1 %v15170_v37  ;;  %12488 = vmatpush3.bf16.msra.mxu0 %v15170_v37 }
 0x18a   : > { %12369 = vmatprep.subr.bf16.mxu1 %v15172_v33  ;;  %12489 = vmatprep.subr.bf16.mxu0 %v15172_v33 }
 0x18c   : > { %1740 = vmatmul.mubr.bf16.gmra.mxu1 %v14543_v21  ;;  %2106 = vmatmul.mubr.bf16.gmra.mxu0 %v14555_v60 }
 0x18d   : > { %12370 = vmatpush3.bf16.msra.mxu1 %v15183_v45  ;;  %12490 = vmatpush3.bf16.msra.mxu0 %v15183_v45 }
 0x18e   : > { %12371 = vmatprep.subr.bf16.mxu1 %v15187_v47  ;;  %12491 = vmatprep.subr.bf16.mxu0 %v15187_v47 }
 0x18f   : > { %1747 = vmatprep.mubr.bf16.mxu1 %v14544_v61  ;;  %2113 = vmatprep.mubr.bf16.mxu0 %v14559_v24 }
 0x191   : > { %12372 = vmatpush3.bf16.msra.mxu1 %v15199_v51  ;;  %12492 = vmatpush3.bf16.msra.mxu0 %v15199_v51 }
 0x192   : > { %12373 = vmatprep.subr.bf16.mxu1 %v15203_v52  ;;  %12493 = vmatprep.subr.bf16.mxu0 %v15203_v52 }
 0x194   : > { %1748 = vmatmul.mubr.bf16.gmra.mxu1 %v14546_v62  ;;  %2114 = vmatmul.mubr.bf16.gmra.mxu0 %v14561_v27 }
 0x195   : > { %12374 = vmatpush3.bf16.msra.mxu1 %v15215_v56  ;;  %12494 = vmatpush3.bf16.msra.mxu0 %v15215_v56 }
 0x196   : > { %12375 = vmatprep.subr.bf16.mxu1 %v15219_v59  ;;  %12495 = vmatprep.subr.bf16.mxu0 %v15219_v59 }
 0x197   : > { %1755 = vmatprep.mubr.bf16.mxu1 %v14547_v0  ;;  %2121 = vmatprep.mubr.bf16.mxu0 %v14565_v1 }
 0x199   : > { %12376 = vmatpush3.bf16.msra.mxu1 %v15231_v63  ;;  %12496 = vmatpush3.bf16.msra.mxu0 %v15231_v63 }
 0x19a   : > { %12377 = vmatprep.subr.bf16.mxu1 %v15233_v20  ;;  %12497 = vmatprep.subr.bf16.mxu0 %v15233_v20 }
 0x19c   : > { %1756 = vmatmul.mubr.bf16.gmra.mxu1 %v14549_v2  ;;  %2122 = vmatmul.mubr.bf16.gmra.mxu0 %v14567_v23 }
 0x19d   : > { %12378 = vmatpush3.bf16.msra.mxu1 %v15241_v26  ;;  %12498 = vmatpush3.bf16.msra.mxu0 %v15241_v26 }
 0x19e   : > { %12379 = vmatprep.subr.bf16.mxu1 %v15243_v4  ;;  %12499 = vmatprep.subr.bf16.mxu0 %v15243_v4 }
 0x19f   : > { %1975 = vmatprep.mubr.bf16.mxu1 %v14552_v3  ;;  %2341 = vmatprep.mubr.bf16.mxu0 %v14573_v5  ;;  %v14595_v3 = vld [vmem:[%s14937_s25 + $0x18] sm:$0xff]  }
 0x1a1   : > { %12380 = vmatpush3.bf16.msra.mxu1 %v15249_v22  ;;  %12500 = vmatpush3.bf16.msra.mxu0 %v15249_v22 }
 0x1a2   : > { %12445 = vmatprep.subr.bf16.mxu1 %v15156_v8  ;;  %v14583_v8 = vld [vmem:[%s14927_s17 + $0x224] ss:$8 sps:$4 sm:$0xff]  }
 0x1a4   : > { %1976 = vmatmul.mubr.bf16.vlgmr.msra.gmra.mxu1 %v14550_v46  ;;  %2342 = vmatmul.mubr.bf16.vlgmr.msra.gmra.mxu0 %v14571_v7 }
 0x1a5   : > { %12446 = vmatpush3.bf16.msra.mxu1 %v15154_v6  ;;  %1983 = vmatprep.mubr.bf16.mxu1 %v14556_v9  ;;  %v14564_v6 = vld [vmem:[%s14927_s17 + $0x160] ss:$8 sps:$4 sm:$0xff]  }
 0x1a6   : > { %12447 = vmatprep.subr.bf16.mxu1 %v15158_v11  ;;  %2349 = vmatprep.mubr.bf16.mxu0 %v14577_v10  ;;  %v14585_v11 = vld [vmem:[%s14927_s17 + $0x220] ss:$8 sps:$4 sm:$0xff]  }
 0x1a9   : > { %12448 = vmatpush3.bf16.msra.mxu1 %v15170_v37  ;;  %v14568_v37 = vld [vmem:[%s14927_s17 + $0x174] ss:$8 sps:$4 sm:$0xff]  }
 0x1aa   : > { %12449 = vmatprep.subr.bf16.mxu1 %v15172_v33  ;;  %v14589_v33 = vld [vmem:[%s14927_s17 + $0x234] ss:$8 sps:$4 sm:$0xff]  }
 0x1ac   : > { %1984 = vmatmul.mubr.bf16.gmra.mxu1 %v14558_v12  ;;  %2350 = vmatmul.mubr.bf16.gmra.mxu0 %v14579_v13  ;;  %v14596_v13 = vld [vmem:[%s14937_s25 + $0x10] sm:$0xff]  }
 0x1ad   : > { %12450 = vmatpush3.bf16.msra.mxu1 %v15183_v45  ;;  %1991 = vmatprep.mubr.bf16.mxu1 %v14562_v14  ;;  %v14570_v45 = vld [vmem:[%s14927_s17 + $0x170] ss:$8 sps:$4 sm:$0xff]  }
 0x1ae   : > { %12451 = vmatprep.subr.bf16.mxu1 %v15187_v47  ;;  %2357 = vmatprep.mubr.bf16.mxu0 %v14583_v8  ;;  %v14591_v47 = vld [vmem:[%s14927_s17 + $0x230] ss:$8 sps:$4 sm:$0xff]  }
 0x1b1   : > { %12452 = vmatpush3.bf16.msra.mxu1 %v15199_v51  ;;  %v14576_v51 = vld [vmem:[%s14927_s17 + $0x1c4] ss:$8 sps:$4 sm:$0xff]  }
 0x1b2   : > { %12453 = vmatprep.subr.bf16.mxu1 %v15203_v52  ;;  %v14574_v52 = vld [vmem:[%s14927_s17 + $0x1c0] ss:$8 sps:$4 sm:$0xff]  }
 0x1b4   : > { %1992 = vmatmul.mubr.bf16.gmra.mxu1 %v14564_v6  ;;  %2358 = vmatmul.mubr.bf16.gmra.mxu0 %v14585_v11 }
 0x1b5   : > { %12454 = vmatpush3.bf16.msra.mxu1 %v15215_v56  ;;  %1999 = vmatprep.mubr.bf16.mxu1 %v14568_v37  ;;  %v14580_v56 = vld [vmem:[%s14927_s17 + $0x1d4] ss:$8 sps:$4 sm:$0xff]  }
 0x1b6   : > { %12455 = vmatprep.subr.bf16.mxu1 %v15219_v59  ;;  %2365 = vmatprep.mubr.bf16.mxu0 %v14589_v33  ;;  %v14582_v59 = vld [vmem:[%s14927_s17 + $0x1d0] ss:$8 sps:$4 sm:$0xff]  }
 0x1b9   : > { %12456 = vmatpush3.bf16.msra.mxu1 %v15231_v63  ;;  %v14586_v63 = vld [vmem:[%s14927_s17 + $0x1e4] ss:$8 sps:$4 sm:$0xff]  }
 0x1ba   : > { %12457 = vmatprep.subr.bf16.mxu1 %v15233_v20  ;;  %v14588_v20 = vld [vmem:[%s14927_s17 + $0x1e0] ss:$8 sps:$4 sm:$0xff]  }
 0x1bc   : > { %2000 = vmatmul.mubr.bf16.gmra.mxu1 %v14570_v45  ;;  %2366 = vmatmul.mubr.bf16.gmra.mxu0 %v14591_v47 }
 0x1bd   : > { %12458 = vmatpush3.bf16.msra.mxu1 %v15241_v26  ;;  %2219 = vmatprep.mubr.bf16.mxu1 %v14576_v51 }
 0x1be   : > { %12459 = vmatprep.subr.bf16.mxu1 %v15243_v4 }
 0x1c1   : > { %12460 = vmatpush3.bf16.msra.mxu1 %v15249_v22 }
 0x1c2   : > { %13164 = vmatprep.subr.bf16.mxu1 %v14595_v3 }
 0x1c4   : > { %2220 = vmatmul.mubr.bf16.vlgmr.msra.gmra.mxu1 %v14574_v52 }
 0x1c5   : > { %2227 = vmatprep.mubr.bf16.mxu1 %v14580_v56  ;;  %13165 = vmatpush3.bf16.msra.mxu1 %v14595_v3 }
 0x1c6   : > { %13166 = vmatprep.subr.bf16.mxu1 %v14596_v13 }
 0x1c9   : > { %13167 = vmatpush3.bf16.msra.mxu1 %v14596_v13 }
 0x1cc   : > { %2228 = vmatmul.mubr.bf16.gmra.mxu1 %v14582_v59 }
 0x1cd   : > { %2235 = vmatprep.mubr.bf16.mxu1 %v14586_v63 }
 0x1d4   : > { %2236 = vmatmul.mubr.bf16.gmra.mxu1 %v14588_v20 }
 0x1d5   : > { %2243 = vmatprep.mubr.bf16.mxu1 %v14592_v15 }
 0x1dc   : > { %2244 = vmatmul.mubr.bf16.gmra.mxu1 %v14594_v16 }
 0x204   : > { %v12181_v26 = vpop.f32.mrf.mxu1  ;;  %v12261_v17 = vpop.f32.mrf.mxu0 }
 0x206   : > { %v12182_v18 = vpop.f32.mrf.mxu1  ;;  %v12262_v4 = vpop.f32.mrf.mxu0 }
 0x207   : > { %v12183_v19 = vadd.f32 %v12182_v18, %v12181_v26  ;;  %v12263_v36 = vadd.f32 %v12262_v4, %v12261_v17 }
 0x208   : > { %v12184_v22 = vpop.f32.mrf.mxu1  ;;  %v12264_v40 = vpop.f32.mrf.mxu0 }
 0x20a   : > { %v12185_v41 = vpop.f32.mrf.mxu1  ;;  %v12265_v39 = vpop.f32.mrf.mxu0 }
 0x20b   : > { %v12186_v33 = vadd.f32 %v12185_v41, %v12184_v22  ;;  %v12266_v56 = vadd.f32 %v12265_v39, %v12264_v40 }
 0x20c   : > { %v12187_v42 = vpop.f32.mrf.mxu1  ;;  %v12267_v43 = vpop.f32.mrf.mxu0 }
 0x20e   : > { %v12188_v44 = vpop.f32.mrf.mxu1  ;;  %v12268_v38 = vpop.f32.mrf.mxu0 }
 0x20f   : > { %v15435_v48 = vadd.f32 %v12188_v44, %v12187_v42  ;;  %v12269_v29 = vadd.f32 %v12268_v38, %v12267_v43 }
 0x210   : > { %v12190_v49 = vpop.f32.mrf.mxu1  ;;  %v12270_v50 = vpop.f32.mrf.mxu0 }
 0x212   : > { %v12191_v32 = vpop.f32.mrf.mxu1  ;;  %v12271_v35 = vpop.f32.mrf.mxu0 }
 0x213   : > { %v12192_v22 = vadd.f32 %v12191_v32, %v12190_v49  ;;  %v12272_v43 = vadd.f32 %v12271_v35, %v12270_v50 }
 0x214   : > { %v12193_v28 = vpop.f32.mrf.mxu1  ;;  %v12273_v53 = vpop.f32.mrf.mxu0 }
 0x216   : > { %v12194_v54 = vpop.f32.mrf.mxu1  ;;  %v12274_v31 = vpop.f32.mrf.mxu0 }
 0x217   : > { %v15437_v55 = vadd.f32 %v12194_v54, %v12193_v28  ;;  %v15439_v34 = vadd.f32 %v12274_v31, %v12273_v53 }
 0x218   : > { %v15441_v25 = vpop.f32.mrf.mxu1  ;;  %v15443_v57 = vpop.f32.mrf.mxu0 }
 0x21a   : > { %v15445_v58 = vpop.f32.mrf.mxu1  ;;  %v15447_v30 = vpop.f32.mrf.mxu0 }
 0x21b   : > { %v12198_v50 = vadd.f32 %v15445_v58, %v15441_v25 }
 0x21c   : > { %v12199_v21 = vpop.f32.mrf.mxu1  ;;  %v12279_v60 = vpop.f32.mrf.mxu0 }
 0x21e   : > { %v12200_v61 = vpop.f32.mrf.mxu1  ;;  %v12280_v24 = vpop.f32.mrf.mxu0 }
 0x21f   : > { %v15449_v62 = vadd.f32 %v12200_v61, %v12199_v21  ;;  %v15451_v27 = vadd.f32 %v12280_v24, %v12279_v60  ;;  %v15489_v60 = vld [vmem:[%s14932_s21] sm:$0xff]  }
 0x220   : > { %v15453_v0 = vpop.f32.mrf.mxu1  ;;  %v15455_v1 = vpop.f32.mrf.mxu0  ;;  %17142 = vst [vmem:[#allocation14_spill] sm:$0xff] %v15489_v60  ;;  %13140 = vmatprep.mubr.msk.bf16.mxu0 %vm2414_vm1, %v15489_v60 }
 0x222   : > { %v15457_v2 = vpop.f32.mrf.mxu1  ;;  %v15459_v23 = vpop.f32.mrf.mxu0 }
 0x224   : > { %v12221_v5 = vpop.f32.mrf.mxu1  ;;  %v12341_v46 = vpop.f32.mrf.mxu0 }
 0x226   : > { %v12222_v7 = vpop.f32.mrf.mxu1  ;;  %v12342_v9 = vpop.f32.mrf.mxu0 }
 0x227   : > { %v12223_v10 = vadd.f32 %v12222_v7, %v12221_v5  ;;  %v15462_v12 = vadd.f32 %v12342_v9, %v12341_v46 }
 0x228   : > { %v12224_v14 = vpop.f32.mrf.mxu1  ;;  %v15465_v8 = vpop.f32.mrf.mxu0 }
 0x229   : > { %v1520_v6 = vmax.f32 %v12183_v19, %v12223_v10 }
 0x22a   : > { %v12225_v11 = vpop.f32.mrf.mxu1  ;;  %v15467_v37 = vpop.f32.mrf.mxu0 }
 0x22b   : > { %v12226_v45 = vadd.f32 %v12225_v11, %v12224_v14  ;;  %v15469_v47 = vmax.f32 %v1520_v6, %v12263_v36  ;;  %v12204_v6 = vadd.f32 %v15457_v2, %v15453_v0 }
 0x22c   : > { %v12227_v51 = vpop.f32.mrf.mxu1  ;;  %v12347_v52 = vpop.f32.mrf.mxu0 }
 0x22d   : > { %v1521_v59 = vmax.f32 %v12186_v33, %v12226_v45  ;;  %v12284_v45 = vadd.f32 %v15459_v23, %v15455_v1  ;;  %v12346_v1 = vadd.f32 %v15467_v37, %v15465_v8 }
 0x22e   : > { %v12228_v63 = vpop.f32.mrf.mxu1  ;;  %v12348_v20 = vpop.f32.mrf.mxu0 }
 0x22f   : > { %v12229_v15 = vadd.f32 %v12228_v63, %v12227_v51  ;;  %v15471_v16 = vmax.f32 %v1521_v59, %v12266_v56  ;;  %v15473_v26 = vadd.f32 %v12348_v20, %v12347_v52 }
 0x230   : > { %v12230_v17 = vpop.f32.mrf.mxu1  ;;  %v15475_v18 = vpop.f32.mrf.mxu0 }
 0x231   : > { %v1522_v4 = vmax.f32 %v15435_v48, %v12229_v15 }
 0x232   : > { %v12231_v19 = vpop.f32.mrf.mxu1  ;;  %v15478_v36 = vpop.f32.mrf.mxu0 }
 0x233   : > { %v12232_v41 = vadd.f32 %v12231_v19, %v12230_v17  ;;  %v15480_v40 = vmax.f32 %v1522_v4, %v12269_v29 }
 0x234   : > { %v12233_v39 = vpop.f32.mrf.mxu1  ;;  %v12353_v42 = vpop.f32.mrf.mxu0 }
 0x235   : > { %v1523_v44 = vmax.f32 %v12192_v22, %v12232_v41 }
 0x236   : > { %v12234_v38 = vpop.f32.mrf.mxu1  ;;  %v12354_v28 = vpop.f32.mrf.mxu0 }
 0x237   : > { %v12235_v53 = vadd.f32 %v12234_v38, %v12233_v39  ;;  %v15482_v54 = vmax.f32 %v1523_v44, %v12272_v43  ;;  %v15484_v31 = vadd.f32 %v12354_v28, %v12353_v42 }
 0x238   : > { %v12236_v48 = vpop.f32.mrf.mxu1  ;;  %v15486_v21 = vpop.f32.mrf.mxu0 }
 0x239   : > { %v1524_v49 = vmax.f32 %v15437_v55, %v12235_v53  ;;  %v12278_v55 = vadd.f32 %v15447_v30, %v15443_v57 }
 0x23a   : > { %v12237_v29 = vpop.f32.mrf.mxu1  ;;  %v15492_v32 = vpop.f32.mrf.mxu0 }
 0x23b   : > { %v12238_v35 = vadd.f32 %v12237_v29, %v12236_v48  ;;  %v15499_v61 = vmax.f32 %v1524_v49, %v15439_v34 }
 0x23c   : > { %v12239_v24 = vpop.f32.mrf.mxu1  ;;  %v15501_v3 = vpop.f32.mrf.mxu0 }
 0x23d   : > { %v1525_v5 = vmax.f32 %v12198_v50, %v12238_v35 }
 0x23e   : > { %v12240_v46 = vpop.f32.mrf.mxu1  ;;  %v15505_v7 = vpop.f32.mrf.mxu0 }
 0x23f   : > { %v12241_v9 = vadd.f32 %v12240_v46, %v12239_v24  ;;  %v1647_v10 = vmax.f32 %v1525_v5, %v12278_v55 }
 0x240   : > { %v12242_v13 = vpop.f32.mrf.mxu1  ;;  %v15507_v14 = vpop.f32.mrf.mxu0 }
 0x241   : > { %v1526_v25 = vmax.f32 %v15449_v62, %v12241_v9 }
 0x242   : > { %v12243_v58 = vpop.f32.mrf.mxu1  ;;  %v15510_v34 = vpop.f32.mrf.mxu0 }
 0x243   : > { %v12244_v11 = vadd.f32 %v12243_v58, %v12242_v13  ;;  %v15515_v57 = vmax.f32 %v1526_v25, %v15451_v27 }
 0x244   : > { %v12301_v30 = vpop.f32.mrf.mxu1  ;;  %v12421_v33 = vpop.f32.mrf.mxu0 }
 0x245   : > { %v1527_v51 = vmax.f32 %v12204_v6, %v12244_v11 }
 0x246   : > { %v12302_v52 = vpop.f32.mrf.mxu1  ;;  %v12422_v56 = vpop.f32.mrf.mxu0 }
 0x247   : > { %v12303_v59 = vadd.f32 %v12302_v52, %v12301_v30  ;;  %v15519_v62 = vmax.f32 %v1527_v51, %v12284_v45  ;;  %v12423_v63 = vadd.f32 %v12422_v56, %v12421_v33 }
 0x248   : > { %v12304_v20 = vpop.f32.mrf.mxu1  ;;  %v12424_v15 = vpop.f32.mrf.mxu0 }
 0x249   : > { %v1764_v0 = vmax.f32 %v15469_v47, %v12303_v59 }
 0x24a   : > { %v12305_v2 = vpop.f32.mrf.mxu1  ;;  %v12425_v17 = vpop.f32.mrf.mxu0 }
 0x24b   : > { %v12306_v27 = vadd.f32 %v12305_v2, %v12304_v20  ;;  %v1886_v4 = vmax.f32 %v1764_v0, %v15462_v12 }
 0x24c   : > { %v12307_v19 = vpop.f32.mrf.mxu1  ;;  %v15523_v22 = vpop.f32.mrf.mxu0 }
 0x24d   : > { %v1765_v23 = vmax.f32 %v15471_v16, %v12306_v27  ;;  %v12352_v16 = vadd.f32 %v15478_v36, %v15475_v18  ;;  %v12426_v27 = vadd.f32 %v12425_v17, %v12424_v15 }
 0x24e   : > { %v12308_v41 = vpop.f32.mrf.mxu1  ;;  %v15528_v39 = vpop.f32.mrf.mxu0 }
 0x24f   : > { %v12309_v42 = vadd.f32 %v12308_v41, %v12307_v19  ;;  %v1887_v43 = vmax.f32 %v1765_v23, %v12346_v1 }
 0x250   : > { %v12310_v44 = vpop.f32.mrf.mxu1  ;;  %v15530_v47 = vpop.f32.mrf.mxu0 }
 0x251   : > { %v1766_v38 = vmax.f32 %v15480_v40, %v12309_v42 }
 0x252   : > { %v12311_v28 = vpop.f32.mrf.mxu1  ;;  %v15533_v12 = vpop.f32.mrf.mxu0 }
 0x253   : > { %v12312_v53 = vadd.f32 %v12311_v28, %v12310_v44  ;;  %v15536_v48 = vmax.f32 %v1766_v38, %v15473_v26 }
 0x254   : > { %v12313_v8 = vpop.f32.mrf.mxu1  ;;  %v15538_v37 = vpop.f32.mrf.mxu0 }
 0x255   : > { %v1767_v49 = vmax.f32 %v15482_v54, %v12312_v53  ;;  %v12358_v54 = vadd.f32 %v15492_v32, %v15486_v21 }
 0x256   : > { %v12314_v29 = vpop.f32.mrf.mxu1  ;;  %v15543_v50 = vpop.f32.mrf.mxu0 }
 0x257   : > { %v12315_v35 = vadd.f32 %v12314_v29, %v12313_v8  ;;  %v15545_v40 = vmax.f32 %v1767_v49, %v12352_v16 }
 0x258   : > { %v12316_v24 = vpop.f32.mrf.mxu1  ;;  %v15547_v55 = vpop.f32.mrf.mxu0 }
 0x259   : > { %v1768_v26 = vmax.f32 %v15499_v61, %v12315_v35 }
 0x25a   : > { %v12317_v5 = vpop.f32.mrf.mxu1  ;;  %v15550_v46 = vpop.f32.mrf.mxu0 }
 0x25b   : > { %v12318_v9 = vadd.f32 %v12317_v5, %v12316_v24  ;;  %v15553_v13 = vmax.f32 %v1768_v26, %v15484_v31 }
 0x25c   : > { %v12319_v18 = vpop.f32.mrf.mxu1  ;;  %v15555_v36 = vpop.f32.mrf.mxu0 }
 0x25d   : > { %v1769_v25 = vmax.f32 %v1647_v10, %v12318_v9 }
 0x25e   : > { %v12320_v58 = vpop.f32.mrf.mxu1  ;;  %v15559_v6 = vpop.f32.mrf.mxu0 }
 0x25f   : > { %v15561_v11 = vmax.f32 %v1769_v25, %v12358_v54 }
 0x260   : > { %v12322_v61 = vpop.f32.mrf.mxu1  ;;  %v15563_v30 = vpop.f32.mrf.mxu0 }
 0x262   : > { %v12323_v33 = vpop.f32.mrf.mxu1  ;;  %v15565_v45 = vpop.f32.mrf.mxu0 }
 0x264   : > { %v12381_v31 = vpop.f32.mrf.mxu1  ;;  %v15567_v52 = vpop.f32.mrf.mxu0 }
 0x265   : > { %17143 = vst [vmem:[#allocation15_spill] sm:$0xff] %v15567_v52 }
 0x266   : > { %v12382_v51 = vpop.f32.mrf.mxu1  ;;  %v15569_v32 = vpop.f32.mrf.mxu0 }
 0x267   : > { %v12383_v56 = vadd.f32 %v12382_v51, %v12381_v31  ;;  %17144 = vst [vmem:[#allocation16_spill] sm:$0xff] %v15569_v32 }
 0x268   : > { %v12384_v59 = vpop.f32.mrf.mxu1  ;;  %v15573_v23 = vpop.f32.mrf.mxu0 }
 0x269   : > { %v2008_v20 = vmax.f32 %v1886_v4, %v12383_v56  ;;  %17146 = vst [vmem:[#allocation18_spill] sm:$0xff] %v15573_v23 }
 0x26a   : > { %v12385_v21 = vpop.f32.mrf.mxu1  ;;  %v15577_v38 = vpop.f32.mrf.mxu0 }
 0x26b   : > { %v12386_v10 = vadd.f32 %v12385_v21, %v12384_v59  ;;  %v15571_v0 = vmax.f32 %v2008_v20, %v12423_v63  ;;  %17148 = vst [vmem:[#allocation20_spill] sm:$0xff] %v15577_v38 }
 0x26c   : > { %v12387_v2 = vpop.f32.mrf.mxu1  ;;  %v15579_v53 = vpop.f32.mrf.mxu0 }
 0x26d   : > { %17145 = vst [vmem:[#allocation17_spill] sm:$0xff] %v15571_v0  ;;  %v2009_v19 = vmax.f32 %v1887_v43, %v12386_v10  ;;  %17149 = vst [vmem:[#allocation21_spill] sm:$0xff] %v15579_v53  ;;  %v12321_v10 = vadd.f32 %v12320_v58, %v12319_v18  ;;  %v12361_v0 = vadd.f32 %v15505_v7, %v15501_v3 }
 0x26e   : > { %v12388_v1 = vpop.f32.mrf.mxu1  ;;  %v15581_v63 = vpop.f32.mrf.mxu0  ;;  %v12364_v53 = vadd.f32 %v15510_v34, %v15507_v14  ;;  %v12438_v14 = vadd.f32 %v15550_v46, %v15547_v55  ;;  %v12441_v34 = vadd.f32 %v15559_v6, %v15555_v36  ;;  %v12432_v55 = vadd.f32 %v15533_v12, %v15530_v47 }
 0x26f   : > { %v15575_v41 = vmax.f32 %v2009_v19, %v12426_v27  ;;  %17150 = vst [vmem:[#allocation22_spill] sm:$0xff] %v15581_v63  ;;  %v12324_v27 = vadd.f32 %v12323_v33, %v12322_v61  ;;  %v1770_v52 = vmax.f32 %v15515_v57, %v12321_v10  ;;  %v12389_v10 = vadd.f32 %v12388_v1, %v12387_v2 }
 0x270   : > { %v12390_v42 = vpop.f32.mrf.mxu1  ;;  %v15583_v17 = vpop.f32.mrf.mxu0  ;;  %v12444_v2 = vadd.f32 %v15565_v45, %v15563_v30 }
 0x271   : > { %17147 = vst [vmem:[#allocation19_spill] sm:$0xff] %v15575_v41  ;;  %17151 = vst [vmem:[#allocation23_spill] sm:$0xff] %v15583_v17  ;;  %v1771_v38 = vmax.f32 %v15519_v62, %v12324_v27  ;;  %v1892_v61 = vmax.f32 %v1770_v52, %v12361_v0 }
 0x272   : > { %v12391_v44 = vpop.f32.mrf.mxu1  ;;  %v15585_v35 = vpop.f32.mrf.mxu0 }
 0x273   : > { %17152 = vst [vmem:[#allocation24_spill] sm:$0xff] %v15585_v35  ;;  %v12392_v33 = vadd.f32 %v12391_v44, %v12390_v42  ;;  %v1893_v35 = vmax.f32 %v1771_v38, %v12364_v53  ;;  %v2010_v44 = vmax.f32 %v15536_v48, %v12389_v10  ;;  %v17172_v10 = vld [vmem:[#allocation16_spill] sm:$0xff] }
 0x274   : > { %v12393_v28 = vpop.f32.mrf.mxu1  ;;  %v15591_v5 = vpop.f32.mrf.mxu0 }
 0x275   : > { %v2011_v0 = vmax.f32 %v15545_v40, %v12392_v33 }
 0x276   : > { %v12394_v4 = vpop.f32.mrf.mxu1  ;;  %v15597_v25 = vpop.f32.mrf.mxu0 }
 0x277   : > { %v2133_v30 = vmax.f32 %v2011_v0, %v12432_v55  ;;  %v15696_v0 = vld [vmem:[%s14932_s21 + $0x20] sm:$0xff]  }
 0x278   : > { %v12396_v8 = vpop.f32.mrf.mxu1  ;;  %v12516_v56 = vpop.f32.mrf.mxu0 }
 0x27a   : > { %v12397_v16 = vpop.f32.mrf.mxu1  ;;  %v12517_v21 = vpop.f32.mrf.mxu0 }
 0x27b   : > { %v12398_v41 = vadd.f32 %v12397_v16, %v12396_v8 }
 0x27c   : > { %v12399_v49 = vpop.f32.mrf.mxu1  ;;  %v12519_v32 = vpop.f32.mrf.mxu0 }
 0x27d   : > { %v2013_v57 = vmax.f32 %v15561_v11, %v12398_v41  ;;  %v12435_v11 = vadd.f32 %v15543_v50, %v15538_v37  ;;  %v12429_v50 = vadd.f32 %v15528_v39, %v15523_v22  ;;  %v17158_v39 = vld [vmem:[#allocation23_spill] sm:$0xff] }
 0x27e   : > { %v12400_v15 = vpop.f32.mrf.mxu1  ;;  %v12520_v58 = vpop.f32.mrf.mxu0 }
 0x27f   : > { %v12401_v63 = vadd.f32 %v12400_v15, %v12399_v49  ;;  %v2135_v41 = vmax.f32 %v2013_v57, %v12438_v14  ;;  %v12521_v45 = vadd.f32 %v12520_v58, %v12519_v32  ;;  %v2132_v12 = vmax.f32 %v2010_v44, %v12429_v50  ;;  %v17159_v32 = vld [vmem:[#allocation24_spill] sm:$0xff]  ;;  %v17168_v58 = vld [vmem:[#allocation18_spill] sm:$0xff] }
 0x280   : > { %v12402_v43 = vpop.f32.mrf.mxu1  ;;  %v12522_v7 = vpop.f32.mrf.mxu0  ;;  %v12515_v49 = vadd.f32 %v15597_v25, %v15591_v5  ;;  %v17163_v5 = vld [vmem:[#allocation21_spill] sm:$0xff] }
 0x281   : > { %v2014_v62 = vmax.f32 %v1892_v61, %v12401_v63  ;;  %v17169_v61 = vld [vmem:[#allocation20_spill] sm:$0xff] }
 0x282   : > { %v12403_v29 = vpop.f32.mrf.mxu1  ;;  %v12523_v36 = vpop.f32.mrf.mxu0  ;;  %v12506_v33 = vadd.f32 %v17169_v61, %v17168_v58  ;;  %v15827_v58 = vld [vmem:[%s14932_s21 + $0xa8] sm:$0xff]   ;;  %v15831_v61 = vld [vmem:[%s14932_s21 + $0xb0] sm:$0xff]  }
 0x283   : > { %v2136_v42 = vmax.f32 %v2014_v62, %v12441_v34  ;;  %v12524_v48 = vadd.f32 %v12523_v36, %v12522_v7  ;;  %v17171_v62 = vld [vmem:[#allocation15_spill] sm:$0xff]  ;;  %17187 = vst [vmem:[#allocation35_spill] sm:$0xff] %v15827_v58  ;;  %17188 = vst [vmem:[#allocation36_spill] sm:$0xff] %v15831_v61 }
 0x284   : > { %v15587_v24 = vpop.f32.mrf.mxu1  ;;  %v15678_v34 = vld [vmem:[%s14932_s21 + $0x8] sm:$0xff]  }
 0x285   : > { %17153 = vst [vmem:[#allocation25_spill] sm:$0xff] %v15587_v24  ;;  %v12404_v24 = vadd.f32 %v12403_v29, %v12402_v43  ;;  %v12512_v29 = vadd.f32 %v17159_v32, %v17158_v39  ;;  %v15733_v39 = vld [vmem:[%s14932_s21 + $0x40] sm:$0xff]  }
 0x286   : > { %v15589_v26 = vpop.f32.mrf.mxu1 }
 0x287   : > { %17154 = vst [vmem:[#allocation26_spill] sm:$0xff] %v15589_v26  ;;  %v12395_v26 = vadd.f32 %v12394_v4, %v12393_v28  ;;  %v2015_v3 = vmax.f32 %v1893_v35, %v12404_v24 }
 0x288   : > { %v15593_v9 = vpop.f32.mrf.mxu1 }
 0x289   : > { %v2012_v27 = vmax.f32 %v15553_v13, %v12395_v26  ;;  %v2137_v6 = vmax.f32 %v2015_v3, %v12444_v2  ;;  %v15710_v2 = vld [vmem:[%s14932_s21 + $0x30] sm:$0xff]  }
 0x28a   : > { %v15595_v54 = vpop.f32.mrf.mxu1 }
 0x28b   : > { %v2134_v46 = vmax.f32 %v2012_v27, %v12435_v11  ;;  %v12466_v47 = vadd.f32 %v15595_v54, %v15593_v9  ;;  %v17164_v54 = vld [vmem:[#allocation22_spill] sm:$0xff]  ;;  %v12503_v27 = vadd.f32 %v17172_v10, %v17171_v62  ;;  %v15706_v11 = vld [vmem:[%s14932_s21 + $0x28] sm:$0xff]  }
 0x28c   : > { %v12467_v31 = vpop.f32.mrf.mxu1  ;;  %v17160_v35 = vld [vmem:[#allocation25_spill] sm:$0xff]  ;;  %v12509_v25 = vadd.f32 %v17164_v54, %v17163_v5  ;;  %v15775_v5 = vld [vmem:[%s14932_s21 + $0x70] sm:$0xff]   ;;  %v15845_v62 = vld [vmem:[%s14932_s21 + $0xc0] sm:$0xff]  }
 0x28d   : > { %17180 = vst [vmem:[#allocation15_spill] sm:$0xff] %v15775_v5  ;;  %v15785_v54 = vld [vmem:[%s14932_s21 + $0x78] sm:$0xff]   ;;  %17190 = vst [vmem:[#allocation38_spill] sm:$0xff] %v15845_v62  ;;  %v15855_v10 = vld [vmem:[%s14932_s21 + $0xc8] sm:$0xff]  }
 0x28e   : > { %v12468_v51 = vpop.f32.mrf.mxu1  ;;  %v17161_v24 = vld [vmem:[#allocation26_spill] sm:$0xff]  ;;  %17181 = vst [vmem:[#allocation16_spill] sm:$0xff] %v15785_v54  ;;  %17191 = vst [vmem:[#allocation39_spill] sm:$0xff] %v15855_v10 }
 0x28f   : > { %v12469_v53 = vadd.f32 %v12468_v51, %v12467_v31  ;;  %v12463_v26 = vadd.f32 %v17161_v24, %v17160_v35  ;;  %v15747_v35 = vld [vmem:[%s14932_s21 + $0x50] sm:$0xff]   ;;  %v15757_v24 = vld [vmem:[%s14932_s21 + $0x58] sm:$0xff]  }
 0x290   : > { %v12470_v59 = vpop.f32.mrf.mxu1 }
 0x291   : > { %v2254_v31 = vmax.f32 %v2132_v12, %v12469_v53 }
 0x292   : > { %v12471_v20 = vpop.f32.mrf.mxu1 }
 0x293   : > { %v12472_v40 = vadd.f32 %v12471_v20, %v12470_v59  ;;  %v15656_v57 = vmax.f32 %v2254_v31, %v12509_v25  ;;  %v15771_v31 = vld [vmem:[%s14932_s21 + $0x68] sm:$0xff]   ;;  %v15789_v25 = vld [vmem:[%s14932_s21 + $0x80] sm:$0xff]  }
 0x294   : > { %v12473_v19 = vpop.f32.mrf.mxu1  ;;  %17179 = vst [vmem:[#allocation20_spill] sm:$0xff] %v15771_v31  ;;  %17182 = vst [vmem:[#allocation30_spill] sm:$0xff] %v15789_v25 }
 0x295   : > { %v2255_v15 = vmax.f32 %v2133_v30, %v12472_v40  ;;  %17170 = vst [vmem:[#allocation25_spill] sm:$0xff] %v15656_v57 }
 0x296   : > { %v12474_v60 = vpop.f32.mrf.mxu1 }
 0x297   : > { %v12475_v1 = vadd.f32 %v12474_v60, %v12473_v19  ;;  %v12518_v60 = vadd.f32 %v12517_v21, %v12516_v56  ;;  %v17165_v56 = vld [vmem:[#allocation19_spill] sm:$0xff]  ;;  %v15644_v20 = vmax.f32 %v2255_v15, %v12512_v29  ;;  %v17167_v19 = vld [vmem:[#allocation17_spill] sm:$0xff] }
 0x298   : > { %v12476_v23 = vpop.f32.mrf.mxu1  ;;  %v2253_v59 = vmax.f32 %v17165_v56, %v12466_v47  ;;  %v15743_v29 = vld [vmem:[%s14932_s21 + $0x48] sm:$0xff]   ;;  %17176 = vst [vmem:[#allocation19_spill] sm:$0xff] %v15747_v35  ;;  %17177 = vst [vmem:[#allocation17_spill] sm:$0xff] %v15757_v24 }
 0x299   : > { %v2256_v16 = vmax.f32 %v2134_v46, %v12475_v1  ;;  %17166 = vst [vmem:[#allocation24_spill] sm:$0xff] %v15644_v20  ;;  %v15665_v7 = vpack.c.bf16 %v15644_v20, %v15656_v57  ;;  %v14605_v1 = vld [vmem:[%s14937_s25 + $0x8] sm:$0xff]   ;;  %17175 = vst [vmem:[#allocation22_spill] sm:$0xff] %v15743_v29 }
 0x29a   : > { %v12477_v18 = vpop.f32.mrf.mxu1  ;;  %v15661_v3 = vmax.f32 %v2253_v59, %v12506_v33  ;;  %v15799_v56 = vld [vmem:[%s14932_s21 + $0x88] sm:$0xff]   ;;  %v15803_v59 = vld [vmem:[%s14932_s21 + $0x90] sm:$0xff]   ;;  %v15841_v33 = vld [vmem:[%s14932_s21 + $0xb8] sm:$0xff]  }
 0x29b   : > { %v12478_v28 = vadd.f32 %v12477_v18, %v12476_v23  ;;  %v15635_v51 = vmax.f32 %v2256_v16, %v12515_v49  ;;  %v2252_v18 = vmax.f32 %v17167_v19, %v12463_v26  ;;  %v15761_v26 = vld [vmem:[%s14932_s21 + $0x60] sm:$0xff]   ;;  %17183 = vst [vmem:[#allocation31_spill] sm:$0xff] %v15799_v56  ;;  %17184 = vst [vmem:[#allocation32_spill] sm:$0xff] %v15803_v59  ;;  %v15813_v19 = vld [vmem:[%s14932_s21 + $0x98] sm:$0xff]  }
 0x29c   : > { %v12479_v17 = vpop.f32.mrf.mxu1  ;;  %17173 = vst [vmem:[#allocation26_spill] sm:$0xff] %v15661_v3  ;;  %17178 = vst [vmem:[#allocation18_spill] sm:$0xff] %v15761_v26 }
 0x29d   : > { %v2257_v38 = vmax.f32 %v2135_v41, %v12478_v28  ;;  %17162 = vst [vmem:[#allocation23_spill] sm:$0xff] %v15635_v51  ;;  %v15682_v28 = vld [vmem:[%s14932_s21 + $0x10] sm:$0xff]   ;;  %v14606_v41 = vld [vmem:[%s14937_s25] sm:$0xff]   ;;  %17185 = vst [vmem:[#allocation33_spill] sm:$0xff] %v15813_v19 }
 0x29e   : > { %v12480_v8 = vpop.f32.mrf.mxu1  ;;  %17189 = vst [vmem:[#allocation37_spill] sm:$0xff] %v15841_v33 }
 0x29f   : > { %v12481_v52 = vadd.f32 %v12480_v8, %v12479_v17  ;;  %v15625_v17 = vmax.f32 %v2257_v38, %v12518_v60  ;;  %v15668_v8 = vmax.f32 %v2252_v18, %v12503_v27  ;;  %v15817_v18 = vld [vmem:[%s14932_s21 + $0xa0] sm:$0xff]   ;;  %v15859_v27 = vld [vmem:[%s14932_s21 + $0xd0] sm:$0xff]  }
 0x2a0   : > { %v12482_v13 = vpop.f32.mrf.mxu1  ;;  %17186 = vst [vmem:[#allocation34_spill] sm:$0xff] %v15817_v18  ;;  %17192 = vst [vmem:[#allocation40_spill] sm:$0xff] %v15859_v27 }
 0x2a1   : > { %v2258_v4 = vmax.f32 %v2136_v42, %v12481_v52  ;;  %17155 = vst [vmem:[#allocation27_spill] sm:$0xff] %v15625_v17  ;;  %v15648_v21 = vpack.c.bf16 %v15625_v17, %v15635_v51  ;;  %17174 = vst [vmem:[#allocation21_spill] sm:$0xff] %v15668_v8  ;;  %v15673_v14 = vpack.c.bf16 %v15661_v3, %v15668_v8  ;;  %v15692_v52 = vld [vmem:[%s14932_s21 + $0x18] sm:$0xff]   ;;  %v14638_v51 = vld [vmem:[%s14937_s25 + $0x30] sm:$0xff]  }
 0x2a2   : > { %v12483_v23 = vpop.f32.mrf.mxu1 }
 0x2a3   : > { %v12484_v37 = vadd.f32 %v12483_v23, %v12482_v13  ;;  %v15627_v43 = vmax.f32 %v2258_v4, %v12521_v45  ;;  %v15717_v13 = vld [vmem:[%s14932_s21 + $0x38] sm:$0xff]  }
 0x2a5   : > { %v2259_v63 = vmax.f32 %v2137_v6, %v12484_v37  ;;  %17156 = vst [vmem:[#allocation28_spill] sm:$0xff] %v15627_v43 }
 0x2a7   : > { %v15629_v22 = vmax.f32 %v2259_v63, %v12524_v48 }
 0x2a9   : > { %17157 = vst [vmem:[#allocation29_spill] sm:$0xff] %v15629_v22  ;;  %v15639_v9 = vpack.c.bf16 %v15629_v22, %v15627_v43 }
 0x2ab   : > { %13132 = vmatprep.subr.bf16.mxu0 %v15639_v9  ;;  %13188 = vmatprep.subr.bf16.mxu1 %v15639_v9 }
 0x2ac   : > { %13133 = vmatpush3.bf16.msra.mxu0 %v15639_v9 }
 0x2ad   : > { %13134 = vmatprep.subr.bf16.mxu0 %v15648_v21 }
 0x2b0   : > { %13135 = vmatpush3.bf16.msra.mxu0 %v15648_v21 }
 0x2b1   : > { %13136 = vmatprep.subr.bf16.mxu0 %v15665_v7 }
 0x2b4   : > { %13137 = vmatpush3.bf16.msra.mxu0 %v15665_v7 }
 0x2b5   : > { %13138 = vmatprep.subr.bf16.mxu0 %v15673_v14 }
 0x2b8   : > { %13139 = vmatpush3.bf16.msra.mxu0 %v15673_v14 }
 0x2b9   : > { %13148 = vmatprep.subr.bf16.mxu0 %v15639_v9 }
 0x2bb   : > { %13141 = vmatmul.mubr.msk.bf16.vlgmr.msra.gmra.mxu0 %vm2414_vm1, %v15678_v34 }
 0x2bc   : > { %13149 = vmatpush3.bf16.msra.mxu0 %v15639_v9  ;;  %13144 = vmatprep.mubr.msk.bf16.mxu0 %vm2414_vm1, %v15682_v28 }
 0x2bd   : > { %13150 = vmatprep.subr.bf16.mxu0 %v15648_v21 }
 0x2c0   : > { %13151 = vmatpush3.bf16.msra.mxu0 %v15648_v21 }
 0x2c1   : > { %13152 = vmatprep.subr.bf16.mxu0 %v15665_v7 }
 0x2c3   : > { %13145 = vmatmul.mubr.msk.bf16.gmra.mxu0 %vm2414_vm1, %v15692_v52 }
 0x2c4   : > { %13153 = vmatpush3.bf16.msra.mxu0 %v15665_v7  ;;  %13156 = vmatprep.mubr.msk.bf16.mxu0 %vm2414_vm1, %v15696_v0 }
 0x2c5   : > { %13154 = vmatprep.subr.bf16.mxu0 %v15673_v14 }
 0x2c8   : > { %13155 = vmatpush3.bf16.msra.mxu0 %v15673_v14 }
 0x2c9   : > { %13176 = vmatprep.subr.bf16.mxu0 %v14605_v1 }
 0x2cb   : > { %13157 = vmatmul.mubr.msk.bf16.vlgmr.msra.gmra.mxu0 %vm2414_vm1, %v15706_v11 }
 0x2cc   : > { %13160 = vmatprep.mubr.msk.bf16.mxu0 %vm2414_vm1, %v15710_v2  ;;  %13177 = vmatpush3.bf16.msra.mxu0 %v14605_v1  ;;  %v14635_v1 = vld [vmem:[%s14937_s25 + $0x28] sm:$0xff]  }
 0x2cd   : > { %13178 = vmatprep.subr.bf16.mxu0 %v14606_v41 }
 0x2d0   : > { %13179 = vmatpush3.bf16.msra.mxu0 %v14606_v41  ;;  %v15870_v41 = vld [vmem:[%s14932_s21 + $0xd8] sm:$0xff]  }
 0x2d1   : > { %13204 = vmatprep.subr.bf16.mxu0 %v14635_v1  ;;  %17193 = vst [vmem:[#allocation41_spill] sm:$0xff] %v15870_v41 }
 0x2d3   : > { %13161 = vmatmul.mubr.msk.bf16.gmra.mxu0 %vm2414_vm1, %v15717_v13 }
 0x37b   : > { %v13142_v42 = vpop.f32.mrf.mxu0 }
 0x37d   : > { %v2461_v44 = vpop.f32.mrf.mxu0 }
 0x37f   : > { %v13143_v55 = vpop.f32.mrf.mxu0 }
 0x380   : > { %v2493_v6 = vpack.c.bf16 %v13143_v55, %v13142_v42  ;;  %v15874_v42 = vld [vmem:[%s14932_s21 + $0xe0] sm:$0xff]   ;;  %v15885_v55 = vld [vmem:[%s14932_s21 + $0xe8] sm:$0xff]  }
 0x381   : > { %v2464_v46 = vpop.f32.mrf.mxu0  ;;  %17194 = vst [vmem:[#allocation42_spill] sm:$0xff] %v15874_v42  ;;  %17195 = vst [vmem:[#allocation43_spill] sm:$0xff] %v15885_v55 }
 0x382   : > { %v2492_v36 = vpack.c.bf16 %v2464_v46, %v2461_v44  ;;  %v14636_v44 = vld [vmem:[%s14937_s25 + $0x20] sm:$0xff]   ;;  %v15889_v46 = vld [vmem:[%s14932_s21 + $0xf0] sm:$0xff]  }
 0x383   : > { %v13146_v23 = vpop.f32.mrf.mxu0  ;;  %17196 = vst [vmem:[#allocation44_spill] sm:$0xff] %v15889_v46 }
 0x384   : > { %13180 = vmatprep.mubr.msk.bf16.mxu0 %vm1035_vm0, %v2492_v36  ;;  %v14637_v36 = vld [vmem:[%s14937_s25 + $0x38] sm:$0xff]  }
 0x385   : > { %v2477_v40 = vpop.f32.mrf.mxu0  ;;  %13181 = vmatmul.mubr.msk.bf16.vlgmr.msra.gmra.mxu0 %vm1035_vm0, %v2493_v6  ;;  %v15900_v6 = vld [vmem:[%s14932_s21 + $0xf8] sm:$0xff]  }
 0x386   : > { %13205 = vmatpush3.bf16.msra.mxu0 %v14635_v1  ;;  %17197 = vst [vmem:[#allocation45_spill] sm:$0xff] %v15900_v6 }
 0x387   : > { %v13147_v38 = vpop.f32.mrf.mxu0  ;;  %13206 = vmatprep.subr.bf16.mxu0 %v14636_v44 }
 0x388   : > { %v2495_v50 = vpack.c.bf16 %v13147_v38, %v13146_v23  ;;  %v15904_v23 = vld [vmem:[%s14932_s21 + $0x100] sm:$0xff]  }
 0x389   : > { %v2480_v4 = vpop.f32.mrf.mxu0  ;;  %17198 = vst [vmem:[#allocation46_spill] sm:$0xff] %v15904_v23 }
 0x38a   : > { %v2494_v37 = vpack.c.bf16 %v2480_v4, %v2477_v40  ;;  %13207 = vmatpush3.bf16.msra.mxu0 %v14636_v44  ;;  %v15918_v40 = vld [vmem:[%s14932_s21 + $0x110] sm:$0xff]  }
 0x38b   : > { %v13158_v30 = vpop.f32.mrf.mxu0  ;;  %13232 = vmatprep.subr.bf16.mxu0 %v14637_v36  ;;  %17200 = vst [vmem:[#allocation48_spill] sm:$0xff] %v15918_v40 }
 0x38c   : > { %13184 = vmatprep.mubr.msk.bf16.mxu0 %vm1035_vm0, %v2494_v37 }
 0x38d   : > { %v2575_v60 = vpop.f32.mrf.mxu0  ;;  %13185 = vmatmul.mubr.msk.bf16.gmra.mxu0 %vm1035_vm0, %v2495_v50 }
 0x38f   : > { %v13159_v45 = vpop.f32.mrf.mxu0 }
 0x390   : > { %v2607_v48 = vpack.c.bf16 %v13159_v45, %v13158_v30 }
 0x391   : > { %v2578_v53 = vpop.f32.mrf.mxu0 }
 0x392   : > { %v2606_v16 = vpack.c.bf16 %v2578_v53, %v2575_v60 }
 0x393   : > { %v13162_v63 = vpop.f32.mrf.mxu0 }
 0x394   : > { %13168 = vmatprep.mubr.msk.bf16.mxu1 %vm1035_vm0, %v2606_v16 }
 0x395   : > { %v2591_v47 = vpop.f32.mrf.mxu0  ;;  %13169 = vmatmul.mubr.msk.bf16.vlgmr.msra.gmra.mxu1 %vm1035_vm0, %v2607_v48 }
 0x396   : > { %13189 = vmatpush3.bf16.msra.mxu1 %v15639_v9 }
 0x397   : > { %13190 = vmatprep.subr.bf16.mxu1 %v15648_v21  ;;  %v13163_v12 = vpop.f32.mrf.mxu0 }
 0x398   : > { %v2609_v32 = vpack.c.bf16 %v13163_v12, %v13162_v63 }
 0x399   : > { %v2594_v49 = vpop.f32.mrf.mxu0 }
 0x39a   : > { %v2608_v15 = vpack.c.bf16 %v2594_v49, %v2591_v47  ;;  %13191 = vmatpush3.bf16.msra.mxu1 %v15648_v21 }
 0x39b   : > { %13192 = vmatprep.subr.bf16.mxu1 %v15665_v7 }
 0x39c   : > { %13172 = vmatprep.mubr.msk.bf16.mxu1 %vm1035_vm0, %v2608_v15 }
 0x39d   : > { %13173 = vmatmul.mubr.msk.bf16.gmra.mxu1 %vm1035_vm0, %v2609_v32 }
 0x39e   : > { %13193 = vmatpush3.bf16.msra.mxu1 %v15665_v7  ;;  %13196 = vmatprep.mubr.msk.bf16.mxu1 %vm2414_vm1, %v15733_v39 }
 0x39f   : > { %13194 = vmatprep.subr.bf16.mxu1 %v15673_v14 }
 0x3a2   : > { %13195 = vmatpush3.bf16.msra.mxu1 %v15673_v14 }
 0x3a3   : > { %13216 = vmatprep.subr.bf16.mxu1 %v15639_v9 }
 0x3a5   : > { %13197 = vmatmul.mubr.msk.bf16.vlgmr.msra.gmra.mxu1 %vm2414_vm1, %v15743_v29 }
 0x3a6   : > { %13217 = vmatpush3.bf16.msra.mxu1 %v15639_v9  ;;  %13200 = vmatprep.mubr.msk.bf16.mxu1 %vm2414_vm1, %v15747_v35 }
 0x3a7   : > { %13218 = vmatprep.subr.bf16.mxu1 %v15648_v21 }
 0x3aa   : > { %13219 = vmatpush3.bf16.msra.mxu1 %v15648_v21 }
 0x3ab   : > { %13220 = vmatprep.subr.bf16.mxu1 %v15665_v7 }
 0x3ad   : > { %13201 = vmatmul.mubr.msk.bf16.gmra.mxu1 %vm2414_vm1, %v15757_v24  ;;  %v11414_v24 = vld [vmem:[%s14942_s29] ss:$0 sm:$0xff] }
 0x3ae   : > { %13221 = vmatpush3.bf16.msra.mxu1 %v15665_v7  ;;  %13224 = vmatprep.mubr.msk.bf16.mxu1 %vm2414_vm1, %v15761_v26 }
 0x3af   : > { %13222 = vmatprep.subr.bf16.mxu1 %v15673_v14 }
 0x3b2   : > { %13223 = vmatpush3.bf16.msra.mxu1 %v15673_v14 }
 0x3b3   : > { %13244 = vmatprep.subr.bf16.mxu1 %v15639_v9 }
 0x3b5   : > { %13225 = vmatmul.mubr.msk.bf16.vlgmr.msra.gmra.mxu1 %vm2414_vm1, %v15771_v31 }
 0x3b6   : > { %13245 = vmatpush3.bf16.msra.mxu1 %v15639_v9  ;;  %13228 = vmatprep.mubr.msk.bf16.mxu1 %vm2414_vm1, %v15775_v5 }
 0x3b7   : > { %13246 = vmatprep.subr.bf16.mxu1 %v15648_v21 }
 0x3ba   : > { %13247 = vmatpush3.bf16.msra.mxu1 %v15648_v21 }
 0x3bb   : > { %13248 = vmatprep.subr.bf16.mxu1 %v15665_v7 }
 0x3bd   : > { %13229 = vmatmul.mubr.msk.bf16.gmra.mxu1 %vm2414_vm1, %v15785_v54 }
 0x3be   : > { %13249 = vmatpush3.bf16.msra.mxu1 %v15665_v7  ;;  %13252 = vmatprep.mubr.msk.bf16.mxu1 %vm2414_vm1, %v15789_v25 }
 0x3bf   : > { %13250 = vmatprep.subr.bf16.mxu1 %v15673_v14 }
 0x3c2   : > { %13251 = vmatpush3.bf16.msra.mxu1 %v15673_v14 }
 0x3c3   : > { %13272 = vmatprep.subr.bf16.mxu1 %v15639_v9 }
 0x3c5   : > { %13253 = vmatmul.mubr.msk.bf16.vlgmr.msra.gmra.mxu1 %vm2414_vm1, %v15799_v56 }
 0x3c6   : > { %13273 = vmatpush3.bf16.msra.mxu1 %v15639_v9  ;;  %13256 = vmatprep.mubr.msk.bf16.mxu1 %vm2414_vm1, %v15803_v59 }
 0x3c7   : > { %13274 = vmatprep.subr.bf16.mxu1 %v15648_v21 }
 0x3ca   : > { %13275 = vmatpush3.bf16.msra.mxu1 %v15648_v21 }
 0x3cb   : > { %13276 = vmatprep.subr.bf16.mxu1 %v15665_v7 }
 0x3cd   : > { %13257 = vmatmul.mubr.msk.bf16.gmra.mxu1 %vm2414_vm1, %v15813_v19 }
 0x3ce   : > { %13277 = vmatpush3.bf16.msra.mxu1 %v15665_v7  ;;  %13280 = vmatprep.mubr.msk.bf16.mxu1 %vm2414_vm1, %v15817_v18 }
 0x3cf   : > { %13278 = vmatprep.subr.bf16.mxu1 %v15673_v14 }
 0x3d2   : > { %13279 = vmatpush3.bf16.msra.mxu1 %v15673_v14 }
 0x3d3   : > { %13300 = vmatprep.subr.bf16.mxu1 %v15639_v9 }
 0x3d5   : > { %13281 = vmatmul.mubr.msk.bf16.vlgmr.msra.gmra.mxu1 %vm2414_vm1, %v15827_v58 }
 0x3d6   : > { %13301 = vmatpush3.bf16.msra.mxu1 %v15639_v9  ;;  %13284 = vmatprep.mubr.msk.bf16.mxu1 %vm2414_vm1, %v15831_v61 }
 0x3d7   : > { %13302 = vmatprep.subr.bf16.mxu1 %v15648_v21 }
 0x3da   : > { %13303 = vmatpush3.bf16.msra.mxu1 %v15648_v21 }
 0x3db   : > { %13304 = vmatprep.subr.bf16.mxu1 %v15665_v7 }
 0x3dd   : > { %13285 = vmatmul.mubr.msk.bf16.gmra.mxu1 %vm2414_vm1, %v15841_v33 }
 0x3de   : > { %13305 = vmatpush3.bf16.msra.mxu1 %v15665_v7  ;;  %13308 = vmatprep.mubr.msk.bf16.mxu1 %vm2414_vm1, %v15845_v62 }
 0x3df   : > { %13306 = vmatprep.subr.bf16.mxu1 %v15673_v14 }
 0x3e2   : > { %13307 = vmatpush3.bf16.msra.mxu1 %v15673_v14 }
 0x3e3   : > { %13328 = vmatprep.subr.bf16.mxu1 %v15639_v9 }
 0x3e5   : > { %13309 = vmatmul.mubr.msk.bf16.vlgmr.msra.gmra.mxu1 %vm2414_vm1, %v15855_v10 }
 0x3e6   : > { %13329 = vmatpush3.bf16.msra.mxu1 %v15639_v9  ;;  %13312 = vmatprep.mubr.msk.bf16.mxu1 %vm2414_vm1, %v15859_v27 }
 0x3e7   : > { %13330 = vmatprep.subr.bf16.mxu1 %v15648_v21 }
 0x3ea   : > { %13331 = vmatpush3.bf16.msra.mxu1 %v15648_v21 }
 0x3eb   : > { %13332 = vmatprep.subr.bf16.mxu1 %v15665_v7 }
 0x3ed   : > { %13313 = vmatmul.mubr.msk.bf16.gmra.mxu1 %vm2414_vm1, %v15870_v41 }
 0x3ee   : > { %13333 = vmatpush3.bf16.msra.mxu1 %v15665_v7  ;;  %13336 = vmatprep.mubr.msk.bf16.mxu1 %vm2414_vm1, %v15874_v42 }
 0x3ef   : > { %13334 = vmatprep.subr.bf16.mxu1 %v15673_v14 }
 0x3f2   : > { %13335 = vmatpush3.bf16.msra.mxu1 %v15673_v14 }
 0x3f3   : > { %13356 = vmatprep.subr.bf16.mxu1 %v15639_v9 }
 0x3f5   : > { %13337 = vmatmul.mubr.msk.bf16.vlgmr.msra.gmra.mxu1 %vm2414_vm1, %v15885_v55 }
 0x3f6   : > { %13357 = vmatpush3.bf16.msra.mxu1 %v15639_v9  ;;  %13340 = vmatprep.mubr.msk.bf16.mxu1 %vm2414_vm1, %v15889_v46  ;;  %v15914_v9 = vld [vmem:[%s14932_s21 + $0x108] sm:$0xff]  }
 0x3f7   : > { %13358 = vmatprep.subr.bf16.mxu1 %v15648_v21  ;;  %17199 = vst [vmem:[#allocation47_spill] sm:$0xff] %v15914_v9 }
 0x3fa   : > { %13359 = vmatpush3.bf16.msra.mxu1 %v15648_v21  ;;  %v15925_v21 = vld [vmem:[%s14932_s21 + $0x118] sm:$0xff]  }
 0x3fb   : > { %13360 = vmatprep.subr.bf16.mxu1 %v15665_v7  ;;  %17201 = vst [vmem:[#allocation49_spill] sm:$0xff] %v15925_v21 }
 0x3fd   : > { %13341 = vmatmul.mubr.msk.bf16.gmra.mxu1 %vm2414_vm1, %v15900_v6 }
 0x3fe   : > { %13361 = vmatpush3.bf16.msra.mxu1 %v15665_v7  ;;  %13364 = vmatprep.mubr.msk.bf16.mxu1 %vm2414_vm1, %v15904_v23  ;;  %v17202_v7 = vld [vmem:[#allocation14_spill] sm:$0xff] }
 0x3ff   : > { %13362 = vmatprep.subr.bf16.mxu1 %v15673_v14 }
 0x402   : > { %13363 = vmatpush3.bf16.msra.mxu1 %v15673_v14 }
 0x405   : > { %13365 = vmatmul.mubr.msk.bf16.vlgmr.msra.gmra.mxu1 %vm2414_vm1, %v15914_v9 }
 0x406   : > { %13368 = vmatprep.mubr.msk.bf16.mxu1 %vm2414_vm1, %v15918_v40 }
 0x40d   : > { %13369 = vmatmul.mubr.msk.bf16.gmra.mxu1 %vm2414_vm1, %v15925_v21 }
 0x40e   : > { %13392 = vmatprep.mubr.msk.bf16.mxu1 %vm2414_vm1, %v17202_v7 }
 0x445   : > { %v13182_v38 = vpop.f32.mrf.mxu0 }
 0x447   : > { %v2762_v4 = vpop.f32.mrf.mxu0 }
 0x449   : > { %v13183_v37 = vpop.f32.mrf.mxu0 }
 0x44b   : > { %v15931_v14 = vpop.f32.mrf.mxu0 }
 0x44d   : > { %v13186_v53 = vpop.f32.mrf.mxu0 }
 0x44f   : > { %v2778_v47 = vpop.f32.mrf.mxu0 }
 0x451   : > { %v13187_v1 = vpop.f32.mrf.mxu0 }
 0x455   : > { %v13170_v50 = vpop.f32.mrf.mxu1 }
 0x456   : > { %v15933_v30 = vadd.f32 %v13182_v38, %v13170_v50 }
 0x457   : > { %v2673_v60 = vpop.f32.mrf.mxu1 }
 0x458   : > { %v15935_v45 = vadd.f32 %v2762_v4, %v2673_v60 }
 0x459   : > { %v13171_v16 = vpop.f32.mrf.mxu1 }
 0x45a   : > { %v15937_v48 = vadd.f32 %v13183_v37, %v13171_v16 }
 0x45b   : > { %v15939_v63 = vpop.f32.mrf.mxu1 }
 0x45c   : > { %v2766_v31 = vadd.f32 %v15931_v14, %v15939_v63 }
 0x45d   : > { %v13174_v12 = vpop.f32.mrf.mxu1 }
 0x45e   : > { %v15941_v49 = vadd.f32 %v13186_v53, %v13174_v12  ;;  %v14639_v12 = vld [vmem:[%s14937_s25 + $0x48] sm:$0xff]  }
 0x45f   : > { %v2689_v15 = vpop.f32.mrf.mxu1 }
 0x460   : > { %v15943_v32 = vadd.f32 %v2778_v47, %v2689_v15 }
 0x461   : > { %v13175_v44 = vpop.f32.mrf.mxu1 }
 0x462   : > { %v15945_v7 = vadd.f32 %v13187_v1, %v13175_v44 }
 0x463   : > { %v15947_v38 = vpop.f32.mrf.mxu1 }
 0x465   : > { %v13198_v4 = vpop.f32.mrf.mxu1 }
 0x467   : > { %v2868_v37 = vpop.f32.mrf.mxu1 }
 0x469   : > { %v13199_v50 = vpop.f32.mrf.mxu1 }
 0x46a   : > { %v2900_v8 = vpack.c.bf16 %v13199_v50, %v13198_v4 }
 0x46b   : > { %v2871_v60 = vpop.f32.mrf.mxu1 }
 0x46c   : > { %v2899_v16 = vpack.c.bf16 %v2871_v60, %v2868_v37 }
 0x46d   : > { %v13202_v3 = vpop.f32.mrf.mxu1 }
 0x46e   : > { %13208 = vmatprep.mubr.msk.bf16.mxu0 %vm1035_vm0, %v2899_v16  ;;  %v14640_v16 = vld [vmem:[%s14937_s25 + $0x40] sm:$0xff]  }
 0x46f   : > { %v2884_v53 = vpop.f32.mrf.mxu1  ;;  %13209 = vmatmul.mubr.msk.bf16.vlgmr.msra.gmra.mxu0 %vm1035_vm0, %v2900_v8 }
 0x470   : > { %13233 = vmatpush3.bf16.msra.mxu0 %v14637_v36 }
 0x471   : > { %v13203_v47 = vpop.f32.mrf.mxu1  ;;  %13234 = vmatprep.subr.bf16.mxu0 %v14638_v51 }
 0x472   : > { %v2902_v44 = vpack.c.bf16 %v13203_v47, %v13202_v3  ;;  %v14641_v3 = vld [vmem:[%s14937_s25 + $0x58] sm:$0xff]  }
 0x473   : > { %v2887_v15 = vpop.f32.mrf.mxu1 }
 0x474   : > { %v2901_v1 = vpack.c.bf16 %v2887_v15, %v2884_v53  ;;  %13235 = vmatpush3.bf16.msra.mxu0 %v14638_v51 }
 0x475   : > { %v13226_v17 = vpop.f32.mrf.mxu1  ;;  %13260 = vmatprep.subr.bf16.mxu0 %v14639_v12 }
 0x476   : > { %13212 = vmatprep.mubr.msk.bf16.mxu0 %vm1035_vm0, %v2901_v1 }
 0x477   : > { %13213 = vmatmul.mubr.msk.bf16.gmra.mxu0 %vm1035_vm0, %v2902_v44  ;;  %v3080_v4 = vpop.f32.mrf.mxu1 }
 0x479   : > { %v13227_v37 = vpop.f32.mrf.mxu1 }
 0x47a   : > { %v3112_v36 = vpack.c.bf16 %v13227_v37, %v13226_v17 }
 0x47b   : > { %v3083_v50 = vpop.f32.mrf.mxu1 }
 0x47c   : > { %v3111_v8 = vpack.c.bf16 %v3083_v50, %v3080_v4 }
 0x47d   : > { %v13230_v60 = vpop.f32.mrf.mxu1 }
 0x47e   : > { %13236 = vmatprep.mubr.msk.bf16.mxu0 %vm1035_vm0, %v3111_v8  ;;  %v14642_v8 = vld [vmem:[%s14937_s25 + $0x50] sm:$0xff]  }
 0x47f   : > { %v3096_v22 = vpop.f32.mrf.mxu1  ;;  %13237 = vmatmul.mubr.msk.bf16.vlgmr.msra.gmra.mxu0 %vm1035_vm0, %v3112_v36 }
 0x480   : > { %13261 = vmatpush3.bf16.msra.mxu0 %v14639_v12 }
 0x481   : > { %v13231_v51 = vpop.f32.mrf.mxu1  ;;  %13262 = vmatprep.subr.bf16.mxu0 %v14640_v16 }
 0x482   : > { %v3114_v15 = vpack.c.bf16 %v13231_v51, %v13230_v60  ;;  %v14643_v60 = vld [vmem:[%s14937_s25 + $0x68] sm:$0xff]  }
 0x483   : > { %v3099_v53 = vpop.f32.mrf.mxu1 }
 0x484   : > { %v3113_v47 = vpack.c.bf16 %v3099_v53, %v3096_v22  ;;  %13263 = vmatpush3.bf16.msra.mxu0 %v14640_v16 }
 0x485   : > { %v13254_v1 = vpop.f32.mrf.mxu1  ;;  %13288 = vmatprep.subr.bf16.mxu0 %v14641_v3 }
 0x486   : > { %13240 = vmatprep.mubr.msk.bf16.mxu0 %vm1035_vm0, %v3113_v47 }
 0x487   : > { %13241 = vmatmul.mubr.msk.bf16.gmra.mxu0 %vm1035_vm0, %v3114_v15  ;;  %v3292_v17 = vpop.f32.mrf.mxu1 }
 0x489   : > { %v13255_v44 = vpop.f32.mrf.mxu1 }
 0x48a   : > { %v3324_v12 = vpack.c.bf16 %v13255_v44, %v13254_v1 }
 0x48b   : > { %v3295_v4 = vpop.f32.mrf.mxu1 }
 0x48c   : > { %v3323_v37 = vpack.c.bf16 %v3295_v4, %v3292_v17 }
 0x48d   : > { %v13258_v50 = vpop.f32.mrf.mxu1 }
 0x48e   : > { %13264 = vmatprep.mubr.msk.bf16.mxu0 %vm1035_vm0, %v3323_v37  ;;  %v14644_v37 = vld [vmem:[%s14937_s25 + $0x60] sm:$0xff]  }
 0x48f   : > { %v3308_v36 = vpop.f32.mrf.mxu1  ;;  %13265 = vmatmul.mubr.msk.bf16.vlgmr.msra.gmra.mxu0 %vm1035_vm0, %v3324_v12 }
 0x490   : > { %13289 = vmatpush3.bf16.msra.mxu0 %v14641_v3 }
 0x491   : > { %v13259_v22 = vpop.f32.mrf.mxu1  ;;  %13290 = vmatprep.subr.bf16.mxu0 %v14642_v8 }
 0x492   : > { %v3326_v53 = vpack.c.bf16 %v13259_v22, %v13258_v50 }
 0x493   : > { %v3311_v16 = vpop.f32.mrf.mxu1 }
 0x494   : > { %v3325_v51 = vpack.c.bf16 %v3311_v16, %v3308_v36  ;;  %13291 = vmatpush3.bf16.msra.mxu0 %v14642_v8  ;;  %v14645_v8 = vld [vmem:[%s14937_s25 + $0x78] sm:$0xff]  }
 0x495   : > { %v13282_v47 = vpop.f32.mrf.mxu1  ;;  %13316 = vmatprep.subr.bf16.mxu0 %v14643_v60 }
 0x496   : > { %13268 = vmatprep.mubr.msk.bf16.mxu0 %vm1035_vm0, %v3325_v51 }
 0x497   : > { %13269 = vmatmul.mubr.msk.bf16.gmra.mxu0 %vm1035_vm0, %v3326_v53  ;;  %v3504_v15 = vpop.f32.mrf.mxu1 }
 0x499   : > { %v13283_v1 = vpop.f32.mrf.mxu1 }
 0x49a   : > { %v3536_v3 = vpack.c.bf16 %v13283_v1, %v13282_v47 }
 0x49b   : > { %v3507_v17 = vpop.f32.mrf.mxu1 }
 0x49c   : > { %v3535_v44 = vpack.c.bf16 %v3507_v17, %v3504_v15 }
 0x49d   : > { %v13286_v4 = vpop.f32.mrf.mxu1 }
 0x49e   : > { %13292 = vmatprep.mubr.msk.bf16.mxu0 %vm1035_vm0, %v3535_v44  ;;  %v14646_v44 = vld [vmem:[%s14937_s25 + $0x70] sm:$0xff]  }
 0x49f   : > { %v3520_v12 = vpop.f32.mrf.mxu1  ;;  %13293 = vmatmul.mubr.msk.bf16.vlgmr.msra.gmra.mxu0 %vm1035_vm0, %v3536_v3 }
 0x4a0   : > { %13317 = vmatpush3.bf16.msra.mxu0 %v14643_v60 }
 0x4a1   : > { %v13287_v50 = vpop.f32.mrf.mxu1  ;;  %13318 = vmatprep.subr.bf16.mxu0 %v14644_v37 }
 0x4a2   : > { %v3538_v16 = vpack.c.bf16 %v13287_v50, %v13286_v4 }
 0x4a3   : > { %v3523_v36 = vpop.f32.mrf.mxu1 }
 0x4a4   : > { %v3537_v22 = vpack.c.bf16 %v3523_v36, %v3520_v12  ;;  %13319 = vmatpush3.bf16.msra.mxu0 %v14644_v37  ;;  %v14647_v37 = vld [vmem:[%s14937_s25 + $0x88] sm:$0xff]  }
 0x4a5   : > { %v13310_v51 = vpop.f32.mrf.mxu1  ;;  %13344 = vmatprep.subr.bf16.mxu0 %v14645_v8 }
 0x4a6   : > { %13296 = vmatprep.mubr.msk.bf16.mxu0 %vm1035_vm0, %v3537_v22 }
 0x4a7   : > { %13297 = vmatmul.mubr.msk.bf16.gmra.mxu0 %vm1035_vm0, %v3538_v16  ;;  %v3716_v53 = vpop.f32.mrf.mxu1 }
 0x4a9   : > { %v13311_v47 = vpop.f32.mrf.mxu1 }
 0x4aa   : > { %v3748_v60 = vpack.c.bf16 %v13311_v47, %v13310_v51 }
 0x4ab   : > { %v3719_v15 = vpop.f32.mrf.mxu1 }
 0x4ac   : > { %v3747_v1 = vpack.c.bf16 %v3719_v15, %v3716_v53 }
 0x4ad   : > { %v13314_v17 = vpop.f32.mrf.mxu1 }
 0x4ae   : > { %13320 = vmatprep.mubr.msk.bf16.mxu0 %vm1035_vm0, %v3747_v1  ;;  %v14648_v1 = vld [vmem:[%s14937_s25 + $0x80] sm:$0xff]  }
 0x4af   : > { %v3732_v3 = vpop.f32.mrf.mxu1  ;;  %13321 = vmatmul.mubr.msk.bf16.vlgmr.msra.gmra.mxu0 %vm1035_vm0, %v3748_v60 }
 0x4b0   : > { %13345 = vmatpush3.bf16.msra.mxu0 %v14645_v8 }
 0x4b1   : > { %v13315_v4 = vpop.f32.mrf.mxu1  ;;  %13346 = vmatprep.subr.bf16.mxu0 %v14646_v44 }
 0x4b2   : > { %v3750_v36 = vpack.c.bf16 %v13315_v4, %v13314_v17 }
 0x4b3   : > { %v3735_v12 = vpop.f32.mrf.mxu1 }
 0x4b4   : > { %v3749_v50 = vpack.c.bf16 %v3735_v12, %v3732_v3  ;;  %13347 = vmatpush3.bf16.msra.mxu0 %v14646_v44 }
 0x4b5   : > { %v13338_v22 = vpop.f32.mrf.mxu1  ;;  %13372 = vmatprep.subr.bf16.mxu0 %v14647_v37 }
 0x4b6   : > { %13324 = vmatprep.mubr.msk.bf16.mxu0 %vm1035_vm0, %v3749_v50 }
 0x4b7   : > { %13325 = vmatmul.mubr.msk.bf16.gmra.mxu0 %vm1035_vm0, %v3750_v36  ;;  %v3928_v16 = vpop.f32.mrf.mxu1 }
 0x4b9   : > { %v13339_v51 = vpop.f32.mrf.mxu1 }
 0x4ba   : > { %v3960_v15 = vpack.c.bf16 %v13339_v51, %v13338_v22 }
 0x4bb   : > { %v3931_v53 = vpop.f32.mrf.mxu1 }
 0x4bc   : > { %v3959_v47 = vpack.c.bf16 %v3931_v53, %v3928_v16 }
 0x4bd   : > { %v13342_v8 = vpop.f32.mrf.mxu1 }
 0x4be   : > { %13348 = vmatprep.mubr.msk.bf16.mxu0 %vm1035_vm0, %v3959_v47 }
 0x4bf   : > { %v3944_v60 = vpop.f32.mrf.mxu1  ;;  %13349 = vmatmul.mubr.msk.bf16.vlgmr.msra.gmra.mxu0 %vm1035_vm0, %v3960_v15 }
 0x4c0   : > { %13373 = vmatpush3.bf16.msra.mxu0 %v14647_v37 }
 0x4c1   : > { %v13343_v17 = vpop.f32.mrf.mxu1  ;;  %13374 = vmatprep.subr.bf16.mxu0 %v14648_v1 }
 0x4c2   : > { %v3962_v4 = vpack.c.bf16 %v13343_v17, %v13342_v8 }
 0x4c3   : > { %v3947_v44 = vpop.f32.mrf.mxu1 }
 0x4c4   : > { %v3961_v3 = vpack.c.bf16 %v3947_v44, %v3944_v60  ;;  %13375 = vmatpush3.bf16.msra.mxu0 %v14648_v1  ;;  %v15990_v60 = vpop.f32.mrf.mxu0 }
 0x4c5   : > { %v13366_v12 = vpop.f32.mrf.mxu1  ;;  %v2782_v59 = vadd.f32 %v15990_v60, %v15947_v38 }
 0x4c6   : > { %13352 = vmatprep.mubr.msk.bf16.mxu0 %vm1035_vm0, %v3961_v3 }
 0x4c7   : > { %13353 = vmatmul.mubr.msk.bf16.gmra.mxu0 %vm1035_vm0, %v3962_v4  ;;  %v4140_v50 = vpop.f32.mrf.mxu1 }
 0x4c9   : > { %v13367_v36 = vpop.f32.mrf.mxu1 }
 0x4ca   : > { %v4172_v51 = vpack.c.bf16 %v13367_v36, %v13366_v12 }
 0x4cb   : > { %v4143_v22 = vpop.f32.mrf.mxu1 }
 0x4cc   : > { %v4171_v16 = vpack.c.bf16 %v4143_v22, %v4140_v50 }
 0x4cd   : > { %v13370_v53 = vpop.f32.mrf.mxu1 }
 0x4ce   : > { %13376 = vmatprep.mubr.msk.bf16.mxu0 %vm1035_vm0, %v4171_v16 }
 0x4cf   : > { %v4156_v37 = vpop.f32.mrf.mxu1  ;;  %13377 = vmatmul.mubr.msk.bf16.vlgmr.msra.gmra.mxu0 %vm1035_vm0, %v4172_v51 }
 0x4d1   : > { %v13371_v47 = vpop.f32.mrf.mxu1 }
 0x4d2   : > { %v4174_v8 = vpack.c.bf16 %v13371_v47, %v13370_v53 }
 0x4d3   : > { %v4159_v15 = vpop.f32.mrf.mxu1 }
 0x4d4   : > { %v4173_v1 = vpack.c.bf16 %v4159_v15, %v4156_v37 }
 0x4d6   : > { %13380 = vmatprep.mubr.msk.bf16.mxu0 %vm1035_vm0, %v4173_v1 }
 0x4d7   : > { %13381 = vmatmul.mubr.msk.bf16.gmra.mxu0 %vm1035_vm0, %v4174_v8 }
 0x4d8   : > { %13408 = vmatprep.mubr.msk.bf16.mxu0 %vm2414_vm1, %v15696_v0 }
 0x52f   : > { %v13210_v17 = vpop.f32.mrf.mxu0 }
 0x530   : > { %v2999_v44 = vadd.f32 %v13210_v17, %v15933_v30 }
 0x531   : > { %v2966_v3 = vpop.f32.mrf.mxu0 }
 0x532   : > { %v2997_v4 = vadd.f32 %v2966_v3, %v15935_v45 }
 0x533   : > { %v13211_v12 = vpop.f32.mrf.mxu0 }
 0x534   : > { %v3000_v50 = vadd.f32 %v13211_v12, %v15937_v48 }
 0x535   : > { %v15995_v36 = vpop.f32.mrf.mxu0 }
 0x537   : > { %v13214_v22 = vpop.f32.mrf.mxu0 }
 0x538   : > { %v3003_v16 = vadd.f32 %v13214_v22, %v15941_v49 }
 0x539   : > { %v2982_v51 = vpop.f32.mrf.mxu0 }
 0x53a   : > { %v3001_v53 = vadd.f32 %v2982_v51, %v15943_v32 }
 0x53b   : > { %v13215_v0 = vpop.f32.mrf.mxu0 }
 0x53c   : > { %v3004_v37 = vadd.f32 %v13215_v0, %v15945_v7 }
 0x53d   : > { %v2985_v47 = vpop.f32.mrf.mxu0 }
 0x53e   : > { %v3002_v26 = vadd.f32 %v2985_v47, %v2782_v59 }
 0x53f   : > { %v13238_v15 = vpop.f32.mrf.mxu0 }
 0x540   : > { %v3211_v30 = vadd.f32 %v13238_v15, %v2999_v44 }
 0x541   : > { %v3178_v1 = vpop.f32.mrf.mxu0 }
 0x542   : > { %v3209_v8 = vadd.f32 %v3178_v1, %v2997_v4 }
 0x543   : > { %v13239_v45 = vpop.f32.mrf.mxu0 }
 0x544   : > { %v3212_v17 = vadd.f32 %v13239_v45, %v3000_v50 }
 0x545   : > { %v16000_v3 = vpop.f32.mrf.mxu0 }
 0x547   : > { %v13242_v48 = vpop.f32.mrf.mxu0 }
 0x548   : > { %v3215_v12 = vadd.f32 %v13242_v48, %v3003_v16 }
 0x549   : > { %v3194_v43 = vpop.f32.mrf.mxu0 }
 0x54a   : > { %v3213_v20 = vadd.f32 %v3194_v43, %v3001_v53 }
 0x54b   : > { %v13243_v49 = vpop.f32.mrf.mxu0 }
 0x54c   : > { %v3216_v22 = vadd.f32 %v13243_v49, %v3004_v37 }
 0x54d   : > { %v3197_v57 = vpop.f32.mrf.mxu0 }
 0x54f   : > { %v13266_v32 = vpop.f32.mrf.mxu0 }
 0x550   : > { %v3423_v51 = vadd.f32 %v13266_v32, %v3211_v30 }
 0x551   : > { %v3390_v21 = vpop.f32.mrf.mxu0 }
 0x552   : > { %v16002_v7 = vadd.f32 %v3390_v21, %v3209_v8 }
 0x553   : > { %v13267_v0 = vpop.f32.mrf.mxu0 }
 0x554   : > { %v3424_v44 = vadd.f32 %v13267_v0, %v3212_v17 }
 0x555   : > { %v3393_v15 = vpop.f32.mrf.mxu0 }
 0x557   : > { %v13270_v4 = vpop.f32.mrf.mxu0 }
 0x558   : > { %v3427_v25 = vadd.f32 %v13270_v4, %v3215_v12 }
 0x559   : > { %v3406_v1 = vpop.f32.mrf.mxu0 }
 0x55a   : > { %v3425_v29 = vadd.f32 %v3406_v1, %v3213_v20 }
 0x55b   : > { %v13271_v50 = vpop.f32.mrf.mxu0 }
 0x55d   : > { %v3409_v45 = vpop.f32.mrf.mxu0 }
 0x55f   : > { %v13294_v40 = vpop.f32.mrf.mxu0 }
 0x560   : > { %v3635_v62 = vadd.f32 %v13294_v40, %v3423_v51 }
 0x561   : > { %v16004_v9 = vpop.f32.mrf.mxu0 }
 0x563   : > { %v13295_v16 = vpop.f32.mrf.mxu0 }
 0x564   : > { %v3636_v18 = vadd.f32 %v13295_v16, %v3424_v44  ;;  %v3214_v44 = vadd.f32 %v3197_v57, %v3002_v26 }
 0x565   : > { %v3605_v43 = vpop.f32.mrf.mxu0 }
 0x567   : > { %v13298_v53 = vpop.f32.mrf.mxu0 }
 0x568   : > { %v3639_v40 = vadd.f32 %v13298_v53, %v3427_v25 }
 0x569   : > { %v3618_v37 = vpop.f32.mrf.mxu0 }
 0x56a   : > { %v3637_v16 = vadd.f32 %v3618_v37, %v3425_v29 }
 0x56b   : > { %v13299_v48 = vpop.f32.mrf.mxu0 }
 0x56d   : > { %v3621_v49 = vpop.f32.mrf.mxu0 }
 0x56f   : > { %v13322_v30 = vpop.f32.mrf.mxu0 }
 0x570   : > { %v3847_v61 = vadd.f32 %v13322_v30, %v3635_v62  ;;  %v2998_v62 = vadd.f32 %v15995_v36, %v2766_v31 }
 0x571   : > { %v16006_v32 = vpop.f32.mrf.mxu0 }
 0x573   : > { %v13323_v21 = vpop.f32.mrf.mxu0 }
 0x574   : > { %v3848_v54 = vadd.f32 %v13323_v21, %v3636_v18 }
 0x575   : > { %v3817_v8 = vpop.f32.mrf.mxu0 }
 0x577   : > { %v13326_v17 = vpop.f32.mrf.mxu0 }
 0x578   : > { %v3851_v38 = vadd.f32 %v13326_v17, %v3639_v40 }
 0x579   : > { %v3830_v0 = vpop.f32.mrf.mxu0 }
 0x57a   : > { %v3849_v59 = vadd.f32 %v3830_v0, %v3637_v16 }
 0x57b   : > { %v13327_v23 = vpop.f32.mrf.mxu0 }
 0x57d   : > { %v3833_v6 = vpop.f32.mrf.mxu0 }
 0x57f   : > { %v13350_v46 = vpop.f32.mrf.mxu0 }
 0x580   : > { %v4059_v19 = vadd.f32 %v13350_v46, %v3847_v61  ;;  %v3428_v61 = vadd.f32 %v13271_v50, %v3216_v22  ;;  %v3633_v50 = vadd.f32 %v16004_v9, %v16002_v7 }
 0x581   : > { %v16008_v55 = vpop.f32.mrf.mxu0 }
 0x582   : > { %v3640_v18 = vadd.f32 %v13299_v48, %v3428_v61 }
 0x583   : > { %v13351_v42 = vpop.f32.mrf.mxu0 }
 0x584   : > { %v4060_v51 = vadd.f32 %v13351_v42, %v3848_v54  ;;  %v3852_v54 = vadd.f32 %v13327_v23, %v3640_v18 }
 0x585   : > { %v4029_v41 = vpop.f32.mrf.mxu0 }
 0x587   : > { %v13354_v27 = vpop.f32.mrf.mxu0 }
 0x588   : > { %v4063_v63 = vadd.f32 %v13354_v27, %v3851_v38 }
 0x589   : > { %v4042_v10 = vpop.f32.mrf.mxu0 }
 0x58a   : > { %v4061_v31 = vadd.f32 %v4042_v10, %v3849_v59  ;;  %v3845_v10 = vadd.f32 %v16006_v32, %v3633_v50  ;;  %v17211_v50 = vld [vmem:[#allocation31_spill] sm:$0xff] }
 0x58b   : > { %v13355_v33 = vpop.f32.mrf.mxu0 }
 0x58c   : > { %v4064_v4 = vadd.f32 %v13355_v33, %v3852_v54  ;;  %v4057_v33 = vadd.f32 %v16008_v55, %v3845_v10  ;;  %v17217_v10 = vld [vmem:[#allocation37_spill] sm:$0xff] }
 0x58d   : > { %v4045_v58 = vpop.f32.mrf.mxu0 }
 0x58f   : > { %v13378_v56 = vpop.f32.mrf.mxu0 }
 0x590   : > { %v4271_v5 = vadd.f32 %v13378_v56, %v4059_v19  ;;  %v3210_v56 = vadd.f32 %v16000_v3, %v2998_v62  ;;  %v3426_v19 = vadd.f32 %v3409_v45, %v3214_v44  ;;  %v14650_v62 = vld [vmem:[%s14947_s3 + $0x10] sm:$0xff]  }
 0x591   : > { %v4238_v35 = vpop.f32.mrf.mxu0 }
 0x592   : > { %v4286_v60 = vadd.f32 %v11414_v24, %v4271_v5  ;;  %v3422_v20 = vadd.f32 %v3393_v15, %v3210_v56  ;;  %v3638_v25 = vadd.f32 %v3621_v49, %v3426_v19  ;;  %v4269_v40 = vadd.f32 %v4238_v35, %v4057_v33  ;;  %v17221_v33 = vld [vmem:[#allocation41_spill] sm:$0xff] }
 0x593   : > { %v13379_v46 = vpop.f32.mrf.mxu0 }
 0x594   : > { %v4272_v12 = vadd.f32 %v13379_v46, %v4060_v51  ;;  %v4294_v57 = vmax.f32 %v4286_v60, 0.0  ;;  %v3634_v29 = vadd.f32 %v3605_v43, %v3422_v20  ;;  %v3850_v5 = vadd.f32 %v3833_v6, %v3638_v25 }
 0x595   : > { %v4241_v14 = vpop.f32.mrf.mxu0 }
 0x596   : > { %v4287_v47 = vadd.f32 %v11414_v24, %v4272_v12  ;;  %v3846_v45 = vadd.f32 %v3817_v8, %v3634_v29  ;;  %v4062_v15 = vadd.f32 %v4045_v58, %v3850_v5  ;;  %v17206_v29 = vld [vmem:[#allocation18_spill] sm:$0xff]  ;;  %v17208_v5 = vld [vmem:[#allocation15_spill] sm:$0xff] }
 0x597   : > { %v13382_v42 = vpop.f32.mrf.mxu0 }
 0x598   : > { %v4295_v26 = vmax.f32 %v4287_v47, 0.0  ;;  %v4275_v36 = vadd.f32 %v13382_v42, %v4063_v63  ;;  %v4058_v48 = vadd.f32 %v4029_v41, %v3846_v45  ;;  %v4284_v41 = vadd.f32 %v11414_v24, %v4269_v40  ;;  %v17213_v45 = vld [vmem:[#allocation33_spill] sm:$0xff] }
 0x599   : > { %v4254_v22 = vpop.f32.mrf.mxu0  ;;  %v17225_v40 = vld [vmem:[#allocation45_spill] sm:$0xff] }
 0x59a   : > { %v16017_v1 = vpack.c.bf16 %v4295_v26, %v4294_v57  ;;  %v4273_v3 = vadd.f32 %v4254_v22, %v4061_v31  ;;  %v4290_v53 = vadd.f32 %v11414_v24, %v4275_v36  ;;  %v4270_v6 = vadd.f32 %v4241_v14, %v4058_v48  ;;  %v17203_v26 = vld [vmem:[#allocation22_spill] sm:$0xff]  ;;  %v17204_v36 = vld [vmem:[#allocation19_spill] sm:$0xff]  ;;  %v17207_v22 = vld [vmem:[#allocation20_spill] sm:$0xff] }
 0x59b   : > { %v13383_v27 = vpop.f32.mrf.mxu0  ;;  %v4292_v55 = vmax.f32 %v4284_v41, 0.0  ;;  %v17219_v48 = vld [vmem:[#allocation39_spill] sm:$0xff] }
 0x59c   : > { %v4276_v23 = vadd.f32 %v13383_v27, %v4064_v4  ;;  %v4288_v49 = vadd.f32 %v11414_v24, %v4273_v3  ;;  %v4298_v21 = vmax.f32 %v4290_v53, 0.0  ;;  %v4285_v8 = vadd.f32 %v11414_v24, %v4270_v6  ;;  %v17209_v4 = vld [vmem:[#allocation16_spill] sm:$0xff]  ;;  %v17210_v3 = vld [vmem:[#allocation30_spill] sm:$0xff]  ;;  %v17215_v53 = vld [vmem:[#allocation35_spill] sm:$0xff] }
 0x59d   : > { %v4257_v37 = vpop.f32.mrf.mxu0  ;;  %v17212_v27 = vld [vmem:[#allocation32_spill] sm:$0xff]  ;;  %v17222_v6 = vld [vmem:[#allocation42_spill] sm:$0xff] }
 0x59e   : > { %v4291_v43 = vadd.f32 %v11414_v24, %v4276_v23  ;;  %v4274_v30 = vadd.f32 %v4257_v37, %v4062_v15  ;;  %v4296_v9 = vmax.f32 %v4288_v49, 0.0  ;;  %v4293_v35 = vmax.f32 %v4285_v8, 0.0  ;;  %v17214_v15 = vld [vmem:[#allocation34_spill] sm:$0xff]  ;;  %v17216_v23 = vld [vmem:[#allocation36_spill] sm:$0xff]  ;;  %v17229_v8 = vld [vmem:[#allocation49_spill] sm:$0xff] }
 0x59f   : > { %v17218_v37 = vld [vmem:[#allocation38_spill] sm:$0xff]  ;;  %v17220_v49 = vld [vmem:[#allocation40_spill] sm:$0xff] }
 0x5a0   : > { %v4299_v17 = vmax.f32 %v4291_v43, 0.0  ;;  %v4289_v0 = vadd.f32 %v11414_v24, %v4274_v30  ;;  %v16037_v32 = vpack.c.bf16 %v4293_v35, %v4292_v55  ;;  %v14649_v24 = vld [vmem:[%s14947_s3 + $0x18] sm:$0xff]   ;;  %v14653_v43 = vld [vmem:[%s14947_s3 + $0x28] sm:$0xff]   ;;  %v14654_v30 = vld [vmem:[%s14947_s3 + $0x20] sm:$0xff]  }
 0x5a2   : > { %v16023_v7 = vpack.c.bf16 %v4299_v17, %v4298_v21  ;;  %v4297_v58 = vmax.f32 %v4289_v0, 0.0  ;;  %v17223_v21 = vld [vmem:[#allocation43_spill] sm:$0xff]  ;;  %v17224_v17 = vld [vmem:[#allocation44_spill] sm:$0xff]  ;;  %v14655_v0 = vld [vmem:[%s14947_s3 + $0x38] sm:$0xff]  }
 0x5a4   : > { %v16025_v51 = vpack.c.bf16 %v4297_v58, %v4296_v9  ;;  %13384 = vmatprep.subr.bf16.mxu1 %v16023_v7  ;;  %13400 = vmatprep.subr.bf16.mxu0 %v16023_v7  ;;  %v17226_v9 = vld [vmem:[#allocation46_spill] sm:$0xff]  ;;  %v17228_v58 = vld [vmem:[#allocation48_spill] sm:$0xff] }
 0x5a5   : > { %13385 = vmatpush3.bf16.msra.mxu1 %v16023_v7  ;;  %13401 = vmatpush3.bf16.msra.mxu0 %v16023_v7 }
 0x5a6   : > { %13386 = vmatprep.subr.bf16.mxu1 %v16025_v51  ;;  %13402 = vmatprep.subr.bf16.mxu0 %v16025_v51 }
 0x5a9   : > { %13387 = vmatpush3.bf16.msra.mxu1 %v16025_v51  ;;  %13403 = vmatpush3.bf16.msra.mxu0 %v16025_v51 }
 0x5aa   : > { %13388 = vmatprep.subr.bf16.mxu1 %v16017_v1  ;;  %13404 = vmatprep.subr.bf16.mxu0 %v16017_v1 }
 0x5ad   : > { %13389 = vmatpush3.bf16.msra.mxu1 %v16017_v1  ;;  %13405 = vmatpush3.bf16.msra.mxu0 %v16017_v1 }
 0x5ae   : > { %13390 = vmatprep.subr.bf16.mxu1 %v16037_v32  ;;  %13406 = vmatprep.subr.bf16.mxu0 %v16037_v32 }
 0x5b1   : > { %13391 = vmatpush3.bf16.msra.mxu1 %v16037_v32  ;;  %13407 = vmatpush3.bf16.msra.mxu0 %v16037_v32 }
 0x5b2   : > { %13416 = vmatprep.subr.bf16.mxu1 %v14649_v24 }
 0x5b4   : > { %13393 = vmatmul.mubr.msk.bf16.vlgmr.msra.gmra.mxu1 %vm2414_vm1, %v15678_v34  ;;  %13409 = vmatmul.mubr.msk.bf16.vlgmr.msra.gmra.mxu0 %vm2414_vm1, %v15706_v11  ;;  %v14651_v34 = vld [vmem:[%s14947_s3 + $0x8] sm:$0xff]   ;;  %v14652_v11 = vld [vmem:[%s14947_s3] sm:$0xff]  }
 0x5b5   : > { %13417 = vmatpush3.bf16.msra.mxu1 %v14649_v24  ;;  %13396 = vmatprep.mubr.msk.bf16.mxu1 %vm2414_vm1, %v15682_v28 }
 0x5b6   : > { %13418 = vmatprep.subr.bf16.mxu1 %v14650_v62  ;;  %13412 = vmatprep.mubr.msk.bf16.mxu0 %vm2414_vm1, %v15710_v2 }
 0x5b7   : > { %13428 = vmatprep.subr.bf16.mxu0 %v14651_v34 }
 0x5b8   : > { %13429 = vmatpush3.bf16.msra.mxu0 %v14651_v34 }
 0x5b9   : > { %13419 = vmatpush3.bf16.msra.mxu1 %v14650_v62  ;;  %13430 = vmatprep.subr.bf16.mxu0 %v14652_v11 }
 0x5ba   : > { %13440 = vmatprep.subr.bf16.mxu1 %v16023_v7 }
 0x5bc   : > { %13397 = vmatmul.mubr.msk.bf16.gmra.mxu1 %vm2414_vm1, %v15692_v52  ;;  %13413 = vmatmul.mubr.msk.bf16.gmra.mxu0 %vm2414_vm1, %v15717_v13 }
 0x5bd   : > { %13431 = vmatpush3.bf16.msra.mxu0 %v14652_v11 }
 0x5be   : > { %13456 = vmatprep.subr.bf16.mxu0 %v14653_v43 }
 0x674   : > { %v13394_v28 = vpop.f32.mrf.mxu1  ;;  %v13410_v44 = vpop.f32.mrf.mxu0 }
 0x676   : > { %v4338_v61 = vpop.f32.mrf.mxu1  ;;  %v4411_v46 = vpop.f32.mrf.mxu0 }
 0x678   : > { %v13395_v2 = vpop.f32.mrf.mxu1  ;;  %v13411_v16 = vpop.f32.mrf.mxu0 }
 0x679   : > { %v4370_v38 = vpack.c.bf16 %v13395_v2, %v13394_v28  ;;  %v4443_v19 = vpack.c.bf16 %v13411_v16, %v13410_v44 }
 0x67a   : > { %v4341_v60 = vpop.f32.mrf.mxu1  ;;  %v4414_v12 = vpop.f32.mrf.mxu0 }
 0x67b   : > { %v4369_v56 = vpack.c.bf16 %v4341_v60, %v4338_v61  ;;  %v4442_v52 = vpack.c.bf16 %v4414_v12, %v4411_v46 }
 0x67c   : > { %v13398_v18 = vpop.f32.mrf.mxu1  ;;  %v13414_v13 = vpop.f32.mrf.mxu0 }
 0x67d   : > { %13420 = vmatprep.mubr.msk.bf16.mxu1 %vm1035_vm0, %v4442_v52  ;;  %13432 = vmatprep.mubr.msk.bf16.mxu0 %vm1035_vm0, %v4369_v56 }
 0x67e   : > { %v4354_v14 = vpop.f32.mrf.mxu1  ;;  %v4427_v59 = vpop.f32.mrf.mxu0  ;;  %13421 = vmatmul.mubr.msk.bf16.vlgmr.msra.gmra.mxu1 %vm1035_vm0, %v4443_v19  ;;  %13433 = vmatmul.mubr.msk.bf16.vlgmr.msra.gmra.mxu0 %vm1035_vm0, %v4370_v38 }
 0x67f   : > { %13441 = vmatpush3.bf16.msra.mxu1 %v16023_v7  ;;  %13457 = vmatpush3.bf16.msra.mxu0 %v14653_v43 }
 0x680   : > { %13442 = vmatprep.subr.bf16.mxu1 %v16025_v51  ;;  %v13399_v63 = vpop.f32.mrf.mxu1  ;;  %v13415_v47 = vpop.f32.mrf.mxu0  ;;  %13458 = vmatprep.subr.bf16.mxu0 %v14654_v30 }
 0x681   : > { %v4372_v20 = vpack.c.bf16 %v13399_v63, %v13398_v18  ;;  %v4445_v57 = vpack.c.bf16 %v13415_v47, %v13414_v13 }
 0x682   : > { %v4357_v25 = vpop.f32.mrf.mxu1  ;;  %v4430_v54 = vpop.f32.mrf.mxu0 }
 0x683   : > { %v4371_v42 = vpack.c.bf16 %v4357_v25, %v4354_v14  ;;  %v4444_v31 = vpack.c.bf16 %v4430_v54, %v4427_v59  ;;  %13443 = vmatpush3.bf16.msra.mxu1 %v16025_v51  ;;  %13459 = vmatpush3.bf16.msra.mxu0 %v14654_v30 }
 0x684   : > { %13444 = vmatprep.subr.bf16.mxu1 %v16017_v1  ;;  %13484 = vmatprep.subr.bf16.mxu0 %v14655_v0 }
 0x685   : > { %13424 = vmatprep.mubr.msk.bf16.mxu1 %vm1035_vm0, %v4444_v31  ;;  %13436 = vmatprep.mubr.msk.bf16.mxu0 %vm1035_vm0, %v4371_v42  ;;  %v14657_v42 = vld [vmem:[%s14947_s3 + $0x48] sm:$0xff]  }
 0x686   : > { %13425 = vmatmul.mubr.msk.bf16.gmra.mxu1 %vm1035_vm0, %v4445_v57  ;;  %13437 = vmatmul.mubr.msk.bf16.gmra.mxu0 %vm1035_vm0, %v4372_v20  ;;  %v14656_v20 = vld [vmem:[%s14947_s3 + $0x30] sm:$0xff]  }
 0x687   : > { %13445 = vmatpush3.bf16.msra.mxu1 %v16017_v1  ;;  %13448 = vmatprep.mubr.msk.bf16.mxu1 %vm2414_vm1, %v15733_v39  ;;  %v17205_v39 = vld [vmem:[#allocation17_spill] sm:$0xff] }
 0x688   : > { %13446 = vmatprep.subr.bf16.mxu1 %v16037_v32 }
 0x68b   : > { %13447 = vmatpush3.bf16.msra.mxu1 %v16037_v32 }
 0x68c   : > { %13468 = vmatprep.subr.bf16.mxu1 %v16023_v7 }
 0x68e   : > { %13449 = vmatmul.mubr.msk.bf16.vlgmr.msra.gmra.mxu1 %vm2414_vm1, %v17203_v26 }
 0x68f   : > { %13469 = vmatpush3.bf16.msra.mxu1 %v16023_v7  ;;  %13452 = vmatprep.mubr.msk.bf16.mxu1 %vm2414_vm1, %v17204_v36 }
 0x690   : > { %13470 = vmatprep.subr.bf16.mxu1 %v16025_v51 }
 0x693   : > { %13471 = vmatpush3.bf16.msra.mxu1 %v16025_v51 }
 0x694   : > { %13472 = vmatprep.subr.bf16.mxu1 %v16017_v1 }
 0x696   : > { %13453 = vmatmul.mubr.msk.bf16.gmra.mxu1 %vm2414_vm1, %v17205_v39 }
 0x697   : > { %13473 = vmatpush3.bf16.msra.mxu1 %v16017_v1  ;;  %13476 = vmatprep.mubr.msk.bf16.mxu1 %vm2414_vm1, %v17206_v29 }
 0x698   : > { %13474 = vmatprep.subr.bf16.mxu1 %v16037_v32 }
 0x69b   : > { %13475 = vmatpush3.bf16.msra.mxu1 %v16037_v32 }
 0x69c   : > { %13496 = vmatprep.subr.bf16.mxu1 %v16023_v7 }
 0x69e   : > { %13477 = vmatmul.mubr.msk.bf16.vlgmr.msra.gmra.mxu1 %vm2414_vm1, %v17207_v22 }
 0x69f   : > { %13497 = vmatpush3.bf16.msra.mxu1 %v16023_v7  ;;  %13480 = vmatprep.mubr.msk.bf16.mxu1 %vm2414_vm1, %v17208_v5 }
 0x6a0   : > { %13498 = vmatprep.subr.bf16.mxu1 %v16025_v51 }
 0x6a3   : > { %13499 = vmatpush3.bf16.msra.mxu1 %v16025_v51 }
 0x6a4   : > { %13500 = vmatprep.subr.bf16.mxu1 %v16017_v1 }
 0x6a6   : > { %13481 = vmatmul.mubr.msk.bf16.gmra.mxu1 %vm2414_vm1, %v17209_v4 }
 0x6a7   : > { %13501 = vmatpush3.bf16.msra.mxu1 %v16017_v1  ;;  %13504 = vmatprep.mubr.msk.bf16.mxu1 %vm2414_vm1, %v17210_v3 }
 0x6a8   : > { %13502 = vmatprep.subr.bf16.mxu1 %v16037_v32 }
 0x6ab   : > { %13503 = vmatpush3.bf16.msra.mxu1 %v16037_v32 }
 0x6ac   : > { %13524 = vmatprep.subr.bf16.mxu1 %v16023_v7 }
 0x6ae   : > { %13505 = vmatmul.mubr.msk.bf16.vlgmr.msra.gmra.mxu1 %vm2414_vm1, %v17211_v50  ;;  %v14658_v50 = vld [vmem:[%s14947_s3 + $0x40] sm:$0xff]  }
 0x6af   : > { %13525 = vmatpush3.bf16.msra.mxu1 %v16023_v7  ;;  %13508 = vmatprep.mubr.msk.bf16.mxu1 %vm2414_vm1, %v17212_v27 }
 0x6b0   : > { %13526 = vmatprep.subr.bf16.mxu1 %v16025_v51 }
 0x6b3   : > { %13527 = vmatpush3.bf16.msra.mxu1 %v16025_v51 }
 0x6b4   : > { %13528 = vmatprep.subr.bf16.mxu1 %v16017_v1 }
 0x6b6   : > { %13509 = vmatmul.mubr.msk.bf16.gmra.mxu1 %vm2414_vm1, %v17213_v45 }
 0x6b7   : > { %13529 = vmatpush3.bf16.msra.mxu1 %v16017_v1  ;;  %13532 = vmatprep.mubr.msk.bf16.mxu1 %vm2414_vm1, %v17214_v15  ;;  %v14659_v15 = vld [vmem:[%s14947_s3 + $0x58] sm:$0xff]  }
 0x6b8   : > { %13530 = vmatprep.subr.bf16.mxu1 %v16037_v32 }
 0x6bb   : > { %13531 = vmatpush3.bf16.msra.mxu1 %v16037_v32 }
 0x6bc   : > { %13552 = vmatprep.subr.bf16.mxu1 %v16023_v7 }
 0x6be   : > { %13533 = vmatmul.mubr.msk.bf16.vlgmr.msra.gmra.mxu1 %vm2414_vm1, %v17215_v53 }
 0x6bf   : > { %13553 = vmatpush3.bf16.msra.mxu1 %v16023_v7  ;;  %13536 = vmatprep.mubr.msk.bf16.mxu1 %vm2414_vm1, %v17216_v23 }
 0x6c0   : > { %13554 = vmatprep.subr.bf16.mxu1 %v16025_v51 }
 0x6c3   : > { %13555 = vmatpush3.bf16.msra.mxu1 %v16025_v51 }
 0x6c4   : > { %13556 = vmatprep.subr.bf16.mxu1 %v16017_v1 }
 0x6c6   : > { %13537 = vmatmul.mubr.msk.bf16.gmra.mxu1 %vm2414_vm1, %v17217_v10 }
 0x6c7   : > { %13557 = vmatpush3.bf16.msra.mxu1 %v16017_v1  ;;  %13560 = vmatprep.mubr.msk.bf16.mxu1 %vm2414_vm1, %v17218_v37 }
 0x6c8   : > { %13558 = vmatprep.subr.bf16.mxu1 %v16037_v32 }
 0x6cb   : > { %13559 = vmatpush3.bf16.msra.mxu1 %v16037_v32 }
 0x6cc   : > { %13580 = vmatprep.subr.bf16.mxu1 %v16023_v7 }
 0x6ce   : > { %13561 = vmatmul.mubr.msk.bf16.vlgmr.msra.gmra.mxu1 %vm2414_vm1, %v17219_v48 }
 0x6cf   : > { %13581 = vmatpush3.bf16.msra.mxu1 %v16023_v7  ;;  %13564 = vmatprep.mubr.msk.bf16.mxu1 %vm2414_vm1, %v17220_v49 }
 0x6d0   : > { %13582 = vmatprep.subr.bf16.mxu1 %v16025_v51 }
 0x6d3   : > { %13583 = vmatpush3.bf16.msra.mxu1 %v16025_v51 }
 0x6d4   : > { %13584 = vmatprep.subr.bf16.mxu1 %v16017_v1 }
 0x6d6   : > { %13565 = vmatmul.mubr.msk.bf16.gmra.mxu1 %vm2414_vm1, %v17221_v33 }
 0x6d7   : > { %13585 = vmatpush3.bf16.msra.mxu1 %v16017_v1  ;;  %13588 = vmatprep.mubr.msk.bf16.mxu1 %vm2414_vm1, %v17222_v6 }
 0x6d8   : > { %13586 = vmatprep.subr.bf16.mxu1 %v16037_v32 }
 0x6db   : > { %13587 = vmatpush3.bf16.msra.mxu1 %v16037_v32 }
 0x6dc   : > { %13608 = vmatprep.subr.bf16.mxu1 %v16023_v7 }
 0x6de   : > { %13589 = vmatmul.mubr.msk.bf16.vlgmr.msra.gmra.mxu1 %vm2414_vm1, %v17223_v21  ;;  %v14660_v21 = vld [vmem:[%s14947_s3 + $0x50] sm:$0xff]  }
 0x6df   : > { %13609 = vmatpush3.bf16.msra.mxu1 %v16023_v7  ;;  %13592 = vmatprep.mubr.msk.bf16.mxu1 %vm2414_vm1, %v17224_v17  ;;  %v17227_v7 = vld [vmem:[#allocation47_spill] sm:$0xff] }
 0x6e0   : > { %13610 = vmatprep.subr.bf16.mxu1 %v16025_v51 }
 0x6e3   : > { %13611 = vmatpush3.bf16.msra.mxu1 %v16025_v51 }
 0x6e4   : > { %13612 = vmatprep.subr.bf16.mxu1 %v16017_v1 }
 0x6e6   : > { %13593 = vmatmul.mubr.msk.bf16.gmra.mxu1 %vm2414_vm1, %v17225_v40  ;;  %v14661_v40 = vld [vmem:[%s14947_s3 + $0x68] sm:$0xff]  }
 0x6e7   : > { %13613 = vmatpush3.bf16.msra.mxu1 %v16017_v1  ;;  %13616 = vmatprep.mubr.msk.bf16.mxu1 %vm2414_vm1, %v17226_v9 }
 0x6e8   : > { %13614 = vmatprep.subr.bf16.mxu1 %v16037_v32 }
 0x6eb   : > { %13615 = vmatpush3.bf16.msra.mxu1 %v16037_v32 }
 0x6ee   : > { %13617 = vmatmul.mubr.msk.bf16.vlgmr.msra.gmra.mxu1 %vm2414_vm1, %v17227_v7 }
 0x6ef   : > { %13620 = vmatprep.mubr.msk.bf16.mxu1 %vm2414_vm1, %v17228_v58 }
 0x6f6   : > { %13621 = vmatmul.mubr.msk.bf16.gmra.mxu1 %vm2414_vm1, %v17229_v8 }
 0x73e   : > { %v13422_v51 = vpop.f32.mrf.mxu1  ;;  %v13434_v41 = vpop.f32.mrf.mxu0 }
 0x73f   : > { %v16184_v35 = vadd.f32 %v13434_v41, %v13422_v51 }
 0x740   : > { %v4509_v1 = vpop.f32.mrf.mxu1  ;;  %v4598_v55 = vpop.f32.mrf.mxu0 }
 0x741   : > { %v16186_v24 = vadd.f32 %v4598_v55, %v4509_v1 }
 0x742   : > { %v13423_v62 = vpop.f32.mrf.mxu1  ;;  %v13435_v34 = vpop.f32.mrf.mxu0 }
 0x743   : > { %v16188_v32 = vadd.f32 %v13435_v34, %v13423_v62 }
 0x744   : > { %v16190_v11 = vpop.f32.mrf.mxu1  ;;  %v16192_v28 = vpop.f32.mrf.mxu0 }
 0x746   : > { %v13426_v44 = vpop.f32.mrf.mxu1  ;;  %v13438_v61 = vpop.f32.mrf.mxu0 }
 0x747   : > { %v16194_v46 = vadd.f32 %v13438_v61, %v13426_v44  ;;  %v14662_v44 = vld [vmem:[%s14947_s3 + $0x60] sm:$0xff]  }
 0x748   : > { %v4525_v2 = vpop.f32.mrf.mxu1  ;;  %v4614_v16 = vpop.f32.mrf.mxu0 }
 0x749   : > { %v16196_v38 = vadd.f32 %v4614_v16, %v4525_v2  ;;  %v14663_v16 = vld [vmem:[%s14947_s3 + $0x78] sm:$0xff]  }
 0x74a   : > { %v13427_v60 = vpop.f32.mrf.mxu1  ;;  %v13439_v12 = vpop.f32.mrf.mxu0 }
 0x74b   : > { %v16198_v56 = vadd.f32 %v13439_v12, %v13427_v60 }
 0x74c   : > { %v16200_v52 = vpop.f32.mrf.mxu1 }
 0x74e   : > { %v13450_v19 = vpop.f32.mrf.mxu1 }
 0x750   : > { %v4663_v18 = vpop.f32.mrf.mxu1 }
 0x752   : > { %v13451_v13 = vpop.f32.mrf.mxu1 }
 0x753   : > { %v4695_v63 = vpack.c.bf16 %v13451_v13, %v13450_v19 }
 0x754   : > { %v4666_v14 = vpop.f32.mrf.mxu1 }
 0x755   : > { %v4694_v59 = vpack.c.bf16 %v4666_v14, %v4663_v18 }
 0x756   : > { %v13454_v47 = vpop.f32.mrf.mxu1 }
 0x757   : > { %13460 = vmatprep.mubr.msk.bf16.mxu0 %vm1035_vm0, %v4694_v59 }
 0x758   : > { %v4679_v25 = vpop.f32.mrf.mxu1  ;;  %13461 = vmatmul.mubr.msk.bf16.vlgmr.msra.gmra.mxu0 %vm1035_vm0, %v4695_v63 }
 0x759   : > { %13485 = vmatpush3.bf16.msra.mxu0 %v14655_v0 }
 0x75a   : > { %v13455_v54 = vpop.f32.mrf.mxu1  ;;  %13486 = vmatprep.subr.bf16.mxu0 %v14656_v20 }
 0x75b   : > { %v4697_v26 = vpack.c.bf16 %v13455_v54, %v13454_v47 }
 0x75c   : > { %v4682_v31 = vpop.f32.mrf.mxu1 }
 0x75d   : > { %v4696_v57 = vpack.c.bf16 %v4682_v31, %v4679_v25  ;;  %13487 = vmatpush3.bf16.msra.mxu0 %v14656_v20  ;;  %v14664_v25 = vld [vmem:[%s14947_s3 + $0x70] sm:$0xff]   ;;  %v14665_v31 = vld [vmem:[%s14947_s3 + $0x88] sm:$0xff]  }
 0x75e   : > { %v13478_v36 = vpop.f32.mrf.mxu1  ;;  %13512 = vmatprep.subr.bf16.mxu0 %v14657_v42 }
 0x75f   : > { %13464 = vmatprep.mubr.msk.bf16.mxu0 %vm1035_vm0, %v4696_v57 }
 0x760   : > { %13465 = vmatmul.mubr.msk.bf16.gmra.mxu0 %vm1035_vm0, %v4697_v26  ;;  %v4834_v39 = vpop.f32.mrf.mxu1 }
 0x762   : > { %v13479_v29 = vpop.f32.mrf.mxu1 }
 0x763   : > { %v4866_v4 = vpack.c.bf16 %v13479_v29, %v13478_v36 }
 0x764   : > { %v4837_v22 = vpop.f32.mrf.mxu1 }
 0x765   : > { %v4865_v5 = vpack.c.bf16 %v4837_v22, %v4834_v39 }
 0x766   : > { %v13482_v3 = vpop.f32.mrf.mxu1 }
 0x767   : > { %13488 = vmatprep.mubr.msk.bf16.mxu0 %vm1035_vm0, %v4865_v5 }
 0x768   : > { %v4850_v27 = vpop.f32.mrf.mxu1  ;;  %13489 = vmatmul.mubr.msk.bf16.vlgmr.msra.gmra.mxu0 %vm1035_vm0, %v4866_v4 }
 0x769   : > { %13513 = vmatpush3.bf16.msra.mxu0 %v14657_v42 }
 0x76a   : > { %v13483_v45 = vpop.f32.mrf.mxu1  ;;  %13514 = vmatprep.subr.bf16.mxu0 %v14658_v50 }
 0x76b   : > { %v4868_v10 = vpack.c.bf16 %v13483_v45, %v13482_v3 }
 0x76c   : > { %v4853_v53 = vpop.f32.mrf.mxu1 }
 0x76d   : > { %v4867_v23 = vpack.c.bf16 %v4853_v53, %v4850_v27  ;;  %13515 = vmatpush3.bf16.msra.mxu0 %v14658_v50  ;;  %v14666_v27 = vld [vmem:[%s14947_s3 + $0x80] sm:$0xff]  }
 0x76e   : > { %v13506_v37 = vpop.f32.mrf.mxu1  ;;  %13540 = vmatprep.subr.bf16.mxu0 %v14659_v15 }
 0x76f   : > { %13492 = vmatprep.mubr.msk.bf16.mxu0 %vm1035_vm0, %v4867_v23 }
 0x770   : > { %13493 = vmatmul.mubr.msk.bf16.gmra.mxu0 %vm1035_vm0, %v4868_v10  ;;  %v5005_v48 = vpop.f32.mrf.mxu1 }
 0x772   : > { %v13507_v49 = vpop.f32.mrf.mxu1 }
 0x773   : > { %v5037_v33 = vpack.c.bf16 %v13507_v49, %v13506_v37 }
 0x774   : > { %v5008_v43 = vpop.f32.mrf.mxu1 }
 0x775   : > { %v5036_v30 = vpack.c.bf16 %v5008_v43, %v5005_v48 }
 0x776   : > { %v13510_v6 = vpop.f32.mrf.mxu1 }
 0x777   : > { %13516 = vmatprep.mubr.msk.bf16.mxu0 %vm1035_vm0, %v5036_v30 }
 0x778   : > { %v5021_v17 = vpop.f32.mrf.mxu1  ;;  %13517 = vmatmul.mubr.msk.bf16.vlgmr.msra.gmra.mxu0 %vm1035_vm0, %v5037_v33 }
 0x779   : > { %13541 = vmatpush3.bf16.msra.mxu0 %v14659_v15 }
 0x77a   : > { %v13511_v0 = vpop.f32.mrf.mxu1  ;;  %13542 = vmatprep.subr.bf16.mxu0 %v14660_v21 }
 0x77b   : > { %v5039_v58 = vpack.c.bf16 %v13511_v0, %v13510_v6 }
 0x77c   : > { %v5024_v9 = vpop.f32.mrf.mxu1 }
 0x77d   : > { %v5038_v7 = vpack.c.bf16 %v5024_v9, %v5021_v17  ;;  %13543 = vmatpush3.bf16.msra.mxu0 %v14660_v21 }
 0x77e   : > { %v13534_v8 = vpop.f32.mrf.mxu1  ;;  %13568 = vmatprep.subr.bf16.mxu0 %v14661_v40 }
 0x77f   : > { %13520 = vmatprep.mubr.msk.bf16.mxu0 %vm1035_vm0, %v5038_v7  ;;  %v14902_v7 = vmov 0.0  }
 0x780   : > { %13521 = vmatmul.mubr.msk.bf16.gmra.mxu0 %vm1035_vm0, %v5039_v58  ;;  %v5176_v51 = vpop.f32.mrf.mxu1  ;;  %13636 = vmatprep.subr.bf16.mxu1 %v14902_v7  ;;  %v16243_v58 = vpop.f32.mrf.mxu0 }
 0x781   : > { %13644 = vmatprep.mubr.msk.bf16.mxu1 %vm14903_vm2, %v14902_v7 }
 0x782   : > { %v13535_v41 = vpop.f32.mrf.mxu1 }
 0x783   : > { %v5208_v62 = vpack.c.bf16 %v13535_v41, %v13534_v8 }
 0x784   : > { %v5179_v1 = vpop.f32.mrf.mxu1 }
 0x785   : > { %v5207_v55 = vpack.c.bf16 %v5179_v1, %v5176_v51 }
 0x786   : > { %v13538_v34 = vpop.f32.mrf.mxu1 }
 0x787   : > { %13544 = vmatprep.mubr.msk.bf16.mxu0 %vm1035_vm0, %v5207_v55 }
 0x788   : > { %v5192_v61 = vpop.f32.mrf.mxu1  ;;  %13545 = vmatmul.mubr.msk.bf16.vlgmr.msra.gmra.mxu0 %vm1035_vm0, %v5208_v62 }
 0x789   : > { %13569 = vmatpush3.bf16.msra.mxu0 %v14661_v40 }
 0x78a   : > { %v13539_v2 = vpop.f32.mrf.mxu1  ;;  %13570 = vmatprep.subr.bf16.mxu0 %v14662_v44 }
 0x78b   : > { %v5210_v19 = vpack.c.bf16 %v13539_v2, %v13538_v34 }
 0x78c   : > { %v5195_v60 = vpop.f32.mrf.mxu1 }
 0x78d   : > { %v5209_v12 = vpack.c.bf16 %v5195_v60, %v5192_v61  ;;  %13571 = vmatpush3.bf16.msra.mxu0 %v14662_v44 }
 0x78e   : > { %v13562_v18 = vpop.f32.mrf.mxu1  ;;  %13596 = vmatprep.subr.bf16.mxu0 %v14663_v16 }
 0x78f   : > { %13548 = vmatprep.mubr.msk.bf16.mxu0 %vm1035_vm0, %v5209_v12 }
 0x790   : > { %13549 = vmatmul.mubr.msk.bf16.gmra.mxu0 %vm1035_vm0, %v5210_v19  ;;  %v5347_v13 = vpop.f32.mrf.mxu1 }
 0x792   : > { %v13563_v14 = vpop.f32.mrf.mxu1 }
 0x793   : > { %v5379_v47 = vpack.c.bf16 %v13563_v14, %v13562_v18 }
 0x794   : > { %v5350_v59 = vpop.f32.mrf.mxu1 }
 0x795   : > { %v5378_v63 = vpack.c.bf16 %v5350_v59, %v5347_v13 }
 0x796   : > { %v13566_v20 = vpop.f32.mrf.mxu1 }
 0x797   : > { %13572 = vmatprep.mubr.msk.bf16.mxu0 %vm1035_vm0, %v5378_v63 }
 0x798   : > { %v5363_v54 = vpop.f32.mrf.mxu1  ;;  %13573 = vmatmul.mubr.msk.bf16.vlgmr.msra.gmra.mxu0 %vm1035_vm0, %v5379_v47 }
 0x799   : > { %13597 = vmatpush3.bf16.msra.mxu0 %v14663_v16 }
 0x79a   : > { %v13567_v42 = vpop.f32.mrf.mxu1  ;;  %13598 = vmatprep.subr.bf16.mxu0 %v14664_v25 }
 0x79b   : > { %v5381_v36 = vpack.c.bf16 %v13567_v42, %v13566_v20 }
 0x79c   : > { %v5366_v57 = vpop.f32.mrf.mxu1 }
 0x79d   : > { %v5380_v26 = vpack.c.bf16 %v5366_v57, %v5363_v54  ;;  %13599 = vmatpush3.bf16.msra.mxu0 %v14664_v25 }
 0x79e   : > { %v13590_v39 = vpop.f32.mrf.mxu1  ;;  %13624 = vmatprep.subr.bf16.mxu0 %v14665_v31 }
 0x79f   : > { %13576 = vmatprep.mubr.msk.bf16.mxu0 %vm1035_vm0, %v5380_v26 }
 0x7a0   : > { %13577 = vmatmul.mubr.msk.bf16.gmra.mxu0 %vm1035_vm0, %v5381_v36  ;;  %v5518_v29 = vpop.f32.mrf.mxu1 }
 0x7a2   : > { %v13591_v22 = vpop.f32.mrf.mxu1 }
 0x7a3   : > { %v5550_v3 = vpack.c.bf16 %v13591_v22, %v13590_v39 }
 0x7a4   : > { %v5521_v5 = vpop.f32.mrf.mxu1 }
 0x7a5   : > { %v5549_v4 = vpack.c.bf16 %v5521_v5, %v5518_v29 }
 0x7a6   : > { %v13594_v50 = vpop.f32.mrf.mxu1 }
 0x7a7   : > { %13600 = vmatprep.mubr.msk.bf16.mxu0 %vm1035_vm0, %v5549_v4 }
 0x7a8   : > { %v5534_v45 = vpop.f32.mrf.mxu1  ;;  %13601 = vmatmul.mubr.msk.bf16.vlgmr.msra.gmra.mxu0 %vm1035_vm0, %v5550_v3 }
 0x7a9   : > { %13625 = vmatpush3.bf16.msra.mxu0 %v14665_v31 }
 0x7aa   : > { %v13595_v15 = vpop.f32.mrf.mxu1  ;;  %13626 = vmatprep.subr.bf16.mxu0 %v14666_v27 }
 0x7ab   : > { %v5552_v10 = vpack.c.bf16 %v13595_v15, %v13594_v50 }
 0x7ac   : > { %v5537_v53 = vpop.f32.mrf.mxu1 }
 0x7ad   : > { %v5551_v23 = vpack.c.bf16 %v5537_v53, %v5534_v45  ;;  %13627 = vmatpush3.bf16.msra.mxu0 %v14666_v27 }
 0x7ae   : > { %v13618_v37 = vpop.f32.mrf.mxu1  ;;  %13648 = vmatprep.subr.bf16.mxu0 %v14902_v7 }
 0x7af   : > { %13604 = vmatprep.mubr.msk.bf16.mxu0 %vm1035_vm0, %v5551_v23 }
 0x7b0   : > { %13605 = vmatmul.mubr.msk.bf16.gmra.mxu0 %vm1035_vm0, %v5552_v10  ;;  %v5689_v48 = vpop.f32.mrf.mxu1 }
 0x7b2   : > { %v13619_v49 = vpop.f32.mrf.mxu1 }
 0x7b3   : > { %v5721_v33 = vpack.c.bf16 %v13619_v49, %v13618_v37 }
 0x7b4   : > { %v5692_v43 = vpop.f32.mrf.mxu1 }
 0x7b5   : > { %v5720_v30 = vpack.c.bf16 %v5692_v43, %v5689_v48 }
 0x7b6   : > { %v13622_v6 = vpop.f32.mrf.mxu1 }
 0x7b7   : > { %13628 = vmatprep.mubr.msk.bf16.mxu0 %vm1035_vm0, %v5720_v30 }
 0x7b8   : > { %v5705_v21 = vpop.f32.mrf.mxu1  ;;  %13629 = vmatmul.mubr.msk.bf16.vlgmr.msra.gmra.mxu0 %vm1035_vm0, %v5721_v33 }
 0x7ba   : > { %v13623_v17 = vpop.f32.mrf.mxu1 }
 0x7bb   : > { %v5723_v9 = vpack.c.bf16 %v13623_v17, %v13622_v6 }
 0x7bc   : > { %v5708_v0 = vpop.f32.mrf.mxu1 }
 0x7bd   : > { %v5722_v40 = vpack.c.bf16 %v5708_v0, %v5705_v21 }
 0x7bf   : > { %13632 = vmatprep.mubr.msk.bf16.mxu0 %vm1035_vm0, %v5722_v40 }
 0x7c0   : > { %13633 = vmatmul.mubr.msk.bf16.gmra.mxu0 %vm1035_vm0, %v5723_v9 }
 0x7c1   : > { %13656 = vmatprep.mubr.msk.bf16.mxu0 %vm14903_vm2, %v14902_v7 }
 0x818   : > { %v13462_v8 = vpop.f32.mrf.mxu0 }
 0x819   : > { %v4794_v51 = vadd.f32 %v13462_v8, %v16184_v35 }
 0x81a   : > { %v4761_v41 = vpop.f32.mrf.mxu0 }
 0x81b   : > { %v4792_v1 = vadd.f32 %v4761_v41, %v16186_v24 }
 0x81c   : > { %v13463_v55 = vpop.f32.mrf.mxu0 }
 0x81d   : > { %v4795_v62 = vadd.f32 %v13463_v55, %v16188_v32 }
 0x81e   : > { %v16252_v34 = vpop.f32.mrf.mxu0 }
 0x820   : > { %v13466_v44 = vpop.f32.mrf.mxu0 }
 0x821   : > { %v4798_v61 = vadd.f32 %v13466_v44, %v16194_v46 }
 0x822   : > { %v4777_v2 = vpop.f32.mrf.mxu0 }
 0x823   : > { %v4796_v35 = vadd.f32 %v4777_v2, %v16196_v38 }
 0x824   : > { %v13467_v16 = vpop.f32.mrf.mxu0 }
 0x825   : > { %v4799_v24 = vadd.f32 %v13467_v16, %v16198_v56  ;;  %v16272_v16 = vld [vmem:[%s14952_s8] ss:$0 sm:$0xff] }
 0x826   : > { %v4780_v60 = vpop.f32.mrf.mxu0 }
 0x828   : > { %v13490_v32 = vpop.f32.mrf.mxu0 }
 0x829   : > { %v4965_v12 = vadd.f32 %v13490_v32, %v4794_v51 }
 0x82a   : > { %v4932_v19 = vpop.f32.mrf.mxu0 }
 0x82b   : > { %v4963_v18 = vadd.f32 %v4932_v19, %v4792_v1 }
 0x82c   : > { %v13491_v13 = vpop.f32.mrf.mxu0 }
 0x82d   : > { %v4966_v14 = vadd.f32 %v13491_v13, %v4795_v62 }
 0x82e   : > { %v16257_v59 = vpop.f32.mrf.mxu0 }
 0x830   : > { %v13494_v63 = vpop.f32.mrf.mxu0 }
 0x831   : > { %v4969_v47 = vadd.f32 %v13494_v63, %v4798_v61 }
 0x832   : > { %v4948_v20 = vpop.f32.mrf.mxu0 }
 0x833   : > { %v4967_v25 = vadd.f32 %v4948_v20, %v4796_v35 }
 0x834   : > { %v13495_v46 = vpop.f32.mrf.mxu0 }
 0x835   : > { %v4970_v54 = vadd.f32 %v13495_v46, %v4799_v24  ;;  %v4618_v24 = vadd.f32 %v16243_v58, %v16200_v52  ;;  %v4602_v46 = vadd.f32 %v16192_v28, %v16190_v11 }
 0x836   : > { %v4951_v42 = vpop.f32.mrf.mxu0 }
 0x837   : > { %v4797_v13 = vadd.f32 %v4780_v60, %v4618_v24  ;;  %v17230_v60 = vld [vmem:[#allocation25_spill] sm:$0xff] }
 0x838   : > { %v13518_v38 = vpop.f32.mrf.mxu0 }
 0x839   : > { %v5136_v31 = vadd.f32 %v13518_v38, %v4965_v12 }
 0x83a   : > { %v5103_v57 = vpop.f32.mrf.mxu0 }
 0x83b   : > { %v5134_v56 = vadd.f32 %v5103_v57, %v4963_v18  ;;  %v4968_v57 = vadd.f32 %v4951_v42, %v4797_v13  ;;  %v17231_v42 = vld [vmem:[#allocation24_spill] sm:$0xff] }
 0x83c   : > { %v13519_v26 = vpop.f32.mrf.mxu0 }
 0x83d   : > { %v5137_v36 = vadd.f32 %v13519_v26, %v4966_v14 }
 0x83e   : > { %v16259_v39 = vpop.f32.mrf.mxu0 }
 0x840   : > { %v13522_v29 = vpop.f32.mrf.mxu0 }
 0x841   : > { %v5140_v32 = vadd.f32 %v13522_v29, %v4969_v47 }
 0x842   : > { %v5119_v22 = vpop.f32.mrf.mxu0 }
 0x843   : > { %v5138_v38 = vadd.f32 %v5119_v22, %v4967_v25 }
 0x844   : > { %v13523_v5 = vpop.f32.mrf.mxu0 }
 0x845   : > { %v5141_v52 = vadd.f32 %v13523_v5, %v4970_v54 }
 0x846   : > { %v5122_v4 = vpop.f32.mrf.mxu0 }
 0x847   : > { %v5139_v29 = vadd.f32 %v5122_v4, %v4968_v57 }
 0x848   : > { %v13546_v3 = vpop.f32.mrf.mxu0 }
 0x849   : > { %v5307_v1 = vadd.f32 %v13546_v3, %v5136_v31 }
 0x84a   : > { %v5274_v50 = vpop.f32.mrf.mxu0 }
 0x84b   : > { %v16261_v27 = vadd.f32 %v5274_v50, %v5134_v56 }
 0x84c   : > { %v13547_v45 = vpop.f32.mrf.mxu0 }
 0x84d   : > { %v5308_v61 = vadd.f32 %v13547_v45, %v5137_v36  ;;  %v4793_v36 = vadd.f32 %v16252_v34, %v4602_v46 }
 0x84e   : > { %v16263_v15 = vpop.f32.mrf.mxu0 }
 0x850   : > { %v13550_v53 = vpop.f32.mrf.mxu0 }
 0x851   : > { %v5311_v14 = vadd.f32 %v13550_v53, %v5140_v32  ;;  %v4964_v53 = vadd.f32 %v16257_v59, %v4793_v36 }
 0x852   : > { %v5290_v23 = vpop.f32.mrf.mxu0 }
 0x853   : > { %v5309_v58 = vadd.f32 %v5290_v23, %v5138_v38  ;;  %v5135_v34 = vadd.f32 %v16259_v39, %v4964_v53 }
 0x854   : > { %v13551_v10 = vpop.f32.mrf.mxu0 }
 0x856   : > { %v5293_v37 = vpop.f32.mrf.mxu0 }
 0x857   : > { %v5310_v25 = vadd.f32 %v5293_v37, %v5139_v29  ;;  %v14668_v29 = vld [vmem:[%s14957_s14] sm:$0xff]  }
 0x858   : > { %v13574_v48 = vpop.f32.mrf.mxu0 }
 0x859   : > { %v5478_v62 = vadd.f32 %v13574_v48, %v5307_v1  ;;  %v5312_v48 = vadd.f32 %v13551_v10, %v5141_v52 }
 0x85a   : > { %v16265_v49 = vpop.f32.mrf.mxu0 }
 0x85c   : > { %v13575_v43 = vpop.f32.mrf.mxu0 }
 0x85d   : > { %v5479_v12 = vadd.f32 %v13575_v43, %v5308_v61 }
 0x85e   : > { %v16267_v30 = vpop.f32.mrf.mxu0 }
 0x860   : > { %v13578_v33 = vpop.f32.mrf.mxu0 }
 0x861   : > { %v5482_v56 = vadd.f32 %v13578_v33, %v5311_v14 }
 0x862   : > { %v5461_v6 = vpop.f32.mrf.mxu0 }
 0x863   : > { %v5480_v11 = vadd.f32 %v5461_v6, %v5309_v58 }
 0x864   : > { %v13579_v21 = vpop.f32.mrf.mxu0 }
 0x865   : > { %v5483_v54 = vadd.f32 %v13579_v21, %v5312_v48  ;;  %v5476_v21 = vadd.f32 %v16265_v49, %v16261_v27  ;;  %v17235_v27 = vld [vmem:[#allocation23_spill] sm:$0xff] }
 0x866   : > { %v5464_v17 = vpop.f32.mrf.mxu0 }
 0x867   : > { %v5481_v4 = vadd.f32 %v5464_v17, %v5310_v25 }
 0x868   : > { %v13602_v0 = vpop.f32.mrf.mxu0 }
 0x869   : > { %v5649_v2 = vadd.f32 %v13602_v0, %v5478_v62 }
 0x86a   : > { %v16269_v40 = vpop.f32.mrf.mxu0 }
 0x86c   : > { %v13603_v9 = vpop.f32.mrf.mxu0 }
 0x86d   : > { %v5650_v63 = vadd.f32 %v13603_v9, %v5479_v12  ;;  %v5306_v9 = vadd.f32 %v16263_v15, %v5135_v34  ;;  %v17233_v12 = vld [vmem:[#allocation29_spill] sm:$0xff] }
 0x86e   : > { %v5619_v8 = vpop.f32.mrf.mxu0 }
 0x86f   : > { %v5477_v62 = vadd.f32 %v16267_v30, %v5306_v9 }
 0x870   : > { %v13606_v51 = vpop.f32.mrf.mxu0 }
 0x871   : > { %v5653_v3 = vadd.f32 %v13606_v51, %v5482_v56 }
 0x872   : > { %v5632_v41 = vpop.f32.mrf.mxu0 }
 0x873   : > { %v5651_v5 = vadd.f32 %v5632_v41, %v5480_v11  ;;  %v5648_v41 = vadd.f32 %v5619_v8, %v5477_v62 }
 0x874   : > { %v13607_v55 = vpop.f32.mrf.mxu0 }
 0x875   : > { %v5654_v51 = vadd.f32 %v13607_v55, %v5483_v54 }
 0x876   : > { %v5635_v44 = vpop.f32.mrf.mxu0 }
 0x877   : > { %v5652_v1 = vadd.f32 %v5635_v44, %v5481_v4  ;;  %v5647_v44 = vadd.f32 %v16269_v40, %v5476_v21  ;;  %v17236_v40 = vld [vmem:[#allocation26_spill] sm:$0xff] }
 0x878   : > { %v13630_v35 = vpop.f32.mrf.mxu0  ;;  %v14675_v4 = vld [vmem:[%s14967_s24 + $0x20] sm:$0xff]  }
 0x879   : > { %v5820_v19 = vadd.f32 %v13630_v35, %v5649_v2  ;;  %v17232_v2 = vld [vmem:[#allocation28_spill] sm:$0xff] }
 0x87a   : > { %v5787_v18 = vpop.f32.mrf.mxu0 }
 0x87b   : > { %v5835_v20 = vadd.f32 %v16272_v16, %v5820_v19  ;;  %v17234_v19 = vld [vmem:[#allocation27_spill] sm:$0xff]  ;;  %v5818_v14 = vadd.f32 %v5787_v18, %v5647_v44 }
 0x87c   : > { %v13631_v31 = vpop.f32.mrf.mxu0 }
 0x87d   : > { %v5821_v26 = vadd.f32 %v13631_v31, %v5650_v63  ;;  %v5843_v50 = vadd.f32 %v5835_v20, %v17230_v60  ;;  %v5833_v31 = vadd.f32 %v16272_v16, %v5818_v14  ;;  %v14671_v60 = vld [vmem:[%s14967_s24 + $0x8] sm:$0xff]  }
 0x87e   : > { %v5790_v47 = vpop.f32.mrf.mxu0 }
 0x87f   : > { %v5836_v45 = vadd.f32 %v16272_v16, %v5821_v26  ;;  %v5851_v33 = vmax.f32 %v5843_v50, 0.0  ;;  %v5819_v32 = vadd.f32 %v5790_v47, %v5648_v41  ;;  %v17237_v26 = vld [vmem:[#allocation21_spill] sm:$0xff]  ;;  %v14667_v47 = vld [vmem:[%s14957_s14 + $0x8] sm:$0xff]   ;;  %v14670_v50 = vld [vmem:[%s14967_s24 + $0x10] sm:$0xff]  }
 0x880   : > { %v13634_v28 = vpop.f32.mrf.mxu0  ;;  %v5841_v36 = vadd.f32 %v5833_v31, %v17237_v26 }
 0x881   : > { %v5844_v22 = vadd.f32 %v5836_v45, %v17231_v42  ;;  %v5824_v43 = vadd.f32 %v13634_v28, %v5653_v3  ;;  %v5834_v20 = vadd.f32 %v16272_v16, %v5819_v32  ;;  %v14669_v3 = vld [vmem:[%s14967_s24 + $0x18] sm:$0xff]   ;;  %v14672_v45 = vld [vmem:[%s14967_s24] sm:$0xff]  }
 0x882   : > { %v5803_v23 = vpop.f32.mrf.mxu0  ;;  %v5849_v52 = vmax.f32 %v5841_v36, 0.0 }
 0x883   : > { %v5852_v0 = vmax.f32 %v5844_v22, 0.0  ;;  %v5839_v59 = vadd.f32 %v16272_v16, %v5824_v43  ;;  %v5822_v10 = vadd.f32 %v5803_v23, %v5651_v5  ;;  %v5842_v18 = vadd.f32 %v5834_v20, %v17236_v40  ;;  %v14673_v5 = vld [vmem:[%s14957_s14 + $0x10] sm:$0xff]   ;;  %v14674_v23 = vld [vmem:[%s14967_s24 + $0x28] sm:$0xff]  }
 0x884   : > { %v13635_v6 = vpop.f32.mrf.mxu0  ;;  %v14680_v20 = vld [vmem:[%s14967_s24 + $0x48] sm:$0xff]  }
 0x885   : > { %v16287_v37 = vpack.c.bf16 %v5852_v0, %v5851_v33  ;;  %v5825_v61 = vadd.f32 %v13635_v6, %v5654_v51  ;;  %v5847_v35 = vadd.f32 %v5839_v59, %v17232_v2  ;;  %v5837_v15 = vadd.f32 %v16272_v16, %v5822_v10 }
 0x886   : > { %v5806_v39 = vpop.f32.mrf.mxu0 }
 0x887   : > { %v5823_v17 = vadd.f32 %v5806_v39, %v5652_v1  ;;  %v5840_v55 = vadd.f32 %v16272_v16, %v5825_v61  ;;  %v5855_v63 = vmax.f32 %v5847_v35, 0.0  ;;  %v5845_v49 = vadd.f32 %v5837_v15, %v17235_v27  ;;  %v14676_v35 = vld [vmem:[%s14957_s14 + $0x18] sm:$0xff]  }
 0x888   : > { %v14677_v15 = vld [vmem:[%s14967_s24 + $0x38] sm:$0xff]  }
 0x889   : > { %v5838_v24 = vadd.f32 %v16272_v16, %v5823_v17  ;;  %v5848_v30 = vadd.f32 %v5840_v55, %v17233_v12  ;;  %v5853_v57 = vmax.f32 %v5845_v49, 0.0  ;;  %v5850_v16 = vmax.f32 %v5842_v18, 0.0  ;;  %v14678_v55 = vld [vmem:[%s14967_s24 + $0x30] sm:$0xff]  }
 0x88b   : > { %v5846_v13 = vadd.f32 %v5838_v24, %v17234_v19  ;;  %v5856_v8 = vmax.f32 %v5848_v30, 0.0  ;;  %v16320_v58 = vpack.c.bf16 %v5850_v16, %v5849_v52 }
 0x88d   : > { %v16301_v46 = vpack.c.bf16 %v5856_v8, %v5855_v63  ;;  %v5854_v38 = vmax.f32 %v5846_v13, 0.0  ;;  %v14679_v8 = vld [vmem:[%s14957_s14 + $0x20] sm:$0xff]  }
 0x88f   : > { %13637 = vmatpush3.bf16.msra.mxu1 %v16301_v46  ;;  %13649 = vmatpush3.bf16.msra.mxu0 %v16301_v46  ;;  %v16309_v56 = vpack.c.bf16 %v5854_v38, %v5853_v57  ;;  %v14681_v38 = vld [vmem:[%s14967_s24 + $0x40] sm:$0xff]  }
 0x890   : > { %13638 = vmatprep.subr.bf16.mxu1 %v14902_v7  ;;  %13650 = vmatprep.subr.bf16.mxu0 %v14902_v7 }
 0x893   : > { %13639 = vmatpush3.bf16.msra.mxu1 %v16309_v56  ;;  %13651 = vmatpush3.bf16.msra.mxu0 %v16309_v56 }
 0x894   : > { %13640 = vmatprep.subr.bf16.mxu1 %v14902_v7  ;;  %13652 = vmatprep.subr.bf16.mxu0 %v14902_v7 }
 0x897   : > { %13641 = vmatpush3.bf16.msra.mxu1 %v16287_v37  ;;  %13653 = vmatpush3.bf16.msra.mxu0 %v16287_v37 }
 0x898   : > { %13642 = vmatprep.subr.bf16.mxu1 %v14902_v7  ;;  %13654 = vmatprep.subr.bf16.mxu0 %v14902_v7 }
 0x89b   : > { %13643 = vmatpush3.bf16.msra.mxu1 %v16320_v58  ;;  %13655 = vmatpush3.bf16.msra.mxu0 %v16320_v58 }
 0x89c   : > { %13660 = vmatprep.subr.bf16.mxu1 %v14902_v7  ;;  %13668 = vmatprep.subr.bf16.mxu0 %v14902_v7 }
 0x89e   : > { %13657 = vmatmul.mubr.msk.bf16.vlgmr.msra.gmra.mxu0 %vm2414_vm1, %v14667_v47  ;;  %13645 = vmatmul.mubr.msk.bf16.vlgmr.msra.gmra.mxu1 %vm2414_vm1, %v14668_v29 }
 0x89f   : > { %13661 = vmatpush3.bf16.msra.mxu1 %v14669_v3  ;;  %13664 = vmatprep.mubr.msk.bf16.mxu1 %vm14903_vm2, %v14902_v7 }
 0x8a0   : > { %13662 = vmatprep.subr.bf16.mxu1 %v14902_v7  ;;  %13672 = vmatprep.mubr.msk.bf16.mxu0 %vm14903_vm2, %v14902_v7 }
 0x8a1   : > { %13669 = vmatpush3.bf16.msra.mxu0 %v14671_v60  ;;  %v14682_v60 = vld [vmem:[%s14957_s14 + $0x28] sm:$0xff]  }
 0x8a2   : > { %13670 = vmatprep.subr.bf16.mxu0 %v14902_v7 }
 0x8a3   : > { %13663 = vmatpush3.bf16.msra.mxu1 %v14670_v50  ;;  %v14683_v50 = vld [vmem:[%s14967_s24 + $0x58] sm:$0xff]  }
 0x8a4   : > { %13676 = vmatprep.subr.bf16.mxu1 %v14902_v7 }
 0x8a5   : > { %13671 = vmatpush3.bf16.msra.mxu0 %v14672_v45  ;;  %v14684_v45 = vld [vmem:[%s14967_s24 + $0x50] sm:$0xff]  }
 0x8a6   : > { %13688 = vmatprep.subr.bf16.mxu0 %v14902_v7 }
 0x95e   : > { %v5962_v53 = vpop.f32.mrf.mxu0  ;;  %v5905_v48 = vpop.f32.mrf.mxu1 }
 0x960   : > { %v13658_v11 = vpop.f32.mrf.mxu0  ;;  %v13646_v28 = vpop.f32.mrf.mxu1 }
 0x962   : > { %v5965_v25 = vpop.f32.mrf.mxu0  ;;  %v5908_v42 = vpop.f32.mrf.mxu1 }
 0x963   : > { %v5969_v22 = vpack.c.bf16 %v5965_v25, %v5962_v53  ;;  %v5912_v43 = vpack.c.bf16 %v5908_v42, %v5905_v48 }
 0x964   : > { %v13659_v34 = vpop.f32.mrf.mxu0  ;;  %v13647_v54 = vpop.f32.mrf.mxu1 }
 0x965   : > { %13665 = vmatmul.mubr.msk.bf16.vlgmr.msra.gmra.mxu1 %vm1035_vm0, %v5969_v22  ;;  %13673 = vmatmul.mubr.msk.bf16.vlgmr.msra.gmra.mxu0 %vm1035_vm0, %v5912_v43 }
 0x966   : > { %13677 = vmatpush3.bf16.msra.mxu1 %v16301_v46  ;;  %13684 = vmatprep.mubr.msk.bf16.mxu1 %vm14903_vm2, %v14902_v7 }
 0x967   : > { %13678 = vmatprep.subr.bf16.mxu1 %v14902_v7  ;;  %13692 = vmatprep.mubr.msk.bf16.mxu0 %vm14903_vm2, %v14902_v7 }
 0x968   : > { %13689 = vmatpush3.bf16.msra.mxu0 %v14674_v23  ;;  %v14685_v23 = vld [vmem:[%s14957_s14 + $0x30] sm:$0xff]  }
 0x969   : > { %13690 = vmatprep.subr.bf16.mxu0 %v14902_v7 }
 0x96a   : > { %13679 = vmatpush3.bf16.msra.mxu1 %v16309_v56 }
 0x96b   : > { %13680 = vmatprep.subr.bf16.mxu1 %v14902_v7 }
 0x96c   : > { %13691 = vmatpush3.bf16.msra.mxu0 %v14675_v4  ;;  %v14686_v4 = vld [vmem:[%s14967_s24 + $0x68] sm:$0xff]  }
 0x96d   : > { %13696 = vmatprep.subr.bf16.mxu0 %v14902_v7 }
 0x96e   : > { %13681 = vmatpush3.bf16.msra.mxu1 %v16287_v37 }
 0x96f   : > { %13682 = vmatprep.subr.bf16.mxu1 %v14902_v7 }
 0x972   : > { %13683 = vmatpush3.bf16.msra.mxu1 %v16320_v58 }
 0x973   : > { %13708 = vmatprep.subr.bf16.mxu1 %v14902_v7 }
 0x975   : > { %13685 = vmatmul.mubr.msk.bf16.vlgmr.msra.gmra.mxu1 %vm2414_vm1, %v14673_v5 }
 0x976   : > { %13712 = vmatprep.mubr.msk.bf16.mxu1 %vm14903_vm2, %v14902_v7  ;;  %13709 = vmatpush3.bf16.msra.mxu1 %v14677_v15 }
 0x977   : > { %13710 = vmatprep.subr.bf16.mxu1 %v14902_v7 }
 0x97a   : > { %13711 = vmatpush3.bf16.msra.mxu1 %v14678_v55 }
 0x97b   : > { %13716 = vmatprep.subr.bf16.mxu1 %v14902_v7 }
 0xa25   : > { %v6024_v33 = vpop.f32.mrf.mxu1  ;;  %v6080_v0 = vpop.f32.mrf.mxu0 }
 0xa26   : > { %v6081_v9 = vadd.f32 %v6080_v0, %v6024_v33  ;;  %v14687_v33 = vld [vmem:[%s14967_s24 + $0x60] sm:$0xff]  }
 0xa27   : > { %v13666_v51 = vpop.f32.mrf.mxu1  ;;  %v13674_v59 = vpop.f32.mrf.mxu0 }
 0xa29   : > { %v6027_v10 = vpop.f32.mrf.mxu1  ;;  %v6083_v6 = vpop.f32.mrf.mxu0 }
 0xa2a   : > { %v6084_v1 = vadd.f32 %v6083_v6, %v6027_v10 }
 0xa2b   : > { %v13667_v62 = vpop.f32.mrf.mxu1  ;;  %v13675_v61 = vpop.f32.mrf.mxu0 }
 0xa35   : > { %v6132_v39 = vpop.f32.mrf.mxu1 }
 0xa37   : > { %v13686_v21 = vpop.f32.mrf.mxu1 }
 0xa39   : > { %v6135_v17 = vpop.f32.mrf.mxu1 }
 0xa3a   : > { %v6139_v41 = vpack.c.bf16 %v6135_v17, %v6132_v39  ;;  %v14688_v17 = vld [vmem:[%s14957_s14 + $0x38] sm:$0xff]  }
 0xa3b   : > { %v13687_v2 = vpop.f32.mrf.mxu1 }
 0xa3c   : > { %13693 = vmatmul.mubr.msk.bf16.vlgmr.msra.gmra.mxu0 %vm1035_vm0, %v6139_v41  ;;  %v14689_v41 = vld [vmem:[%s14967_s24 + $0x78] sm:$0xff]   ;;  %v14690_v2 = vld [vmem:[%s14967_s24 + $0x70] sm:$0xff]  }
 0xa3d   : > { %13697 = vmatpush3.bf16.msra.mxu0 %v16301_v46  ;;  %13704 = vmatprep.mubr.msk.bf16.mxu0 %vm14903_vm2, %v14902_v7 }
 0xa3e   : > { %13698 = vmatprep.subr.bf16.mxu0 %v14902_v7 }
 0xa41   : > { %13699 = vmatpush3.bf16.msra.mxu0 %v16309_v56 }
 0xa42   : > { %13700 = vmatprep.subr.bf16.mxu0 %v14902_v7 }
 0xa45   : > { %13701 = vmatpush3.bf16.msra.mxu0 %v16287_v37 }
 0xa46   : > { %13702 = vmatprep.subr.bf16.mxu0 %v14902_v7 }
 0xa49   : > { %13703 = vmatpush3.bf16.msra.mxu0 %v16320_v58 }
 0xa4a   : > { %13728 = vmatprep.subr.bf16.mxu0 %v14902_v7 }
 0xa4c   : > { %13705 = vmatmul.mubr.msk.bf16.vlgmr.msra.gmra.mxu0 %vm2414_vm1, %v14676_v35 }
 0xa4d   : > { %13732 = vmatprep.mubr.msk.bf16.mxu0 %vm14903_vm2, %v14902_v7  ;;  %13729 = vmatpush3.bf16.msra.mxu0 %v14680_v20 }
 0xa4e   : > { %13730 = vmatprep.subr.bf16.mxu0 %v14902_v7 }
 0xa51   : > { %13731 = vmatpush3.bf16.msra.mxu0 %v14681_v38 }
 0xa52   : > { %13736 = vmatprep.subr.bf16.mxu0 %v14902_v7 }
 0xafc   : > { %v6194_v24 = vpop.f32.mrf.mxu0 }
 0xafd   : > { %v6201_v44 = vadd.f32 %v6194_v24, %v6081_v9 }
 0xafe   : > { %v13694_v32 = vpop.f32.mrf.mxu0 }
 0xb00   : > { %v6197_v12 = vpop.f32.mrf.mxu0 }
 0xb01   : > { %v6202_v30 = vadd.f32 %v6197_v12, %v6084_v1 }
 0xb02   : > { %v13695_v19 = vpop.f32.mrf.mxu0 }
 0xb0c   : > { %v6248_v13 = vpop.f32.mrf.mxu0 }
 0xb0e   : > { %v13706_v14 = vpop.f32.mrf.mxu0 }
 0xb10   : > { %v6251_v63 = vpop.f32.mrf.mxu0 }
 0xb11   : > { %v6255_v27 = vpack.c.bf16 %v6251_v63, %v6248_v13  ;;  %v14691_v63 = vld [vmem:[%s14957_s14 + $0x40] sm:$0xff]  }
 0xb12   : > { %v13707_v49 = vpop.f32.mrf.mxu0 }
 0xb13   : > { %13713 = vmatmul.mubr.msk.bf16.vlgmr.msra.gmra.mxu1 %vm1035_vm0, %v6255_v27 }
 0xb14   : > { %13717 = vmatpush3.bf16.msra.mxu1 %v16301_v46  ;;  %13724 = vmatprep.mubr.msk.bf16.mxu1 %vm14903_vm2, %v14902_v7 }
 0xb15   : > { %13718 = vmatprep.subr.bf16.mxu1 %v14902_v7 }
 0xb18   : > { %13719 = vmatpush3.bf16.msra.mxu1 %v16309_v56 }
 0xb19   : > { %13720 = vmatprep.subr.bf16.mxu1 %v14902_v7 }
 0xb1c   : > { %13721 = vmatpush3.bf16.msra.mxu1 %v16287_v37 }
 0xb1d   : > { %13722 = vmatprep.subr.bf16.mxu1 %v14902_v7 }
 0xb20   : > { %13723 = vmatpush3.bf16.msra.mxu1 %v16320_v58 }
 0xb21   : > { %13748 = vmatprep.subr.bf16.mxu1 %v14902_v7 }
 0xb23   : > { %13725 = vmatmul.mubr.msk.bf16.vlgmr.msra.gmra.mxu1 %vm2414_vm1, %v14679_v8 }
 0xb24   : > { %13752 = vmatprep.mubr.msk.bf16.mxu1 %vm14903_vm2, %v14902_v7  ;;  %13749 = vmatpush3.bf16.msra.mxu1 %v14683_v50 }
 0xb25   : > { %13750 = vmatprep.subr.bf16.mxu1 %v14902_v7 }
 0xb28   : > { %13751 = vmatpush3.bf16.msra.mxu1 %v14684_v45 }
 0xb29   : > { %13756 = vmatprep.subr.bf16.mxu1 %v14902_v7 }
 0xbd3   : > { %v6310_v31 = vpop.f32.mrf.mxu1 }
 0xbd4   : > { %v6317_v57 = vadd.f32 %v6310_v31, %v6201_v44 }
 0xbd5   : > { %v13714_v40 = vpop.f32.mrf.mxu1 }
 0xbd6   : > { %v14694_v40 = vld [vmem:[%s14987_s20 + $0x8] sm:$0xff]  }
 0xbd7   : > { %v6313_v18 = vpop.f32.mrf.mxu1 }
 0xbd8   : > { %v6318_v26 = vadd.f32 %v6313_v18, %v6202_v30 }
 0xbd9   : > { %v13715_v36 = vpop.f32.mrf.mxu1 }
 0xbda   : > { %v14695_v36 = vld [vmem:[%s14987_s20] sm:$0xff]  }
 0xbe3   : > { %v6364_v16 = vpop.f32.mrf.mxu1 }
 0xbe5   : > { %v13726_v52 = vpop.f32.mrf.mxu1 }
 0xbe7   : > { %v6367_v47 = vpop.f32.mrf.mxu1 }
 0xbe8   : > { %v16402_v29 = vpack.c.bf16 %v6367_v47, %v6364_v16  ;;  %v11631_v47 = vld [vmem:[%s14972_s30] ss:$0 sm:$0xff] }
 0xbe9   : > { %v13727_v3 = vpop.f32.mrf.mxu1 }
 0xbea   : > { %13733 = vmatmul.mubr.msk.bf16.vlgmr.msra.gmra.mxu0 %vm1035_vm0, %v16402_v29 }
 0xbeb   : > { %13737 = vmatpush3.bf16.msra.mxu0 %v16301_v46  ;;  %13744 = vmatprep.mubr.msk.bf16.mxu0 %vm14903_vm2, %v14902_v7 }
 0xbec   : > { %13738 = vmatprep.subr.bf16.mxu0 %v14902_v7 }
 0xbef   : > { %13739 = vmatpush3.bf16.msra.mxu0 %v16309_v56 }
 0xbf0   : > { %13740 = vmatprep.subr.bf16.mxu0 %v14902_v7 }
 0xbf3   : > { %13741 = vmatpush3.bf16.msra.mxu0 %v16287_v37 }
 0xbf4   : > { %13742 = vmatprep.subr.bf16.mxu0 %v14902_v7 }
 0xbf7   : > { %13743 = vmatpush3.bf16.msra.mxu0 %v16320_v58 }
 0xbf8   : > { %13768 = vmatprep.subr.bf16.mxu0 %v14902_v7 }
 0xbfa   : > { %13745 = vmatmul.mubr.msk.bf16.vlgmr.msra.gmra.mxu0 %vm2414_vm1, %v14682_v60 }
 0xbfb   : > { %13772 = vmatprep.mubr.msk.bf16.mxu0 %vm14903_vm2, %v14902_v7  ;;  %13769 = vmatpush3.bf16.msra.mxu0 %v14686_v4  ;;  %v14699_v4 = vld [vmem:[%s17238_s15 + $0x30] sm:$0xff]  }
 0xbfc   : > { %13770 = vmatprep.subr.bf16.mxu0 %v14902_v7 }
 0xbff   : > { %13771 = vmatpush3.bf16.msra.mxu0 %v14687_v33  ;;  %v14701_v33 = vld [vmem:[%s17238_s15 + $0x28] sm:$0xff]  }
 0xc00   : > { %13776 = vmatprep.subr.bf16.mxu0 %v14902_v7 }
 0xcaa   : > { %v6426_v53 = vpop.f32.mrf.mxu0 }
 0xcab   : > { %v6433_v48 = vadd.f32 %v6426_v53, %v6317_v57 }
 0xcac   : > { %v13734_v11 = vpop.f32.mrf.mxu0 }
 0xcae   : > { %v6429_v28 = vpop.f32.mrf.mxu0 }
 0xcaf   : > { %v6434_v25 = vadd.f32 %v6429_v28, %v6318_v26 }
 0xcb0   : > { %v13735_v42 = vpop.f32.mrf.mxu0 }
 0xcba   : > { %v6480_v22 = vpop.f32.mrf.mxu0 }
 0xcbc   : > { %v13746_v43 = vpop.f32.mrf.mxu0 }
 0xcbd   : > { %v14696_v43 = vld [vmem:[%s14962_s19 + $0x8] sm:$0xff]  }
 0xcbe   : > { %v6483_v34 = vpop.f32.mrf.mxu0 }
 0xcbf   : > { %v6487_v54 = vpack.c.bf16 %v6483_v34, %v6480_v22  ;;  %v14697_v34 = vld [vmem:[%s14962_s19] sm:$0xff]  }
 0xcc0   : > { %v13747_v5 = vpop.f32.mrf.mxu0 }
 0xcc1   : > { %13753 = vmatmul.mubr.msk.bf16.vlgmr.msra.gmra.mxu1 %vm1035_vm0, %v6487_v54  ;;  %v14698_v54 = vld [vmem:[%s17238_s15 + $0x38] sm:$0xff]  }
 0xcc2   : > { %13757 = vmatpush3.bf16.msra.mxu1 %v16301_v46  ;;  %13764 = vmatprep.mubr.msk.bf16.mxu1 %vm14903_vm2, %v14902_v7  ;;  %v14700_v5 = vld [vmem:[%s17238_s15 + $0x18] sm:$0xff]  }
 0xcc3   : > { %13758 = vmatprep.subr.bf16.mxu1 %v14902_v7 }
 0xcc6   : > { %13759 = vmatpush3.bf16.msra.mxu1 %v16309_v56 }
 0xcc7   : > { %13760 = vmatprep.subr.bf16.mxu1 %v14902_v7 }
 0xcca   : > { %13761 = vmatpush3.bf16.msra.mxu1 %v16287_v37 }
 0xccb   : > { %13762 = vmatprep.subr.bf16.mxu1 %v14902_v7 }
 0xcce   : > { %13763 = vmatpush3.bf16.msra.mxu1 %v16320_v58 }
 0xccf   : > { %13788 = vmatprep.subr.bf16.mxu1 %v14902_v7 }
 0xcd1   : > { %13765 = vmatmul.mubr.msk.bf16.vlgmr.msra.gmra.mxu1 %vm2414_vm1, %v14685_v23 }
 0xcd2   : > { %13792 = vmatprep.mubr.msk.bf16.mxu1 %vm14903_vm2, %v14902_v7  ;;  %13789 = vmatpush3.bf16.msra.mxu1 %v14689_v41  ;;  %v14708_v41 = vld [vmem:[%s17238_s15 + $0x58] sm:$0xff]  }
 0xcd3   : > { %13790 = vmatprep.subr.bf16.mxu1 %v14902_v7 }
 0xcd6   : > { %13791 = vmatpush3.bf16.msra.mxu1 %v14690_v2 }
 0xcd7   : > { %13796 = vmatprep.subr.bf16.mxu1 %v14902_v7 }
 0xd81   : > { %v6542_v0 = vpop.f32.mrf.mxu1 }
 0xd82   : > { %v6549_v9 = vadd.f32 %v6542_v0, %v6433_v48  ;;  %v14702_v0 = vld [vmem:[%s17238_s15 + $0x10] sm:$0xff]  }
 0xd83   : > { %v13754_v51 = vpop.f32.mrf.mxu1 }
 0xd84   : > { %v14703_v51 = vld [vmem:[%s17238_s15 + $0x20] sm:$0xff]  }
 0xd85   : > { %v6545_v59 = vpop.f32.mrf.mxu1 }
 0xd86   : > { %v6550_v10 = vadd.f32 %v6545_v59, %v6434_v25  ;;  %v14705_v59 = vld [vmem:[%s17238_s15] sm:$0xff]  }
 0xd87   : > { %v13755_v6 = vpop.f32.mrf.mxu1 }
 0xd91   : > { %v6596_v1 = vpop.f32.mrf.mxu1 }
 0xd93   : > { %v13766_v62 = vpop.f32.mrf.mxu1 }
 0xd95   : > { %v6599_v61 = vpop.f32.mrf.mxu1 }
 0xd96   : > { %v6603_v39 = vpack.c.bf16 %v6599_v61, %v6596_v1 }
 0xd97   : > { %v13767_v21 = vpop.f32.mrf.mxu1 }
 0xd98   : > { %13773 = vmatmul.mubr.msk.bf16.vlgmr.msra.gmra.mxu0 %vm1035_vm0, %v6603_v39 }
 0xd99   : > { %13777 = vmatpush3.bf16.msra.mxu0 %v16301_v46  ;;  %13784 = vmatprep.mubr.msk.bf16.mxu0 %vm14903_vm2, %v14902_v7 }
 0xd9a   : > { %13778 = vmatprep.subr.bf16.mxu0 %v14902_v7 }
 0xd9d   : > { %13779 = vmatpush3.bf16.msra.mxu0 %v16309_v56 }
 0xd9e   : > { %13780 = vmatprep.subr.bf16.mxu0 %v14902_v7 }
 0xda1   : > { %13781 = vmatpush3.bf16.msra.mxu0 %v16287_v37 }
 0xda2   : > { %13782 = vmatprep.subr.bf16.mxu0 %v14902_v7 }
 0xda5   : > { %13783 = vmatpush3.bf16.msra.mxu0 %v16320_v58 }
 0xda6   : > { %13808 = vmatprep.subr.bf16.mxu0 %v14902_v7 }
 0xda8   : > { %13785 = vmatmul.mubr.msk.bf16.vlgmr.msra.gmra.mxu0 %vm2414_vm1, %v14688_v17 }
 0xda9   : > { %13812 = vmatprep.mubr.msk.bf16.mxu0 %vm14903_vm2, %v14902_v7 }
 0xe58   : > { %v6658_v35 = vpop.f32.mrf.mxu0 }
 0xe59   : > { %v6665_v15 = vadd.f32 %v6658_v35, %v6549_v9  ;;  %v14704_v9 = vld [vmem:[%s17238_s15 + $0x8] sm:$0xff]  }
 0xe5a   : > { %v13774_v55 = vpop.f32.mrf.mxu0 }
 0xe5b   : > { %v14707_v55 = vld [vmem:[%s14962_s19 + $0x18] sm:$0xff]  }
 0xe5c   : > { %v6661_v24 = vpop.f32.mrf.mxu0 }
 0xe5d   : > { %v6666_v44 = vadd.f32 %v6661_v24, %v6550_v10  ;;  %v14709_v24 = vld [vmem:[%s17238_s15 + $0x50] sm:$0xff]  }
 0xe5e   : > { %v13775_v32 = vpop.f32.mrf.mxu0 }
 0xe5f   : > { %v14711_v32 = vld [vmem:[%s17238_s15 + $0x78] sm:$0xff]  }
 0xe68   : > { %v6712_v12 = vpop.f32.mrf.mxu0 }
 0xe6a   : > { %v13786_v30 = vpop.f32.mrf.mxu0 }
 0xe6b   : > { %v14713_v30 = vld [vmem:[%s17238_s15 + $0x70] sm:$0xff]  }
 0xe6c   : > { %v6715_v19 = vpop.f32.mrf.mxu0 }
 0xe6d   : > { %v6719_v13 = vpack.c.bf16 %v6715_v19, %v6712_v12  ;;  %v14712_v12 = vld [vmem:[%s17238_s15 + $0x40] sm:$0xff]   ;;  %v14714_v19 = vld [vmem:[%s17238_s15 + $0x68] sm:$0xff]  }
 0xe6e   : > { %v13787_v14 = vpop.f32.mrf.mxu0 }
 0xe6f   : > { %13793 = vmatmul.mubr.msk.bf16.vlgmr.msra.gmra.mxu1 %vm1035_vm0, %v6719_v13  ;;  %v14715_v13 = vld [vmem:[%s17238_s15 + $0x60] sm:$0xff]  }
 0xe70   : > { %13797 = vmatpush3.bf16.msra.mxu1 %v16301_v46  ;;  %13804 = vmatprep.mubr.msk.bf16.mxu1 %vm14903_vm2, %v14902_v7  ;;  %v14692_v46 = vld [vmem:[%s14967_s24 + $0x88] sm:$0xff]  }
 0xe71   : > { %13798 = vmatprep.subr.bf16.mxu1 %v14902_v7  ;;  %13809 = vmatpush3.bf16.msra.mxu0 %v14692_v46 }
 0xe72   : > { %13810 = vmatprep.subr.bf16.mxu0 %v14902_v7 }
 0xe74   : > { %13799 = vmatpush3.bf16.msra.mxu1 %v16309_v56  ;;  %v14693_v56 = vld [vmem:[%s14967_s24 + $0x80] sm:$0xff]  }
 0xe75   : > { %13800 = vmatprep.subr.bf16.mxu1 %v14902_v7  ;;  %13811 = vmatpush3.bf16.msra.mxu0 %v14693_v56 }
 0xe76   : > { %13816 = vmatprep.subr.bf16.mxu0 %v14902_v7 }
 0xe78   : > { %13801 = vmatpush3.bf16.msra.mxu1 %v16287_v37 }
 0xe79   : > { %13802 = vmatprep.subr.bf16.mxu1 %v14902_v7 }
 0xe7c   : > { %13803 = vmatpush3.bf16.msra.mxu1 %v16320_v58 }
 0xe7d   : > { %13824 = vmatprep.subr.bf16.mxu1 %v14902_v7 }
 0xe7f   : > { %13805 = vmatmul.mubr.msk.bf16.vlgmr.msra.gmra.mxu1 %vm2414_vm1, %v14691_v63 }
 0xe80   : > { %13826 = vmatprep.mubr.msk.bf16.mxu1 %vm14903_vm2, %v14902_v7 }
 0xf2f   : > { %v6774_v37 = vpop.f32.mrf.mxu1 }
 0xf30   : > { %v6781_v27 = vadd.f32 %v6774_v37, %v6665_v15  ;;  %v14706_v15 = vld [vmem:[%s14962_s19 + $0x10] sm:$0xff]  }
 0xf31   : > { %v13794_v58 = vpop.f32.mrf.mxu1 }
 0xf33   : > { %v6777_v49 = vpop.f32.mrf.mxu1 }
 0xf34   : > { %v6782_v8 = vadd.f32 %v6777_v49, %v6666_v44  ;;  %v14710_v44 = vld [vmem:[%s17238_s15 + $0x48] sm:$0xff]  }
 0xf35   : > { %v13795_v20 = vpop.f32.mrf.mxu1 }
 0xf3f   : > { %v6828_v38 = vpop.f32.mrf.mxu1 }
 0xf41   : > { %v13806_v31 = vpop.f32.mrf.mxu1 }
 0xf43   : > { %v6831_v57 = vpop.f32.mrf.mxu1 }
 0xf44   : > { %v6835_v18 = vpack.c.bf16 %v6831_v57, %v6828_v38 }
 0xf45   : > { %v13807_v26 = vpop.f32.mrf.mxu1 }
 0xf46   : > { %13813 = vmatmul.mubr.msk.bf16.vlgmr.msra.gmra.mxu0 %vm1035_vm0, %v6835_v18 }
 0xf47   : > { %13817 = vmatpush3.bf16.msra.mxu0 %v14694_v40  ;;  %13820 = vmatprep.mubr.msk.bf16.mxu0 %vm14903_vm2, %v14902_v7 }
 0xf48   : > { %13818 = vmatprep.subr.bf16.mxu0 %v14902_v7 }
 0xf4b   : > { %13819 = vmatpush3.bf16.msra.mxu0 %v14695_v36 }
 0xf4c   : > { %13830 = vmatprep.subr.bf16.mxu0 %v14902_v7 }
 0xf4e   : > { %13821 = vmatmul.mubr.msk.bf16.vlgmr.msra.gmra.mxu0 %vm1035_vm0, %v16402_v29 }
 0xf4f   : > { %13832 = vmatprep.mubr.msk.bf16.mxu0 %vm14903_vm2, %v14902_v7 }
0x1006   : > { %v6890_v16 = vpop.f32.mrf.mxu0 }
0x1007   : > { %v6897_v52 = vadd.f32 %v6890_v16, %v6781_v27  ;;  %v14716_v16 = vld [vmem:[%s14962_s19 + $0x20] sm:$0xff]  }
0x1008   : > { %v13814_v3 = vpop.f32.mrf.mxu0 }
0x1009   : > { %v6906_v50 = vadd.f32 %v11631_v47, %v6897_v52  ;;  %v14718_v3 = vld [vmem:[%s17238_s15 + $0x98] sm:$0xff]  }
0x100a   : > { %v6893_v60 = vpop.f32.mrf.mxu0 }
0x100b   : > { %v6898_v45 = vadd.f32 %v6893_v60, %v6782_v8  ;;  %v6908_v28 = vmax.f32 %v6906_v50, 0.0  ;;  %v14717_v50 = vld [vmem:[%s14962_s19 + $0x28] sm:$0xff]  }
0x100c   : > { %v13815_v53 = vpop.f32.mrf.mxu0 }
0x100d   : > { %v6907_v48 = vadd.f32 %v11631_v47, %v6898_v45  ;;  %v14719_v45 = vld [vmem:[%s17238_s15 + $0x90] sm:$0xff]   ;;  %v14720_v53 = vld [vmem:[%s17238_s15 + $0x88] sm:$0xff]  }
0x100e   : > { %v16493_v11 = vpop.f32.mrf.mxu0 }
0x100f   : > { %v6909_v29 = vmax.f32 %v6907_v48, 0.0  ;;  %v14721_v48 = vld [vmem:[%s17238_s15 + $0xb8] sm:$0xff]  }
0x1010   : > { %v13822_v25 = vpop.f32.mrf.mxu0 }
0x1011   : > { %v16495_v42 = vpack.c.bf16 %v6909_v29, %v6908_v28  ;;  %v14722_v28 = vld [vmem:[%s17238_s15 + $0x80] sm:$0xff]   ;;  %v14723_v29 = vld [vmem:[%s17238_s15 + $0xb0] sm:$0xff]   ;;  %v14724_v25 = vld [vmem:[%s17238_s15 + $0xa8] sm:$0xff]  }
0x1012   : > { %v16497_v22 = vpop.f32.mrf.mxu0 }
0x1013   : > { %13825 = vmatpush3.bf16.msra.mxu1 %v16495_v42  ;;  %13831 = vmatpush3.bf16.msra.mxu0 %v16495_v42 }
0x1014   : > { %v13823_v23 = vpop.f32.mrf.mxu0  ;;  %13836 = vmatprep.subr.bf16.mxu1 %v14902_v7  ;;  %13848 = vmatprep.subr.bf16.mxu0 %v14902_v7 }
0x1016   : > { %13833 = vmatmul.mubr.msk.bf16.vlgmr.msra.gmra.mxu0 %vm6982_vm3, %v14696_v43  ;;  %13827 = vmatmul.mubr.msk.bf16.vlgmr.msra.gmra.mxu1 %vm6982_vm3, %v14697_v34  ;;  %v14725_v43 = vld [vmem:[%s17238_s15 + $0xa0] sm:$0xff]  }
0x1017   : > { %13837 = vmatpush3.bf16.msra.mxu1 %v14698_v54  ;;  %13849 = vmatpush3.bf16.msra.mxu0 %v14700_v5 }
0x1018   : > { %13838 = vmatprep.subr.bf16.mxu1 %v14902_v7  ;;  %13850 = vmatprep.subr.bf16.mxu0 %v14902_v7 }
0x1019   : > { %13844 = vmatprep.mubr.msk.bf16.mxu1 %vm14903_vm2, %v14902_v7  ;;  %13856 = vmatprep.mubr.msk.bf16.mxu0 %vm14903_vm2, %v14902_v7 }
0x101b   : > { %13839 = vmatpush3.bf16.msra.mxu1 %v14699_v4  ;;  %13851 = vmatpush3.bf16.msra.mxu0 %v14702_v0 }
0x101c   : > { %13840 = vmatprep.subr.bf16.mxu1 %v14902_v7  ;;  %13852 = vmatprep.subr.bf16.mxu0 %v14902_v7 }
0x101f   : > { %13841 = vmatpush3.bf16.msra.mxu1 %v14701_v33  ;;  %13853 = vmatpush3.bf16.msra.mxu0 %v14704_v9 }
0x1020   : > { %13842 = vmatprep.subr.bf16.mxu1 %v14902_v7  ;;  %13854 = vmatprep.subr.bf16.mxu0 %v14902_v7 }
0x1023   : > { %13843 = vmatpush3.bf16.msra.mxu1 %v14703_v51  ;;  %13855 = vmatpush3.bf16.msra.mxu0 %v14705_v59 }
0x1024   : > { %13860 = vmatprep.subr.bf16.mxu1 %v14902_v7  ;;  %13866 = vmatprep.subr.bf16.mxu0 %v14902_v7 }
0x10d6   : > { %v7081_v10 = vpop.f32.mrf.mxu0  ;;  %v7020_v6 = vpop.f32.mrf.mxu1 }
0x10d8   : > { %v13834_v1 = vpop.f32.mrf.mxu0  ;;  %v13828_v62 = vpop.f32.mrf.mxu1 }
0x10da   : > { %v7084_v61 = vpop.f32.mrf.mxu0  ;;  %v7023_v39 = vpop.f32.mrf.mxu1 }
0x10db   : > { %v7088_v21 = vpack.c.bf16 %v7084_v61, %v7081_v10  ;;  %v7027_v17 = vpack.c.bf16 %v7023_v39, %v7020_v6 }
0x10dc   : > { %v13835_v2 = vpop.f32.mrf.mxu0  ;;  %v13829_v35 = vpop.f32.mrf.mxu1 }
0x10dd   : > { %13845 = vmatmul.mubr.msk.bf16.vlgmr.msra.gmra.mxu1 %vm2414_vm1, %v7088_v21  ;;  %13857 = vmatmul.mubr.msk.bf16.vlgmr.msra.gmra.mxu0 %vm2414_vm1, %v7027_v17  ;;  %v14726_v2 = vld [vmem:[%s14962_s19 + $0x30] sm:$0xff]  }
0x10de   : > { %13861 = vmatpush3.bf16.msra.mxu1 %v16495_v42  ;;  %13862 = vmatprep.mubr.msk.bf16.mxu1 %vm14903_vm2, %v14902_v7 }
0x10df   : > { %13878 = vmatprep.subr.bf16.mxu1 %v14902_v7  ;;  %13867 = vmatpush3.bf16.msra.mxu0 %v14708_v41 }
0x10e0   : > { %13868 = vmatprep.subr.bf16.mxu0 %v14902_v7  ;;  %13874 = vmatprep.mubr.msk.bf16.mxu0 %vm14903_vm2, %v14902_v7 }
0x10e3   : > { %13869 = vmatpush3.bf16.msra.mxu0 %v14709_v24 }
0x10e4   : > { %13870 = vmatprep.subr.bf16.mxu0 %v14902_v7 }
0x10e5   : > { %13863 = vmatmul.mubr.msk.bf16.vlgmr.msra.gmra.mxu1 %vm6982_vm3, %v14706_v15 }
0x10e6   : > { %13879 = vmatpush3.bf16.msra.mxu1 %v16495_v42  ;;  %13880 = vmatprep.mubr.msk.bf16.mxu1 %vm14903_vm2, %v14902_v7 }
0x10e7   : > { %13884 = vmatprep.subr.bf16.mxu1 %v14902_v7  ;;  %13871 = vmatpush3.bf16.msra.mxu0 %v14710_v44  ;;  %v14727_v44 = vld [vmem:[%s14962_s19 + $0x38] sm:$0xff]  }
0x10e8   : > { %13872 = vmatprep.subr.bf16.mxu0 %v14902_v7 }
0x10eb   : > { %13873 = vmatpush3.bf16.msra.mxu0 %v14712_v12  ;;  %v14730_v12 = vld [vmem:[%s17238_s15 + $0xc8] sm:$0xff]  }
0x10ec   : > { %13896 = vmatprep.subr.bf16.mxu0 %v14902_v7 }
0x10ed   : > { %13881 = vmatmul.mubr.msk.bf16.vlgmr.msra.gmra.mxu1 %vm6982_vm3, %v14707_v55  ;;  %v14728_v55 = vld [vmem:[%s17238_s15 + $0xd8] sm:$0xff]  }
0x10ee   : > { %13892 = vmatprep.mubr.msk.bf16.mxu1 %vm14903_vm2, %v14902_v7  ;;  %13885 = vmatpush3.bf16.msra.mxu1 %v14711_v32  ;;  %v14729_v32 = vld [vmem:[%s17238_s15 + $0xd0] sm:$0xff]  }
0x10ef   : > { %13886 = vmatprep.subr.bf16.mxu1 %v14902_v7 }
0x10f2   : > { %13887 = vmatpush3.bf16.msra.mxu1 %v14713_v30  ;;  %v14731_v30 = vld [vmem:[%s17238_s15 + $0xf8] sm:$0xff]  }
0x10f3   : > { %13888 = vmatprep.subr.bf16.mxu1 %v14902_v7 }
0x10f6   : > { %13889 = vmatpush3.bf16.msra.mxu1 %v14714_v19  ;;  %v14732_v19 = vld [vmem:[%s17238_s15 + $0xc0] sm:$0xff]  }
0x10f7   : > { %13890 = vmatprep.subr.bf16.mxu1 %v14902_v7 }
0x10fa   : > { %13891 = vmatpush3.bf16.msra.mxu1 %v14715_v13  ;;  %v14733_v13 = vld [vmem:[%s17238_s15 + $0xf0] sm:$0xff]  }
0x10fb   : > { %13914 = vmatprep.subr.bf16.mxu1 %v14902_v7 }
0x119d   : > { %v7159_v14 = vpop.f32.mrf.mxu1  ;;  %v7227_v63 = vpop.f32.mrf.mxu0 }
0x119e   : > { %v7228_v46 = vadd.f32 %v7227_v63, %v7159_v14  ;;  %v14734_v14 = vld [vmem:[%s17238_s15 + $0xe8] sm:$0xff]   ;;  %v14735_v63 = vld [vmem:[%s17238_s15 + $0xe0] sm:$0xff]  }
0x119f   : > { %v13846_v56 = vpop.f32.mrf.mxu1  ;;  %v13858_v37 = vpop.f32.mrf.mxu0 }
0x11a1   : > { %v7162_v27 = vpop.f32.mrf.mxu1  ;;  %v7230_v58 = vpop.f32.mrf.mxu0 }
0x11a2   : > { %v7231_v49 = vadd.f32 %v7230_v58, %v7162_v27 }
0x11a3   : > { %v13847_v8 = vpop.f32.mrf.mxu1  ;;  %v13859_v20 = vpop.f32.mrf.mxu0 }
0x11a5   : > { %v7279_v38 = vpop.f32.mrf.mxu1 }
0x11a7   : > { %v13864_v31 = vpop.f32.mrf.mxu1 }
0x11a9   : > { %v7282_v57 = vpop.f32.mrf.mxu1 }
0x11aa   : > { %v7286_v40 = vpack.c.bf16 %v7282_v57, %v7279_v38 }
0x11ab   : > { %v13865_v18 = vpop.f32.mrf.mxu1 }
0x11ac   : > { %13875 = vmatmul.mubr.msk.bf16.vlgmr.msra.gmra.mxu0 %vm2414_vm1, %v7286_v40 }
0x11ad   : > { %13897 = vmatpush3.bf16.msra.mxu0 %v16495_v42  ;;  %v7411_v26 = vpop.f32.mrf.mxu1  ;;  %13898 = vmatprep.mubr.msk.bf16.mxu0 %vm14903_vm2, %v14902_v7 }
0x11ae   : > { %13902 = vmatprep.subr.bf16.mxu0 %v14902_v7 }
0x11af   : > { %v13882_v36 = vpop.f32.mrf.mxu1 }
0x11b1   : > { %v7414_v52 = vpop.f32.mrf.mxu1 }
0x11b2   : > { %v7418_v47 = vpack.c.bf16 %v7414_v52, %v7411_v26 }
0x11b3   : > { %v13883_v60 = vpop.f32.mrf.mxu1 }
0x11b4   : > { %13893 = vmatmul.mubr.msk.bf16.vlgmr.msra.gmra.mxu1 %vm2414_vm1, %v7418_v47  ;;  %13899 = vmatmul.mubr.msk.bf16.vlgmr.msra.gmra.mxu0 %vm6982_vm3, %v14716_v16  ;;  %v14736_v60 = vld [vmem:[%s14962_s19 + $0x40] sm:$0xff]  }
0x11b5   : > { %13915 = vmatpush3.bf16.msra.mxu1 %v16495_v42  ;;  %13916 = vmatprep.mubr.msk.bf16.mxu1 %vm14903_vm2, %v14902_v7 }
0x11b6   : > { %13903 = vmatpush3.bf16.msra.mxu0 %v14718_v3  ;;  %13920 = vmatprep.subr.bf16.mxu1 %v14902_v7 }
0x11b7   : > { %13904 = vmatprep.subr.bf16.mxu0 %v14902_v7  ;;  %13910 = vmatprep.mubr.msk.bf16.mxu0 %vm14903_vm2, %v14902_v7 }
0x11ba   : > { %13905 = vmatpush3.bf16.msra.mxu0 %v14719_v45 }
0x11bb   : > { %13906 = vmatprep.subr.bf16.mxu0 %v14902_v7 }
0x11bc   : > { %13917 = vmatmul.mubr.msk.bf16.vlgmr.msra.gmra.mxu1 %vm6982_vm3, %v14717_v50 }
0x11bd   : > { %13928 = vmatprep.mubr.msk.bf16.mxu1 %vm14903_vm2, %v14902_v7  ;;  %13921 = vmatpush3.bf16.msra.mxu1 %v14721_v48  ;;  %v14738_v48 = vld [vmem:[%s17238_s15 + $0x110] sm:$0xff]  }
0x11be   : > { %13907 = vmatpush3.bf16.msra.mxu0 %v14720_v53  ;;  %13922 = vmatprep.subr.bf16.mxu1 %v14902_v7 }
0x11bf   : > { %13908 = vmatprep.subr.bf16.mxu0 %v14902_v7 }
0x11c1   : > { %13923 = vmatpush3.bf16.msra.mxu1 %v14723_v29  ;;  %v14740_v29 = vld [vmem:[%s17238_s15 + $0x100] sm:$0xff]  }
0x11c2   : > { %13909 = vmatpush3.bf16.msra.mxu0 %v14722_v28  ;;  %13924 = vmatprep.subr.bf16.mxu1 %v14902_v7  ;;  %v14739_v28 = vld [vmem:[%s17238_s15 + $0x108] sm:$0xff]  }
0x11c3   : > { %13932 = vmatprep.subr.bf16.mxu0 %v14902_v7 }
0x11c5   : > { %13925 = vmatpush3.bf16.msra.mxu1 %v14724_v25 }
0x11c6   : > { %13926 = vmatprep.subr.bf16.mxu1 %v14902_v7 }
0x11c9   : > { %13927 = vmatpush3.bf16.msra.mxu1 %v14725_v43 }
0x11ca   : > { %13950 = vmatprep.subr.bf16.mxu1 %v14902_v7 }
0x126c   : > { %v7357_v34 = vpop.f32.mrf.mxu0 }
0x126d   : > { %v7364_v54 = vadd.f32 %v7357_v34, %v7228_v46 }
0x126e   : > { %v13876_v5 = vpop.f32.mrf.mxu0 }
0x1270   : > { %v7360_v23 = vpop.f32.mrf.mxu0 }
0x1271   : > { %v7365_v4 = vadd.f32 %v7360_v23, %v7231_v49 }
0x1272   : > { %v13877_v33 = vpop.f32.mrf.mxu0 }
0x1274   : > { %v7489_v0 = vpop.f32.mrf.mxu1  ;;  %v7543_v9 = vpop.f32.mrf.mxu0 }
0x1275   : > { %v7496_v51 = vadd.f32 %v7489_v0, %v7364_v54 }
0x1276   : > { %v13894_v59 = vpop.f32.mrf.mxu1  ;;  %v13900_v10 = vpop.f32.mrf.mxu0 }
0x1278   : > { %v7492_v6 = vpop.f32.mrf.mxu1  ;;  %v7546_v1 = vpop.f32.mrf.mxu0 }
0x1279   : > { %v7497_v62 = vadd.f32 %v7492_v6, %v7365_v4  ;;  %v7550_v61 = vpack.c.bf16 %v7546_v1, %v7543_v9 }
0x127a   : > { %v13895_v39 = vpop.f32.mrf.mxu1  ;;  %v13901_v21 = vpop.f32.mrf.mxu0 }
0x127b   : > { %13911 = vmatmul.mubr.msk.bf16.vlgmr.msra.gmra.mxu0 %vm2414_vm1, %v7550_v61  ;;  %v14742_v39 = vld [vmem:[%s17239_s16 + $0x38] sm:$0xff]   ;;  %v14744_v21 = vld [vmem:[%s17239_s16 + $0x30] sm:$0xff]  }
0x127c   : > { %13933 = vmatpush3.bf16.msra.mxu0 %v16495_v42  ;;  %v7675_v17 = vpop.f32.mrf.mxu1  ;;  %13934 = vmatprep.mubr.msk.bf16.mxu0 %vm14903_vm2, %v14902_v7 }
0x127d   : > { %13938 = vmatprep.subr.bf16.mxu0 %v14902_v7 }
0x127e   : > { %v13918_v41 = vpop.f32.mrf.mxu1 }
0x1280   : > { %v7678_v35 = vpop.f32.mrf.mxu1 }
0x1281   : > { %v7682_v15 = vpack.c.bf16 %v7678_v35, %v7675_v17  ;;  %v11632_v17 = vld [vmem:[%s17240_s18] ss:$0 sm:$0xff]  ;;  %s17249_s18 = sld [smem:[#allocation10_spill]] }
0x1282   : > { %v13919_v24 = vpop.f32.mrf.mxu1 }
0x1283   : > { %13929 = vmatmul.mubr.msk.bf16.vlgmr.msra.gmra.mxu1 %vm2414_vm1, %v7682_v15  ;;  %13935 = vmatmul.mubr.msk.bf16.vlgmr.msra.gmra.mxu0 %vm6982_vm3, %v14726_v2  ;;  %v11779_v2 = vld [vmem:[%s17241_s22] ss:$0 sm:$0xff]  ;;  %s898_s22 = scalar_lea.vmem %s15057_s4, %s17251_s10 }
0x1284   : > { %13951 = vmatpush3.bf16.msra.mxu1 %v16495_v42  ;;  %13952 = vmatprep.mubr.msk.bf16.mxu1 %vm14903_vm2, %v14902_v7 }
0x1285   : > { %13939 = vmatpush3.bf16.msra.mxu0 %v14728_v55  ;;  %13956 = vmatprep.subr.bf16.mxu1 %v14902_v7  ;;  %v6969_v55 = vadd.f32 %v11632_v17, %v16493_v11  ;;  %v8172_v11 = vld [vmem:[%s17242_s23] sm:$0x3] }
0x1286   : > { %13940 = vmatprep.subr.bf16.mxu0 %v14902_v7  ;;  %13946 = vmatprep.mubr.msk.bf16.mxu0 %vm14903_vm2, %v14902_v7 }
0x1289   : > { %13941 = vmatpush3.bf16.msra.mxu0 %v14729_v32 }
0x128a   : > { %13942 = vmatprep.subr.bf16.mxu0 %v14902_v7 }
0x128b   : > { %13953 = vmatmul.mubr.msk.bf16.vlgmr.msra.gmra.mxu1 %vm6982_vm3, %v14727_v44 }
0x128c   : > { %13964 = vmatprep.mubr.msk.bf16.mxu1 %vm14903_vm2, %v14902_v7  ;;  %13957 = vmatpush3.bf16.msra.mxu1 %v14731_v30 }
0x128d   : > { %13943 = vmatpush3.bf16.msra.mxu0 %v14730_v12  ;;  %13958 = vmatprep.subr.bf16.mxu1 %v14902_v7 }
0x128e   : > { %13944 = vmatprep.subr.bf16.mxu0 %v14902_v7 }
0x1290   : > { %13959 = vmatpush3.bf16.msra.mxu1 %v14733_v13 }
0x1291   : > { %13945 = vmatpush3.bf16.msra.mxu0 %v14732_v19  ;;  %13960 = vmatprep.subr.bf16.mxu1 %v14902_v7  ;;  %v6972_v19 = vadd.f32 %v11632_v17, %v16497_v22  ;;  %v11781_v22 = vld [vmem:[%s17242_s23 + $0x2] sm:$0x3] }
0x1292   : > { %13968 = vmatprep.subr.bf16.mxu0 %v14902_v7 }
0x1294   : > { %13961 = vmatpush3.bf16.msra.mxu1 %v14734_v14 }
0x1295   : > { %13962 = vmatprep.subr.bf16.mxu1 %v14902_v7 }
0x1298   : > { %13963 = vmatpush3.bf16.msra.mxu1 %v14735_v63 }
0x1299   : > { %13986 = vmatprep.subr.bf16.mxu1 %v14902_v7 }
0x133b   : > { %v7621_v46 = vpop.f32.mrf.mxu0 }
0x133c   : > { %v7628_v56 = vadd.f32 %v7621_v46, %v7496_v51 }
0x133d   : > { %v13912_v37 = vpop.f32.mrf.mxu0 }
0x133e   : > { %v14741_v37 = vld [vmem:[%s17239_s16 + $0x18] sm:$0xff]  }
0x133f   : > { %v7624_v27 = vpop.f32.mrf.mxu0 }
0x1340   : > { %v7629_v58 = vadd.f32 %v7624_v27, %v7497_v62  ;;  %v14743_v27 = vld [vmem:[%s17239_s16 + $0x10] sm:$0xff]  }
0x1341   : > { %v13913_v49 = vpop.f32.mrf.mxu0 }
0x1342   : > { %v14747_v49 = vld [vmem:[%s17239_s16] sm:$0xff]  }
0x1343   : > { %v7753_v8 = vpop.f32.mrf.mxu1  ;;  %v7807_v20 = vpop.f32.mrf.mxu0 }
0x1344   : > { %v7760_v38 = vadd.f32 %v7753_v8, %v7628_v56  ;;  %v14746_v8 = vld [vmem:[%s17239_s16 + $0x28] sm:$0xff]  }
0x1345   : > { %v13930_v31 = vpop.f32.mrf.mxu1  ;;  %v13936_v57 = vpop.f32.mrf.mxu0 }
0x1346   : > { %v14749_v31 = vld [vmem:[%s17239_s16 + $0x58] sm:$0xff]  }
0x1347   : > { %v7756_v40 = vpop.f32.mrf.mxu1  ;;  %v7810_v18 = vpop.f32.mrf.mxu0 }
0x1348   : > { %v7761_v26 = vadd.f32 %v7756_v40, %v7629_v58  ;;  %v7814_v36 = vpack.c.bf16 %v7810_v18, %v7807_v20  ;;  %v14745_v58 = vld [vmem:[%s17239_s16 + $0x8] sm:$0xff]   ;;  %v14748_v20 = vld [vmem:[%s17239_s16 + $0x20] sm:$0xff]  }
0x1349   : > { %v13931_v16 = vpop.f32.mrf.mxu1  ;;  %v13937_v52 = vpop.f32.mrf.mxu0 }
0x134a   : > { %13947 = vmatmul.mubr.msk.bf16.vlgmr.msra.gmra.mxu0 %vm2414_vm1, %v7814_v36 }
0x134b   : > { %13969 = vmatpush3.bf16.msra.mxu0 %v16495_v42  ;;  %v7939_v47 = vpop.f32.mrf.mxu1  ;;  %13970 = vmatprep.mubr.msk.bf16.mxu0 %vm14903_vm2, %v14902_v7  ;;  %v14737_v42 = vld [vmem:[%s17238_s15 + $0x118] sm:$0xff]  }
0x134c   : > { %13974 = vmatprep.subr.bf16.mxu0 %v14902_v7 }
0x134d   : > { %v13954_v3 = vpop.f32.mrf.mxu1 }
0x134f   : > { %v7942_v50 = vpop.f32.mrf.mxu1 }
0x1350   : > { %v7946_v45 = vpack.c.bf16 %v7942_v50, %v7939_v47  ;;  %v11816_v50 = vld [vmem:[%s17242_s23 + $0x6] sm:$0x3] }
0x1351   : > { %v13955_v53 = vpop.f32.mrf.mxu1 }
0x1352   : > { %13965 = vmatmul.mubr.msk.bf16.vlgmr.msra.gmra.mxu1 %vm2414_vm1, %v7946_v45  ;;  %13971 = vmatmul.mubr.msk.bf16.vlgmr.msra.gmra.mxu0 %vm6982_vm3, %v14736_v60  ;;  %v11801_v60 = vld [vmem:[%s17242_s23 + $0x4] sm:$0x3]  ;;  %v14750_v45 = vld [vmem:[%s17239_s16 + $0x50] sm:$0xff]   ;;  %v14751_v53 = vld [vmem:[%s17239_s16 + $0x48] sm:$0xff]  }
0x1353   : > { %13982 = vmatprep.mubr.msk.bf16.mxu0 %vm14903_vm2, %v14902_v7  ;;  %13988 = vmatprep.mubr.msk.bf16.mxu1 %vm14903_vm2, %v14902_v7 }
0x1354   : > { %13975 = vmatpush3.bf16.msra.mxu0 %v14737_v42  ;;  %v14752_v42 = vld [vmem:[%s17239_s16 + $0x78] sm:$0xff]  }
0x1355   : > { %13976 = vmatprep.subr.bf16.mxu0 %v14902_v7 }
0x1358   : > { %13977 = vmatpush3.bf16.msra.mxu0 %v14738_v48  ;;  %v14753_v48 = vld [vmem:[%s17239_s16 + $0x40] sm:$0xff]  }
0x1359   : > { %13978 = vmatprep.subr.bf16.mxu0 %v14902_v7 }
0x135c   : > { %13979 = vmatpush3.bf16.msra.mxu0 %v14739_v28  ;;  %v14754_v28 = vld [vmem:[%s17239_s16 + $0x70] sm:$0xff]  }
0x135d   : > { %13980 = vmatprep.subr.bf16.mxu0 %v14902_v7 }
0x1360   : > { %13981 = vmatpush3.bf16.msra.mxu0 %v14740_v29  ;;  %v14755_v29 = vld [vmem:[%s17239_s16 + $0x68] sm:$0xff]  }
0x1361   : > { %13998 = vmatprep.subr.bf16.mxu0 %v14902_v7 }
0x140a   : > { %v7885_v25 = vpop.f32.mrf.mxu0 }
0x140b   : > { %v7892_v43 = vadd.f32 %v7885_v25, %v7760_v38  ;;  %v14756_v25 = vld [vmem:[%s17239_s16 + $0x60] sm:$0xff]  }
0x140c   : > { %v13948_v34 = vpop.f32.mrf.mxu0 }
0x140e   : > { %v7888_v54 = vpop.f32.mrf.mxu0 }
0x140f   : > { %v7893_v5 = vadd.f32 %v7888_v54, %v7761_v26 }
0x1410   : > { %v13949_v23 = vpop.f32.mrf.mxu0 }
0x1412   : > { %v8017_v4 = vpop.f32.mrf.mxu1  ;;  %v8071_v33 = vpop.f32.mrf.mxu0 }
0x1413   : > { %v8024_v0 = vadd.f32 %v8017_v4, %v7892_v43 }
0x1414   : > { %v13966_v9 = vpop.f32.mrf.mxu1  ;;  %v13972_v51 = vpop.f32.mrf.mxu0 }
0x1416   : > { %v8020_v59 = vpop.f32.mrf.mxu1  ;;  %v8074_v10 = vpop.f32.mrf.mxu0 }
0x1417   : > { %v8025_v6 = vadd.f32 %v8020_v59, %v7893_v5  ;;  %v8078_v1 = vpack.c.bf16 %v8074_v10, %v8071_v33 }
0x1418   : > { %v13973_v62 = vpop.f32.mrf.mxu0  ;;  %v13967_v61 = vpop.f32.mrf.mxu1 }
0x1419   : > { %13983 = vmatmul.mubr.msk.bf16.vlgmr.msra.gmra.mxu0 %vm2414_vm1, %v8078_v1  ;;  %v11831_v61 = vld [vmem:[%s17242_s23 + $0x8] sm:$0x3] }
0x141a   : > { %14006 = vmatprep.mubr.msk.bf16.mxu0 %vm14903_vm2, %v14902_v7  ;;  %13999 = vmatpush3.bf16.msra.mxu0 %v14742_v39 }
0x141b   : > { %14000 = vmatprep.subr.bf16.mxu0 %v14902_v7 }
0x141e   : > { %14001 = vmatpush3.bf16.msra.mxu0 %v14744_v21  ;;  %v14757_v21 = vld [vmem:[%s17239_s16 + $0x98] sm:$0xff]  }
0x141f   : > { %14002 = vmatprep.subr.bf16.mxu0 %v14902_v7 }
0x1422   : > { %14003 = vmatpush3.bf16.msra.mxu0 %v14746_v8 }
0x1423   : > { %14004 = vmatprep.subr.bf16.mxu0 %v14902_v7 }
0x1426   : > { %14005 = vmatpush3.bf16.msra.mxu0 %v14748_v20 }
0x1427   : > { %14022 = vmatprep.subr.bf16.mxu0 %v14902_v7 }
0x14d9   : > { %v8149_v41 = vpop.f32.mrf.mxu0 }
0x14da   : > { %v8156_v35 = vadd.f32 %v8149_v41, %v8024_v0 }
0x14db   : > { %v13984_v15 = vpop.f32.mrf.mxu0 }
0x14dc   : > { %v8165_v24 = vadd.f32 %v11779_v2, %v8156_v35  ;;  %v11846_v15 = vld [vmem:[%s17242_s23 + $0xa] sm:$0x3] }
0x14dd   : > { %v8152_v44 = vpop.f32.mrf.mxu0 }
0x14de   : > { %v8167_v32 = vadd.f32 %v8165_v24, %v6969_v55  ;;  %v8157_v12 = vadd.f32 %v8152_v44, %v8025_v6  ;;  %v14759_v55 = vld [vmem:[%s17239_s16 + $0x88] sm:$0xff]   ;;  %v14760_v24 = vld [vmem:[%s17239_s16 + $0xb8] sm:$0xff]   ;;  %v14761_v44 = vld [vmem:[%s17239_s16 + $0x80] sm:$0xff]  }
0x14df   : > { %v13985_v30 = vpop.f32.mrf.mxu0 }
0x14e0   : > { %v8166_v13 = vadd.f32 %v11779_v2, %v8157_v12  ;;  %v8169_v63 = vmax.f32 %v8167_v32, 0.0  ;;  %v14758_v2 = vld [vmem:[%s17239_s16 + $0x90] sm:$0xff]   ;;  %v14763_v12 = vld [vmem:[%s17239_s16 + $0xa8] sm:$0xff]   ;;  %v14764_v30 = vld [vmem:[%s17239_s16 + $0xa0] sm:$0xff]  }
0x14e1   : > { %v14762_v32 = vld [vmem:[%s17239_s16 + $0xb0] sm:$0xff]  }
0x14e2   : > { %v8168_v14 = vadd.f32 %v8166_v13, %v6972_v19 }
0x14e4   : > { %v8170_v46 = vmax.f32 %v8168_v14, 0.0 }
0x14e6   : > { %v16660_v56 = vpack.c.bf16 %v8170_v46, %v8169_v63 }
0x14e8   : > { %13987 = vmatpush3.bf16.msra.mxu1 %v16660_v56 }
0x14e9   : > { %13992 = vmatprep.subr.bf16.mxu1 %v14902_v7 }
0x14eb   : > { %13989 = vmatmul.mubr.msk.bf16.vlgmr.msra.gmra.mxu1 %vm6982_vm3, %v8172_v11 }
0x14ec   : > { %13993 = vmatpush3.bf16.msra.mxu1 %v16660_v56  ;;  %13994 = vmatprep.mubr.msk.bf16.mxu1 %vm14903_vm2, %v14902_v7 }
0x14ed   : > { %14010 = vmatprep.subr.bf16.mxu1 %v14902_v7 }
0x14f3   : > { %13995 = vmatmul.mubr.msk.bf16.vlgmr.msra.gmra.mxu1 %vm6982_vm3, %v11781_v22 }
0x14f4   : > { %14011 = vmatpush3.bf16.msra.mxu1 %v14741_v37  ;;  %14018 = vmatprep.mubr.msk.bf16.mxu1 %vm14903_vm2, %v14902_v7 }
0x14f5   : > { %14012 = vmatprep.subr.bf16.mxu1 %v14902_v7 }
0x14f8   : > { %14013 = vmatpush3.bf16.msra.mxu1 %v14743_v27 }
0x14f9   : > { %14014 = vmatprep.subr.bf16.mxu1 %v14902_v7 }
0x14fc   : > { %14015 = vmatpush3.bf16.msra.mxu1 %v14745_v58 }
0x14fd   : > { %14016 = vmatprep.subr.bf16.mxu1 %v14902_v7 }
0x1500   : > { %14017 = vmatpush3.bf16.msra.mxu1 %v14747_v49 }
0x1501   : > { %14028 = vmatprep.subr.bf16.mxu1 %v14902_v7 }
0x15ab   : > { %v8210_v38 = vpop.f32.mrf.mxu1 }
0x15ac   : > { %v8216_v57 = vpack.c.bf16 %v8210_v38, %v8210_v38 }
0x15ad   : > { %v13990_v40 = vpop.f32.mrf.mxu1 }
0x15ae   : > { %14019 = vmatmul.mubr.msk.bf16.vlgmr.msra.gmra.mxu1 %vm2414_vm1, %v8216_v57  ;;  %v11861_v40 = vld [vmem:[%s17242_s23 + $0xc] sm:$0x3] }
0x15af   : > { %v8213_v18 = vpop.f32.mrf.mxu1  ;;  %14029 = vmatpush3.bf16.msra.mxu1 %v14749_v31  ;;  %14036 = vmatprep.mubr.msk.bf16.mxu1 %vm14903_vm2, %v14902_v7 }
0x15b0   : > { %14030 = vmatprep.subr.bf16.mxu1 %v14902_v7 }
0x15b1   : > { %v13991_v26 = vpop.f32.mrf.mxu1 }
0x15b2   : > { %v14765_v26 = vld [vmem:[%s17239_s16 + $0xd8] sm:$0xff]  }
0x15b3   : > { %v8264_v36 = vpop.f32.mrf.mxu1  ;;  %14031 = vmatpush3.bf16.msra.mxu1 %v14750_v45  ;;  %v14769_v45 = vld [vmem:[%s17239_s16 + $0xc0] sm:$0xff]  }
0x15b4   : > { %v8270_v16 = vpack.c.bf16 %v8264_v36, %v8264_v36  ;;  %14032 = vmatprep.subr.bf16.mxu1 %v14902_v7 }
0x15b5   : > { %v13996_v52 = vpop.f32.mrf.mxu1 }
0x15b6   : > { %14007 = vmatmul.mubr.msk.bf16.vlgmr.msra.gmra.mxu0 %vm2414_vm1, %v8270_v16  ;;  %v14766_v52 = vld [vmem:[%s17239_s16 + $0xd0] sm:$0xff]  }
0x15b7   : > { %14023 = vmatpush3.bf16.msra.mxu0 %v16660_v56  ;;  %v8267_v47 = vpop.f32.mrf.mxu1  ;;  %14024 = vmatprep.mubr.msk.bf16.mxu0 %vm14903_vm2, %v14902_v7 }
0x15b8   : > { %14040 = vmatprep.subr.bf16.mxu0 %v14902_v7  ;;  %14033 = vmatpush3.bf16.msra.mxu1 %v14751_v53  ;;  %v14770_v53 = vld [vmem:[%s17239_s16 + $0xf0] sm:$0xff]  }
0x15b9   : > { %v13997_v3 = vpop.f32.mrf.mxu1  ;;  %14034 = vmatprep.subr.bf16.mxu1 %v14902_v7 }
0x15ba   : > { %v11876_v3 = vld [vmem:[%s17242_s23 + $0xe] sm:$0x3] }
0x15bc   : > { %14035 = vmatpush3.bf16.msra.mxu1 %v14753_v48  ;;  %v14772_v48 = vld [vmem:[%s17239_s16 + $0xe0] sm:$0xff]  }
0x15bd   : > { %14058 = vmatprep.subr.bf16.mxu1 %v14902_v7 }
0x15be   : > { %14025 = vmatmul.mubr.msk.bf16.vlgmr.msra.gmra.mxu0 %vm6982_vm3, %v11801_v60  ;;  %v14767_v60 = vld [vmem:[%s17239_s16 + $0xc8] sm:$0xff]  }
0x15bf   : > { %14041 = vmatpush3.bf16.msra.mxu0 %v16660_v56  ;;  %14042 = vmatprep.mubr.msk.bf16.mxu0 %vm14903_vm2, %v14902_v7 }
0x15c0   : > { %14046 = vmatprep.subr.bf16.mxu0 %v14902_v7 }
0x15c6   : > { %14043 = vmatmul.mubr.msk.bf16.vlgmr.msra.gmra.mxu0 %vm6982_vm3, %v11816_v50  ;;  %v14768_v50 = vld [vmem:[%s17239_s16 + $0xf8] sm:$0xff]  }
0x15c7   : > { %14054 = vmatprep.mubr.msk.bf16.mxu0 %vm14903_vm2, %v14902_v7  ;;  %14047 = vmatpush3.bf16.msra.mxu0 %v14752_v42  ;;  %v14771_v42 = vld [vmem:[%s17239_s16 + $0xe8] sm:$0xff]  }
0x15c8   : > { %14048 = vmatprep.subr.bf16.mxu0 %v14902_v7 }
0x15cb   : > { %14049 = vmatpush3.bf16.msra.mxu0 %v14754_v28 }
0x15cc   : > { %14050 = vmatprep.subr.bf16.mxu0 %v14902_v7 }
0x15cf   : > { %14051 = vmatpush3.bf16.msra.mxu0 %v14755_v29 }
0x15d0   : > { %14052 = vmatprep.subr.bf16.mxu0 %v14902_v7 }
0x15d3   : > { %14053 = vmatpush3.bf16.msra.mxu0 %v14756_v25 }
0x15d4   : > { %14076 = vmatprep.subr.bf16.mxu0 %v14902_v7 }
0x166e   : > { %v8408_v43 = vpop.f32.mrf.mxu1 }
0x1670   : > { %v14020_v34 = vpop.f32.mrf.mxu1 }
0x1672   : > { %v8411_v54 = vpop.f32.mrf.mxu1 }
0x1674   : > { %v14021_v5 = vpop.f32.mrf.mxu1 }
0x1676   : > { %v8341_v23 = vpop.f32.mrf.mxu0 }
0x1677   : > { %v8409_v4 = vadd.f32 %v8408_v43, %v8341_v23 }
0x1678   : > { %v14008_v33 = vpop.f32.mrf.mxu0 }
0x167a   : > { %v8344_v0 = vpop.f32.mrf.mxu0 }
0x167c   : > { %v14009_v9 = vpop.f32.mrf.mxu0 }
0x167e   : > { %v8453_v51 = vpop.f32.mrf.mxu0 }
0x167f   : > { %v8459_v59 = vpack.c.bf16 %v8453_v51, %v8453_v51 }
0x1680   : > { %v14026_v10 = vpop.f32.mrf.mxu0 }
0x1681   : > { %14037 = vmatmul.mubr.msk.bf16.vlgmr.msra.gmra.mxu1 %vm2414_vm1, %v8459_v59 }
0x1682   : > { %14059 = vmatpush3.bf16.msra.mxu1 %v16660_v56  ;;  %v8456_v6 = vpop.f32.mrf.mxu0  ;;  %14060 = vmatprep.mubr.msk.bf16.mxu1 %vm14903_vm2, %v14902_v7 }
0x1683   : > { %14064 = vmatprep.subr.bf16.mxu1 %v14902_v7 }
0x1684   : > { %v14027_v1 = vpop.f32.mrf.mxu0 }
0x1685   : > { %v11891_v1 = vld [vmem:[%s17242_s23 + $0x10] sm:$0x3] }
0x1686   : > { %v8576_v62 = vpop.f32.mrf.mxu0 }
0x1687   : > { %v8582_v39 = vpack.c.bf16 %v8576_v62, %v8576_v62  ;;  %v14773_v62 = vld [vmem:[%s17243_s26 + $0x18] sm:$0xff]  }
0x1688   : > { %v14044_v17 = vpop.f32.mrf.mxu0 }
0x1689   : > { %14055 = vmatmul.mubr.msk.bf16.vlgmr.msra.gmra.mxu0 %vm2414_vm1, %v8582_v39  ;;  %14061 = vmatmul.mubr.msk.bf16.vlgmr.msra.gmra.mxu1 %vm6982_vm3, %v11831_v61  ;;  %v14777_v39 = vld [vmem:[%s17239_s16 + $0x118] sm:$0xff]  }
0x168a   : > { %14077 = vmatpush3.bf16.msra.mxu0 %v16660_v56  ;;  %14078 = vmatprep.mubr.msk.bf16.mxu0 %vm14903_vm2, %v14902_v7  ;;  %v8579_v41 = vpop.f32.mrf.mxu0 }
0x168b   : > { %14065 = vmatpush3.bf16.msra.mxu1 %v14757_v21  ;;  %14082 = vmatprep.subr.bf16.mxu0 %v14902_v7 }
0x168c   : > { %14066 = vmatprep.subr.bf16.mxu1 %v14902_v7  ;;  %v14045_v35 = vpop.f32.mrf.mxu0  ;;  %14072 = vmatprep.mubr.msk.bf16.mxu1 %vm14903_vm2, %v14902_v7 }
0x168d   : > { %v14776_v35 = vld [vmem:[%s17243_s26] sm:$0xff]  }
0x168f   : > { %14067 = vmatpush3.bf16.msra.mxu1 %v14758_v2  ;;  %v14775_v2 = vld [vmem:[%s17243_s26 + $0x8] sm:$0xff]  }
0x1690   : > { %14068 = vmatprep.subr.bf16.mxu1 %v14902_v7 }
0x1691   : > { %14079 = vmatmul.mubr.msk.bf16.vlgmr.msra.gmra.mxu0 %vm6982_vm3, %v11846_v15  ;;  %v14778_v15 = vld [vmem:[%s17239_s16 + $0x110] sm:$0xff]  }
0x1692   : > { %14090 = vmatprep.mubr.msk.bf16.mxu0 %vm14903_vm2, %v14902_v7  ;;  %14083 = vmatpush3.bf16.msra.mxu0 %v14760_v24  ;;  %v14780_v24 = vld [vmem:[%s17239_s16 + $0x100] sm:$0xff]  }
0x1693   : > { %14069 = vmatpush3.bf16.msra.mxu1 %v14759_v55  ;;  %14084 = vmatprep.subr.bf16.mxu0 %v14902_v7  ;;  %v14779_v55 = vld [vmem:[%s17239_s16 + $0x108] sm:$0xff]  }
0x1694   : > { %14070 = vmatprep.subr.bf16.mxu1 %v14902_v7 }
0x1696   : > { %14085 = vmatpush3.bf16.msra.mxu0 %v14762_v32 }
0x1697   : > { %14071 = vmatpush3.bf16.msra.mxu1 %v14761_v44  ;;  %14086 = vmatprep.subr.bf16.mxu0 %v14902_v7 }
0x1698   : > { %14094 = vmatprep.subr.bf16.mxu1 %v14902_v7 }
0x169a   : > { %14087 = vmatpush3.bf16.msra.mxu0 %v14763_v12 }
0x169b   : > { %14088 = vmatprep.subr.bf16.mxu0 %v14902_v7 }
0x169e   : > { %14089 = vmatpush3.bf16.msra.mxu0 %v14764_v30 }
0x169f   : > { %14112 = vmatprep.subr.bf16.mxu0 %v14902_v7 }
0x1741   : > { %v8530_v19 = vpop.f32.mrf.mxu1 }
0x1742   : > { %v8536_v13 = vadd.f32 %v8530_v19, %v8409_v4 }
0x1743   : > { %v14038_v14 = vpop.f32.mrf.mxu1 }
0x1745   : > { %v8533_v63 = vpop.f32.mrf.mxu1 }
0x1747   : > { %v14039_v46 = vpop.f32.mrf.mxu1 }
0x1749   : > { %v8653_v11 = vpop.f32.mrf.mxu0  ;;  %v8699_v22 = vpop.f32.mrf.mxu1 }
0x174a   : > { %v8659_v37 = vadd.f32 %v8653_v11, %v8536_v13  ;;  %v16754_v27 = vpack.c.bf16 %v8699_v22, %v8699_v22 }
0x174b   : > { %v14056_v58 = vpop.f32.mrf.mxu0  ;;  %v14062_v49 = vpop.f32.mrf.mxu1 }
0x174c   : > { %14073 = vmatmul.mubr.msk.bf16.vlgmr.msra.gmra.mxu1 %vm2414_vm1, %v16754_v27 }
0x174d   : > { %14095 = vmatpush3.bf16.msra.mxu1 %v16660_v56  ;;  %v8656_v8 = vpop.f32.mrf.mxu0  ;;  %v8702_v20 = vpop.f32.mrf.mxu1  ;;  %14096 = vmatprep.mubr.msk.bf16.mxu1 %vm14903_vm2, %v14902_v7 }
0x174e   : > { %14100 = vmatprep.subr.bf16.mxu1 %v14902_v7 }
0x174f   : > { %v14057_v38 = vpop.f32.mrf.mxu0  ;;  %v14063_v31 = vpop.f32.mrf.mxu1 }
0x1751   : > { %v8822_v57 = vpop.f32.mrf.mxu0 }
0x1752   : > { %v8828_v18 = vpack.c.bf16 %v8822_v57, %v8822_v57 }
0x1753   : > { %v14080_v36 = vpop.f32.mrf.mxu0 }
0x1754   : > { %14091 = vmatmul.mubr.msk.bf16.vlgmr.msra.gmra.mxu0 %vm2414_vm1, %v8828_v18  ;;  %14097 = vmatmul.mubr.msk.bf16.vlgmr.msra.gmra.mxu1 %vm6982_vm3, %v11861_v40  ;;  %v11906_v40 = vld [vmem:[%s17244_s28] ss:$0 sm:$0xff] }
0x1755   : > { %14113 = vmatpush3.bf16.msra.mxu0 %v16660_v56  ;;  %14114 = vmatprep.mubr.msk.bf16.mxu0 %vm14903_vm2, %v14902_v7  ;;  %v8825_v16 = vpop.f32.mrf.mxu0 }
0x1756   : > { %14101 = vmatpush3.bf16.msra.mxu1 %v14765_v26  ;;  %14118 = vmatprep.subr.bf16.mxu0 %v14902_v7 }
0x1757   : > { %14102 = vmatprep.subr.bf16.mxu1 %v14902_v7  ;;  %v14081_v47 = vpop.f32.mrf.mxu0  ;;  %14108 = vmatprep.mubr.msk.bf16.mxu1 %vm14903_vm2, %v14902_v7 }
0x175a   : > { %14103 = vmatpush3.bf16.msra.mxu1 %v14766_v52 }
0x175b   : > { %14104 = vmatprep.subr.bf16.mxu1 %v14902_v7 }
0x175c   : > { %14115 = vmatmul.mubr.msk.bf16.vlgmr.msra.gmra.mxu0 %vm6982_vm3, %v11876_v3 }
0x175d   : > { %14126 = vmatprep.mubr.msk.bf16.mxu0 %vm14903_vm2, %v14902_v7  ;;  %14119 = vmatpush3.bf16.msra.mxu0 %v14768_v50  ;;  %v11914_v50 = vld [vmem:[%s17245_s1 + $0x2] sm:$0x3] }
0x175e   : > { %14105 = vmatpush3.bf16.msra.mxu1 %v14767_v60  ;;  %14120 = vmatprep.subr.bf16.mxu0 %v14902_v7 }
0x175f   : > { %14106 = vmatprep.subr.bf16.mxu1 %v14902_v7 }
0x1761   : > { %14121 = vmatpush3.bf16.msra.mxu0 %v14770_v53  ;;  %v14781_v53 = vld [vmem:[%s17246_s2 + $0x78] sm:$0xff]  }
0x1762   : > { %14107 = vmatpush3.bf16.msra.mxu1 %v14769_v45  ;;  %14122 = vmatprep.subr.bf16.mxu0 %v14902_v7  ;;  %v9364_v45 = vld [vmem:[%s17245_s1] sm:$0x3] }
0x1763   : > { %14130 = vmatprep.subr.bf16.mxu1 %v14902_v7 }
0x1765   : > { %14123 = vmatpush3.bf16.msra.mxu0 %v14771_v42  ;;  %v14786_v42 = vld [vmem:[%s17246_s2 + $0x38] sm:$0xff]  }
0x1766   : > { %14124 = vmatprep.subr.bf16.mxu0 %v14902_v7 }
0x1769   : > { %14125 = vmatpush3.bf16.msra.mxu0 %v14772_v48  ;;  %v14782_v48 = vld [vmem:[%s17246_s2 + $0x70] sm:$0xff]  }
0x176a   : > { %14148 = vmatprep.subr.bf16.mxu0 %v14902_v7 }
0x180c   : > { %v8776_v28 = vpop.f32.mrf.mxu1 }
0x180d   : > { %v8782_v29 = vadd.f32 %v8776_v28, %v8659_v37  ;;  %v14788_v28 = vld [vmem:[%s17246_s2 + $0x30] sm:$0xff]  }
0x180e   : > { %v14074_v25 = vpop.f32.mrf.mxu1 }
0x180f   : > { %v14790_v25 = vld [vmem:[%s17246_s2 + $0x28] sm:$0xff]  }
0x1810   : > { %v8779_v43 = vpop.f32.mrf.mxu1 }
0x1811   : > { %v14784_v43 = vld [vmem:[%s17246_s2 + $0x60] sm:$0xff]  }
0x1812   : > { %v14075_v34 = vpop.f32.mrf.mxu1 }
0x1813   : > { %v14785_v34 = vld [vmem:[%s17246_s2 + $0x58] sm:$0xff]  }
0x1814   : > { %v8899_v54 = vpop.f32.mrf.mxu0  ;;  %v8945_v5 = vpop.f32.mrf.mxu1 }
0x1815   : > { %v8905_v23 = vadd.f32 %v8899_v54, %v8782_v29  ;;  %v8951_v4 = vpack.c.bf16 %v8945_v5, %v8945_v5  ;;  %v14783_v29 = vld [vmem:[%s17246_s2 + $0x68] sm:$0xff]   ;;  %v14787_v54 = vld [vmem:[%s17246_s2 + $0x50] sm:$0xff]  }
0x1816   : > { %v14092_v33 = vpop.f32.mrf.mxu0  ;;  %v14098_v0 = vpop.f32.mrf.mxu1  ;;  %v14789_v5 = vld [vmem:[%s17246_s2 + $0x48] sm:$0xff]  }
0x1817   : > { %14109 = vmatmul.mubr.msk.bf16.vlgmr.msra.gmra.mxu1 %vm2414_vm1, %v8951_v4  ;;  %v14792_v4 = vld [vmem:[%s17246_s2 + $0x20] sm:$0xff]   ;;  %v14793_v33 = vld [vmem:[%s17246_s2 + $0x18] sm:$0xff]   ;;  %v14794_v0 = vld [vmem:[%s17246_s2 + $0x10] sm:$0xff]  }
0x1818   : > { %14131 = vmatpush3.bf16.msra.mxu1 %v16660_v56  ;;  %v8902_v9 = vpop.f32.mrf.mxu0  ;;  %v8948_v51 = vpop.f32.mrf.mxu1  ;;  %14132 = vmatprep.mubr.msk.bf16.mxu1 %vm14903_vm2, %v14902_v7  ;;  %v14774_v56 = vld [vmem:[%s17243_s26 + $0x10] sm:$0xff]  }
0x1819   : > { %14136 = vmatprep.subr.bf16.mxu1 %v14902_v7  ;;  %v14795_v9 = vld [vmem:[%s17246_s2 + $0x8] sm:$0xff]   ;;  %v14796_v51 = vld [vmem:[%s17246_s2] sm:$0xff]  }
0x181a   : > { %v14093_v59 = vpop.f32.mrf.mxu0  ;;  %v14099_v10 = vpop.f32.mrf.mxu1 }
0x181c   : > { %v9068_v6 = vpop.f32.mrf.mxu0 }
0x181d   : > { %v9074_v61 = vpack.c.bf16 %v9068_v6, %v9068_v6 }
0x181e   : > { %v14116_v21 = vpop.f32.mrf.mxu0 }
0x181f   : > { %14127 = vmatmul.mubr.msk.bf16.vlgmr.msra.gmra.mxu0 %vm2414_vm1, %v9074_v61  ;;  %14133 = vmatmul.mubr.msk.bf16.vlgmr.msra.gmra.mxu1 %vm6982_vm3, %v11891_v1 }
0x1820   : > { %14149 = vmatpush3.bf16.msra.mxu0 %v14773_v62  ;;  %14156 = vmatprep.mubr.msk.bf16.mxu0 %vm14903_vm2, %v14902_v7  ;;  %v9071_v17 = vpop.f32.mrf.mxu0  ;;  %v14797_v62 = vld [vmem:[%s17246_s2 + $0xb8] sm:$0xff]  }
0x1821   : > { %14150 = vmatprep.subr.bf16.mxu0 %v14902_v7  ;;  %14137 = vmatpush3.bf16.msra.mxu1 %v14777_v39  ;;  %v14798_v17 = vld [vmem:[%s17246_s2 + $0xb0] sm:$0xff]  }
0x1822   : > { %14138 = vmatprep.subr.bf16.mxu1 %v14902_v7  ;;  %v14117_v41 = vpop.f32.mrf.mxu0  ;;  %14144 = vmatprep.mubr.msk.bf16.mxu1 %vm14903_vm2, %v14902_v7 }
0x1824   : > { %14151 = vmatpush3.bf16.msra.mxu0 %v14774_v56 }
0x1825   : > { %14152 = vmatprep.subr.bf16.mxu0 %v14902_v7  ;;  %14139 = vmatpush3.bf16.msra.mxu1 %v14778_v15  ;;  %v14799_v15 = vld [vmem:[%s17246_s2 + $0xa8] sm:$0xff]  }
0x1826   : > { %14140 = vmatprep.subr.bf16.mxu1 %v14902_v7 }
0x1828   : > { %14153 = vmatpush3.bf16.msra.mxu0 %v14775_v2 }
0x1829   : > { %14154 = vmatprep.subr.bf16.mxu0 %v14902_v7  ;;  %14141 = vmatpush3.bf16.msra.mxu1 %v14779_v55  ;;  %v14801_v55 = vld [vmem:[%s17246_s2 + $0xa0] sm:$0xff]  }
0x182a   : > { %14142 = vmatprep.subr.bf16.mxu1 %v14902_v7 }
0x182c   : > { %14155 = vmatpush3.bf16.msra.mxu0 %v14776_v35  ;;  %v11948_v35 = vld [vmem:[%s17245_s1 + $0x4] sm:$0x3] }
0x182d   : > { %14166 = vmatprep.subr.bf16.mxu0 %v14902_v7  ;;  %14143 = vmatpush3.bf16.msra.mxu1 %v14780_v24  ;;  %v11974_v24 = vld [vmem:[%s17245_s1 + $0x6] sm:$0x3] }
0x182e   : > { %14160 = vmatprep.subr.bf16.mxu1 %v14902_v7 }
0x182f   : > { %14157 = vmatmul.mubr.msk.bf16.vlgmr.msra.gmra.mxu0 %vm2414_vm1, %v16754_v27 }
0x1830   : > { %14168 = vmatprep.mubr.msk.bf16.mxu0 %vm14903_vm2, %v14902_v7 }
0x18d7   : > { %v9022_v44 = vpop.f32.mrf.mxu1 }
0x18d8   : > { %v9028_v32 = vadd.f32 %v9022_v44, %v8905_v23  ;;  %v14791_v23 = vld [vmem:[%s17246_s2 + $0x40] sm:$0xff]   ;;  %v14800_v44 = vld [vmem:[%s17246_s2 + $0xf8] sm:$0xff]  }
0x18d9   : > { %v14110_v12 = vpop.f32.mrf.mxu1 }
0x18da   : > { %v14802_v12 = vld [vmem:[%s17246_s2 + $0xf0] sm:$0xff]  }
0x18db   : > { %v9025_v30 = vpop.f32.mrf.mxu1 }
0x18dc   : > { %v14805_v30 = vld [vmem:[%s17246_s2 + $0x90] sm:$0xff]  }
0x18dd   : > { %v14111_v19 = vpop.f32.mrf.mxu1 }
0x18de   : > { %v14804_v19 = vld [vmem:[%s17246_s2 + $0xe8] sm:$0xff]  }
0x18df   : > { %v9145_v13 = vpop.f32.mrf.mxu0  ;;  %v9191_v14 = vpop.f32.mrf.mxu1 }
0x18e0   : > { %v9151_v63 = vadd.f32 %v9145_v13, %v9028_v32  ;;  %v9197_v46 = vpack.c.bf16 %v9191_v14, %v9191_v14  ;;  %v14803_v32 = vld [vmem:[%s17246_s2 + $0x98] sm:$0xff]   ;;  %v14806_v13 = vld [vmem:[%s17246_s2 + $0xe0] sm:$0xff]   ;;  %v14807_v14 = vld [vmem:[%s17246_s2 + $0x88] sm:$0xff]  }
0x18e1   : > { %v14134_v11 = vpop.f32.mrf.mxu1  ;;  %v14128_v22 = vpop.f32.mrf.mxu0 }
0x18e2   : > { %14145 = vmatmul.mubr.msk.bf16.vlgmr.msra.gmra.mxu1 %vm2414_vm1, %v9197_v46  ;;  %v14809_v46 = vld [vmem:[%s17246_s2 + $0x80] sm:$0xff]   ;;  %v14810_v11 = vld [vmem:[%s17246_s2 + $0xd0] sm:$0xff]   ;;  %v14811_v22 = vld [vmem:[%s17246_s2 + $0xc8] sm:$0xff]  }
0x18e3   : > { %v9194_v37 = vpop.f32.mrf.mxu1  ;;  %v9148_v27 = vpop.f32.mrf.mxu0  ;;  %14162 = vmatprep.mubr.msk.bf16.mxu1 %vm14903_vm2, %v14902_v7 }
0x18e4   : > { %v14812_v37 = vld [vmem:[%s17246_s2 + $0xc0] sm:$0xff]  }
0x18e5   : > { %v14135_v58 = vpop.f32.mrf.mxu1  ;;  %v14129_v49 = vpop.f32.mrf.mxu0 }
0x18ef   : > { %v16826_v8 = vpop.f32.mrf.mxu0 }
0x18f1   : > { %v14158_v20 = vpop.f32.mrf.mxu0 }
0x18f3   : > { %v9361_v38 = vpop.f32.mrf.mxu0 }
0x18f5   : > { %v14159_v31 = vpop.f32.mrf.mxu0 }
0x19a2   : > { %v9268_v57 = vpop.f32.mrf.mxu1 }
0x19a3   : > { %v9274_v18 = vadd.f32 %v9268_v57, %v9151_v63  ;;  %v14808_v63 = vld [vmem:[%s17246_s2 + $0xd8] sm:$0xff]  }
0x19a4   : > { %v14146_v26 = vpop.f32.mrf.mxu1 }
0x19a5   : > { %v9282_v36 = vadd.f32 %v11906_v40, %v9274_v18 }
0x19a6   : > { %v9271_v16 = vpop.f32.mrf.mxu1 }
0x19a7   : > { %v9283_v52 = vmax.f32 %v9282_v36, 0.0 }
0x19a8   : > { %v14147_v47 = vpop.f32.mrf.mxu1 }
0x19a9   : > { %v9284_v3 = vpack.c.bf16 %v9283_v52, %v9283_v52 }
0x19ab   : > { %v16829_v60 = vsel %vm9369_vm4, %v9284_v3, 0 }
0x19ac   : > { %14161 = vmatpush3.bf16.msra.mxu1 %v16829_v60  ;;  %14167 = vmatpush3.bf16.msra.mxu0 %v16829_v60 }
0x19ad   : > { %14172 = vmatprep.subr.bf16.mxu1 %v14902_v7  ;;  %14192 = vmatprep.subr.bf16.mxu0 %v14902_v7 }
0x19af   : > { %14169 = vmatmul.mubr.msk.bf16.vlgmr.msra.gmra.mxu0 %vm9365_vm5, %v11914_v50  ;;  %14163 = vmatmul.mubr.msk.bf16.vlgmr.msra.gmra.mxu1 %vm9365_vm5, %v9364_v45  ;;  %v12000_v50 = vld [vmem:[%s17245_s1 + $0x8] sm:$0x3] }
0x19b0   : > { %14173 = vmatpush3.bf16.msra.mxu1 %v14781_v53  ;;  %14193 = vmatpush3.bf16.msra.mxu0 %v14786_v42  ;;  %v14813_v53 = vld [vmem:[%s17246_s2 + $0x138] sm:$0xff]  }
0x19b1   : > { %14174 = vmatprep.subr.bf16.mxu1 %v14902_v7  ;;  %14194 = vmatprep.subr.bf16.mxu0 %v14902_v7 }
0x19b2   : > { %14188 = vmatprep.mubr.msk.bf16.mxu1 %vm14903_vm2, %v14902_v7  ;;  %14208 = vmatprep.mubr.msk.bf16.mxu0 %vm14903_vm2, %v14902_v7 }
0x19b4   : > { %14175 = vmatpush3.bf16.msra.mxu1 %v14782_v48  ;;  %14195 = vmatpush3.bf16.msra.mxu0 %v14788_v28  ;;  %v14814_v28 = vld [vmem:[%s17246_s2 + $0x130] sm:$0xff]  }
0x19b5   : > { %14176 = vmatprep.subr.bf16.mxu1 %v14902_v7  ;;  %14196 = vmatprep.subr.bf16.mxu0 %v14902_v7 }
0x19b8   : > { %14177 = vmatpush3.bf16.msra.mxu1 %v14783_v29  ;;  %14197 = vmatpush3.bf16.msra.mxu0 %v14790_v25  ;;  %v12026_v25 = vld [vmem:[%s17245_s1 + $0xa] sm:$0x3] }
0x19b9   : > { %14178 = vmatprep.subr.bf16.mxu1 %v14902_v7  ;;  %14198 = vmatprep.subr.bf16.mxu0 %v14902_v7 }
0x19bc   : > { %14179 = vmatpush3.bf16.msra.mxu1 %v14784_v43  ;;  %14199 = vmatpush3.bf16.msra.mxu0 %v14792_v4  ;;  %v14816_v43 = vld [vmem:[%s17246_s2 + $0x178] sm:$0xff]  }
0x19bd   : > { %14180 = vmatprep.subr.bf16.mxu1 %v14902_v7  ;;  %14200 = vmatprep.subr.bf16.mxu0 %v14902_v7  ;;  %v14819_v4 = vld [vmem:[%s17246_s2 + $0x118] sm:$0xff]  }
0x19c0   : > { %14181 = vmatpush3.bf16.msra.mxu1 %v14785_v34  ;;  %14201 = vmatpush3.bf16.msra.mxu0 %v14793_v33  ;;  %v14815_v34 = vld [vmem:[%s17246_s2 + $0x128] sm:$0xff]   ;;  %v14822_v33 = vld [vmem:[%s17246_s2 + $0x160] sm:$0xff]  }
0x19c1   : > { %14182 = vmatprep.subr.bf16.mxu1 %v14902_v7  ;;  %14202 = vmatprep.subr.bf16.mxu0 %v14902_v7 }
0x19c4   : > { %14183 = vmatpush3.bf16.msra.mxu1 %v14787_v54  ;;  %14203 = vmatpush3.bf16.msra.mxu0 %v14794_v0  ;;  %v14818_v54 = vld [vmem:[%s17246_s2 + $0x170] sm:$0xff]  }
0x19c5   : > { %14184 = vmatprep.subr.bf16.mxu1 %v14902_v7  ;;  %14204 = vmatprep.subr.bf16.mxu0 %v14902_v7  ;;  %v14821_v0 = vld [vmem:[%s17246_s2 + $0x110] sm:$0xff]  }
0x19c8   : > { %14185 = vmatpush3.bf16.msra.mxu1 %v14789_v5  ;;  %14205 = vmatpush3.bf16.msra.mxu0 %v14795_v9  ;;  %v14817_v5 = vld [vmem:[%s17246_s2 + $0x120] sm:$0xff]   ;;  %v14823_v9 = vld [vmem:[%s17246_s2 + $0x108] sm:$0xff]  }
0x19c9   : > { %14186 = vmatprep.subr.bf16.mxu1 %v14902_v7  ;;  %14206 = vmatprep.subr.bf16.mxu0 %v14902_v7 }
0x19cc   : > { %14187 = vmatpush3.bf16.msra.mxu1 %v14791_v23  ;;  %14207 = vmatpush3.bf16.msra.mxu0 %v14796_v51  ;;  %v14820_v23 = vld [vmem:[%s17246_s2 + $0x168] sm:$0xff]   ;;  %v14824_v51 = vld [vmem:[%s17246_s2 + $0x158] sm:$0xff]  }
0x19cd   : > { %14212 = vmatprep.subr.bf16.mxu1 %v14902_v7  ;;  %14218 = vmatprep.subr.bf16.mxu0 %v14902_v7 }
0x1a6f   : > { %v9469_v59 = vpop.f32.mrf.mxu0  ;;  %v9407_v10 = vpop.f32.mrf.mxu1 }
0x1a70   : > { %v9475_v6 = vpack.c.bf16 %v9469_v59, %v9469_v59  ;;  %v9413_v1 = vpack.c.bf16 %v9407_v10, %v9407_v10  ;;  %v14825_v59 = vld [vmem:[%s17246_s2 + $0x100] sm:$0xff]   ;;  %v14826_v10 = vld [vmem:[%s17246_s2 + $0x150] sm:$0xff]  }
0x1a71   : > { %v14170_v61 = vpop.f32.mrf.mxu0  ;;  %v14164_v39 = vpop.f32.mrf.mxu1 }
0x1a72   : > { %14189 = vmatmul.mubr.bf16.vlgmr.msra.gmra.mxu1 %v9475_v6  ;;  %14209 = vmatmul.mubr.bf16.vlgmr.msra.gmra.mxu0 %v9413_v1  ;;  %v14827_v6 = vld [vmem:[%s17246_s2 + $0x148] sm:$0xff]   ;;  %v14828_v1 = vld [vmem:[%s17246_s2 + $0x140] sm:$0xff]  }
0x1a73   : > { %14213 = vmatpush3.bf16.msra.mxu1 %v16829_v60  ;;  %14214 = vmatprep.mubr.msk.bf16.mxu1 %vm14903_vm2, %v14902_v7  ;;  %v9472_v21 = vpop.f32.mrf.mxu0  ;;  %v9410_v56 = vpop.f32.mrf.mxu1 }
0x1a74   : > { %14238 = vmatprep.subr.bf16.mxu1 %v14902_v7  ;;  %14219 = vmatpush3.bf16.msra.mxu0 %v14797_v62 }
0x1a75   : > { %v14171_v41 = vpop.f32.mrf.mxu0  ;;  %14220 = vmatprep.subr.bf16.mxu0 %v14902_v7  ;;  %v14165_v2 = vpop.f32.mrf.mxu1  ;;  %14234 = vmatprep.mubr.msk.bf16.mxu0 %vm14903_vm2, %v14902_v7 }
0x1a78   : > { %14221 = vmatpush3.bf16.msra.mxu0 %v14798_v17 }
0x1a79   : > { %14222 = vmatprep.subr.bf16.mxu0 %v14902_v7 }
0x1a7a   : > { %14215 = vmatmul.mubr.msk.bf16.vlgmr.msra.gmra.mxu1 %vm9365_vm5, %v11948_v35 }
0x1a7b   : > { %14239 = vmatpush3.bf16.msra.mxu1 %v16829_v60  ;;  %14240 = vmatprep.mubr.msk.bf16.mxu1 %vm14903_vm2, %v14902_v7 }
0x1a7c   : > { %14244 = vmatprep.subr.bf16.mxu1 %v14902_v7  ;;  %14223 = vmatpush3.bf16.msra.mxu0 %v14799_v15 }
0x1a7d   : > { %14224 = vmatprep.subr.bf16.mxu0 %v14902_v7 }
0x1a80   : > { %14225 = vmatpush3.bf16.msra.mxu0 %v14801_v55 }
0x1a81   : > { %14226 = vmatprep.subr.bf16.mxu0 %v14902_v7 }
0x1a82   : > { %14241 = vmatmul.mubr.msk.bf16.vlgmr.msra.gmra.mxu1 %vm9365_vm5, %v11974_v24 }
0x1a83   : > { %14245 = vmatpush3.bf16.msra.mxu1 %v14800_v44  ;;  %14260 = vmatprep.mubr.msk.bf16.mxu1 %vm14903_vm2, %v14902_v7 }
0x1a84   : > { %14246 = vmatprep.subr.bf16.mxu1 %v14902_v7  ;;  %14227 = vmatpush3.bf16.msra.mxu0 %v14803_v32 }
0x1a85   : > { %14228 = vmatprep.subr.bf16.mxu0 %v14902_v7 }
0x1a87   : > { %14247 = vmatpush3.bf16.msra.mxu1 %v14802_v12 }
0x1a88   : > { %14248 = vmatprep.subr.bf16.mxu1 %v14902_v7  ;;  %14229 = vmatpush3.bf16.msra.mxu0 %v14805_v30 }
0x1a89   : > { %14230 = vmatprep.subr.bf16.mxu0 %v14902_v7 }
0x1a8b   : > { %14249 = vmatpush3.bf16.msra.mxu1 %v14804_v19  ;;  %v12052_v19 = vld [vmem:[%s17245_s1 + $0xc] sm:$0x3] }
0x1a8c   : > { %14250 = vmatprep.subr.bf16.mxu1 %v14902_v7  ;;  %14231 = vmatpush3.bf16.msra.mxu0 %v14807_v14  ;;  %v14829_v14 = vld [vmem:[%s17246_s2 + $0x1b8] sm:$0xff]  }
0x1a8d   : > { %14232 = vmatprep.subr.bf16.mxu0 %v14902_v7 }
0x1a8f   : > { %14251 = vmatpush3.bf16.msra.mxu1 %v14806_v13 }
0x1a90   : > { %14252 = vmatprep.subr.bf16.mxu1 %v14902_v7  ;;  %14233 = vmatpush3.bf16.msra.mxu0 %v14809_v46 }
0x1a91   : > { %14264 = vmatprep.subr.bf16.mxu0 %v14902_v7 }
0x1a93   : > { %14253 = vmatpush3.bf16.msra.mxu1 %v14808_v63 }
0x1a94   : > { %14254 = vmatprep.subr.bf16.mxu1 %v14902_v7 }
0x1a97   : > { %14255 = vmatpush3.bf16.msra.mxu1 %v14810_v11  ;;  %v14830_v11 = vld [vmem:[%s17246_s2 + $0x1b0] sm:$0xff]  }
0x1a98   : > { %14256 = vmatprep.subr.bf16.mxu1 %v14902_v7 }
0x1a9b   : > { %14257 = vmatpush3.bf16.msra.mxu1 %v14811_v22 }
0x1a9c   : > { %14258 = vmatprep.subr.bf16.mxu1 %v14902_v7 }
0x1a9f   : > { %14259 = vmatpush3.bf16.msra.mxu1 %v14812_v37  ;;  %v12078_v37 = vld [vmem:[%s17245_s1 + $0xe] sm:$0x3] }
0x1aa0   : > { %14290 = vmatprep.subr.bf16.mxu1 %v14902_v7 }
0x1b32   : > { %v9575_v27 = vpop.f32.mrf.mxu1  ;;  %v9663_v58 = vpop.f32.mrf.mxu0 }
0x1b33   : > { %v16923_v49 = vadd.f32 %v9663_v58, %v9575_v27  ;;  %v14832_v27 = vld [vmem:[%s17246_s2 + $0x1f8] sm:$0xff]   ;;  %v14831_v58 = vld [vmem:[%s17246_s2 + $0x1a8] sm:$0xff]  }
0x1b34   : > { %v14190_v20 = vpop.f32.mrf.mxu1  ;;  %v14210_v38 = vpop.f32.mrf.mxu0 }
0x1b35   : > { %v14833_v20 = vld [vmem:[%s17246_s2 + $0x1a0] sm:$0xff]   ;;  %v14836_v38 = vld [vmem:[%s17246_s2 + $0x1e8] sm:$0xff]  }
0x1b36   : > { %v9578_v31 = vpop.f32.mrf.mxu1  ;;  %v9666_v57 = vpop.f32.mrf.mxu0 }
0x1b37   : > { %v14835_v31 = vld [vmem:[%s17246_s2 + $0x198] sm:$0xff]   ;;  %v14837_v57 = vld [vmem:[%s17246_s2 + $0x190] sm:$0xff]  }
0x1b38   : > { %v14191_v40 = vpop.f32.mrf.mxu1  ;;  %v14211_v18 = vpop.f32.mrf.mxu0 }
0x1b39   : > { %v14838_v40 = vld [vmem:[%s17246_s2 + $0x1e0] sm:$0xff]   ;;  %v14839_v18 = vld [vmem:[%s17246_s2 + $0x188] sm:$0xff]  }
0x1b3a   : > { %v9708_v26 = vpop.f32.mrf.mxu1 }
0x1b3b   : > { %v9714_v36 = vpack.c.bf16 %v9708_v26, %v9708_v26  ;;  %v14840_v26 = vld [vmem:[%s17246_s2 + $0x1d8] sm:$0xff]  }
0x1b3c   : > { %v14216_v16 = vpop.f32.mrf.mxu1 }
0x1b3d   : > { %14235 = vmatmul.mubr.bf16.vlgmr.msra.gmra.mxu0 %v9714_v36  ;;  %v14841_v36 = vld [vmem:[%s17246_s2 + $0x180] sm:$0xff]   ;;  %v14842_v16 = vld [vmem:[%s17246_s2 + $0x1d0] sm:$0xff]  }
0x1b3e   : > { %14265 = vmatpush3.bf16.msra.mxu0 %v16829_v60  ;;  %v9711_v52 = vpop.f32.mrf.mxu1  ;;  %14266 = vmatprep.mubr.msk.bf16.mxu0 %vm14903_vm2, %v14902_v7 }
0x1b3f   : > { %14270 = vmatprep.subr.bf16.mxu0 %v14902_v7  ;;  %v14843_v52 = vld [vmem:[%s17246_s2 + $0x1c8] sm:$0xff]  }
0x1b40   : > { %v14217_v47 = vpop.f32.mrf.mxu1 }
0x1b41   : > { %v14844_v47 = vld [vmem:[%s17246_s2 + $0x1c0] sm:$0xff]  }
0x1b42   : > { %v9860_v3 = vpop.f32.mrf.mxu1 }
0x1b43   : > { %v9866_v45 = vpack.c.bf16 %v9860_v3, %v9860_v3 }
0x1b44   : > { %v14242_v42 = vpop.f32.mrf.mxu1 }
0x1b45   : > { %14261 = vmatmul.mubr.bf16.vlgmr.msra.gmra.mxu1 %v9866_v45  ;;  %14267 = vmatmul.mubr.msk.bf16.vlgmr.msra.gmra.mxu0 %vm9365_vm5, %v12000_v50 }
0x1b46   : > { %14291 = vmatpush3.bf16.msra.mxu1 %v16829_v60  ;;  %14292 = vmatprep.mubr.msk.bf16.mxu1 %vm14903_vm2, %v14902_v7  ;;  %v9863_v48 = vpop.f32.mrf.mxu1 }
0x1b47   : > { %14271 = vmatpush3.bf16.msra.mxu0 %v14813_v53  ;;  %14296 = vmatprep.subr.bf16.mxu1 %v14902_v7 }
0x1b48   : > { %14272 = vmatprep.subr.bf16.mxu0 %v14902_v7  ;;  %v14243_v29 = vpop.f32.mrf.mxu1  ;;  %14286 = vmatprep.mubr.msk.bf16.mxu0 %vm14903_vm2, %v14902_v7 }
0x1b4b   : > { %14273 = vmatpush3.bf16.msra.mxu0 %v14814_v28 }
0x1b4c   : > { %14274 = vmatprep.subr.bf16.mxu0 %v14902_v7 }
0x1b4d   : > { %14293 = vmatmul.mubr.msk.bf16.vlgmr.msra.gmra.mxu1 %vm9365_vm5, %v12026_v25 }
0x1b4e   : > { %14297 = vmatpush3.bf16.msra.mxu1 %v14816_v43  ;;  %14312 = vmatprep.mubr.msk.bf16.mxu1 %vm14903_vm2, %v14902_v7 }
0x1b4f   : > { %14275 = vmatpush3.bf16.msra.mxu0 %v14815_v34  ;;  %14298 = vmatprep.subr.bf16.mxu1 %v14902_v7 }
0x1b50   : > { %14276 = vmatprep.subr.bf16.mxu0 %v14902_v7 }
0x1b52   : > { %14299 = vmatpush3.bf16.msra.mxu1 %v14818_v54 }
0x1b53   : > { %14277 = vmatpush3.bf16.msra.mxu0 %v14817_v5  ;;  %14300 = vmatprep.subr.bf16.mxu1 %v14902_v7 }
0x1b54   : > { %14278 = vmatprep.subr.bf16.mxu0 %v14902_v7 }
0x1b56   : > { %14301 = vmatpush3.bf16.msra.mxu1 %v14820_v23 }
0x1b57   : > { %14279 = vmatpush3.bf16.msra.mxu0 %v14819_v4  ;;  %14302 = vmatprep.subr.bf16.mxu1 %v14902_v7 }
0x1b58   : > { %14280 = vmatprep.subr.bf16.mxu0 %v14902_v7 }
0x1b5a   : > { %14303 = vmatpush3.bf16.msra.mxu1 %v14822_v33 }
0x1b5b   : > { %14281 = vmatpush3.bf16.msra.mxu0 %v14821_v0  ;;  %14304 = vmatprep.subr.bf16.mxu1 %v14902_v7  ;;  %v12104_v0 = vld [vmem:[%s17245_s1 + $0x10] sm:$0x3] }
0x1b5c   : > { %14282 = vmatprep.subr.bf16.mxu0 %v14902_v7 }
0x1b5e   : > { %14305 = vmatpush3.bf16.msra.mxu1 %v14824_v51 }
0x1b5f   : > { %14283 = vmatpush3.bf16.msra.mxu0 %v14823_v9  ;;  %14306 = vmatprep.subr.bf16.mxu1 %v14902_v7  ;;  %v14845_v9 = vld [vmem:[%s17246_s2 + $0x238] sm:$0xff]  }
0x1b60   : > { %14284 = vmatprep.subr.bf16.mxu0 %v14902_v7 }
0x1b62   : > { %14307 = vmatpush3.bf16.msra.mxu1 %v14826_v10 }
0x1b63   : > { %14285 = vmatpush3.bf16.msra.mxu0 %v14825_v59  ;;  %14308 = vmatprep.subr.bf16.mxu1 %v14902_v7 }
0x1b64   : > { %14316 = vmatprep.subr.bf16.mxu0 %v14902_v7 }
0x1b66   : > { %14309 = vmatpush3.bf16.msra.mxu1 %v14827_v6 }
0x1b67   : > { %14310 = vmatprep.subr.bf16.mxu1 %v14902_v7 }
0x1b6a   : > { %14311 = vmatpush3.bf16.msra.mxu1 %v14828_v1  ;;  %v14847_v1 = vld [vmem:[%s17246_s2 + $0x228] sm:$0xff]  }
0x1b6b   : > { %14342 = vmatprep.subr.bf16.mxu1 %v14902_v7 }
0x1bfd   : > { %v9814_v62 = vpop.f32.mrf.mxu0 }
0x1bfe   : > { %v9820_v61 = vadd.f32 %v9814_v62, %v16923_v49  ;;  %v14834_v49 = vld [vmem:[%s17246_s2 + $0x1f0] sm:$0xff]   ;;  %v14848_v62 = vld [vmem:[%s17246_s2 + $0x220] sm:$0xff]  }
0x1bff   : > { %v14236_v39 = vpop.f32.mrf.mxu0 }
0x1c00   : > { %v14850_v39 = vld [vmem:[%s17246_s2 + $0x210] sm:$0xff]  }
0x1c01   : > { %v9817_v21 = vpop.f32.mrf.mxu0 }
0x1c02   : > { %v14851_v21 = vld [vmem:[%s17246_s2 + $0x208] sm:$0xff]  }
0x1c03   : > { %v14237_v56 = vpop.f32.mrf.mxu0 }
0x1c04   : > { %v14852_v56 = vld [vmem:[%s17246_s2 + $0x200] sm:$0xff]  }
0x1c05   : > { %v9966_v17 = vpop.f32.mrf.mxu1  ;;  %v10012_v41 = vpop.f32.mrf.mxu0 }
0x1c06   : > { %v16974_v2 = vadd.f32 %v9966_v17, %v9820_v61  ;;  %v10018_v35 = vpack.c.bf16 %v10012_v41, %v10012_v41  ;;  %v14849_v61 = vld [vmem:[%s17246_s2 + $0x218] sm:$0xff]   ;;  %v14854_v41 = vld [vmem:[%s17247_s0 + $0x30] sm:$0xff]  }
0x1c07   : > { %v14262_v15 = vpop.f32.mrf.mxu1  ;;  %v14268_v55 = vpop.f32.mrf.mxu0  ;;  %v14853_v17 = vld [vmem:[%s17247_s0 + $0x38] sm:$0xff]  }
0x1c08   : > { %14287 = vmatmul.mubr.bf16.vlgmr.msra.gmra.mxu0 %v10018_v35 }
0x1c09   : > { %14317 = vmatpush3.bf16.msra.mxu0 %v16829_v60  ;;  %v9969_v24 = vpop.f32.mrf.mxu1  ;;  %14318 = vmatprep.mubr.msk.bf16.mxu0 %vm14903_vm2, %v14902_v7  ;;  %v10015_v44 = vpop.f32.mrf.mxu0 }
0x1c0a   : > { %14322 = vmatprep.subr.bf16.mxu0 %v14902_v7 }
0x1c0b   : > { %v14263_v32 = vpop.f32.mrf.mxu1  ;;  %v14269_v12 = vpop.f32.mrf.mxu0 }
0x1c0d   : > { %v10164_v30 = vpop.f32.mrf.mxu1 }
0x1c0e   : > { %v10170_v13 = vpack.c.bf16 %v10164_v30, %v10164_v30 }
0x1c0f   : > { %v14294_v63 = vpop.f32.mrf.mxu1 }
0x1c10   : > { %14313 = vmatmul.mubr.bf16.vlgmr.msra.gmra.mxu1 %v10170_v13  ;;  %14319 = vmatmul.mubr.msk.bf16.vlgmr.msra.gmra.mxu0 %vm9365_vm5, %v12052_v19 }
0x1c11   : > { %14343 = vmatpush3.bf16.msra.mxu1 %v16829_v60  ;;  %14344 = vmatprep.mubr.msk.bf16.mxu1 %vm14903_vm2, %v14902_v7  ;;  %v10167_v46 = vpop.f32.mrf.mxu1 }
0x1c12   : > { %14323 = vmatpush3.bf16.msra.mxu0 %v14829_v14  ;;  %14348 = vmatprep.subr.bf16.mxu1 %v14902_v7 }
0x1c13   : > { %14324 = vmatprep.subr.bf16.mxu0 %v14902_v7  ;;  %v14295_v22 = vpop.f32.mrf.mxu1  ;;  %14338 = vmatprep.mubr.msk.bf16.mxu0 %vm14903_vm2, %v14902_v7 }
0x1c14   : > { %v14855_v22 = vld [vmem:[%s17247_s0 + $0x28] sm:$0xff]  }
0x1c16   : > { %14325 = vmatpush3.bf16.msra.mxu0 %v14830_v11 }
0x1c17   : > { %14326 = vmatprep.subr.bf16.mxu0 %v14902_v7 }
0x1c18   : > { %14345 = vmatmul.mubr.msk.bf16.vlgmr.msra.gmra.mxu1 %vm9365_vm5, %v12078_v37  ;;  %v14856_v37 = vld [vmem:[%s17247_s0 + $0x20] sm:$0xff]  }
0x1c19   : > { %14349 = vmatpush3.bf16.msra.mxu1 %v14832_v27  ;;  %14364 = vmatprep.mubr.msk.bf16.mxu1 %vm14903_vm2, %v14902_v7  ;;  %v14857_v27 = vld [vmem:[%s17247_s0 + $0x18] sm:$0xff]  }
0x1c1a   : > { %14327 = vmatpush3.bf16.msra.mxu0 %v14831_v58  ;;  %14350 = vmatprep.subr.bf16.mxu1 %v14902_v7  ;;  %v14858_v58 = vld [vmem:[%s17247_s0 + $0x10] sm:$0xff]  }
0x1c1b   : > { %14328 = vmatprep.subr.bf16.mxu0 %v14902_v7 }
0x1c1d   : > { %14351 = vmatpush3.bf16.msra.mxu1 %v14834_v49  ;;  %v14859_v49 = vld [vmem:[%s17247_s0 + $0x8] sm:$0xff]  }
0x1c1e   : > { %14329 = vmatpush3.bf16.msra.mxu0 %v14833_v20  ;;  %14352 = vmatprep.subr.bf16.mxu1 %v14902_v7  ;;  %v14860_v20 = vld [vmem:[%s17247_s0] sm:$0xff]  }
0x1c1f   : > { %14330 = vmatprep.subr.bf16.mxu0 %v14902_v7 }
0x1c21   : > { %14353 = vmatpush3.bf16.msra.mxu1 %v14836_v38  ;;  %v14861_v38 = vld [vmem:[%s15047_s6 + $0x18] sm:$0xff]  }
0x1c22   : > { %14331 = vmatpush3.bf16.msra.mxu0 %v14835_v31  ;;  %14354 = vmatprep.subr.bf16.mxu1 %v14902_v7  ;;  %v14862_v31 = vld [vmem:[%s15047_s6 + $0x10] sm:$0xff]  }
0x1c23   : > { %14332 = vmatprep.subr.bf16.mxu0 %v14902_v7 }
0x1c25   : > { %14355 = vmatpush3.bf16.msra.mxu1 %v14838_v40 }
0x1c26   : > { %14333 = vmatpush3.bf16.msra.mxu0 %v14837_v57  ;;  %14356 = vmatprep.subr.bf16.mxu1 %v14902_v7  ;;  %v11907_v57 = vld [vmem:[%s17248_s11] ss:$0 sm:$0xff] }
0x1c27   : > { %14334 = vmatprep.subr.bf16.mxu0 %v14902_v7 }
0x1c29   : > { %14357 = vmatpush3.bf16.msra.mxu1 %v14840_v26 }
0x1c2a   : > { %14335 = vmatpush3.bf16.msra.mxu0 %v14839_v18  ;;  %14358 = vmatprep.subr.bf16.mxu1 %v14902_v7  ;;  %v12130_v18 = vld [vmem:[%s17249_s18] ss:$0 sm:$0xff] }
0x1c2b   : > { %14336 = vmatprep.subr.bf16.mxu0 %v14902_v7 }
0x1c2d   : > { %14359 = vmatpush3.bf16.msra.mxu1 %v14842_v16  ;;  %v9359_v16 = vadd.f32 %v11907_v57, %v16826_v8  ;;  %v14863_v8 = vld [vmem:[%s15047_s6 + $0x8] sm:$0xff]  }
0x1c2e   : > { %14337 = vmatpush3.bf16.msra.mxu0 %v14841_v36  ;;  %14360 = vmatprep.subr.bf16.mxu1 %v14902_v7 }
0x1c2f   : > { %14368 = vmatprep.subr.bf16.mxu0 %v14902_v7 }
0x1c31   : > { %14361 = vmatpush3.bf16.msra.mxu1 %v14843_v52 }
0x1c32   : > { %14362 = vmatprep.subr.bf16.mxu1 %v14902_v7 }
0x1c35   : > { %14363 = vmatpush3.bf16.msra.mxu1 %v14844_v47 }
0x1c36   : > { %14394 = vmatprep.subr.bf16.mxu1 %v14902_v7 }
0x1cc8   : > { %v10118_v3 = vpop.f32.mrf.mxu0 }
0x1cc9   : > { %v10124_v50 = vadd.f32 %v10118_v3, %v16974_v2 }
0x1cca   : > { %v14288_v45 = vpop.f32.mrf.mxu0 }
0x1ccc   : > { %v10121_v53 = vpop.f32.mrf.mxu0 }
0x1cce   : > { %v14289_v42 = vpop.f32.mrf.mxu0 }
0x1cd0   : > { %v10270_v48 = vpop.f32.mrf.mxu1  ;;  %v10316_v28 = vpop.f32.mrf.mxu0 }
0x1cd1   : > { %v10276_v29 = vadd.f32 %v10270_v48, %v10124_v50  ;;  %v10322_v25 = vpack.c.bf16 %v10316_v28, %v10316_v28 }
0x1cd2   : > { %v14314_v43 = vpop.f32.mrf.mxu1  ;;  %v14320_v34 = vpop.f32.mrf.mxu0 }
0x1cd3   : > { %14339 = vmatmul.mubr.bf16.vlgmr.msra.gmra.mxu0 %v10322_v25 }
0x1cd4   : > { %14369 = vmatpush3.bf16.msra.mxu0 %v16829_v60  ;;  %v10273_v54 = vpop.f32.mrf.mxu1  ;;  %14370 = vmatprep.mubr.msk.bf16.mxu0 %vm14903_vm2, %v14902_v7  ;;  %v10319_v5 = vpop.f32.mrf.mxu0  ;;  %v14846_v60 = vld [vmem:[%s17246_s2 + $0x230] sm:$0xff]  }
0x1cd5   : > { %14374 = vmatprep.subr.bf16.mxu0 %v14902_v7  ;;  %v14864_v5 = vld [vmem:[%s15047_s6] sm:$0xff]  }
0x1cd6   : > { %v14315_v23 = vpop.f32.mrf.mxu1  ;;  %v14321_v4 = vpop.f32.mrf.mxu0 }
0x1cd7   : > { %v10770_v23 = vld [vmem:[%s15042_s12] sm:$0x1] }
0x1cd8   : > { %v10468_v33 = vpop.f32.mrf.mxu1 }
0x1cd9   : > { %v10474_v51 = vpack.c.bf16 %v10468_v33, %v10468_v33 }
0x1cda   : > { %v14346_v59 = vpop.f32.mrf.mxu1 }
0x1cdb   : > { %14365 = vmatmul.mubr.bf16.vlgmr.msra.gmra.mxu1 %v10474_v51  ;;  %14371 = vmatmul.mubr.msk.bf16.vlgmr.msra.gmra.mxu0 %vm9365_vm5, %v12104_v0 }
0x1cdc   : > { %14375 = vmatpush3.bf16.msra.mxu0 %v14845_v9  ;;  %v10471_v10 = vpop.f32.mrf.mxu1  ;;  %14390 = vmatprep.mubr.msk.bf16.mxu0 %vm14903_vm2, %v14902_v7 }
0x1cdd   : > { %14376 = vmatprep.subr.bf16.mxu0 %v14902_v7  ;;  %14410 = vmatprep.mubr.msk.bf16.mxu1 %vm14903_vm2, %v14902_v7  ;;  %v10869_v10 = vld [vmem:[%s15052_s27] sm:$0x1] }
0x1cde   : > { %v14347_v6 = vpop.f32.mrf.mxu1  ;;  %14395 = vmatpush3.bf16.msra.mxu1 %v14853_v17 }
0x1cdf   : > { %14396 = vmatprep.subr.bf16.mxu1 %v14902_v7 }
0x1ce0   : > { %14377 = vmatpush3.bf16.msra.mxu0 %v14846_v60 }
0x1ce1   : > { %14378 = vmatprep.subr.bf16.mxu0 %v14902_v7 }
0x1ce2   : > { %14397 = vmatpush3.bf16.msra.mxu1 %v14854_v41 }
0x1ce3   : > { %14398 = vmatprep.subr.bf16.mxu1 %v14902_v7 }
0x1ce4   : > { %14379 = vmatpush3.bf16.msra.mxu0 %v14847_v1 }
0x1ce5   : > { %14380 = vmatprep.subr.bf16.mxu0 %v14902_v7 }
0x1ce6   : > { %14399 = vmatpush3.bf16.msra.mxu1 %v14855_v22 }
0x1ce7   : > { %14400 = vmatprep.subr.bf16.mxu1 %v14902_v7 }
0x1ce8   : > { %14381 = vmatpush3.bf16.msra.mxu0 %v14848_v62 }
0x1ce9   : > { %14382 = vmatprep.subr.bf16.mxu0 %v14902_v7 }
0x1cea   : > { %14401 = vmatpush3.bf16.msra.mxu1 %v14856_v37 }
0x1ceb   : > { %14402 = vmatprep.subr.bf16.mxu1 %v14902_v7 }
0x1cec   : > { %14383 = vmatpush3.bf16.msra.mxu0 %v14849_v61 }
0x1ced   : > { %14384 = vmatprep.subr.bf16.mxu0 %v14902_v7 }
0x1cee   : > { %14403 = vmatpush3.bf16.msra.mxu1 %v14857_v27 }
0x1cef   : > { %14404 = vmatprep.subr.bf16.mxu1 %v14902_v7 }
0x1cf0   : > { %14385 = vmatpush3.bf16.msra.mxu0 %v14850_v39 }
0x1cf1   : > { %14386 = vmatprep.subr.bf16.mxu0 %v14902_v7 }
0x1cf2   : > { %14405 = vmatpush3.bf16.msra.mxu1 %v14858_v58 }
0x1cf3   : > { %14406 = vmatprep.subr.bf16.mxu1 %v14902_v7 }
0x1cf4   : > { %14387 = vmatpush3.bf16.msra.mxu0 %v14851_v21 }
0x1cf5   : > { %14388 = vmatprep.subr.bf16.mxu0 %v14902_v7 }
0x1cf6   : > { %14407 = vmatpush3.bf16.msra.mxu1 %v14859_v49 }
0x1cf7   : > { %14408 = vmatprep.subr.bf16.mxu1 %v14902_v7 }
0x1cf8   : > { %14389 = vmatpush3.bf16.msra.mxu0 %v14852_v56 }
0x1cf9   : > { %14414 = vmatprep.subr.bf16.mxu0 %v14902_v7 }
0x1cfa   : > { %14409 = vmatpush3.bf16.msra.mxu1 %v14860_v20 }
0x1d93   : > { %v10422_v2 = vpop.f32.mrf.mxu0 }
0x1d94   : > { %v10428_v35 = vadd.f32 %v10422_v2, %v10276_v29 }
0x1d95   : > { %v14340_v15 = vpop.f32.mrf.mxu0 }
0x1d97   : > { %v10425_v55 = vpop.f32.mrf.mxu0 }
0x1d99   : > { %v14341_v24 = vpop.f32.mrf.mxu0 }
0x1d9b   : > { %v10574_v44 = vpop.f32.mrf.mxu1  ;;  %v10620_v32 = vpop.f32.mrf.mxu0 }
0x1d9c   : > { %v10580_v12 = vadd.f32 %v10574_v44, %v10428_v35  ;;  %v10626_v30 = vpack.c.bf16 %v10620_v32, %v10620_v32 }
0x1d9d   : > { %v14372_v19 = vpop.f32.mrf.mxu0  ;;  %v14366_v13 = vpop.f32.mrf.mxu1 }
0x1d9e   : > { %14391 = vmatmul.mubr.bf16.vlgmr.msra.gmra.mxu0 %v10626_v30 }
0x1d9f   : > { %v10623_v14 = vpop.f32.mrf.mxu0  ;;  %v10577_v63 = vpop.f32.mrf.mxu1  ;;  %14422 = vmatprep.mubr.msk.bf16.mxu0 %vm14903_vm2, %v14902_v7  ;;  %14415 = vmatpush3.bf16.msra.mxu0 %v14861_v38 }
0x1da0   : > { %14416 = vmatprep.subr.bf16.mxu0 %v14902_v7 }
0x1da1   : > { %v14373_v46 = vpop.f32.mrf.mxu0  ;;  %v14367_v11 = vpop.f32.mrf.mxu1 }
0x1da3   : > { %14417 = vmatpush3.bf16.msra.mxu0 %v14862_v31 }
0x1da4   : > { %14418 = vmatprep.subr.bf16.mxu0 %v14902_v7 }
0x1da7   : > { %14419 = vmatpush3.bf16.msra.mxu0 %v14863_v8 }
0x1da8   : > { %14420 = vmatprep.subr.bf16.mxu0 %v14902_v7 }
0x1dab   : > { %14421 = vmatpush3.bf16.msra.mxu0 %v14864_v5 }
0x1e5e   : > { %v10726_v40 = vpop.f32.mrf.mxu0 }
0x1e5f   : > { %v10732_v26 = vadd.f32 %v10726_v40, %v10580_v12 }
0x1e60   : > { %v14392_v36 = vpop.f32.mrf.mxu0 }
0x1e61   : > { %v10740_v52 = vadd.f32 %v12130_v18, %v10732_v26 }
0x1e62   : > { %v10729_v47 = vpop.f32.mrf.mxu0 }
0x1e63   : > { %v10741_v3 = vadd.f32 %v10740_v52, %v9359_v16 }
0x1e64   : > { %v14393_v50 = vpop.f32.mrf.mxu0 }
0x1e65   : > { %v10742_v45 = vmax.f32 %v10741_v3, 0.0 }
0x1e67   : > { %v10744_v53 = vsel %vm10743_vm6, %v10742_v45, 0.0 }
0x1e68   : > { %v10745_v42 = vrot.slane %v10744_v53, 4 }
0x1e6a   : > { %v10746_v48 = vadd.f32 %v10745_v42, %v10744_v53 }
0x1e6c   : > { %v10747_v28 = vrot.slane %v10746_v48, 2 }
0x1e6e   : > { %v10748_v29 = vadd.f32 %v10747_v28, %v10746_v48 }
0x1e70   : > { %v10749_v25 = vrot.slane %v10748_v29, 1 }
0x1e72   : > { %v10750_v43 = vadd.f32 %v10749_v25, %v10748_v29 }
0x1e74   : > { %v10752_v34 = vmul.f32 0.25, %v10750_v43 }
0x1e76   : > { %v10753_v54 = vpack.c.bf16 %v10752_v34, %v10752_v34 }
0x1e78   : > { %14411 = vmatmul.mubr.bf16.vlgmr.msra.gmra.mxu1 %v10753_v54 }
0x1f38   : > { %v10853_v4 = vpop.f32.mrf.mxu1 }
0x1f39   : > { %v10854_v33 = vadd.f32 %v10853_v4, %v10770_v23 }
0x1f3a   : > { %v14412_v0 = vpop.f32.mrf.mxu1 }
0x1f3b   : > { %v10859_v9 = vmax.f32 %v10854_v33, 0.0 }
0x1f3c   : > { %v10856_v51 = vpop.f32.mrf.mxu1 }
0x1f3d   : > { %v10860_v59 = vpack.c.bf16 %v10859_v9, %v10859_v9 }
0x1f3e   : > { %v14413_v60 = vpop.f32.mrf.mxu1 }
0x1f3f   : > { %14423 = vmatmul.mubr.msk.bf16.vlgmr.msra.gmra.mxu0 %vm2414_vm1, %v10860_v59 }
0x1fff   : > { %v10931_v6 = vpop.f32.mrf.mxu0 }
0x2000   : > { %v10932_v1 = vadd.f32 %v10931_v6, %v10869_v10 }
0x2001   : > { %v14424_v62 = vpop.f32.mrf.mxu0 }
0x2002   : > { %10937 = vst [vmem:[%s898_s22] sm:$0x1] %v10932_v1 }
0x2003   : > { %v10934_v61 = vpop.f32.mrf.mxu0 }
0x2005   : > { %v14425_v7 = vpop.f32.mrf.mxu0 }
0x2006 PF: > { %s69_s7 = sadd.s32 1, %s14871_s7  }
0x2007   : > { %p66_p4 = scmp.ge.s32.totalorder %s69_s7, 8  }
0x2009   :  { %68 = sbr.rel (!%p66_p4) target bundleno = 46 (0x2e), region = 291 }

</bundles_post_ra>
